<compile_context>
chip_gen: v7x
topology: tpu7x:2x2x1
jax: 0.10.0
libtpu: 0.0.40
codegen_flags: <defaults>
</compile_context>

<pallas_src>
import numpy as np
import jax
import jax.numpy as jnp
from jax.experimental import pallas as pl
from jax.experimental.pallas import tpu as pltpu

# ----------------------------- model / problem sizes -----------------------------
N_GRAPHS = 2
NODES_PER_GRAPH = 16
N_NODES = N_GRAPHS * NODES_PER_GRAPH     # 32 nodes total
IN_NODE_FEATS = 4                        # data.x feature dim (forward only uses x[:, :3])
FIELD_DIM = 5                            # `fields` feature dim
HEADS = 3
HIDDEN = 64
PACKED = HEADS * HIDDEN                  # 192 head-packed lanes
N_LAYERS = 4
PLANES = [3 + FIELD_DIM, 64, 64, 4]      # planes[0] = conv1 in-dim, planes[-1] = output dim
POOL_RATIO = 0.8
NEG_SLOPE = 0.2                          # GATConv default LeakyReLU slope
NEG_INF = -1e30
FIN_PAD = HIDDEN                         # conv1 in-dim (8) zero-padded to 64

_SQRT_HALF = 0.7071067811865476


# ----------------------------- in-kernel math helpers -----------------------------
def _erf(z):
    # TODO(synk): torch.nn.GELU uses exact erf; this is the Abramowitz&Stegun 7.1.26
    # polynomial (~1.5e-7 abs err) because lax.erf has no guaranteed Mosaic lowering.
    a1, a2, a3, a4, a5 = 0.254829592, -0.284496736, 1.421413741, -1.453152027, 1.061405429
    p = 0.3275911
    s = jnp.where(z >= 0.0, 1.0, -1.0)
    az = jnp.abs(z)
    t = 1.0 / (1.0 + p * az)
    poly = ((((a5 * t + a4) * t + a3) * t + a2) * t + a1) * t
    return s * (1.0 - poly * jnp.exp(-az * az))


def _gelu(x):
    return 0.5 * x * (1.0 + _erf(x * _SQRT_HALF))


def _bf16(x):
    return x.astype(jnp.bfloat16)


# ----------------------------- the fused Pallas kernel -----------------------------
def recognizer_kernel(x0_ref, adj_ref, same_ref, onehot_ref, onehot_t_ref,
                      w_ref, att_ref, bias_ref, pw_ref,
                      w1_ref, b1_ref, w2_ref, b2_ref, w3_ref, b3_ref,
                      o_ref):
    """Full forward: 4x (GATConv -> GELU -> TopKPooling -> [gmp|gap] readout) + MLP head.

    x0:       [N, 64]   input features (real dim 8, zero padded)
    adj:      [N, N]    base edges (no self loops), adj[dst, src]
    same:     [N, N]    same-graph indicator
    onehot:   [B, N]    graph membership (rows)        onehot_t: [N, B] (columns)
    w:        [4, 64, 192]   head-packed GATConv lin weights (layer-stacked)
    att:      [4, 192, 6]    block-diag [att_dst_h | att_src_h] vectors
    bias:     [4, 1, 64]     GATConv bias (concat=False)
    pw:       [4, 64, 1]     TopKPooling weight, pre-L2-normalized
    w1/b1/w2/b2/w3/b3:       lin1 / lin2 / lin3
    """
    n = N_NODES
    x = x0_ref[...]
    adj0 = adj_ref[...]
    same = same_ref[...]
    onehot = onehot_ref[...]
    onehot_t = onehot_t_ref[...]

    row = jax.lax.broadcasted_iota(jnp.int32, (n, n), 0)   # dst / node index i
    col = jax.lax.broadcasted_iota(jnp.int32, (n, n), 1)   # src / competitor index j
    eye = (row == col).astype(jnp.float32)

    mask = jnp.ones((n, 1), jnp.float32)                   # active-node mask
    max_sum = jnp.zeros((N_GRAPHS, HIDDEN), jnp.float32)   # sum over layers of gmp part
    mean_sum = jnp.zeros((N_GRAPHS, HIDDEN), jnp.float32)  # sum over layers of gap part

    for l in range(N_LAYERS):                              # static 4-layer loop (fully fused)
        w = w_ref[l]                                       # [64, 192]
        att = att_ref[l]                                   # [192, 6]
        bias = bias_ref[l]                                 # [1, 64]
        pw = pw_ref[l]                                     # [64, 1]

        mask_row = mask.T                                  # [1, N] (cheap vector transpose)
        adj = adj0 * (mask * mask_row) + eye * mask        # surviving edges + self loops on active

        # ---- GATConv: one packed feature matmul + one packed attention-coefficient matmul ----
        hh_all = jnp.dot(_bf16(x), _bf16(w), preferred_element_type=jnp.float32)       # [N, 192]
        coef = jnp.dot(_bf16(hh_all), _bf16(att), preferred_element_type=jnp.float32)  # [N, 6]

        acc = jnp.zeros((n, HIDDEN), jnp.float32)
        for hd in range(HEADS):                            # static head loop
            a_d = coef[:, hd:hd + 1]                       # [N, 1]  att_dst . h
            a_s = coef[:, HEADS + hd:HEADS + hd + 1]       # [N, 1]  att_src . h
            e = a_d + a_s.T                                # e[dst, src]
            e = jnp.where(e >= 0.0, e, NEG_SLOPE * e)      # LeakyReLU(0.2)
            e = jnp.where(adj > 0.0, e, NEG_INF)           # mask non-edges
            m = jnp.max(e, axis=-1, keepdims=True)
            p = jnp.exp(e - m) * adj
            denom = jnp.maximum(jnp.sum(p, axis=-1, keepdims=True), 1e-16)
            attn = p * pl.reciprocal(denom, approx=True)   # softmax over sources per dst
            hh_h = hh_all[:, hd * HIDDEN:(hd + 1) * HIDDEN]
            acc = acc + jnp.dot(_bf16(attn), _bf16(hh_h), preferred_element_type=jnp.float32)

        h = _gelu(acc * (1.0 / HEADS) + bias)              # concat=False head-mean + bias, GELU

        # ---- TopKPooling: score + on-device rank-based top-k selection + gating ----
        score = jnp.dot(h, pw, preferred_element_type=jnp.float32)   # [N, 1] = h @ (w/||w||)
        s_col = score                                      # s_i along rows
        s_row = score.T                                    # s_j along columns
        beats = jnp.logical_or(s_row > s_col,
                               jnp.logical_and(s_row == s_col, col < row))
        beats_f = jnp.where(beats, 1.0, 0.0) * same * mask_row       # active same-graph competitors
        rank = jnp.sum(beats_f, axis=-1, keepdims=True)              # [N, 1]
        n_active = jnp.sum(same * mask_row, axis=-1, keepdims=True)  # per-node graph size
        k_node = jnp.ceil(POOL_RATIO * n_active)                     # k = ceil(ratio * n)
        new_mask = mask * jnp.where(rank < k_node, 1.0, 0.0)         # keep top-k per graph

        xg = h * jnp.tanh(score) * new_mask                # TopKPooling multiplier + node drop

        # ---- readout: cat([global_max, global_mean]) per graph, accumulated across layers ----
        nm_row = new_mask.T                                # [1, N]
        sel = onehot * nm_row                              # [B, N]
        cnt = jnp.sum(sel, axis=-1, keepdims=True)         # [B, 1]
        mean_all = (jnp.dot(sel, xg, preferred_element_type=jnp.float32)
                    * pl.reciprocal(jnp.maximum(cnt, 1.0), approx=True))          # gap -> [B, C]
        max_rows = []
        for b in range(N_GRAPHS):                          # static loop (B=2): masked maxes
            sel_col = onehot_t[:, b:b + 1] * new_mask      # [N, 1]
            mb = jnp.max(jnp.where(sel_col > 0.0, xg, NEG_INF), axis=0, keepdims=True)  # [1, C]
            mb = jnp.where(cnt[b:b + 1, :] > 0.0, mb, 0.0)  # guard against empty graph
            max_rows.append(mb)
        max_sum = max_sum + jnp.concatenate(max_rows, axis=0)   # gmp part
        mean_sum = mean_sum + mean_all                          # gap part

        x = xg
        mask = new_mask

    # ---- MLP head: lin1(cat([gmp, gap])) as a split matmul (no concat), GELU, lin2, GELU, lin3 ----
    w1 = w1_ref[...]                                       # [128, 64]
    h1 = (jnp.dot(_bf16(max_sum), _bf16(w1[:HIDDEN, :]), preferred_element_type=jnp.float32)
          + jnp.dot(_bf16(mean_sum), _bf16(w1[HIDDEN:, :]), preferred_element_type=jnp.float32)
          + b1_ref[...])
    h1 = _gelu(h1)
    h2 = _gelu(jnp.dot(_bf16(h1), _bf16(w2_ref[...]),
                       preferred_element_type=jnp.float32) + b2_ref[...])
    o_ref[...] = jnp.dot(_bf16(h2), _bf16(w3_ref[...]),
                         preferred_element_type=jnp.float32) + b3_ref[...]


# ----------------------------- pallas_call wrapper (single launch, jitted) -----------------------------
def _vmem():
    return pl.BlockSpec(memory_space=pltpu.MemorySpace.VMEM)


@jax.jit
def recognizer_gat_forward(data_x, fields, adj0, onehot, onehot_t, same_graph,
                           gat_packed, mlp_params):
    # x = torch.cat((x[:, :3], fields), dim=-1), zero-padded to 64 features so all 4
    # conv layers share one stacked weight shape.
    x = jnp.concatenate([data_x[:, :3], fields], axis=-1)
    x = jnp.pad(x, ((0, 0), (0, FIN_PAD - x.shape[1])))
    w_all, att_all, bias_all, pw_all = gat_packed
    w1, b1, w2, b2, w3, b3 = mlp_params
    return pl.pallas_call(
        recognizer_kernel,
        out_shape=jax.ShapeDtypeStruct((N_GRAPHS, PLANES[-1]), jnp.float32),
        in_specs=[_vmem()] * 15,
        out_specs=_vmem(),
    )(x, adj0, same_graph, onehot, onehot_t,
      w_all, att_all, bias_all, pw_all, w1, b1, w2, b2, w3, b3)


# ----------------------------- deterministic params / inputs -----------------------------
def init_params(key):
    keys = iter(jax.random.split(key, 32))

    def nrm(shape, scale=0.1):
        return scale * jax.random.normal(next(keys), shape, dtype=jnp.float32)

    layers = []
    fin = PLANES[0]
    for _ in range(N_LAYERS):
        w = nrm((HEADS, fin, HIDDEN))            # GATConv lin weight, per head
        asrc = nrm((HEADS, 1, HIDDEN))           # att_src
        adst = nrm((HEADS, 1, HIDDEN))           # att_dst
        bias = nrm((1, HIDDEN))                  # GATConv bias (concat=False -> size C)
        pw = nrm((HIDDEN, 1))                    # TopKPooling weight
        pw = pw / jnp.linalg.norm(pw)            # pre-normalize (score uses w/||w||)
        layers.append((w, asrc, adst, bias, pw))
        fin = HIDDEN
    w1, b1 = nrm((2 * HIDDEN, HIDDEN)), nrm((1, HIDDEN))
    w2, b2 = nrm((HIDDEN, HIDDEN)), nrm((1, HIDDEN))
    w3, b3 = nrm((HIDDEN, PLANES[-1])), nrm((1, PLANES[-1]))
    return layers, (w1, b1, w2, b2, w3, b3)


def pack_gat_params(layers):
    """Head-pack and layer-stack the GATConv / TopKPooling params for the fused kernel."""
    w_all, att_all, bias_all, pw_all = [], [], [], []
    for (w, asrc, adst, bias, pw) in layers:
        fin = w.shape[1]
        # [H, Fin, C] -> [Fin, H*C], zero-pad Fin -> 64
        w_packed = jnp.transpose(w, (1, 0, 2)).reshape(fin, PACKED)
        w_packed = jnp.pad(w_packed, ((0, FIN_PAD - fin), (0, 0)))
        # block-diagonal attention vectors: col h = att_dst_h, col HEADS+h = att_src_h
        att = jnp.zeros((PACKED, 2 * HEADS), jnp.float32)
        for hd in range(HEADS):
            att = att.at[hd * HIDDEN:(hd + 1) * HIDDEN, hd].set(adst[hd, 0])
            att = att.at[hd * HIDDEN:(hd + 1) * HIDDEN, HEADS + hd].set(asrc[hd, 0])
        w_all.append(w_packed)
        att_all.append(att)
        bias_all.append(bias)
        pw_all.append(pw)
    return (jnp.stack(w_all), jnp.stack(att_all), jnp.stack(bias_all), jnp.stack(pw_all))


def build_graph(rng):
    batch = np.repeat(np.arange(N_GRAPHS), NODES_PER_GRAPH)
    adj = np.zeros((N_NODES, N_NODES), dtype=np.float32)      # adj[dst, src], no self loops
    for g in range(N_GRAPHS):
        base = g * NODES_PER_GRAPH
        for i in range(NODES_PER_GRAPH):                      # bidirectional ring
            j = (i + 1) % NODES_PER_GRAPH
            adj[base + j, base + i] = 1.0
            adj[base + i, base + j] = 1.0
        for _ in range(12):                                   # extra random intra-graph edges
            i, j = rng.integers(0, NODES_PER_GRAPH, size=2)
            if i != j:
                adj[base + j, base + i] = 1.0
    return adj, batch


if __name__ == "__main__":
    key = jax.random.PRNGKey(0)
    k_x, k_f, k_p = jax.random.split(key, 3)

    data_x = jax.random.normal(k_x, (N_NODES, IN_NODE_FEATS), dtype=jnp.float32)
    fields = jax.random.normal(k_f, (N_NODES, FIELD_DIM), dtype=jnp.float32)
    adj_np, batch_np = build_graph(np.random.default_rng(0))
    adj0 = jnp.asarray(adj_np)
    onehot_np = (batch_np[None, :] == np.arange(N_GRAPHS)[:, None]).astype(np.float32)
    onehot = jnp.asarray(onehot_np)
    onehot_t = jnp.asarray(np.ascontiguousarray(onehot_np.T))
    same_graph = jnp.asarray((batch_np[:, None] == batch_np[None, :]).astype(np.float32))

    layers, mlp_params = init_params(k_p)
    gat_packed = pack_gat_params(layers)

    out = recognizer_gat_forward(data_x, fields, adj0, onehot, onehot_t, same_graph,
                                 gat_packed, mlp_params)
    out = jax.block_until_ready(out)
    assert out.shape == (N_GRAPHS, PLANES[-1])
    assert np.all(np.isfinite(np.asarray(out)))
    print("KERNEL_OK")
</pallas_src>

<mosaic_0001>
module attributes {stable_mosaic.version = 11 : i64} {
  func.func @recognizer_kernel(%arg0: memref<32x64xf32, #tpu.memory_space<vmem>>, %arg1: memref<32x32xf32, #tpu.memory_space<vmem>>, %arg2: memref<32x32xf32, #tpu.memory_space<vmem>>, %arg3: memref<2x32xf32, #tpu.memory_space<vmem>>, %arg4: memref<32x2xf32, #tpu.memory_space<vmem>>, %arg5: memref<4x64x192xf32, #tpu.memory_space<vmem>>, %arg6: memref<4x192x6xf32, #tpu.memory_space<vmem>>, %arg7: memref<4x1x64xf32, #tpu.memory_space<vmem>>, %arg8: memref<4x64x1xf32, #tpu.memory_space<vmem>>, %arg9: memref<128x64xf32, #tpu.memory_space<vmem>>, %arg10: memref<1x64xf32, #tpu.memory_space<vmem>>, %arg11: memref<64x64xf32, #tpu.memory_space<vmem>>, %arg12: memref<1x64xf32, #tpu.memory_space<vmem>>, %arg13: memref<64x4xf32, #tpu.memory_space<vmem>>, %arg14: memref<1x4xf32, #tpu.memory_space<vmem>>, %arg15: memref<2x4xf32, #tpu.memory_space<vmem>>) attributes {dimension_semantics = [], scalar_prefetch = 0 : i64, scratch_operands = 0 : i64, tpu.core_type = #tpu.core_type<tc>} {
    %c0 = arith.constant 0 : index
    %c0_0 = arith.constant 0 : index
    %0 = vector.load %arg0[%c0, %c0_0] : memref<32x64xf32, #tpu.memory_space<vmem>>, vector<32x64xf32>
    %c0_1 = arith.constant 0 : index
    %c0_2 = arith.constant 0 : index
    %1 = vector.load %arg1[%c0_1, %c0_2] : memref<32x32xf32, #tpu.memory_space<vmem>>, vector<32x32xf32>
    %c0_3 = arith.constant 0 : index
    %c0_4 = arith.constant 0 : index
    %2 = vector.load %arg2[%c0_3, %c0_4] : memref<32x32xf32, #tpu.memory_space<vmem>>, vector<32x32xf32>
    %c0_5 = arith.constant 0 : index
    %c0_6 = arith.constant 0 : index
    %3 = vector.load %arg3[%c0_5, %c0_6] : memref<2x32xf32, #tpu.memory_space<vmem>>, vector<2x32xf32>
    %c0_7 = arith.constant 0 : index
    %c0_8 = arith.constant 0 : index
    %4 = vector.load %arg4[%c0_7, %c0_8] : memref<32x2xf32, #tpu.memory_space<vmem>>, vector<32x2xf32>
    %5 = tpu.iota {dimensions = array<i32: 0>} : vector<32x32xi32>
    %6 = tpu.iota {dimensions = array<i32: 1>} : vector<32x32xi32>
    %7 = arith.cmpi eq, %5, %6 : vector<32x32xi32>
    %8 = arith.extui %7 : vector<32x32xi1> to vector<32x32xi32>
    %9 = arith.sitofp %8 : vector<32x32xi32> to vector<32x32xf32>
    %cst = arith.constant 1.000000e+00 : f32
    %10 = vector.broadcast %cst : f32 to vector<32x1xf32>
    %cst_9 = arith.constant 0.000000e+00 : f32
    %11 = vector.broadcast %cst_9 : f32 to vector<2x64xf32>
    %cst_10 = arith.constant 0.000000e+00 : f32
    %12 = vector.broadcast %cst_10 : f32 to vector<2x64xf32>
    %c0_11 = arith.constant 0 : index
    %c0_12 = arith.constant 0 : index
    %c0_13 = arith.constant 0 : index
    %13 = vector.load %arg5[%c0_11, %c0_12, %c0_13] : memref<4x64x192xf32, #tpu.memory_space<vmem>>, vector<1x64x192xf32>
    %14 = vector.shape_cast %13 : vector<1x64x192xf32> to vector<64x192xf32>
    %c0_14 = arith.constant 0 : index
    %c0_15 = arith.constant 0 : index
    %c0_16 = arith.constant 0 : index
    %15 = vector.load %arg6[%c0_14, %c0_15, %c0_16] : memref<4x192x6xf32, #tpu.memory_space<vmem>>, vector<1x192x6xf32>
    %16 = vector.shape_cast %15 : vector<1x192x6xf32> to vector<192x6xf32>
    %c0_17 = arith.constant 0 : index
    %c0_18 = arith.constant 0 : index
    %c0_19 = arith.constant 0 : index
    %17 = vector.load %arg7[%c0_17, %c0_18, %c0_19] : memref<4x1x64xf32, #tpu.memory_space<vmem>>, vector<1x1x64xf32>
    %18 = vector.shape_cast %17 : vector<1x1x64xf32> to vector<1x64xf32>
    %c0_20 = arith.constant 0 : index
    %c0_21 = arith.constant 0 : index
    %c0_22 = arith.constant 0 : index
    %19 = vector.load %arg8[%c0_20, %c0_21, %c0_22] : memref<4x64x1xf32, #tpu.memory_space<vmem>>, vector<1x64x1xf32>
    %20 = vector.shape_cast %19 : vector<1x64x1xf32> to vector<64x1xf32>
    %21 = tpu.transpose %10, [1, 0] : vector<32x1xf32> -> vector<1x32xf32>
    %22 = vector.broadcast %10 : vector<32x1xf32> to vector<32x32xf32>
    %23 = vector.broadcast %21 : vector<1x32xf32> to vector<32x32xf32>
    %24 = arith.mulf %22, %23 : vector<32x32xf32>
    %25 = arith.mulf %1, %24 : vector<32x32xf32>
    %26 = vector.broadcast %10 : vector<32x1xf32> to vector<32x32xf32>
    %27 = arith.mulf %9, %26 : vector<32x32xf32>
    %28 = arith.addf %25, %27 : vector<32x32xf32>
    %29 = arith.truncf %0 : vector<32x64xf32> to vector<32x64xbf16>
    %30 = arith.truncf %14 : vector<64x192xf32> to vector<64x192xbf16>
    %cst_23 = arith.constant dense<0.000000e+00> : vector<32x192xf32>
    %31 = tpu.matmul %29, %30, %cst_23 {dimension_numbers = #tpu.dot_dimension_numbers<[1], [0], [0], [1], [0, 0, 1, 1], [], []>} : vector<32x64xbf16>, vector<64x192xbf16>, vector<32x192xf32> -> vector<32x192xf32>
    %32 = arith.truncf %31 : vector<32x192xf32> to vector<32x192xbf16>
    %33 = arith.truncf %16 : vector<192x6xf32> to vector<192x6xbf16>
    %cst_24 = arith.constant dense<0.000000e+00> : vector<32x6xf32>
    %34 = tpu.matmul %32, %33, %cst_24 {dimension_numbers = #tpu.dot_dimension_numbers<[1], [0], [0], [1], [0, 0, 1, 1], [], []>} : vector<32x192xbf16>, vector<192x6xbf16>, vector<32x6xf32> -> vector<32x6xf32>
    %cst_25 = arith.constant 0.000000e+00 : f32
    %35 = vector.broadcast %cst_25 : f32 to vector<32x64xf32>
    %36 = vector.extract_strided_slice %34 {offsets = [0, 0], sizes = [32, 1], strides = [1, 1]} : vector<32x6xf32> to vector<32x1xf32>
    %37 = vector.extract_strided_slice %34 {offsets = [0, 3], sizes = [32, 1], strides = [1, 1]} : vector<32x6xf32> to vector<32x1xf32>
    %38 = tpu.transpose %37, [1, 0] : vector<32x1xf32> -> vector<1x32xf32>
    %39 = vector.broadcast %36 : vector<32x1xf32> to vector<32x32xf32>
    %40 = vector.broadcast %38 : vector<1x32xf32> to vector<32x32xf32>
    %41 = arith.addf %39, %40 : vector<32x32xf32>
    %cst_26 = arith.constant 0.000000e+00 : f32
    %42 = vector.broadcast %cst_26 : f32 to vector<32x32xf32>
    %43 = arith.cmpf oge, %41, %42 : vector<32x32xf32>
    %cst_27 = arith.constant 2.000000e-01 : f32
    %44 = vector.broadcast %cst_27 : f32 to vector<32x32xf32>
    %45 = arith.mulf %44, %41 : vector<32x32xf32>
    %46 = arith.select %43, %41, %45 : vector<32x32xi1>, vector<32x32xf32>
    %cst_28 = arith.constant 0.000000e+00 : f32
    %47 = vector.broadcast %cst_28 : f32 to vector<32x32xf32>
    %48 = arith.cmpf ogt, %28, %47 : vector<32x32xf32>
    %cst_29 = arith.constant -1.000000e+30 : f32
    %49 = vector.broadcast %cst_29 : f32 to vector<32x32xf32>
    %50 = arith.select %48, %46, %49 : vector<32x32xi1>, vector<32x32xf32>
    %cst_30 = arith.constant dense<0xFF800000> : vector<32xf32>
    %51 = vector.multi_reduction <maximumf>, %50, %cst_30 [1] : vector<32x32xf32> to vector<32xf32>
    %52 = vector.shape_cast %51 : vector<32xf32> to vector<32x1xf32>
    %53 = vector.broadcast %52 : vector<32x1xf32> to vector<32x32xf32>
    %54 = arith.subf %50, %53 : vector<32x32xf32>
    %55 = math.exp %54 : vector<32x32xf32>
    %56 = arith.mulf %55, %28 : vector<32x32xf32>
    %cst_31 = arith.constant dense<0.000000e+00> : vector<32xf32>
    %57 = vector.multi_reduction <add>, %56, %cst_31 [1] : vector<32x32xf32> to vector<32xf32>
    %58 = vector.shape_cast %57 : vector<32xf32> to vector<32x1xf32>
    %cst_32 = arith.constant 1.000000e-16 : f32
    %59 = vector.broadcast %cst_32 : f32 to vector<32x1xf32>
    %60 = arith.maximumf %58, %59 : vector<32x1xf32>
    %61 = tpu.reciprocal %60 {approx = true} : vector<32x1xf32> -> vector<32x1xf32>
    %62 = vector.broadcast %61 : vector<32x1xf32> to vector<32x32xf32>
    %63 = arith.mulf %56, %62 : vector<32x32xf32>
    %64 = vector.extract_strided_slice %31 {offsets = [0, 0], sizes = [32, 64], strides = [1, 1]} : vector<32x192xf32> to vector<32x64xf32>
    %65 = arith.truncf %63 : vector<32x32xf32> to vector<32x32xbf16>
    %66 = arith.truncf %64 : vector<32x64xf32> to vector<32x64xbf16>
    %cst_33 = arith.constant dense<0.000000e+00> : vector<32x64xf32>
    %67 = tpu.matmul %65, %66, %cst_33 {dimension_numbers = #tpu.dot_dimension_numbers<[1], [0], [0], [1], [0, 0, 1, 1], [], []>} : vector<32x32xbf16>, vector<32x64xbf16>, vector<32x64xf32> -> vector<32x64xf32>
    %68 = arith.addf %35, %67 : vector<32x64xf32>
    %69 = vector.extract_strided_slice %34 {offsets = [0, 1], sizes = [32, 1], strides = [1, 1]} : vector<32x6xf32> to vector<32x1xf32>
    %70 = vector.extract_strided_slice %34 {offsets = [0, 4], sizes = [32, 1], strides = [1, 1]} : vector<32x6xf32> to vector<32x1xf32>
    %71 = tpu.transpose %70, [1, 0] : vector<32x1xf32> -> vector<1x32xf32>
    %72 = vector.broadcast %69 : vector<32x1xf32> to vector<32x32xf32>
    %73 = vector.broadcast %71 : vector<1x32xf32> to vector<32x32xf32>
    %74 = arith.addf %72, %73 : vector<32x32xf32>
    %cst_34 = arith.constant 0.000000e+00 : f32
    %75 = vector.broadcast %cst_34 : f32 to vector<32x32xf32>
    %76 = arith.cmpf oge, %74, %75 : vector<32x32xf32>
    %cst_35 = arith.constant 2.000000e-01 : f32
    %77 = vector.broadcast %cst_35 : f32 to vector<32x32xf32>
    %78 = arith.mulf %77, %74 : vector<32x32xf32>
    %79 = arith.select %76, %74, %78 : vector<32x32xi1>, vector<32x32xf32>
    %cst_36 = arith.constant 0.000000e+00 : f32
    %80 = vector.broadcast %cst_36 : f32 to vector<32x32xf32>
    %81 = arith.cmpf ogt, %28, %80 : vector<32x32xf32>
    %cst_37 = arith.constant -1.000000e+30 : f32
    %82 = vector.broadcast %cst_37 : f32 to vector<32x32xf32>
    %83 = arith.select %81, %79, %82 : vector<32x32xi1>, vector<32x32xf32>
    %cst_38 = arith.constant dense<0xFF800000> : vector<32xf32>
    %84 = vector.multi_reduction <maximumf>, %83, %cst_38 [1] : vector<32x32xf32> to vector<32xf32>
    %85 = vector.shape_cast %84 : vector<32xf32> to vector<32x1xf32>
    %86 = vector.broadcast %85 : vector<32x1xf32> to vector<32x32xf32>
    %87 = arith.subf %83, %86 : vector<32x32xf32>
    %88 = math.exp %87 : vector<32x32xf32>
    %89 = arith.mulf %88, %28 : vector<32x32xf32>
    %cst_39 = arith.constant dense<0.000000e+00> : vector<32xf32>
    %90 = vector.multi_reduction <add>, %89, %cst_39 [1] : vector<32x32xf32> to vector<32xf32>
    %91 = vector.shape_cast %90 : vector<32xf32> to vector<32x1xf32>
    %cst_40 = arith.constant 1.000000e-16 : f32
    %92 = vector.broadcast %cst_40 : f32 to vector<32x1xf32>
    %93 = arith.maximumf %91, %92 : vector<32x1xf32>
    %94 = tpu.reciprocal %93 {approx = true} : vector<32x1xf32> -> vector<32x1xf32>
    %95 = vector.broadcast %94 : vector<32x1xf32> to vector<32x32xf32>
    %96 = arith.mulf %89, %95 : vector<32x32xf32>
    %97 = vector.extract_strided_slice %31 {offsets = [0, 64], sizes = [32, 64], strides = [1, 1]} : vector<32x192xf32> to vector<32x64xf32>
    %98 = arith.truncf %96 : vector<32x32xf32> to vector<32x32xbf16>
    %99 = arith.truncf %97 : vector<32x64xf32> to vector<32x64xbf16>
    %cst_41 = arith.constant dense<0.000000e+00> : vector<32x64xf32>
    %100 = tpu.matmul %98, %99, %cst_41 {dimension_numbers = #tpu.dot_dimension_numbers<[1], [0], [0], [1], [0, 0, 1, 1], [], []>} : vector<32x32xbf16>, vector<32x64xbf16>, vector<32x64xf32> -> vector<32x64xf32>
    %101 = arith.addf %68, %100 : vector<32x64xf32>
    %102 = vector.extract_strided_slice %34 {offsets = [0, 2], sizes = [32, 1], strides = [1, 1]} : vector<32x6xf32> to vector<32x1xf32>
    %103 = vector.extract_strided_slice %34 {offsets = [0, 5], sizes = [32, 1], strides = [1, 1]} : vector<32x6xf32> to vector<32x1xf32>
    %104 = tpu.transpose %103, [1, 0] : vector<32x1xf32> -> vector<1x32xf32>
    %105 = vector.broadcast %102 : vector<32x1xf32> to vector<32x32xf32>
    %106 = vector.broadcast %104 : vector<1x32xf32> to vector<32x32xf32>
    %107 = arith.addf %105, %106 : vector<32x32xf32>
    %cst_42 = arith.constant 0.000000e+00 : f32
    %108 = vector.broadcast %cst_42 : f32 to vector<32x32xf32>
    %109 = arith.cmpf oge, %107, %108 : vector<32x32xf32>
    %cst_43 = arith.constant 2.000000e-01 : f32
    %110 = vector.broadcast %cst_43 : f32 to vector<32x32xf32>
    %111 = arith.mulf %110, %107 : vector<32x32xf32>
    %112 = arith.select %109, %107, %111 : vector<32x32xi1>, vector<32x32xf32>
    %cst_44 = arith.constant 0.000000e+00 : f32
    %113 = vector.broadcast %cst_44 : f32 to vector<32x32xf32>
    %114 = arith.cmpf ogt, %28, %113 : vector<32x32xf32>
    %cst_45 = arith.constant -1.000000e+30 : f32
    %115 = vector.broadcast %cst_45 : f32 to vector<32x32xf32>
    %116 = arith.select %114, %112, %115 : vector<32x32xi1>, vector<32x32xf32>
    %cst_46 = arith.constant dense<0xFF800000> : vector<32xf32>
    %117 = vector.multi_reduction <maximumf>, %116, %cst_46 [1] : vector<32x32xf32> to vector<32xf32>
    %118 = vector.shape_cast %117 : vector<32xf32> to vector<32x1xf32>
    %119 = vector.broadcast %118 : vector<32x1xf32> to vector<32x32xf32>
    %120 = arith.subf %116, %119 : vector<32x32xf32>
    %121 = math.exp %120 : vector<32x32xf32>
    %122 = arith.mulf %121, %28 : vector<32x32xf32>
    %cst_47 = arith.constant dense<0.000000e+00> : vector<32xf32>
    %123 = vector.multi_reduction <add>, %122, %cst_47 [1] : vector<32x32xf32> to vector<32xf32>
    %124 = vector.shape_cast %123 : vector<32xf32> to vector<32x1xf32>
    %cst_48 = arith.constant 1.000000e-16 : f32
    %125 = vector.broadcast %cst_48 : f32 to vector<32x1xf32>
    %126 = arith.maximumf %124, %125 : vector<32x1xf32>
    %127 = tpu.reciprocal %126 {approx = true} : vector<32x1xf32> -> vector<32x1xf32>
    %128 = vector.broadcast %127 : vector<32x1xf32> to vector<32x32xf32>
    %129 = arith.mulf %122, %128 : vector<32x32xf32>
    %130 = vector.extract_strided_slice %31 {offsets = [0, 128], sizes = [32, 64], strides = [1, 1]} : vector<32x192xf32> to vector<32x64xf32>
    %131 = arith.truncf %129 : vector<32x32xf32> to vector<32x32xbf16>
    %132 = arith.truncf %130 : vector<32x64xf32> to vector<32x64xbf16>
    %cst_49 = arith.constant dense<0.000000e+00> : vector<32x64xf32>
    %133 = tpu.matmul %131, %132, %cst_49 {dimension_numbers = #tpu.dot_dimension_numbers<[1], [0], [0], [1], [0, 0, 1, 1], [], []>} : vector<32x32xbf16>, vector<32x64xbf16>, vector<32x64xf32> -> vector<32x64xf32>
    %134 = arith.addf %101, %133 : vector<32x64xf32>
    %cst_50 = arith.constant 0.333333343 : f32
    %135 = vector.broadcast %cst_50 : f32 to vector<32x64xf32>
    %136 = arith.mulf %134, %135 : vector<32x64xf32>
    %137 = vector.broadcast %18 : vector<1x64xf32> to vector<32x64xf32>
    %138 = arith.addf %136, %137 : vector<32x64xf32>
    %cst_51 = arith.constant 5.000000e-01 : f32
    %139 = vector.broadcast %cst_51 : f32 to vector<32x64xf32>
    %140 = arith.mulf %139, %138 : vector<32x64xf32>
    %cst_52 = arith.constant 0.707106769 : f32
    %141 = vector.broadcast %cst_52 : f32 to vector<32x64xf32>
    %142 = arith.mulf %138, %141 : vector<32x64xf32>
    %cst_53 = arith.constant 0.000000e+00 : f32
    %143 = vector.broadcast %cst_53 : f32 to vector<32x64xf32>
    %144 = arith.cmpf oge, %142, %143 : vector<32x64xf32>
    %cst_54 = arith.constant 1.000000e+00 : f32
    %cst_55 = arith.constant -1.000000e+00 : f32
    %145 = vector.broadcast %cst_54 : f32 to vector<32x64xf32>
    %146 = vector.broadcast %cst_55 : f32 to vector<32x64xf32>
    %147 = arith.select %144, %145, %146 : vector<32x64xi1>, vector<32x64xf32>
    %148 = math.absf %142 : vector<32x64xf32>
    %cst_56 = arith.constant 0.327591091 : f32
    %149 = vector.broadcast %cst_56 : f32 to vector<32x64xf32>
    %150 = arith.mulf %149, %148 : vector<32x64xf32>
    %cst_57 = arith.constant 1.000000e+00 : f32
    %151 = vector.broadcast %cst_57 : f32 to vector<32x64xf32>
    %152 = arith.addf %151, %150 : vector<32x64xf32>
    %cst_58 = arith.constant 1.000000e+00 : f32
    %153 = vector.broadcast %cst_58 : f32 to vector<32x64xf32>
    %154 = arith.divf %153, %152 : vector<32x64xf32>
    %cst_59 = arith.constant 1.06140542 : f32
    %155 = vector.broadcast %cst_59 : f32 to vector<32x64xf32>
    %156 = arith.mulf %155, %154 : vector<32x64xf32>
    %cst_60 = arith.constant -1.45315206 : f32
    %157 = vector.broadcast %cst_60 : f32 to vector<32x64xf32>
    %158 = arith.addf %156, %157 : vector<32x64xf32>
    %159 = arith.mulf %158, %154 : vector<32x64xf32>
    %cst_61 = arith.constant 1.42141378 : f32
    %160 = vector.broadcast %cst_61 : f32 to vector<32x64xf32>
    %161 = arith.addf %159, %160 : vector<32x64xf32>
    %162 = arith.mulf %161, %154 : vector<32x64xf32>
    %cst_62 = arith.constant -0.284496725 : f32
    %163 = vector.broadcast %cst_62 : f32 to vector<32x64xf32>
    %164 = arith.addf %162, %163 : vector<32x64xf32>
    %165 = arith.mulf %164, %154 : vector<32x64xf32>
    %cst_63 = arith.constant 0.254829586 : f32
    %166 = vector.broadcast %cst_63 : f32 to vector<32x64xf32>
    %167 = arith.addf %165, %166 : vector<32x64xf32>
    %168 = arith.mulf %167, %154 : vector<32x64xf32>
    %cst_64 = arith.constant 0.000000e+00 : f32
    %169 = vector.broadcast %cst_64 : f32 to vector<32x64xf32>
    %170 = arith.subf %169, %148 : vector<32x64xf32>
    %171 = arith.mulf %170, %148 : vector<32x64xf32>
    %172 = math.exp %171 : vector<32x64xf32>
    %173 = arith.mulf %168, %172 : vector<32x64xf32>
    %cst_65 = arith.constant 1.000000e+00 : f32
    %174 = vector.broadcast %cst_65 : f32 to vector<32x64xf32>
    %175 = arith.subf %174, %173 : vector<32x64xf32>
    %176 = arith.mulf %147, %175 : vector<32x64xf32>
    %cst_66 = arith.constant 1.000000e+00 : f32
    %177 = vector.broadcast %cst_66 : f32 to vector<32x64xf32>
    %178 = arith.addf %177, %176 : vector<32x64xf32>
    %179 = arith.mulf %140, %178 : vector<32x64xf32>
    %cst_67 = arith.constant dense<0.000000e+00> : vector<32x1xf32>
    %180 = tpu.matmul %179, %20, %cst_67 {dimension_numbers = #tpu.dot_dimension_numbers<[1], [0], [0], [1], [0, 0, 1, 1], [], []>} : vector<32x64xf32>, vector<64x1xf32>, vector<32x1xf32> -> vector<32x1xf32>
    %181 = tpu.transpose %180, [1, 0] : vector<32x1xf32> -> vector<1x32xf32>
    %182 = vector.broadcast %181 : vector<1x32xf32> to vector<32x32xf32>
    %183 = vector.broadcast %180 : vector<32x1xf32> to vector<32x32xf32>
    %184 = arith.cmpf ogt, %182, %183 : vector<32x32xf32>
    %185 = vector.broadcast %181 : vector<1x32xf32> to vector<32x32xf32>
    %186 = vector.broadcast %180 : vector<32x1xf32> to vector<32x32xf32>
    %187 = arith.cmpf oeq, %185, %186 : vector<32x32xf32>
    %188 = arith.cmpi slt, %6, %5 : vector<32x32xi32>
    %189 = arith.andi %187, %188 : vector<32x32xi1>
    %190 = arith.ori %184, %189 : vector<32x32xi1>
    %cst_68 = arith.constant 1.000000e+00 : f32
    %cst_69 = arith.constant 0.000000e+00 : f32
    %191 = vector.broadcast %cst_68 : f32 to vector<32x32xf32>
    %192 = vector.broadcast %cst_69 : f32 to vector<32x32xf32>
    %193 = arith.select %190, %191, %192 : vector<32x32xi1>, vector<32x32xf32>
    %194 = arith.mulf %193, %2 : vector<32x32xf32>
    %195 = vector.broadcast %21 : vector<1x32xf32> to vector<32x32xf32>
    %196 = arith.mulf %194, %195 : vector<32x32xf32>
    %cst_70 = arith.constant dense<0.000000e+00> : vector<32xf32>
    %197 = vector.multi_reduction <add>, %196, %cst_70 [1] : vector<32x32xf32> to vector<32xf32>
    %198 = vector.shape_cast %197 : vector<32xf32> to vector<32x1xf32>
    %199 = vector.broadcast %21 : vector<1x32xf32> to vector<32x32xf32>
    %200 = arith.mulf %2, %199 : vector<32x32xf32>
    %cst_71 = arith.constant dense<0.000000e+00> : vector<32xf32>
    %201 = vector.multi_reduction <add>, %200, %cst_71 [1] : vector<32x32xf32> to vector<32xf32>
    %202 = vector.shape_cast %201 : vector<32xf32> to vector<32x1xf32>
    %cst_72 = arith.constant 8.000000e-01 : f32
    %203 = vector.broadcast %cst_72 : f32 to vector<32x1xf32>
    %204 = arith.mulf %203, %202 : vector<32x1xf32>
    %205 = math.ceil %204 : vector<32x1xf32>
    %206 = arith.cmpf olt, %198, %205 : vector<32x1xf32>
    %cst_73 = arith.constant 1.000000e+00 : f32
    %cst_74 = arith.constant 0.000000e+00 : f32
    %207 = vector.broadcast %cst_73 : f32 to vector<32x1xf32>
    %208 = vector.broadcast %cst_74 : f32 to vector<32x1xf32>
    %209 = arith.select %206, %207, %208 : vector<32x1xi1>, vector<32x1xf32>
    %210 = arith.mulf %10, %209 : vector<32x1xf32>
    %211 = math.tanh %180 : vector<32x1xf32>
    %212 = vector.broadcast %211 : vector<32x1xf32> to vector<32x64xf32>
    %213 = arith.mulf %179, %212 : vector<32x64xf32>
    %214 = vector.broadcast %210 : vector<32x1xf32> to vector<32x64xf32>
    %215 = arith.mulf %213, %214 : vector<32x64xf32>
    %216 = tpu.transpose %210, [1, 0] : vector<32x1xf32> -> vector<1x32xf32>
    %217 = vector.broadcast %216 : vector<1x32xf32> to vector<2x32xf32>
    %218 = arith.mulf %3, %217 : vector<2x32xf32>
    %cst_75 = arith.constant dense<0.000000e+00> : vector<2xf32>
    %219 = vector.multi_reduction <add>, %218, %cst_75 [1] : vector<2x32xf32> to vector<2xf32>
    %220 = vector.shape_cast %219 : vector<2xf32> to vector<2x1xf32>
    %cst_76 = arith.constant dense<0.000000e+00> : vector<2x64xf32>
    %221 = tpu.matmul %218, %215, %cst_76 {dimension_numbers = #tpu.dot_dimension_numbers<[1], [0], [0], [1], [0, 0, 1, 1], [], []>} : vector<2x32xf32>, vector<32x64xf32>, vector<2x64xf32> -> vector<2x64xf32>
    %cst_77 = arith.constant 1.000000e+00 : f32
    %222 = vector.broadcast %cst_77 : f32 to vector<2x1xf32>
    %223 = arith.maximumf %220, %222 : vector<2x1xf32>
    %224 = tpu.reciprocal %223 {approx = true} : vector<2x1xf32> -> vector<2x1xf32>
    %225 = vector.broadcast %224 : vector<2x1xf32> to vector<2x64xf32>
    %226 = arith.mulf %221, %225 : vector<2x64xf32>
    %227 = vector.extract_strided_slice %4 {offsets = [0, 0], sizes = [32, 1], strides = [1, 1]} : vector<32x2xf32> to vector<32x1xf32>
    %228 = arith.mulf %227, %210 : vector<32x1xf32>
    %cst_78 = arith.constant 0.000000e+00 : f32
    %229 = vector.broadcast %cst_78 : f32 to vector<32x1xf32>
    %230 = arith.cmpf ogt, %228, %229 : vector<32x1xf32>
    %cst_79 = arith.constant -1.000000e+30 : f32
    %231 = vector.shape_cast %230 : vector<32x1xi1> to vector<32x1xi1>
    %232 = vector.broadcast %231 : vector<32x1xi1> to vector<32x64xi1>
    %233 = vector.broadcast %cst_79 : f32 to vector<32x64xf32>
    %234 = arith.select %232, %215, %233 : vector<32x64xi1>, vector<32x64xf32>
    %cst_80 = arith.constant dense<0xFF800000> : vector<64xf32>
    %235 = vector.multi_reduction <maximumf>, %234, %cst_80 [0] : vector<32x64xf32> to vector<64xf32>
    %236 = vector.shape_cast %235 : vector<64xf32> to vector<1x64xf32>
    %237 = vector.extract_strided_slice %220 {offsets = [0, 0], sizes = [1, 1], strides = [1, 1]} : vector<2x1xf32> to vector<1x1xf32>
    %cst_81 = arith.constant 0.000000e+00 : f32
    %238 = vector.broadcast %cst_81 : f32 to vector<1x1xf32>
    %239 = arith.cmpf ogt, %237, %238 : vector<1x1xf32>
    %cst_82 = arith.constant 0.000000e+00 : f32
    %240 = vector.shape_cast %239 : vector<1x1xi1> to vector<1x1xi1>
    %241 = vector.broadcast %240 : vector<1x1xi1> to vector<1x64xi1>
    %242 = vector.broadcast %cst_82 : f32 to vector<1x64xf32>
    %243 = arith.select %241, %236, %242 : vector<1x64xi1>, vector<1x64xf32>
    %244 = vector.extract_strided_slice %4 {offsets = [0, 1], sizes = [32, 1], strides = [1, 1]} : vector<32x2xf32> to vector<32x1xf32>
    %245 = arith.mulf %244, %210 : vector<32x1xf32>
    %cst_83 = arith.constant 0.000000e+00 : f32
    %246 = vector.broadcast %cst_83 : f32 to vector<32x1xf32>
    %247 = arith.cmpf ogt, %245, %246 : vector<32x1xf32>
    %cst_84 = arith.constant -1.000000e+30 : f32
    %248 = vector.shape_cast %247 : vector<32x1xi1> to vector<32x1xi1>
    %249 = vector.broadcast %248 : vector<32x1xi1> to vector<32x64xi1>
    %250 = vector.broadcast %cst_84 : f32 to vector<32x64xf32>
    %251 = arith.select %249, %215, %250 : vector<32x64xi1>, vector<32x64xf32>
    %cst_85 = arith.constant dense<0xFF800000> : vector<64xf32>
    %252 = vector.multi_reduction <maximumf>, %251, %cst_85 [0] : vector<32x64xf32> to vector<64xf32>
    %253 = vector.shape_cast %252 : vector<64xf32> to vector<1x64xf32>
    %254 = vector.extract_strided_slice %220 {offsets = [1, 0], sizes = [1, 1], strides = [1, 1]} : vector<2x1xf32> to vector<1x1xf32>
    %cst_86 = arith.constant 0.000000e+00 : f32
    %255 = vector.broadcast %cst_86 : f32 to vector<1x1xf32>
    %256 = arith.cmpf ogt, %254, %255 : vector<1x1xf32>
    %cst_87 = arith.constant 0.000000e+00 : f32
    %257 = vector.shape_cast %256 : vector<1x1xi1> to vector<1x1xi1>
    %258 = vector.broadcast %257 : vector<1x1xi1> to vector<1x64xi1>
    %259 = vector.broadcast %cst_87 : f32 to vector<1x64xf32>
    %260 = arith.select %258, %253, %259 : vector<1x64xi1>, vector<1x64xf32>
    %261 = tpu.concatenate %243, %260 in 0 : vector<1x64xf32>, vector<1x64xf32> -> vector<2x64xf32>
    %262 = arith.addf %11, %261 : vector<2x64xf32>
    %263 = arith.addf %12, %226 : vector<2x64xf32>
    %c1 = arith.constant 1 : index
    %c0_88 = arith.constant 0 : index
    %c0_89 = arith.constant 0 : index
    %264 = vector.load %arg5[%c1, %c0_88, %c0_89] : memref<4x64x192xf32, #tpu.memory_space<vmem>>, vector<1x64x192xf32>
    %265 = vector.shape_cast %264 : vector<1x64x192xf32> to vector<64x192xf32>
    %c1_90 = arith.constant 1 : index
    %c0_91 = arith.constant 0 : index
    %c0_92 = arith.constant 0 : index
    %266 = vector.load %arg6[%c1_90, %c0_91, %c0_92] : memref<4x192x6xf32, #tpu.memory_space<vmem>>, vector<1x192x6xf32>
    %267 = vector.shape_cast %266 : vector<1x192x6xf32> to vector<192x6xf32>
    %c1_93 = arith.constant 1 : index
    %c0_94 = arith.constant 0 : index
    %c0_95 = arith.constant 0 : index
    %268 = vector.load %arg7[%c1_93, %c0_94, %c0_95] : memref<4x1x64xf32, #tpu.memory_space<vmem>>, vector<1x1x64xf32>
    %269 = vector.shape_cast %268 : vector<1x1x64xf32> to vector<1x64xf32>
    %c1_96 = arith.constant 1 : index
    %c0_97 = arith.constant 0 : index
    %c0_98 = arith.constant 0 : index
    %270 = vector.load %arg8[%c1_96, %c0_97, %c0_98] : memref<4x64x1xf32, #tpu.memory_space<vmem>>, vector<1x64x1xf32>
    %271 = vector.shape_cast %270 : vector<1x64x1xf32> to vector<64x1xf32>
    %272 = tpu.transpose %210, [1, 0] : vector<32x1xf32> -> vector<1x32xf32>
    %273 = vector.broadcast %210 : vector<32x1xf32> to vector<32x32xf32>
    %274 = vector.broadcast %272 : vector<1x32xf32> to vector<32x32xf32>
    %275 = arith.mulf %273, %274 : vector<32x32xf32>
    %276 = arith.mulf %1, %275 : vector<32x32xf32>
    %277 = vector.broadcast %210 : vector<32x1xf32> to vector<32x32xf32>
    %278 = arith.mulf %9, %277 : vector<32x32xf32>
    %279 = arith.addf %276, %278 : vector<32x32xf32>
    %280 = arith.truncf %215 : vector<32x64xf32> to vector<32x64xbf16>
    %281 = arith.truncf %265 : vector<64x192xf32> to vector<64x192xbf16>
    %cst_99 = arith.constant dense<0.000000e+00> : vector<32x192xf32>
    %282 = tpu.matmul %280, %281, %cst_99 {dimension_numbers = #tpu.dot_dimension_numbers<[1], [0], [0], [1], [0, 0, 1, 1], [], []>} : vector<32x64xbf16>, vector<64x192xbf16>, vector<32x192xf32> -> vector<32x192xf32>
    %283 = arith.truncf %282 : vector<32x192xf32> to vector<32x192xbf16>
    %284 = arith.truncf %267 : vector<192x6xf32> to vector<192x6xbf16>
    %cst_100 = arith.constant dense<0.000000e+00> : vector<32x6xf32>
    %285 = tpu.matmul %283, %284, %cst_100 {dimension_numbers = #tpu.dot_dimension_numbers<[1], [0], [0], [1], [0, 0, 1, 1], [], []>} : vector<32x192xbf16>, vector<192x6xbf16>, vector<32x6xf32> -> vector<32x6xf32>
    %cst_101 = arith.constant 0.000000e+00 : f32
    %286 = vector.broadcast %cst_101 : f32 to vector<32x64xf32>
    %287 = vector.extract_strided_slice %285 {offsets = [0, 0], sizes = [32, 1], strides = [1, 1]} : vector<32x6xf32> to vector<32x1xf32>
    %288 = vector.extract_strided_slice %285 {offsets = [0, 3], sizes = [32, 1], strides = [1, 1]} : vector<32x6xf32> to vector<32x1xf32>
    %289 = tpu.transpose %288, [1, 0] : vector<32x1xf32> -> vector<1x32xf32>
    %290 = vector.broadcast %287 : vector<32x1xf32> to vector<32x32xf32>
    %291 = vector.broadcast %289 : vector<1x32xf32> to vector<32x32xf32>
    %292 = arith.addf %290, %291 : vector<32x32xf32>
    %cst_102 = arith.constant 0.000000e+00 : f32
    %293 = vector.broadcast %cst_102 : f32 to vector<32x32xf32>
    %294 = arith.cmpf oge, %292, %293 : vector<32x32xf32>
    %cst_103 = arith.constant 2.000000e-01 : f32
    %295 = vector.broadcast %cst_103 : f32 to vector<32x32xf32>
    %296 = arith.mulf %295, %292 : vector<32x32xf32>
    %297 = arith.select %294, %292, %296 : vector<32x32xi1>, vector<32x32xf32>
    %cst_104 = arith.constant 0.000000e+00 : f32
    %298 = vector.broadcast %cst_104 : f32 to vector<32x32xf32>
    %299 = arith.cmpf ogt, %279, %298 : vector<32x32xf32>
    %cst_105 = arith.constant -1.000000e+30 : f32
    %300 = vector.broadcast %cst_105 : f32 to vector<32x32xf32>
    %301 = arith.select %299, %297, %300 : vector<32x32xi1>, vector<32x32xf32>
    %cst_106 = arith.constant dense<0xFF800000> : vector<32xf32>
    %302 = vector.multi_reduction <maximumf>, %301, %cst_106 [1] : vector<32x32xf32> to vector<32xf32>
    %303 = vector.shape_cast %302 : vector<32xf32> to vector<32x1xf32>
    %304 = vector.broadcast %303 : vector<32x1xf32> to vector<32x32xf32>
    %305 = arith.subf %301, %304 : vector<32x32xf32>
    %306 = math.exp %305 : vector<32x32xf32>
    %307 = arith.mulf %306, %279 : vector<32x32xf32>
    %cst_107 = arith.constant dense<0.000000e+00> : vector<32xf32>
    %308 = vector.multi_reduction <add>, %307, %cst_107 [1] : vector<32x32xf32> to vector<32xf32>
    %309 = vector.shape_cast %308 : vector<32xf32> to vector<32x1xf32>
    %cst_108 = arith.constant 1.000000e-16 : f32
    %310 = vector.broadcast %cst_108 : f32 to vector<32x1xf32>
    %311 = arith.maximumf %309, %310 : vector<32x1xf32>
    %312 = tpu.reciprocal %311 {approx = true} : vector<32x1xf32> -> vector<32x1xf32>
    %313 = vector.broadcast %312 : vector<32x1xf32> to vector<32x32xf32>
    %314 = arith.mulf %307, %313 : vector<32x32xf32>
    %315 = vector.extract_strided_slice %282 {offsets = [0, 0], sizes = [32, 64], strides = [1, 1]} : vector<32x192xf32> to vector<32x64xf32>
    %316 = arith.truncf %314 : vector<32x32xf32> to vector<32x32xbf16>
    %317 = arith.truncf %315 : vector<32x64xf32> to vector<32x64xbf16>
    %cst_109 = arith.constant dense<0.000000e+00> : vector<32x64xf32>
    %318 = tpu.matmul %316, %317, %cst_109 {dimension_numbers = #tpu.dot_dimension_numbers<[1], [0], [0], [1], [0, 0, 1, 1], [], []>} : vector<32x32xbf16>, vector<32x64xbf16>, vector<32x64xf32> -> vector<32x64xf32>
    %319 = arith.addf %286, %318 : vector<32x64xf32>
    %320 = vector.extract_strided_slice %285 {offsets = [0, 1], sizes = [32, 1], strides = [1, 1]} : vector<32x6xf32> to vector<32x1xf32>
    %321 = vector.extract_strided_slice %285 {offsets = [0, 4], sizes = [32, 1], strides = [1, 1]} : vector<32x6xf32> to vector<32x1xf32>
    %322 = tpu.transpose %321, [1, 0] : vector<32x1xf32> -> vector<1x32xf32>
    %323 = vector.broadcast %320 : vector<32x1xf32> to vector<32x32xf32>
    %324 = vector.broadcast %322 : vector<1x32xf32> to vector<32x32xf32>
    %325 = arith.addf %323, %324 : vector<32x32xf32>
    %cst_110 = arith.constant 0.000000e+00 : f32
    %326 = vector.broadcast %cst_110 : f32 to vector<32x32xf32>
    %327 = arith.cmpf oge, %325, %326 : vector<32x32xf32>
    %cst_111 = arith.constant 2.000000e-01 : f32
    %328 = vector.broadcast %cst_111 : f32 to vector<32x32xf32>
    %329 = arith.mulf %328, %325 : vector<32x32xf32>
    %330 = arith.select %327, %325, %329 : vector<32x32xi1>, vector<32x32xf32>
    %cst_112 = arith.constant 0.000000e+00 : f32
    %331 = vector.broadcast %cst_112 : f32 to vector<32x32xf32>
    %332 = arith.cmpf ogt, %279, %331 : vector<32x32xf32>
    %cst_113 = arith.constant -1.000000e+30 : f32
    %333 = vector.broadcast %cst_113 : f32 to vector<32x32xf32>
    %334 = arith.select %332, %330, %333 : vector<32x32xi1>, vector<32x32xf32>
    %cst_114 = arith.constant dense<0xFF800000> : vector<32xf32>
    %335 = vector.multi_reduction <maximumf>, %334, %cst_114 [1] : vector<32x32xf32> to vector<32xf32>
    %336 = vector.shape_cast %335 : vector<32xf32> to vector<32x1xf32>
    %337 = vector.broadcast %336 : vector<32x1xf32> to vector<32x32xf32>
    %338 = arith.subf %334, %337 : vector<32x32xf32>
    %339 = math.exp %338 : vector<32x32xf32>
    %340 = arith.mulf %339, %279 : vector<32x32xf32>
    %cst_115 = arith.constant dense<0.000000e+00> : vector<32xf32>
    %341 = vector.multi_reduction <add>, %340, %cst_115 [1] : vector<32x32xf32> to vector<32xf32>
    %342 = vector.shape_cast %341 : vector<32xf32> to vector<32x1xf32>
    %cst_116 = arith.constant 1.000000e-16 : f32
    %343 = vector.broadcast %cst_116 : f32 to vector<32x1xf32>
    %344 = arith.maximumf %342, %343 : vector<32x1xf32>
    %345 = tpu.reciprocal %344 {approx = true} : vector<32x1xf32> -> vector<32x1xf32>
    %346 = vector.broadcast %345 : vector<32x1xf32> to vector<32x32xf32>
    %347 = arith.mulf %340, %346 : vector<32x32xf32>
    %348 = vector.extract_strided_slice %282 {offsets = [0, 64], sizes = [32, 64], strides = [1, 1]} : vector<32x192xf32> to vector<32x64xf32>
    %349 = arith.truncf %347 : vector<32x32xf32> to vector<32x32xbf16>
    %350 = arith.truncf %348 : vector<32x64xf32> to vector<32x64xbf16>
    %cst_117 = arith.constant dense<0.000000e+00> : vector<32x64xf32>
    %351 = tpu.matmul %349, %350, %cst_117 {dimension_numbers = #tpu.dot_dimension_numbers<[1], [0], [0], [1], [0, 0, 1, 1], [], []>} : vector<32x32xbf16>, vector<32x64xbf16>, vector<32x64xf32> -> vector<32x64xf32>
    %352 = arith.addf %319, %351 : vector<32x64xf32>
    %353 = vector.extract_strided_slice %285 {offsets = [0, 2], sizes = [32, 1], strides = [1, 1]} : vector<32x6xf32> to vector<32x1xf32>
    %354 = vector.extract_strided_slice %285 {offsets = [0, 5], sizes = [32, 1], strides = [1, 1]} : vector<32x6xf32> to vector<32x1xf32>
    %355 = tpu.transpose %354, [1, 0] : vector<32x1xf32> -> vector<1x32xf32>
    %356 = vector.broadcast %353 : vector<32x1xf32> to vector<32x32xf32>
    %357 = vector.broadcast %355 : vector<1x32xf32> to vector<32x32xf32>
    %358 = arith.addf %356, %357 : vector<32x32xf32>
    %cst_118 = arith.constant 0.000000e+00 : f32
    %359 = vector.broadcast %cst_118 : f32 to vector<32x32xf32>
    %360 = arith.cmpf oge, %358, %359 : vector<32x32xf32>
    %cst_119 = arith.constant 2.000000e-01 : f32
    %361 = vector.broadcast %cst_119 : f32 to vector<32x32xf32>
    %362 = arith.mulf %361, %358 : vector<32x32xf32>
    %363 = arith.select %360, %358, %362 : vector<32x32xi1>, vector<32x32xf32>
    %cst_120 = arith.constant 0.000000e+00 : f32
    %364 = vector.broadcast %cst_120 : f32 to vector<32x32xf32>
    %365 = arith.cmpf ogt, %279, %364 : vector<32x32xf32>
    %cst_121 = arith.constant -1.000000e+30 : f32
    %366 = vector.broadcast %cst_121 : f32 to vector<32x32xf32>
    %367 = arith.select %365, %363, %366 : vector<32x32xi1>, vector<32x32xf32>
    %cst_122 = arith.constant dense<0xFF800000> : vector<32xf32>
    %368 = vector.multi_reduction <maximumf>, %367, %cst_122 [1] : vector<32x32xf32> to vector<32xf32>
    %369 = vector.shape_cast %368 : vector<32xf32> to vector<32x1xf32>
    %370 = vector.broadcast %369 : vector<32x1xf32> to vector<32x32xf32>
    %371 = arith.subf %367, %370 : vector<32x32xf32>
    %372 = math.exp %371 : vector<32x32xf32>
    %373 = arith.mulf %372, %279 : vector<32x32xf32>
    %cst_123 = arith.constant dense<0.000000e+00> : vector<32xf32>
    %374 = vector.multi_reduction <add>, %373, %cst_123 [1] : vector<32x32xf32> to vector<32xf32>
    %375 = vector.shape_cast %374 : vector<32xf32> to vector<32x1xf32>
    %cst_124 = arith.constant 1.000000e-16 : f32
    %376 = vector.broadcast %cst_124 : f32 to vector<32x1xf32>
    %377 = arith.maximumf %375, %376 : vector<32x1xf32>
    %378 = tpu.reciprocal %377 {approx = true} : vector<32x1xf32> -> vector<32x1xf32>
    %379 = vector.broadcast %378 : vector<32x1xf32> to vector<32x32xf32>
    %380 = arith.mulf %373, %379 : vector<32x32xf32>
    %381 = vector.extract_strided_slice %282 {offsets = [0, 128], sizes = [32, 64], strides = [1, 1]} : vector<32x192xf32> to vector<32x64xf32>
    %382 = arith.truncf %380 : vector<32x32xf32> to vector<32x32xbf16>
    %383 = arith.truncf %381 : vector<32x64xf32> to vector<32x64xbf16>
    %cst_125 = arith.constant dense<0.000000e+00> : vector<32x64xf32>
    %384 = tpu.matmul %382, %383, %cst_125 {dimension_numbers = #tpu.dot_dimension_numbers<[1], [0], [0], [1], [0, 0, 1, 1], [], []>} : vector<32x32xbf16>, vector<32x64xbf16>, vector<32x64xf32> -> vector<32x64xf32>
    %385 = arith.addf %352, %384 : vector<32x64xf32>
    %cst_126 = arith.constant 0.333333343 : f32
    %386 = vector.broadcast %cst_126 : f32 to vector<32x64xf32>
    %387 = arith.mulf %385, %386 : vector<32x64xf32>
    %388 = vector.broadcast %269 : vector<1x64xf32> to vector<32x64xf32>
    %389 = arith.addf %387, %388 : vector<32x64xf32>
    %cst_127 = arith.constant 5.000000e-01 : f32
    %390 = vector.broadcast %cst_127 : f32 to vector<32x64xf32>
    %391 = arith.mulf %390, %389 : vector<32x64xf32>
    %cst_128 = arith.constant 0.707106769 : f32
    %392 = vector.broadcast %cst_128 : f32 to vector<32x64xf32>
    %393 = arith.mulf %389, %392 : vector<32x64xf32>
    %cst_129 = arith.constant 0.000000e+00 : f32
    %394 = vector.broadcast %cst_129 : f32 to vector<32x64xf32>
    %395 = arith.cmpf oge, %393, %394 : vector<32x64xf32>
    %cst_130 = arith.constant 1.000000e+00 : f32
    %cst_131 = arith.constant -1.000000e+00 : f32
    %396 = vector.broadcast %cst_130 : f32 to vector<32x64xf32>
    %397 = vector.broadcast %cst_131 : f32 to vector<32x64xf32>
    %398 = arith.select %395, %396, %397 : vector<32x64xi1>, vector<32x64xf32>
    %399 = math.absf %393 : vector<32x64xf32>
    %cst_132 = arith.constant 0.327591091 : f32
    %400 = vector.broadcast %cst_132 : f32 to vector<32x64xf32>
    %401 = arith.mulf %400, %399 : vector<32x64xf32>
    %cst_133 = arith.constant 1.000000e+00 : f32
    %402 = vector.broadcast %cst_133 : f32 to vector<32x64xf32>
    %403 = arith.addf %402, %401 : vector<32x64xf32>
    %cst_134 = arith.constant 1.000000e+00 : f32
    %404 = vector.broadcast %cst_134 : f32 to vector<32x64xf32>
    %405 = arith.divf %404, %403 : vector<32x64xf32>
    %cst_135 = arith.constant 1.06140542 : f32
    %406 = vector.broadcast %cst_135 : f32 to vector<32x64xf32>
    %407 = arith.mulf %406, %405 : vector<32x64xf32>
    %cst_136 = arith.constant -1.45315206 : f32
    %408 = vector.broadcast %cst_136 : f32 to vector<32x64xf32>
    %409 = arith.addf %407, %408 : vector<32x64xf32>
    %410 = arith.mulf %409, %405 : vector<32x64xf32>
    %cst_137 = arith.constant 1.42141378 : f32
    %411 = vector.broadcast %cst_137 : f32 to vector<32x64xf32>
    %412 = arith.addf %410, %411 : vector<32x64xf32>
    %413 = arith.mulf %412, %405 : vector<32x64xf32>
    %cst_138 = arith.constant -0.284496725 : f32
    %414 = vector.broadcast %cst_138 : f32 to vector<32x64xf32>
    %415 = arith.addf %413, %414 : vector<32x64xf32>
    %416 = arith.mulf %415, %405 : vector<32x64xf32>
    %cst_139 = arith.constant 0.254829586 : f32
    %417 = vector.broadcast %cst_139 : f32 to vector<32x64xf32>
    %418 = arith.addf %416, %417 : vector<32x64xf32>
    %419 = arith.mulf %418, %405 : vector<32x64xf32>
    %cst_140 = arith.constant 0.000000e+00 : f32
    %420 = vector.broadcast %cst_140 : f32 to vector<32x64xf32>
    %421 = arith.subf %420, %399 : vector<32x64xf32>
    %422 = arith.mulf %421, %399 : vector<32x64xf32>
    %423 = math.exp %422 : vector<32x64xf32>
    %424 = arith.mulf %419, %423 : vector<32x64xf32>
    %cst_141 = arith.constant 1.000000e+00 : f32
    %425 = vector.broadcast %cst_141 : f32 to vector<32x64xf32>
    %426 = arith.subf %425, %424 : vector<32x64xf32>
    %427 = arith.mulf %398, %426 : vector<32x64xf32>
    %cst_142 = arith.constant 1.000000e+00 : f32
    %428 = vector.broadcast %cst_142 : f32 to vector<32x64xf32>
    %429 = arith.addf %428, %427 : vector<32x64xf32>
    %430 = arith.mulf %391, %429 : vector<32x64xf32>
    %cst_143 = arith.constant dense<0.000000e+00> : vector<32x1xf32>
    %431 = tpu.matmul %430, %271, %cst_143 {dimension_numbers = #tpu.dot_dimension_numbers<[1], [0], [0], [1], [0, 0, 1, 1], [], []>} : vector<32x64xf32>, vector<64x1xf32>, vector<32x1xf32> -> vector<32x1xf32>
    %432 = tpu.transpose %431, [1, 0] : vector<32x1xf32> -> vector<1x32xf32>
    %433 = vector.broadcast %432 : vector<1x32xf32> to vector<32x32xf32>
    %434 = vector.broadcast %431 : vector<32x1xf32> to vector<32x32xf32>
    %435 = arith.cmpf ogt, %433, %434 : vector<32x32xf32>
    %436 = vector.broadcast %432 : vector<1x32xf32> to vector<32x32xf32>
    %437 = vector.broadcast %431 : vector<32x1xf32> to vector<32x32xf32>
    %438 = arith.cmpf oeq, %436, %437 : vector<32x32xf32>
    %439 = arith.cmpi slt, %6, %5 : vector<32x32xi32>
    %440 = arith.andi %438, %439 : vector<32x32xi1>
    %441 = arith.ori %435, %440 : vector<32x32xi1>
    %cst_144 = arith.constant 1.000000e+00 : f32
    %cst_145 = arith.constant 0.000000e+00 : f32
    %442 = vector.broadcast %cst_144 : f32 to vector<32x32xf32>
    %443 = vector.broadcast %cst_145 : f32 to vector<32x32xf32>
    %444 = arith.select %441, %442, %443 : vector<32x32xi1>, vector<32x32xf32>
    %445 = arith.mulf %444, %2 : vector<32x32xf32>
    %446 = vector.broadcast %272 : vector<1x32xf32> to vector<32x32xf32>
    %447 = arith.mulf %445, %446 : vector<32x32xf32>
    %cst_146 = arith.constant dense<0.000000e+00> : vector<32xf32>
    %448 = vector.multi_reduction <add>, %447, %cst_146 [1] : vector<32x32xf32> to vector<32xf32>
    %449 = vector.shape_cast %448 : vector<32xf32> to vector<32x1xf32>
    %450 = vector.broadcast %272 : vector<1x32xf32> to vector<32x32xf32>
    %451 = arith.mulf %2, %450 : vector<32x32xf32>
    %cst_147 = arith.constant dense<0.000000e+00> : vector<32xf32>
    %452 = vector.multi_reduction <add>, %451, %cst_147 [1] : vector<32x32xf32> to vector<32xf32>
    %453 = vector.shape_cast %452 : vector<32xf32> to vector<32x1xf32>
    %cst_148 = arith.constant 8.000000e-01 : f32
    %454 = vector.broadcast %cst_148 : f32 to vector<32x1xf32>
    %455 = arith.mulf %454, %453 : vector<32x1xf32>
    %456 = math.ceil %455 : vector<32x1xf32>
    %457 = arith.cmpf olt, %449, %456 : vector<32x1xf32>
    %cst_149 = arith.constant 1.000000e+00 : f32
    %cst_150 = arith.constant 0.000000e+00 : f32
    %458 = vector.broadcast %cst_149 : f32 to vector<32x1xf32>
    %459 = vector.broadcast %cst_150 : f32 to vector<32x1xf32>
    %460 = arith.select %457, %458, %459 : vector<32x1xi1>, vector<32x1xf32>
    %461 = arith.mulf %210, %460 : vector<32x1xf32>
    %462 = math.tanh %431 : vector<32x1xf32>
    %463 = vector.broadcast %462 : vector<32x1xf32> to vector<32x64xf32>
    %464 = arith.mulf %430, %463 : vector<32x64xf32>
    %465 = vector.broadcast %461 : vector<32x1xf32> to vector<32x64xf32>
    %466 = arith.mulf %464, %465 : vector<32x64xf32>
    %467 = tpu.transpose %461, [1, 0] : vector<32x1xf32> -> vector<1x32xf32>
    %468 = vector.broadcast %467 : vector<1x32xf32> to vector<2x32xf32>
    %469 = arith.mulf %3, %468 : vector<2x32xf32>
    %cst_151 = arith.constant dense<0.000000e+00> : vector<2xf32>
    %470 = vector.multi_reduction <add>, %469, %cst_151 [1] : vector<2x32xf32> to vector<2xf32>
    %471 = vector.shape_cast %470 : vector<2xf32> to vector<2x1xf32>
    %cst_152 = arith.constant dense<0.000000e+00> : vector<2x64xf32>
    %472 = tpu.matmul %469, %466, %cst_152 {dimension_numbers = #tpu.dot_dimension_numbers<[1], [0], [0], [1], [0, 0, 1, 1], [], []>} : vector<2x32xf32>, vector<32x64xf32>, vector<2x64xf32> -> vector<2x64xf32>
    %cst_153 = arith.constant 1.000000e+00 : f32
    %473 = vector.broadcast %cst_153 : f32 to vector<2x1xf32>
    %474 = arith.maximumf %471, %473 : vector<2x1xf32>
    %475 = tpu.reciprocal %474 {approx = true} : vector<2x1xf32> -> vector<2x1xf32>
    %476 = vector.broadcast %475 : vector<2x1xf32> to vector<2x64xf32>
    %477 = arith.mulf %472, %476 : vector<2x64xf32>
    %478 = vector.extract_strided_slice %4 {offsets = [0, 0], sizes = [32, 1], strides = [1, 1]} : vector<32x2xf32> to vector<32x1xf32>
    %479 = arith.mulf %478, %461 : vector<32x1xf32>
    %cst_154 = arith.constant 0.000000e+00 : f32
    %480 = vector.broadcast %cst_154 : f32 to vector<32x1xf32>
    %481 = arith.cmpf ogt, %479, %480 : vector<32x1xf32>
    %cst_155 = arith.constant -1.000000e+30 : f32
    %482 = vector.shape_cast %481 : vector<32x1xi1> to vector<32x1xi1>
    %483 = vector.broadcast %482 : vector<32x1xi1> to vector<32x64xi1>
    %484 = vector.broadcast %cst_155 : f32 to vector<32x64xf32>
    %485 = arith.select %483, %466, %484 : vector<32x64xi1>, vector<32x64xf32>
    %cst_156 = arith.constant dense<0xFF800000> : vector<64xf32>
    %486 = vector.multi_reduction <maximumf>, %485, %cst_156 [0] : vector<32x64xf32> to vector<64xf32>
    %487 = vector.shape_cast %486 : vector<64xf32> to vector<1x64xf32>
    %488 = vector.extract_strided_slice %471 {offsets = [0, 0], sizes = [1, 1], strides = [1, 1]} : vector<2x1xf32> to vector<1x1xf32>
    %cst_157 = arith.constant 0.000000e+00 : f32
    %489 = vector.broadcast %cst_157 : f32 to vector<1x1xf32>
    %490 = arith.cmpf ogt, %488, %489 : vector<1x1xf32>
    %cst_158 = arith.constant 0.000000e+00 : f32
    %491 = vector.shape_cast %490 : vector<1x1xi1> to vector<1x1xi1>
    %492 = vector.broadcast %491 : vector<1x1xi1> to vector<1x64xi1>
    %493 = vector.broadcast %cst_158 : f32 to vector<1x64xf32>
    %494 = arith.select %492, %487, %493 : vector<1x64xi1>, vector<1x64xf32>
    %495 = vector.extract_strided_slice %4 {offsets = [0, 1], sizes = [32, 1], strides = [1, 1]} : vector<32x2xf32> to vector<32x1xf32>
    %496 = arith.mulf %495, %461 : vector<32x1xf32>
    %cst_159 = arith.constant 0.000000e+00 : f32
    %497 = vector.broadcast %cst_159 : f32 to vector<32x1xf32>
    %498 = arith.cmpf ogt, %496, %497 : vector<32x1xf32>
    %cst_160 = arith.constant -1.000000e+30 : f32
    %499 = vector.shape_cast %498 : vector<32x1xi1> to vector<32x1xi1>
    %500 = vector.broadcast %499 : vector<32x1xi1> to vector<32x64xi1>
    %501 = vector.broadcast %cst_160 : f32 to vector<32x64xf32>
    %502 = arith.select %500, %466, %501 : vector<32x64xi1>, vector<32x64xf32>
    %cst_161 = arith.constant dense<0xFF800000> : vector<64xf32>
    %503 = vector.multi_reduction <maximumf>, %502, %cst_161 [0] : vector<32x64xf32> to vector<64xf32>
    %504 = vector.shape_cast %503 : vector<64xf32> to vector<1x64xf32>
    %505 = vector.extract_strided_slice %471 {offsets = [1, 0], sizes = [1, 1], strides = [1, 1]} : vector<2x1xf32> to vector<1x1xf32>
    %cst_162 = arith.constant 0.000000e+00 : f32
    %506 = vector.broadcast %cst_162 : f32 to vector<1x1xf32>
    %507 = arith.cmpf ogt, %505, %506 : vector<1x1xf32>
    %cst_163 = arith.constant 0.000000e+00 : f32
    %508 = vector.shape_cast %507 : vector<1x1xi1> to vector<1x1xi1>
    %509 = vector.broadcast %508 : vector<1x1xi1> to vector<1x64xi1>
    %510 = vector.broadcast %cst_163 : f32 to vector<1x64xf32>
    %511 = arith.select %509, %504, %510 : vector<1x64xi1>, vector<1x64xf32>
    %512 = tpu.concatenate %494, %511 in 0 : vector<1x64xf32>, vector<1x64xf32> -> vector<2x64xf32>
    %513 = arith.addf %262, %512 : vector<2x64xf32>
    %514 = arith.addf %263, %477 : vector<2x64xf32>
    %c2 = arith.constant 2 : index
    %c0_164 = arith.constant 0 : index
    %c0_165 = arith.constant 0 : index
    %515 = vector.load %arg5[%c2, %c0_164, %c0_165] : memref<4x64x192xf32, #tpu.memory_space<vmem>>, vector<1x64x192xf32>
    %516 = vector.shape_cast %515 : vector<1x64x192xf32> to vector<64x192xf32>
    %c2_166 = arith.constant 2 : index
    %c0_167 = arith.constant 0 : index
    %c0_168 = arith.constant 0 : index
    %517 = vector.load %arg6[%c2_166, %c0_167, %c0_168] : memref<4x192x6xf32, #tpu.memory_space<vmem>>, vector<1x192x6xf32>
    %518 = vector.shape_cast %517 : vector<1x192x6xf32> to vector<192x6xf32>
    %c2_169 = arith.constant 2 : index
    %c0_170 = arith.constant 0 : index
    %c0_171 = arith.constant 0 : index
    %519 = vector.load %arg7[%c2_169, %c0_170, %c0_171] : memref<4x1x64xf32, #tpu.memory_space<vmem>>, vector<1x1x64xf32>
    %520 = vector.shape_cast %519 : vector<1x1x64xf32> to vector<1x64xf32>
    %c2_172 = arith.constant 2 : index
    %c0_173 = arith.constant 0 : index
    %c0_174 = arith.constant 0 : index
    %521 = vector.load %arg8[%c2_172, %c0_173, %c0_174] : memref<4x64x1xf32, #tpu.memory_space<vmem>>, vector<1x64x1xf32>
    %522 = vector.shape_cast %521 : vector<1x64x1xf32> to vector<64x1xf32>
    %523 = tpu.transpose %461, [1, 0] : vector<32x1xf32> -> vector<1x32xf32>
    %524 = vector.broadcast %461 : vector<32x1xf32> to vector<32x32xf32>
    %525 = vector.broadcast %523 : vector<1x32xf32> to vector<32x32xf32>
    %526 = arith.mulf %524, %525 : vector<32x32xf32>
    %527 = arith.mulf %1, %526 : vector<32x32xf32>
    %528 = vector.broadcast %461 : vector<32x1xf32> to vector<32x32xf32>
    %529 = arith.mulf %9, %528 : vector<32x32xf32>
    %530 = arith.addf %527, %529 : vector<32x32xf32>
    %531 = arith.truncf %466 : vector<32x64xf32> to vector<32x64xbf16>
    %532 = arith.truncf %516 : vector<64x192xf32> to vector<64x192xbf16>
    %cst_175 = arith.constant dense<0.000000e+00> : vector<32x192xf32>
    %533 = tpu.matmul %531, %532, %cst_175 {dimension_numbers = #tpu.dot_dimension_numbers<[1], [0], [0], [1], [0, 0, 1, 1], [], []>} : vector<32x64xbf16>, vector<64x192xbf16>, vector<32x192xf32> -> vector<32x192xf32>
    %534 = arith.truncf %533 : vector<32x192xf32> to vector<32x192xbf16>
    %535 = arith.truncf %518 : vector<192x6xf32> to vector<192x6xbf16>
    %cst_176 = arith.constant dense<0.000000e+00> : vector<32x6xf32>
    %536 = tpu.matmul %534, %535, %cst_176 {dimension_numbers = #tpu.dot_dimension_numbers<[1], [0], [0], [1], [0, 0, 1, 1], [], []>} : vector<32x192xbf16>, vector<192x6xbf16>, vector<32x6xf32> -> vector<32x6xf32>
    %cst_177 = arith.constant 0.000000e+00 : f32
    %537 = vector.broadcast %cst_177 : f32 to vector<32x64xf32>
    %538 = vector.extract_strided_slice %536 {offsets = [0, 0], sizes = [32, 1], strides = [1, 1]} : vector<32x6xf32> to vector<32x1xf32>
    %539 = vector.extract_strided_slice %536 {offsets = [0, 3], sizes = [32, 1], strides = [1, 1]} : vector<32x6xf32> to vector<32x1xf32>
    %540 = tpu.transpose %539, [1, 0] : vector<32x1xf32> -> vector<1x32xf32>
    %541 = vector.broadcast %538 : vector<32x1xf32> to vector<32x32xf32>
    %542 = vector.broadcast %540 : vector<1x32xf32> to vector<32x32xf32>
    %543 = arith.addf %541, %542 : vector<32x32xf32>
    %cst_178 = arith.constant 0.000000e+00 : f32
    %544 = vector.broadcast %cst_178 : f32 to vector<32x32xf32>
    %545 = arith.cmpf oge, %543, %544 : vector<32x32xf32>
    %cst_179 = arith.constant 2.000000e-01 : f32
    %546 = vector.broadcast %cst_179 : f32 to vector<32x32xf32>
    %547 = arith.mulf %546, %543 : vector<32x32xf32>
    %548 = arith.select %545, %543, %547 : vector<32x32xi1>, vector<32x32xf32>
    %cst_180 = arith.constant 0.000000e+00 : f32
    %549 = vector.broadcast %cst_180 : f32 to vector<32x32xf32>
    %550 = arith.cmpf ogt, %530, %549 : vector<32x32xf32>
    %cst_181 = arith.constant -1.000000e+30 : f32
    %551 = vector.broadcast %cst_181 : f32 to vector<32x32xf32>
    %552 = arith.select %550, %548, %551 : vector<32x32xi1>, vector<32x32xf32>
    %cst_182 = arith.constant dense<0xFF800000> : vector<32xf32>
    %553 = vector.multi_reduction <maximumf>, %552, %cst_182 [1] : vector<32x32xf32> to vector<32xf32>
    %554 = vector.shape_cast %553 : vector<32xf32> to vector<32x1xf32>
    %555 = vector.broadcast %554 : vector<32x1xf32> to vector<32x32xf32>
    %556 = arith.subf %552, %555 : vector<32x32xf32>
    %557 = math.exp %556 : vector<32x32xf32>
    %558 = arith.mulf %557, %530 : vector<32x32xf32>
    %cst_183 = arith.constant dense<0.000000e+00> : vector<32xf32>
    %559 = vector.multi_reduction <add>, %558, %cst_183 [1] : vector<32x32xf32> to vector<32xf32>
    %560 = vector.shape_cast %559 : vector<32xf32> to vector<32x1xf32>
    %cst_184 = arith.constant 1.000000e-16 : f32
    %561 = vector.broadcast %cst_184 : f32 to vector<32x1xf32>
    %562 = arith.maximumf %560, %561 : vector<32x1xf32>
    %563 = tpu.reciprocal %562 {approx = true} : vector<32x1xf32> -> vector<32x1xf32>
    %564 = vector.broadcast %563 : vector<32x1xf32> to vector<32x32xf32>
    %565 = arith.mulf %558, %564 : vector<32x32xf32>
    %566 = vector.extract_strided_slice %533 {offsets = [0, 0], sizes = [32, 64], strides = [1, 1]} : vector<32x192xf32> to vector<32x64xf32>
    %567 = arith.truncf %565 : vector<32x32xf32> to vector<32x32xbf16>
    %568 = arith.truncf %566 : vector<32x64xf32> to vector<32x64xbf16>
    %cst_185 = arith.constant dense<0.000000e+00> : vector<32x64xf32>
    %569 = tpu.matmul %567, %568, %cst_185 {dimension_numbers = #tpu.dot_dimension_numbers<[1], [0], [0], [1], [0, 0, 1, 1], [], []>} : vector<32x32xbf16>, vector<32x64xbf16>, vector<32x64xf32> -> vector<32x64xf32>
    %570 = arith.addf %537, %569 : vector<32x64xf32>
    %571 = vector.extract_strided_slice %536 {offsets = [0, 1], sizes = [32, 1], strides = [1, 1]} : vector<32x6xf32> to vector<32x1xf32>
    %572 = vector.extract_strided_slice %536 {offsets = [0, 4], sizes = [32, 1], strides = [1, 1]} : vector<32x6xf32> to vector<32x1xf32>
    %573 = tpu.transpose %572, [1, 0] : vector<32x1xf32> -> vector<1x32xf32>
    %574 = vector.broadcast %571 : vector<32x1xf32> to vector<32x32xf32>
    %575 = vector.broadcast %573 : vector<1x32xf32> to vector<32x32xf32>
    %576 = arith.addf %574, %575 : vector<32x32xf32>
    %cst_186 = arith.constant 0.000000e+00 : f32
    %577 = vector.broadcast %cst_186 : f32 to vector<32x32xf32>
    %578 = arith.cmpf oge, %576, %577 : vector<32x32xf32>
    %cst_187 = arith.constant 2.000000e-01 : f32
    %579 = vector.broadcast %cst_187 : f32 to vector<32x32xf32>
    %580 = arith.mulf %579, %576 : vector<32x32xf32>
    %581 = arith.select %578, %576, %580 : vector<32x32xi1>, vector<32x32xf32>
    %cst_188 = arith.constant 0.000000e+00 : f32
    %582 = vector.broadcast %cst_188 : f32 to vector<32x32xf32>
    %583 = arith.cmpf ogt, %530, %582 : vector<32x32xf32>
    %cst_189 = arith.constant -1.000000e+30 : f32
    %584 = vector.broadcast %cst_189 : f32 to vector<32x32xf32>
    %585 = arith.select %583, %581, %584 : vector<32x32xi1>, vector<32x32xf32>
    %cst_190 = arith.constant dense<0xFF800000> : vector<32xf32>
    %586 = vector.multi_reduction <maximumf>, %585, %cst_190 [1] : vector<32x32xf32> to vector<32xf32>
    %587 = vector.shape_cast %586 : vector<32xf32> to vector<32x1xf32>
    %588 = vector.broadcast %587 : vector<32x1xf32> to vector<32x32xf32>
    %589 = arith.subf %585, %588 : vector<32x32xf32>
    %590 = math.exp %589 : vector<32x32xf32>
    %591 = arith.mulf %590, %530 : vector<32x32xf32>
    %cst_191 = arith.constant dense<0.000000e+00> : vector<32xf32>
    %592 = vector.multi_reduction <add>, %591, %cst_191 [1] : vector<32x32xf32> to vector<32xf32>
    %593 = vector.shape_cast %592 : vector<32xf32> to vector<32x1xf32>
    %cst_192 = arith.constant 1.000000e-16 : f32
    %594 = vector.broadcast %cst_192 : f32 to vector<32x1xf32>
    %595 = arith.maximumf %593, %594 : vector<32x1xf32>
    %596 = tpu.reciprocal %595 {approx = true} : vector<32x1xf32> -> vector<32x1xf32>
    %597 = vector.broadcast %596 : vector<32x1xf32> to vector<32x32xf32>
    %598 = arith.mulf %591, %597 : vector<32x32xf32>
    %599 = vector.extract_strided_slice %533 {offsets = [0, 64], sizes = [32, 64], strides = [1, 1]} : vector<32x192xf32> to vector<32x64xf32>
    %600 = arith.truncf %598 : vector<32x32xf32> to vector<32x32xbf16>
    %601 = arith.truncf %599 : vector<32x64xf32> to vector<32x64xbf16>
    %cst_193 = arith.constant dense<0.000000e+00> : vector<32x64xf32>
    %602 = tpu.matmul %600, %601, %cst_193 {dimension_numbers = #tpu.dot_dimension_numbers<[1], [0], [0], [1], [0, 0, 1, 1], [], []>} : vector<32x32xbf16>, vector<32x64xbf16>, vector<32x64xf32> -> vector<32x64xf32>
    %603 = arith.addf %570, %602 : vector<32x64xf32>
    %604 = vector.extract_strided_slice %536 {offsets = [0, 2], sizes = [32, 1], strides = [1, 1]} : vector<32x6xf32> to vector<32x1xf32>
    %605 = vector.extract_strided_slice %536 {offsets = [0, 5], sizes = [32, 1], strides = [1, 1]} : vector<32x6xf32> to vector<32x1xf32>
    %606 = tpu.transpose %605, [1, 0] : vector<32x1xf32> -> vector<1x32xf32>
    %607 = vector.broadcast %604 : vector<32x1xf32> to vector<32x32xf32>
    %608 = vector.broadcast %606 : vector<1x32xf32> to vector<32x32xf32>
    %609 = arith.addf %607, %608 : vector<32x32xf32>
    %cst_194 = arith.constant 0.000000e+00 : f32
    %610 = vector.broadcast %cst_194 : f32 to vector<32x32xf32>
    %611 = arith.cmpf oge, %609, %610 : vector<32x32xf32>
    %cst_195 = arith.constant 2.000000e-01 : f32
    %612 = vector.broadcast %cst_195 : f32 to vector<32x32xf32>
    %613 = arith.mulf %612, %609 : vector<32x32xf32>
    %614 = arith.select %611, %609, %613 : vector<32x32xi1>, vector<32x32xf32>
    %cst_196 = arith.constant 0.000000e+00 : f32
    %615 = vector.broadcast %cst_196 : f32 to vector<32x32xf32>
    %616 = arith.cmpf ogt, %530, %615 : vector<32x32xf32>
    %cst_197 = arith.constant -1.000000e+30 : f32
    %617 = vector.broadcast %cst_197 : f32 to vector<32x32xf32>
    %618 = arith.select %616, %614, %617 : vector<32x32xi1>, vector<32x32xf32>
    %cst_198 = arith.constant dense<0xFF800000> : vector<32xf32>
    %619 = vector.multi_reduction <maximumf>, %618, %cst_198 [1] : vector<32x32xf32> to vector<32xf32>
    %620 = vector.shape_cast %619 : vector<32xf32> to vector<32x1xf32>
    %621 = vector.broadcast %620 : vector<32x1xf32> to vector<32x32xf32>
    %622 = arith.subf %618, %621 : vector<32x32xf32>
    %623 = math.exp %622 : vector<32x32xf32>
    %624 = arith.mulf %623, %530 : vector<32x32xf32>
    %cst_199 = arith.constant dense<0.000000e+00> : vector<32xf32>
    %625 = vector.multi_reduction <add>, %624, %cst_199 [1] : vector<32x32xf32> to vector<32xf32>
    %626 = vector.shape_cast %625 : vector<32xf32> to vector<32x1xf32>
    %cst_200 = arith.constant 1.000000e-16 : f32
    %627 = vector.broadcast %cst_200 : f32 to vector<32x1xf32>
    %628 = arith.maximumf %626, %627 : vector<32x1xf32>
    %629 = tpu.reciprocal %628 {approx = true} : vector<32x1xf32> -> vector<32x1xf32>
    %630 = vector.broadcast %629 : vector<32x1xf32> to vector<32x32xf32>
    %631 = arith.mulf %624, %630 : vector<32x32xf32>
    %632 = vector.extract_strided_slice %533 {offsets = [0, 128], sizes = [32, 64], strides = [1, 1]} : vector<32x192xf32> to vector<32x64xf32>
    %633 = arith.truncf %631 : vector<32x32xf32> to vector<32x32xbf16>
    %634 = arith.truncf %632 : vector<32x64xf32> to vector<32x64xbf16>
    %cst_201 = arith.constant dense<0.000000e+00> : vector<32x64xf32>
    %635 = tpu.matmul %633, %634, %cst_201 {dimension_numbers = #tpu.dot_dimension_numbers<[1], [0], [0], [1], [0, 0, 1, 1], [], []>} : vector<32x32xbf16>, vector<32x64xbf16>, vector<32x64xf32> -> vector<32x64xf32>
    %636 = arith.addf %603, %635 : vector<32x64xf32>
    %cst_202 = arith.constant 0.333333343 : f32
    %637 = vector.broadcast %cst_202 : f32 to vector<32x64xf32>
    %638 = arith.mulf %636, %637 : vector<32x64xf32>
    %639 = vector.broadcast %520 : vector<1x64xf32> to vector<32x64xf32>
    %640 = arith.addf %638, %639 : vector<32x64xf32>
    %cst_203 = arith.constant 5.000000e-01 : f32
    %641 = vector.broadcast %cst_203 : f32 to vector<32x64xf32>
    %642 = arith.mulf %641, %640 : vector<32x64xf32>
    %cst_204 = arith.constant 0.707106769 : f32
    %643 = vector.broadcast %cst_204 : f32 to vector<32x64xf32>
    %644 = arith.mulf %640, %643 : vector<32x64xf32>
    %cst_205 = arith.constant 0.000000e+00 : f32
    %645 = vector.broadcast %cst_205 : f32 to vector<32x64xf32>
    %646 = arith.cmpf oge, %644, %645 : vector<32x64xf32>
    %cst_206 = arith.constant 1.000000e+00 : f32
    %cst_207 = arith.constant -1.000000e+00 : f32
    %647 = vector.broadcast %cst_206 : f32 to vector<32x64xf32>
    %648 = vector.broadcast %cst_207 : f32 to vector<32x64xf32>
    %649 = arith.select %646, %647, %648 : vector<32x64xi1>, vector<32x64xf32>
    %650 = math.absf %644 : vector<32x64xf32>
    %cst_208 = arith.constant 0.327591091 : f32
    %651 = vector.broadcast %cst_208 : f32 to vector<32x64xf32>
    %652 = arith.mulf %651, %650 : vector<32x64xf32>
    %cst_209 = arith.constant 1.000000e+00 : f32
    %653 = vector.broadcast %cst_209 : f32 to vector<32x64xf32>
    %654 = arith.addf %653, %652 : vector<32x64xf32>
    %cst_210 = arith.constant 1.000000e+00 : f32
    %655 = vector.broadcast %cst_210 : f32 to vector<32x64xf32>
    %656 = arith.divf %655, %654 : vector<32x64xf32>
    %cst_211 = arith.constant 1.06140542 : f32
    %657 = vector.broadcast %cst_211 : f32 to vector<32x64xf32>
    %658 = arith.mulf %657, %656 : vector<32x64xf32>
    %cst_212 = arith.constant -1.45315206 : f32
    %659 = vector.broadcast %cst_212 : f32 to vector<32x64xf32>
    %660 = arith.addf %658, %659 : vector<32x64xf32>
    %661 = arith.mulf %660, %656 : vector<32x64xf32>
    %cst_213 = arith.constant 1.42141378 : f32
    %662 = vector.broadcast %cst_213 : f32 to vector<32x64xf32>
    %663 = arith.addf %661, %662 : vector<32x64xf32>
    %664 = arith.mulf %663, %656 : vector<32x64xf32>
    %cst_214 = arith.constant -0.284496725 : f32
    %665 = vector.broadcast %cst_214 : f32 to vector<32x64xf32>
    %666 = arith.addf %664, %665 : vector<32x64xf32>
    %667 = arith.mulf %666, %656 : vector<32x64xf32>
    %cst_215 = arith.constant 0.254829586 : f32
    %668 = vector.broadcast %cst_215 : f32 to vector<32x64xf32>
    %669 = arith.addf %667, %668 : vector<32x64xf32>
    %670 = arith.mulf %669, %656 : vector<32x64xf32>
    %cst_216 = arith.constant 0.000000e+00 : f32
    %671 = vector.broadcast %cst_216 : f32 to vector<32x64xf32>
    %672 = arith.subf %671, %650 : vector<32x64xf32>
    %673 = arith.mulf %672, %650 : vector<32x64xf32>
    %674 = math.exp %673 : vector<32x64xf32>
    %675 = arith.mulf %670, %674 : vector<32x64xf32>
    %cst_217 = arith.constant 1.000000e+00 : f32
    %676 = vector.broadcast %cst_217 : f32 to vector<32x64xf32>
    %677 = arith.subf %676, %675 : vector<32x64xf32>
    %678 = arith.mulf %649, %677 : vector<32x64xf32>
    %cst_218 = arith.constant 1.000000e+00 : f32
    %679 = vector.broadcast %cst_218 : f32 to vector<32x64xf32>
    %680 = arith.addf %679, %678 : vector<32x64xf32>
    %681 = arith.mulf %642, %680 : vector<32x64xf32>
    %cst_219 = arith.constant dense<0.000000e+00> : vector<32x1xf32>
    %682 = tpu.matmul %681, %522, %cst_219 {dimension_numbers = #tpu.dot_dimension_numbers<[1], [0], [0], [1], [0, 0, 1, 1], [], []>} : vector<32x64xf32>, vector<64x1xf32>, vector<32x1xf32> -> vector<32x1xf32>
    %683 = tpu.transpose %682, [1, 0] : vector<32x1xf32> -> vector<1x32xf32>
    %684 = vector.broadcast %683 : vector<1x32xf32> to vector<32x32xf32>
    %685 = vector.broadcast %682 : vector<32x1xf32> to vector<32x32xf32>
    %686 = arith.cmpf ogt, %684, %685 : vector<32x32xf32>
    %687 = vector.broadcast %683 : vector<1x32xf32> to vector<32x32xf32>
    %688 = vector.broadcast %682 : vector<32x1xf32> to vector<32x32xf32>
    %689 = arith.cmpf oeq, %687, %688 : vector<32x32xf32>
    %690 = arith.cmpi slt, %6, %5 : vector<32x32xi32>
    %691 = arith.andi %689, %690 : vector<32x32xi1>
    %692 = arith.ori %686, %691 : vector<32x32xi1>
    %cst_220 = arith.constant 1.000000e+00 : f32
    %cst_221 = arith.constant 0.000000e+00 : f32
    %693 = vector.broadcast %cst_220 : f32 to vector<32x32xf32>
    %694 = vector.broadcast %cst_221 : f32 to vector<32x32xf32>
    %695 = arith.select %692, %693, %694 : vector<32x32xi1>, vector<32x32xf32>
    %696 = arith.mulf %695, %2 : vector<32x32xf32>
    %697 = vector.broadcast %523 : vector<1x32xf32> to vector<32x32xf32>
    %698 = arith.mulf %696, %697 : vector<32x32xf32>
    %cst_222 = arith.constant dense<0.000000e+00> : vector<32xf32>
    %699 = vector.multi_reduction <add>, %698, %cst_222 [1] : vector<32x32xf32> to vector<32xf32>
    %700 = vector.shape_cast %699 : vector<32xf32> to vector<32x1xf32>
    %701 = vector.broadcast %523 : vector<1x32xf32> to vector<32x32xf32>
    %702 = arith.mulf %2, %701 : vector<32x32xf32>
    %cst_223 = arith.constant dense<0.000000e+00> : vector<32xf32>
    %703 = vector.multi_reduction <add>, %702, %cst_223 [1] : vector<32x32xf32> to vector<32xf32>
    %704 = vector.shape_cast %703 : vector<32xf32> to vector<32x1xf32>
    %cst_224 = arith.constant 8.000000e-01 : f32
    %705 = vector.broadcast %cst_224 : f32 to vector<32x1xf32>
    %706 = arith.mulf %705, %704 : vector<32x1xf32>
    %707 = math.ceil %706 : vector<32x1xf32>
    %708 = arith.cmpf olt, %700, %707 : vector<32x1xf32>
    %cst_225 = arith.constant 1.000000e+00 : f32
    %cst_226 = arith.constant 0.000000e+00 : f32
    %709 = vector.broadcast %cst_225 : f32 to vector<32x1xf32>
    %710 = vector.broadcast %cst_226 : f32 to vector<32x1xf32>
    %711 = arith.select %708, %709, %710 : vector<32x1xi1>, vector<32x1xf32>
    %712 = arith.mulf %461, %711 : vector<32x1xf32>
    %713 = math.tanh %682 : vector<32x1xf32>
    %714 = vector.broadcast %713 : vector<32x1xf32> to vector<32x64xf32>
    %715 = arith.mulf %681, %714 : vector<32x64xf32>
    %716 = vector.broadcast %712 : vector<32x1xf32> to vector<32x64xf32>
    %717 = arith.mulf %715, %716 : vector<32x64xf32>
    %718 = tpu.transpose %712, [1, 0] : vector<32x1xf32> -> vector<1x32xf32>
    %719 = vector.broadcast %718 : vector<1x32xf32> to vector<2x32xf32>
    %720 = arith.mulf %3, %719 : vector<2x32xf32>
    %cst_227 = arith.constant dense<0.000000e+00> : vector<2xf32>
    %721 = vector.multi_reduction <add>, %720, %cst_227 [1] : vector<2x32xf32> to vector<2xf32>
    %722 = vector.shape_cast %721 : vector<2xf32> to vector<2x1xf32>
    %cst_228 = arith.constant dense<0.000000e+00> : vector<2x64xf32>
    %723 = tpu.matmul %720, %717, %cst_228 {dimension_numbers = #tpu.dot_dimension_numbers<[1], [0], [0], [1], [0, 0, 1, 1], [], []>} : vector<2x32xf32>, vector<32x64xf32>, vector<2x64xf32> -> vector<2x64xf32>
    %cst_229 = arith.constant 1.000000e+00 : f32
    %724 = vector.broadcast %cst_229 : f32 to vector<2x1xf32>
    %725 = arith.maximumf %722, %724 : vector<2x1xf32>
    %726 = tpu.reciprocal %725 {approx = true} : vector<2x1xf32> -> vector<2x1xf32>
    %727 = vector.broadcast %726 : vector<2x1xf32> to vector<2x64xf32>
    %728 = arith.mulf %723, %727 : vector<2x64xf32>
    %729 = vector.extract_strided_slice %4 {offsets = [0, 0], sizes = [32, 1], strides = [1, 1]} : vector<32x2xf32> to vector<32x1xf32>
    %730 = arith.mulf %729, %712 : vector<32x1xf32>
    %cst_230 = arith.constant 0.000000e+00 : f32
    %731 = vector.broadcast %cst_230 : f32 to vector<32x1xf32>
    %732 = arith.cmpf ogt, %730, %731 : vector<32x1xf32>
    %cst_231 = arith.constant -1.000000e+30 : f32
    %733 = vector.shape_cast %732 : vector<32x1xi1> to vector<32x1xi1>
    %734 = vector.broadcast %733 : vector<32x1xi1> to vector<32x64xi1>
    %735 = vector.broadcast %cst_231 : f32 to vector<32x64xf32>
    %736 = arith.select %734, %717, %735 : vector<32x64xi1>, vector<32x64xf32>
    %cst_232 = arith.constant dense<0xFF800000> : vector<64xf32>
    %737 = vector.multi_reduction <maximumf>, %736, %cst_232 [0] : vector<32x64xf32> to vector<64xf32>
    %738 = vector.shape_cast %737 : vector<64xf32> to vector<1x64xf32>
    %739 = vector.extract_strided_slice %722 {offsets = [0, 0], sizes = [1, 1], strides = [1, 1]} : vector<2x1xf32> to vector<1x1xf32>
    %cst_233 = arith.constant 0.000000e+00 : f32
    %740 = vector.broadcast %cst_233 : f32 to vector<1x1xf32>
    %741 = arith.cmpf ogt, %739, %740 : vector<1x1xf32>
    %cst_234 = arith.constant 0.000000e+00 : f32
    %742 = vector.shape_cast %741 : vector<1x1xi1> to vector<1x1xi1>
    %743 = vector.broadcast %742 : vector<1x1xi1> to vector<1x64xi1>
    %744 = vector.broadcast %cst_234 : f32 to vector<1x64xf32>
    %745 = arith.select %743, %738, %744 : vector<1x64xi1>, vector<1x64xf32>
    %746 = vector.extract_strided_slice %4 {offsets = [0, 1], sizes = [32, 1], strides = [1, 1]} : vector<32x2xf32> to vector<32x1xf32>
    %747 = arith.mulf %746, %712 : vector<32x1xf32>
    %cst_235 = arith.constant 0.000000e+00 : f32
    %748 = vector.broadcast %cst_235 : f32 to vector<32x1xf32>
    %749 = arith.cmpf ogt, %747, %748 : vector<32x1xf32>
    %cst_236 = arith.constant -1.000000e+30 : f32
    %750 = vector.shape_cast %749 : vector<32x1xi1> to vector<32x1xi1>
    %751 = vector.broadcast %750 : vector<32x1xi1> to vector<32x64xi1>
    %752 = vector.broadcast %cst_236 : f32 to vector<32x64xf32>
    %753 = arith.select %751, %717, %752 : vector<32x64xi1>, vector<32x64xf32>
    %cst_237 = arith.constant dense<0xFF800000> : vector<64xf32>
    %754 = vector.multi_reduction <maximumf>, %753, %cst_237 [0] : vector<32x64xf32> to vector<64xf32>
    %755 = vector.shape_cast %754 : vector<64xf32> to vector<1x64xf32>
    %756 = vector.extract_strided_slice %722 {offsets = [1, 0], sizes = [1, 1], strides = [1, 1]} : vector<2x1xf32> to vector<1x1xf32>
    %cst_238 = arith.constant 0.000000e+00 : f32
    %757 = vector.broadcast %cst_238 : f32 to vector<1x1xf32>
    %758 = arith.cmpf ogt, %756, %757 : vector<1x1xf32>
    %cst_239 = arith.constant 0.000000e+00 : f32
    %759 = vector.shape_cast %758 : vector<1x1xi1> to vector<1x1xi1>
    %760 = vector.broadcast %759 : vector<1x1xi1> to vector<1x64xi1>
    %761 = vector.broadcast %cst_239 : f32 to vector<1x64xf32>
    %762 = arith.select %760, %755, %761 : vector<1x64xi1>, vector<1x64xf32>
    %763 = tpu.concatenate %745, %762 in 0 : vector<1x64xf32>, vector<1x64xf32> -> vector<2x64xf32>
    %764 = arith.addf %513, %763 : vector<2x64xf32>
    %765 = arith.addf %514, %728 : vector<2x64xf32>
    %c3 = arith.constant 3 : index
    %c0_240 = arith.constant 0 : index
    %c0_241 = arith.constant 0 : index
    %766 = vector.load %arg5[%c3, %c0_240, %c0_241] : memref<4x64x192xf32, #tpu.memory_space<vmem>>, vector<1x64x192xf32>
    %767 = vector.shape_cast %766 : vector<1x64x192xf32> to vector<64x192xf32>
    %c3_242 = arith.constant 3 : index
    %c0_243 = arith.constant 0 : index
    %c0_244 = arith.constant 0 : index
    %768 = vector.load %arg6[%c3_242, %c0_243, %c0_244] : memref<4x192x6xf32, #tpu.memory_space<vmem>>, vector<1x192x6xf32>
    %769 = vector.shape_cast %768 : vector<1x192x6xf32> to vector<192x6xf32>
    %c3_245 = arith.constant 3 : index
    %c0_246 = arith.constant 0 : index
    %c0_247 = arith.constant 0 : index
    %770 = vector.load %arg7[%c3_245, %c0_246, %c0_247] : memref<4x1x64xf32, #tpu.memory_space<vmem>>, vector<1x1x64xf32>
    %771 = vector.shape_cast %770 : vector<1x1x64xf32> to vector<1x64xf32>
    %c3_248 = arith.constant 3 : index
    %c0_249 = arith.constant 0 : index
    %c0_250 = arith.constant 0 : index
    %772 = vector.load %arg8[%c3_248, %c0_249, %c0_250] : memref<4x64x1xf32, #tpu.memory_space<vmem>>, vector<1x64x1xf32>
    %773 = vector.shape_cast %772 : vector<1x64x1xf32> to vector<64x1xf32>
    %774 = tpu.transpose %712, [1, 0] : vector<32x1xf32> -> vector<1x32xf32>
    %775 = vector.broadcast %712 : vector<32x1xf32> to vector<32x32xf32>
    %776 = vector.broadcast %774 : vector<1x32xf32> to vector<32x32xf32>
    %777 = arith.mulf %775, %776 : vector<32x32xf32>
    %778 = arith.mulf %1, %777 : vector<32x32xf32>
    %779 = vector.broadcast %712 : vector<32x1xf32> to vector<32x32xf32>
    %780 = arith.mulf %9, %779 : vector<32x32xf32>
    %781 = arith.addf %778, %780 : vector<32x32xf32>
    %782 = arith.truncf %717 : vector<32x64xf32> to vector<32x64xbf16>
    %783 = arith.truncf %767 : vector<64x192xf32> to vector<64x192xbf16>
    %cst_251 = arith.constant dense<0.000000e+00> : vector<32x192xf32>
    %784 = tpu.matmul %782, %783, %cst_251 {dimension_numbers = #tpu.dot_dimension_numbers<[1], [0], [0], [1], [0, 0, 1, 1], [], []>} : vector<32x64xbf16>, vector<64x192xbf16>, vector<32x192xf32> -> vector<32x192xf32>
    %785 = arith.truncf %784 : vector<32x192xf32> to vector<32x192xbf16>
    %786 = arith.truncf %769 : vector<192x6xf32> to vector<192x6xbf16>
    %cst_252 = arith.constant dense<0.000000e+00> : vector<32x6xf32>
    %787 = tpu.matmul %785, %786, %cst_252 {dimension_numbers = #tpu.dot_dimension_numbers<[1], [0], [0], [1], [0, 0, 1, 1], [], []>} : vector<32x192xbf16>, vector<192x6xbf16>, vector<32x6xf32> -> vector<32x6xf32>
    %cst_253 = arith.constant 0.000000e+00 : f32
    %788 = vector.broadcast %cst_253 : f32 to vector<32x64xf32>
    %789 = vector.extract_strided_slice %787 {offsets = [0, 0], sizes = [32, 1], strides = [1, 1]} : vector<32x6xf32> to vector<32x1xf32>
    %790 = vector.extract_strided_slice %787 {offsets = [0, 3], sizes = [32, 1], strides = [1, 1]} : vector<32x6xf32> to vector<32x1xf32>
    %791 = tpu.transpose %790, [1, 0] : vector<32x1xf32> -> vector<1x32xf32>
    %792 = vector.broadcast %789 : vector<32x1xf32> to vector<32x32xf32>
    %793 = vector.broadcast %791 : vector<1x32xf32> to vector<32x32xf32>
    %794 = arith.addf %792, %793 : vector<32x32xf32>
    %cst_254 = arith.constant 0.000000e+00 : f32
    %795 = vector.broadcast %cst_254 : f32 to vector<32x32xf32>
    %796 = arith.cmpf oge, %794, %795 : vector<32x32xf32>
    %cst_255 = arith.constant 2.000000e-01 : f32
    %797 = vector.broadcast %cst_255 : f32 to vector<32x32xf32>
    %798 = arith.mulf %797, %794 : vector<32x32xf32>
    %799 = arith.select %796, %794, %798 : vector<32x32xi1>, vector<32x32xf32>
    %cst_256 = arith.constant 0.000000e+00 : f32
    %800 = vector.broadcast %cst_256 : f32 to vector<32x32xf32>
    %801 = arith.cmpf ogt, %781, %800 : vector<32x32xf32>
    %cst_257 = arith.constant -1.000000e+30 : f32
    %802 = vector.broadcast %cst_257 : f32 to vector<32x32xf32>
    %803 = arith.select %801, %799, %802 : vector<32x32xi1>, vector<32x32xf32>
    %cst_258 = arith.constant dense<0xFF800000> : vector<32xf32>
    %804 = vector.multi_reduction <maximumf>, %803, %cst_258 [1] : vector<32x32xf32> to vector<32xf32>
    %805 = vector.shape_cast %804 : vector<32xf32> to vector<32x1xf32>
    %806 = vector.broadcast %805 : vector<32x1xf32> to vector<32x32xf32>
    %807 = arith.subf %803, %806 : vector<32x32xf32>
    %808 = math.exp %807 : vector<32x32xf32>
    %809 = arith.mulf %808, %781 : vector<32x32xf32>
    %cst_259 = arith.constant dense<0.000000e+00> : vector<32xf32>
    %810 = vector.multi_reduction <add>, %809, %cst_259 [1] : vector<32x32xf32> to vector<32xf32>
    %811 = vector.shape_cast %810 : vector<32xf32> to vector<32x1xf32>
    %cst_260 = arith.constant 1.000000e-16 : f32
    %812 = vector.broadcast %cst_260 : f32 to vector<32x1xf32>
    %813 = arith.maximumf %811, %812 : vector<32x1xf32>
    %814 = tpu.reciprocal %813 {approx = true} : vector<32x1xf32> -> vector<32x1xf32>
    %815 = vector.broadcast %814 : vector<32x1xf32> to vector<32x32xf32>
    %816 = arith.mulf %809, %815 : vector<32x32xf32>
    %817 = vector.extract_strided_slice %784 {offsets = [0, 0], sizes = [32, 64], strides = [1, 1]} : vector<32x192xf32> to vector<32x64xf32>
    %818 = arith.truncf %816 : vector<32x32xf32> to vector<32x32xbf16>
    %819 = arith.truncf %817 : vector<32x64xf32> to vector<32x64xbf16>
    %cst_261 = arith.constant dense<0.000000e+00> : vector<32x64xf32>
    %820 = tpu.matmul %818, %819, %cst_261 {dimension_numbers = #tpu.dot_dimension_numbers<[1], [0], [0], [1], [0, 0, 1, 1], [], []>} : vector<32x32xbf16>, vector<32x64xbf16>, vector<32x64xf32> -> vector<32x64xf32>
    %821 = arith.addf %788, %820 : vector<32x64xf32>
    %822 = vector.extract_strided_slice %787 {offsets = [0, 1], sizes = [32, 1], strides = [1, 1]} : vector<32x6xf32> to vector<32x1xf32>
    %823 = vector.extract_strided_slice %787 {offsets = [0, 4], sizes = [32, 1], strides = [1, 1]} : vector<32x6xf32> to vector<32x1xf32>
    %824 = tpu.transpose %823, [1, 0] : vector<32x1xf32> -> vector<1x32xf32>
    %825 = vector.broadcast %822 : vector<32x1xf32> to vector<32x32xf32>
    %826 = vector.broadcast %824 : vector<1x32xf32> to vector<32x32xf32>
    %827 = arith.addf %825, %826 : vector<32x32xf32>
    %cst_262 = arith.constant 0.000000e+00 : f32
    %828 = vector.broadcast %cst_262 : f32 to vector<32x32xf32>
    %829 = arith.cmpf oge, %827, %828 : vector<32x32xf32>
    %cst_263 = arith.constant 2.000000e-01 : f32
    %830 = vector.broadcast %cst_263 : f32 to vector<32x32xf32>
    %831 = arith.mulf %830, %827 : vector<32x32xf32>
    %832 = arith.select %829, %827, %831 : vector<32x32xi1>, vector<32x32xf32>
    %cst_264 = arith.constant 0.000000e+00 : f32
    %833 = vector.broadcast %cst_264 : f32 to vector<32x32xf32>
    %834 = arith.cmpf ogt, %781, %833 : vector<32x32xf32>
    %cst_265 = arith.constant -1.000000e+30 : f32
    %835 = vector.broadcast %cst_265 : f32 to vector<32x32xf32>
    %836 = arith.select %834, %832, %835 : vector<32x32xi1>, vector<32x32xf32>
    %cst_266 = arith.constant dense<0xFF800000> : vector<32xf32>
    %837 = vector.multi_reduction <maximumf>, %836, %cst_266 [1] : vector<32x32xf32> to vector<32xf32>
    %838 = vector.shape_cast %837 : vector<32xf32> to vector<32x1xf32>
    %839 = vector.broadcast %838 : vector<32x1xf32> to vector<32x32xf32>
    %840 = arith.subf %836, %839 : vector<32x32xf32>
    %841 = math.exp %840 : vector<32x32xf32>
    %842 = arith.mulf %841, %781 : vector<32x32xf32>
    %cst_267 = arith.constant dense<0.000000e+00> : vector<32xf32>
    %843 = vector.multi_reduction <add>, %842, %cst_267 [1] : vector<32x32xf32> to vector<32xf32>
    %844 = vector.shape_cast %843 : vector<32xf32> to vector<32x1xf32>
    %cst_268 = arith.constant 1.000000e-16 : f32
    %845 = vector.broadcast %cst_268 : f32 to vector<32x1xf32>
    %846 = arith.maximumf %844, %845 : vector<32x1xf32>
    %847 = tpu.reciprocal %846 {approx = true} : vector<32x1xf32> -> vector<32x1xf32>
    %848 = vector.broadcast %847 : vector<32x1xf32> to vector<32x32xf32>
    %849 = arith.mulf %842, %848 : vector<32x32xf32>
    %850 = vector.extract_strided_slice %784 {offsets = [0, 64], sizes = [32, 64], strides = [1, 1]} : vector<32x192xf32> to vector<32x64xf32>
    %851 = arith.truncf %849 : vector<32x32xf32> to vector<32x32xbf16>
    %852 = arith.truncf %850 : vector<32x64xf32> to vector<32x64xbf16>
    %cst_269 = arith.constant dense<0.000000e+00> : vector<32x64xf32>
    %853 = tpu.matmul %851, %852, %cst_269 {dimension_numbers = #tpu.dot_dimension_numbers<[1], [0], [0], [1], [0, 0, 1, 1], [], []>} : vector<32x32xbf16>, vector<32x64xbf16>, vector<32x64xf32> -> vector<32x64xf32>
    %854 = arith.addf %821, %853 : vector<32x64xf32>
    %855 = vector.extract_strided_slice %787 {offsets = [0, 2], sizes = [32, 1], strides = [1, 1]} : vector<32x6xf32> to vector<32x1xf32>
    %856 = vector.extract_strided_slice %787 {offsets = [0, 5], sizes = [32, 1], strides = [1, 1]} : vector<32x6xf32> to vector<32x1xf32>
    %857 = tpu.transpose %856, [1, 0] : vector<32x1xf32> -> vector<1x32xf32>
    %858 = vector.broadcast %855 : vector<32x1xf32> to vector<32x32xf32>
    %859 = vector.broadcast %857 : vector<1x32xf32> to vector<32x32xf32>
    %860 = arith.addf %858, %859 : vector<32x32xf32>
    %cst_270 = arith.constant 0.000000e+00 : f32
    %861 = vector.broadcast %cst_270 : f32 to vector<32x32xf32>
    %862 = arith.cmpf oge, %860, %861 : vector<32x32xf32>
    %cst_271 = arith.constant 2.000000e-01 : f32
    %863 = vector.broadcast %cst_271 : f32 to vector<32x32xf32>
    %864 = arith.mulf %863, %860 : vector<32x32xf32>
    %865 = arith.select %862, %860, %864 : vector<32x32xi1>, vector<32x32xf32>
    %cst_272 = arith.constant 0.000000e+00 : f32
    %866 = vector.broadcast %cst_272 : f32 to vector<32x32xf32>
    %867 = arith.cmpf ogt, %781, %866 : vector<32x32xf32>
    %cst_273 = arith.constant -1.000000e+30 : f32
    %868 = vector.broadcast %cst_273 : f32 to vector<32x32xf32>
    %869 = arith.select %867, %865, %868 : vector<32x32xi1>, vector<32x32xf32>
    %cst_274 = arith.constant dense<0xFF800000> : vector<32xf32>
    %870 = vector.multi_reduction <maximumf>, %869, %cst_274 [1] : vector<32x32xf32> to vector<32xf32>
    %871 = vector.shape_cast %870 : vector<32xf32> to vector<32x1xf32>
    %872 = vector.broadcast %871 : vector<32x1xf32> to vector<32x32xf32>
    %873 = arith.subf %869, %872 : vector<32x32xf32>
    %874 = math.exp %873 : vector<32x32xf32>
    %875 = arith.mulf %874, %781 : vector<32x32xf32>
    %cst_275 = arith.constant dense<0.000000e+00> : vector<32xf32>
    %876 = vector.multi_reduction <add>, %875, %cst_275 [1] : vector<32x32xf32> to vector<32xf32>
    %877 = vector.shape_cast %876 : vector<32xf32> to vector<32x1xf32>
    %cst_276 = arith.constant 1.000000e-16 : f32
    %878 = vector.broadcast %cst_276 : f32 to vector<32x1xf32>
    %879 = arith.maximumf %877, %878 : vector<32x1xf32>
    %880 = tpu.reciprocal %879 {approx = true} : vector<32x1xf32> -> vector<32x1xf32>
    %881 = vector.broadcast %880 : vector<32x1xf32> to vector<32x32xf32>
    %882 = arith.mulf %875, %881 : vector<32x32xf32>
    %883 = vector.extract_strided_slice %784 {offsets = [0, 128], sizes = [32, 64], strides = [1, 1]} : vector<32x192xf32> to vector<32x64xf32>
    %884 = arith.truncf %882 : vector<32x32xf32> to vector<32x32xbf16>
    %885 = arith.truncf %883 : vector<32x64xf32> to vector<32x64xbf16>
    %cst_277 = arith.constant dense<0.000000e+00> : vector<32x64xf32>
    %886 = tpu.matmul %884, %885, %cst_277 {dimension_numbers = #tpu.dot_dimension_numbers<[1], [0], [0], [1], [0, 0, 1, 1], [], []>} : vector<32x32xbf16>, vector<32x64xbf16>, vector<32x64xf32> -> vector<32x64xf32>
    %887 = arith.addf %854, %886 : vector<32x64xf32>
    %cst_278 = arith.constant 0.333333343 : f32
    %888 = vector.broadcast %cst_278 : f32 to vector<32x64xf32>
    %889 = arith.mulf %887, %888 : vector<32x64xf32>
    %890 = vector.broadcast %771 : vector<1x64xf32> to vector<32x64xf32>
    %891 = arith.addf %889, %890 : vector<32x64xf32>
    %cst_279 = arith.constant 5.000000e-01 : f32
    %892 = vector.broadcast %cst_279 : f32 to vector<32x64xf32>
    %893 = arith.mulf %892, %891 : vector<32x64xf32>
    %cst_280 = arith.constant 0.707106769 : f32
    %894 = vector.broadcast %cst_280 : f32 to vector<32x64xf32>
    %895 = arith.mulf %891, %894 : vector<32x64xf32>
    %cst_281 = arith.constant 0.000000e+00 : f32
    %896 = vector.broadcast %cst_281 : f32 to vector<32x64xf32>
    %897 = arith.cmpf oge, %895, %896 : vector<32x64xf32>
    %cst_282 = arith.constant 1.000000e+00 : f32
    %cst_283 = arith.constant -1.000000e+00 : f32
    %898 = vector.broadcast %cst_282 : f32 to vector<32x64xf32>
    %899 = vector.broadcast %cst_283 : f32 to vector<32x64xf32>
    %900 = arith.select %897, %898, %899 : vector<32x64xi1>, vector<32x64xf32>
    %901 = math.absf %895 : vector<32x64xf32>
    %cst_284 = arith.constant 0.327591091 : f32
    %902 = vector.broadcast %cst_284 : f32 to vector<32x64xf32>
    %903 = arith.mulf %902, %901 : vector<32x64xf32>
    %cst_285 = arith.constant 1.000000e+00 : f32
    %904 = vector.broadcast %cst_285 : f32 to vector<32x64xf32>
    %905 = arith.addf %904, %903 : vector<32x64xf32>
    %cst_286 = arith.constant 1.000000e+00 : f32
    %906 = vector.broadcast %cst_286 : f32 to vector<32x64xf32>
    %907 = arith.divf %906, %905 : vector<32x64xf32>
    %cst_287 = arith.constant 1.06140542 : f32
    %908 = vector.broadcast %cst_287 : f32 to vector<32x64xf32>
    %909 = arith.mulf %908, %907 : vector<32x64xf32>
    %cst_288 = arith.constant -1.45315206 : f32
    %910 = vector.broadcast %cst_288 : f32 to vector<32x64xf32>
    %911 = arith.addf %909, %910 : vector<32x64xf32>
    %912 = arith.mulf %911, %907 : vector<32x64xf32>
    %cst_289 = arith.constant 1.42141378 : f32
    %913 = vector.broadcast %cst_289 : f32 to vector<32x64xf32>
    %914 = arith.addf %912, %913 : vector<32x64xf32>
    %915 = arith.mulf %914, %907 : vector<32x64xf32>
    %cst_290 = arith.constant -0.284496725 : f32
    %916 = vector.broadcast %cst_290 : f32 to vector<32x64xf32>
    %917 = arith.addf %915, %916 : vector<32x64xf32>
    %918 = arith.mulf %917, %907 : vector<32x64xf32>
    %cst_291 = arith.constant 0.254829586 : f32
    %919 = vector.broadcast %cst_291 : f32 to vector<32x64xf32>
    %920 = arith.addf %918, %919 : vector<32x64xf32>
    %921 = arith.mulf %920, %907 : vector<32x64xf32>
    %cst_292 = arith.constant 0.000000e+00 : f32
    %922 = vector.broadcast %cst_292 : f32 to vector<32x64xf32>
    %923 = arith.subf %922, %901 : vector<32x64xf32>
    %924 = arith.mulf %923, %901 : vector<32x64xf32>
    %925 = math.exp %924 : vector<32x64xf32>
    %926 = arith.mulf %921, %925 : vector<32x64xf32>
    %cst_293 = arith.constant 1.000000e+00 : f32
    %927 = vector.broadcast %cst_293 : f32 to vector<32x64xf32>
    %928 = arith.subf %927, %926 : vector<32x64xf32>
    %929 = arith.mulf %900, %928 : vector<32x64xf32>
    %cst_294 = arith.constant 1.000000e+00 : f32
    %930 = vector.broadcast %cst_294 : f32 to vector<32x64xf32>
    %931 = arith.addf %930, %929 : vector<32x64xf32>
    %932 = arith.mulf %893, %931 : vector<32x64xf32>
    %cst_295 = arith.constant dense<0.000000e+00> : vector<32x1xf32>
    %933 = tpu.matmul %932, %773, %cst_295 {dimension_numbers = #tpu.dot_dimension_numbers<[1], [0], [0], [1], [0, 0, 1, 1], [], []>} : vector<32x64xf32>, vector<64x1xf32>, vector<32x1xf32> -> vector<32x1xf32>
    %934 = tpu.transpose %933, [1, 0] : vector<32x1xf32> -> vector<1x32xf32>
    %935 = vector.broadcast %934 : vector<1x32xf32> to vector<32x32xf32>
    %936 = vector.broadcast %933 : vector<32x1xf32> to vector<32x32xf32>
    %937 = arith.cmpf ogt, %935, %936 : vector<32x32xf32>
    %938 = vector.broadcast %934 : vector<1x32xf32> to vector<32x32xf32>
    %939 = vector.broadcast %933 : vector<32x1xf32> to vector<32x32xf32>
    %940 = arith.cmpf oeq, %938, %939 : vector<32x32xf32>
    %941 = arith.cmpi slt, %6, %5 : vector<32x32xi32>
    %942 = arith.andi %940, %941 : vector<32x32xi1>
    %943 = arith.ori %937, %942 : vector<32x32xi1>
    %cst_296 = arith.constant 1.000000e+00 : f32
    %cst_297 = arith.constant 0.000000e+00 : f32
    %944 = vector.broadcast %cst_296 : f32 to vector<32x32xf32>
    %945 = vector.broadcast %cst_297 : f32 to vector<32x32xf32>
    %946 = arith.select %943, %944, %945 : vector<32x32xi1>, vector<32x32xf32>
    %947 = arith.mulf %946, %2 : vector<32x32xf32>
    %948 = vector.broadcast %774 : vector<1x32xf32> to vector<32x32xf32>
    %949 = arith.mulf %947, %948 : vector<32x32xf32>
    %cst_298 = arith.constant dense<0.000000e+00> : vector<32xf32>
    %950 = vector.multi_reduction <add>, %949, %cst_298 [1] : vector<32x32xf32> to vector<32xf32>
    %951 = vector.shape_cast %950 : vector<32xf32> to vector<32x1xf32>
    %952 = vector.broadcast %774 : vector<1x32xf32> to vector<32x32xf32>
    %953 = arith.mulf %2, %952 : vector<32x32xf32>
    %cst_299 = arith.constant dense<0.000000e+00> : vector<32xf32>
    %954 = vector.multi_reduction <add>, %953, %cst_299 [1] : vector<32x32xf32> to vector<32xf32>
    %955 = vector.shape_cast %954 : vector<32xf32> to vector<32x1xf32>
    %cst_300 = arith.constant 8.000000e-01 : f32
    %956 = vector.broadcast %cst_300 : f32 to vector<32x1xf32>
    %957 = arith.mulf %956, %955 : vector<32x1xf32>
    %958 = math.ceil %957 : vector<32x1xf32>
    %959 = arith.cmpf olt, %951, %958 : vector<32x1xf32>
    %cst_301 = arith.constant 1.000000e+00 : f32
    %cst_302 = arith.constant 0.000000e+00 : f32
    %960 = vector.broadcast %cst_301 : f32 to vector<32x1xf32>
    %961 = vector.broadcast %cst_302 : f32 to vector<32x1xf32>
    %962 = arith.select %959, %960, %961 : vector<32x1xi1>, vector<32x1xf32>
    %963 = arith.mulf %712, %962 : vector<32x1xf32>
    %964 = math.tanh %933 : vector<32x1xf32>
    %965 = vector.broadcast %964 : vector<32x1xf32> to vector<32x64xf32>
    %966 = arith.mulf %932, %965 : vector<32x64xf32>
    %967 = vector.broadcast %963 : vector<32x1xf32> to vector<32x64xf32>
    %968 = arith.mulf %966, %967 : vector<32x64xf32>
    %969 = tpu.transpose %963, [1, 0] : vector<32x1xf32> -> vector<1x32xf32>
    %970 = vector.broadcast %969 : vector<1x32xf32> to vector<2x32xf32>
    %971 = arith.mulf %3, %970 : vector<2x32xf32>
    %cst_303 = arith.constant dense<0.000000e+00> : vector<2xf32>
    %972 = vector.multi_reduction <add>, %971, %cst_303 [1] : vector<2x32xf32> to vector<2xf32>
    %973 = vector.shape_cast %972 : vector<2xf32> to vector<2x1xf32>
    %cst_304 = arith.constant dense<0.000000e+00> : vector<2x64xf32>
    %974 = tpu.matmul %971, %968, %cst_304 {dimension_numbers = #tpu.dot_dimension_numbers<[1], [0], [0], [1], [0, 0, 1, 1], [], []>} : vector<2x32xf32>, vector<32x64xf32>, vector<2x64xf32> -> vector<2x64xf32>
    %cst_305 = arith.constant 1.000000e+00 : f32
    %975 = vector.broadcast %cst_305 : f32 to vector<2x1xf32>
    %976 = arith.maximumf %973, %975 : vector<2x1xf32>
    %977 = tpu.reciprocal %976 {approx = true} : vector<2x1xf32> -> vector<2x1xf32>
    %978 = vector.broadcast %977 : vector<2x1xf32> to vector<2x64xf32>
    %979 = arith.mulf %974, %978 : vector<2x64xf32>
    %980 = vector.extract_strided_slice %4 {offsets = [0, 0], sizes = [32, 1], strides = [1, 1]} : vector<32x2xf32> to vector<32x1xf32>
    %981 = arith.mulf %980, %963 : vector<32x1xf32>
    %cst_306 = arith.constant 0.000000e+00 : f32
    %982 = vector.broadcast %cst_306 : f32 to vector<32x1xf32>
    %983 = arith.cmpf ogt, %981, %982 : vector<32x1xf32>
    %cst_307 = arith.constant -1.000000e+30 : f32
    %984 = vector.shape_cast %983 : vector<32x1xi1> to vector<32x1xi1>
    %985 = vector.broadcast %984 : vector<32x1xi1> to vector<32x64xi1>
    %986 = vector.broadcast %cst_307 : f32 to vector<32x64xf32>
    %987 = arith.select %985, %968, %986 : vector<32x64xi1>, vector<32x64xf32>
    %cst_308 = arith.constant dense<0xFF800000> : vector<64xf32>
    %988 = vector.multi_reduction <maximumf>, %987, %cst_308 [0] : vector<32x64xf32> to vector<64xf32>
    %989 = vector.shape_cast %988 : vector<64xf32> to vector<1x64xf32>
    %990 = vector.extract_strided_slice %973 {offsets = [0, 0], sizes = [1, 1], strides = [1, 1]} : vector<2x1xf32> to vector<1x1xf32>
    %cst_309 = arith.constant 0.000000e+00 : f32
    %991 = vector.broadcast %cst_309 : f32 to vector<1x1xf32>
    %992 = arith.cmpf ogt, %990, %991 : vector<1x1xf32>
    %cst_310 = arith.constant 0.000000e+00 : f32
    %993 = vector.shape_cast %992 : vector<1x1xi1> to vector<1x1xi1>
    %994 = vector.broadcast %993 : vector<1x1xi1> to vector<1x64xi1>
    %995 = vector.broadcast %cst_310 : f32 to vector<1x64xf32>
    %996 = arith.select %994, %989, %995 : vector<1x64xi1>, vector<1x64xf32>
    %997 = vector.extract_strided_slice %4 {offsets = [0, 1], sizes = [32, 1], strides = [1, 1]} : vector<32x2xf32> to vector<32x1xf32>
    %998 = arith.mulf %997, %963 : vector<32x1xf32>
    %cst_311 = arith.constant 0.000000e+00 : f32
    %999 = vector.broadcast %cst_311 : f32 to vector<32x1xf32>
    %1000 = arith.cmpf ogt, %998, %999 : vector<32x1xf32>
    %cst_312 = arith.constant -1.000000e+30 : f32
    %1001 = vector.shape_cast %1000 : vector<32x1xi1> to vector<32x1xi1>
    %1002 = vector.broadcast %1001 : vector<32x1xi1> to vector<32x64xi1>
    %1003 = vector.broadcast %cst_312 : f32 to vector<32x64xf32>
    %1004 = arith.select %1002, %968, %1003 : vector<32x64xi1>, vector<32x64xf32>
    %cst_313 = arith.constant dense<0xFF800000> : vector<64xf32>
    %1005 = vector.multi_reduction <maximumf>, %1004, %cst_313 [0] : vector<32x64xf32> to vector<64xf32>
    %1006 = vector.shape_cast %1005 : vector<64xf32> to vector<1x64xf32>
    %1007 = vector.extract_strided_slice %973 {offsets = [1, 0], sizes = [1, 1], strides = [1, 1]} : vector<2x1xf32> to vector<1x1xf32>
    %cst_314 = arith.constant 0.000000e+00 : f32
    %1008 = vector.broadcast %cst_314 : f32 to vector<1x1xf32>
    %1009 = arith.cmpf ogt, %1007, %1008 : vector<1x1xf32>
    %cst_315 = arith.constant 0.000000e+00 : f32
    %1010 = vector.shape_cast %1009 : vector<1x1xi1> to vector<1x1xi1>
    %1011 = vector.broadcast %1010 : vector<1x1xi1> to vector<1x64xi1>
    %1012 = vector.broadcast %cst_315 : f32 to vector<1x64xf32>
    %1013 = arith.select %1011, %1006, %1012 : vector<1x64xi1>, vector<1x64xf32>
    %1014 = tpu.concatenate %996, %1013 in 0 : vector<1x64xf32>, vector<1x64xf32> -> vector<2x64xf32>
    %1015 = arith.addf %764, %1014 : vector<2x64xf32>
    %1016 = arith.addf %765, %979 : vector<2x64xf32>
    %c0_316 = arith.constant 0 : index
    %c0_317 = arith.constant 0 : index
    %1017 = vector.load %arg9[%c0_316, %c0_317] : memref<128x64xf32, #tpu.memory_space<vmem>>, vector<128x64xf32>
    %1018 = arith.truncf %1015 : vector<2x64xf32> to vector<2x64xbf16>
    %1019 = vector.extract_strided_slice %1017 {offsets = [0, 0], sizes = [64, 64], strides = [1, 1]} : vector<128x64xf32> to vector<64x64xf32>
    %1020 = arith.truncf %1019 : vector<64x64xf32> to vector<64x64xbf16>
    %cst_318 = arith.constant dense<0.000000e+00> : vector<2x64xf32>
    %1021 = tpu.matmul %1018, %1020, %cst_318 {dimension_numbers = #tpu.dot_dimension_numbers<[1], [0], [0], [1], [0, 0, 1, 1], [], []>} : vector<2x64xbf16>, vector<64x64xbf16>, vector<2x64xf32> -> vector<2x64xf32>
    %1022 = arith.truncf %1016 : vector<2x64xf32> to vector<2x64xbf16>
    %1023 = vector.extract_strided_slice %1017 {offsets = [64, 0], sizes = [64, 64], strides = [1, 1]} : vector<128x64xf32> to vector<64x64xf32>
    %1024 = arith.truncf %1023 : vector<64x64xf32> to vector<64x64xbf16>
    %cst_319 = arith.constant dense<0.000000e+00> : vector<2x64xf32>
    %1025 = tpu.matmul %1022, %1024, %cst_319 {dimension_numbers = #tpu.dot_dimension_numbers<[1], [0], [0], [1], [0, 0, 1, 1], [], []>} : vector<2x64xbf16>, vector<64x64xbf16>, vector<2x64xf32> -> vector<2x64xf32>
    %1026 = arith.addf %1021, %1025 : vector<2x64xf32>
    %c0_320 = arith.constant 0 : index
    %c0_321 = arith.constant 0 : index
    %1027 = vector.load %arg10[%c0_320, %c0_321] : memref<1x64xf32, #tpu.memory_space<vmem>>, vector<1x64xf32>
    %1028 = vector.broadcast %1027 : vector<1x64xf32> to vector<2x64xf32>
    %1029 = arith.addf %1026, %1028 : vector<2x64xf32>
    %cst_322 = arith.constant 5.000000e-01 : f32
    %1030 = vector.broadcast %cst_322 : f32 to vector<2x64xf32>
    %1031 = arith.mulf %1030, %1029 : vector<2x64xf32>
    %cst_323 = arith.constant 0.707106769 : f32
    %1032 = vector.broadcast %cst_323 : f32 to vector<2x64xf32>
    %1033 = arith.mulf %1029, %1032 : vector<2x64xf32>
    %cst_324 = arith.constant 0.000000e+00 : f32
    %1034 = vector.broadcast %cst_324 : f32 to vector<2x64xf32>
    %1035 = arith.cmpf oge, %1033, %1034 : vector<2x64xf32>
    %cst_325 = arith.constant 1.000000e+00 : f32
    %cst_326 = arith.constant -1.000000e+00 : f32
    %1036 = vector.broadcast %cst_325 : f32 to vector<2x64xf32>
    %1037 = vector.broadcast %cst_326 : f32 to vector<2x64xf32>
    %1038 = arith.select %1035, %1036, %1037 : vector<2x64xi1>, vector<2x64xf32>
    %1039 = math.absf %1033 : vector<2x64xf32>
    %cst_327 = arith.constant 0.327591091 : f32
    %1040 = vector.broadcast %cst_327 : f32 to vector<2x64xf32>
    %1041 = arith.mulf %1040, %1039 : vector<2x64xf32>
    %cst_328 = arith.constant 1.000000e+00 : f32
    %1042 = vector.broadcast %cst_328 : f32 to vector<2x64xf32>
    %1043 = arith.addf %1042, %1041 : vector<2x64xf32>
    %cst_329 = arith.constant 1.000000e+00 : f32
    %1044 = vector.broadcast %cst_329 : f32 to vector<2x64xf32>
    %1045 = arith.divf %1044, %1043 : vector<2x64xf32>
    %cst_330 = arith.constant 1.06140542 : f32
    %1046 = vector.broadcast %cst_330 : f32 to vector<2x64xf32>
    %1047 = arith.mulf %1046, %1045 : vector<2x64xf32>
    %cst_331 = arith.constant -1.45315206 : f32
    %1048 = vector.broadcast %cst_331 : f32 to vector<2x64xf32>
    %1049 = arith.addf %1047, %1048 : vector<2x64xf32>
    %1050 = arith.mulf %1049, %1045 : vector<2x64xf32>
    %cst_332 = arith.constant 1.42141378 : f32
    %1051 = vector.broadcast %cst_332 : f32 to vector<2x64xf32>
    %1052 = arith.addf %1050, %1051 : vector<2x64xf32>
    %1053 = arith.mulf %1052, %1045 : vector<2x64xf32>
    %cst_333 = arith.constant -0.284496725 : f32
    %1054 = vector.broadcast %cst_333 : f32 to vector<2x64xf32>
    %1055 = arith.addf %1053, %1054 : vector<2x64xf32>
    %1056 = arith.mulf %1055, %1045 : vector<2x64xf32>
    %cst_334 = arith.constant 0.254829586 : f32
    %1057 = vector.broadcast %cst_334 : f32 to vector<2x64xf32>
    %1058 = arith.addf %1056, %1057 : vector<2x64xf32>
    %1059 = arith.mulf %1058, %1045 : vector<2x64xf32>
    %cst_335 = arith.constant 0.000000e+00 : f32
    %1060 = vector.broadcast %cst_335 : f32 to vector<2x64xf32>
    %1061 = arith.subf %1060, %1039 : vector<2x64xf32>
    %1062 = arith.mulf %1061, %1039 : vector<2x64xf32>
    %1063 = math.exp %1062 : vector<2x64xf32>
    %1064 = arith.mulf %1059, %1063 : vector<2x64xf32>
    %cst_336 = arith.constant 1.000000e+00 : f32
    %1065 = vector.broadcast %cst_336 : f32 to vector<2x64xf32>
    %1066 = arith.subf %1065, %1064 : vector<2x64xf32>
    %1067 = arith.mulf %1038, %1066 : vector<2x64xf32>
    %cst_337 = arith.constant 1.000000e+00 : f32
    %1068 = vector.broadcast %cst_337 : f32 to vector<2x64xf32>
    %1069 = arith.addf %1068, %1067 : vector<2x64xf32>
    %1070 = arith.mulf %1031, %1069 : vector<2x64xf32>
    %1071 = arith.truncf %1070 : vector<2x64xf32> to vector<2x64xbf16>
    %c0_338 = arith.constant 0 : index
    %c0_339 = arith.constant 0 : index
    %1072 = vector.load %arg11[%c0_338, %c0_339] : memref<64x64xf32, #tpu.memory_space<vmem>>, vector<64x64xf32>
    %1073 = arith.truncf %1072 : vector<64x64xf32> to vector<64x64xbf16>
    %cst_340 = arith.constant dense<0.000000e+00> : vector<2x64xf32>
    %1074 = tpu.matmul %1071, %1073, %cst_340 {dimension_numbers = #tpu.dot_dimension_numbers<[1], [0], [0], [1], [0, 0, 1, 1], [], []>} : vector<2x64xbf16>, vector<64x64xbf16>, vector<2x64xf32> -> vector<2x64xf32>
    %c0_341 = arith.constant 0 : index
    %c0_342 = arith.constant 0 : index
    %1075 = vector.load %arg12[%c0_341, %c0_342] : memref<1x64xf32, #tpu.memory_space<vmem>>, vector<1x64xf32>
    %1076 = vector.broadcast %1075 : vector<1x64xf32> to vector<2x64xf32>
    %1077 = arith.addf %1074, %1076 : vector<2x64xf32>
    %cst_343 = arith.constant 5.000000e-01 : f32
    %1078 = vector.broadcast %cst_343 : f32 to vector<2x64xf32>
    %1079 = arith.mulf %1078, %1077 : vector<2x64xf32>
    %cst_344 = arith.constant 0.707106769 : f32
    %1080 = vector.broadcast %cst_344 : f32 to vector<2x64xf32>
    %1081 = arith.mulf %1077, %1080 : vector<2x64xf32>
    %cst_345 = arith.constant 0.000000e+00 : f32
    %1082 = vector.broadcast %cst_345 : f32 to vector<2x64xf32>
    %1083 = arith.cmpf oge, %1081, %1082 : vector<2x64xf32>
    %cst_346 = arith.constant 1.000000e+00 : f32
    %cst_347 = arith.constant -1.000000e+00 : f32
    %1084 = vector.broadcast %cst_346 : f32 to vector<2x64xf32>
    %1085 = vector.broadcast %cst_347 : f32 to vector<2x64xf32>
    %1086 = arith.select %1083, %1084, %1085 : vector<2x64xi1>, vector<2x64xf32>
    %1087 = math.absf %1081 : vector<2x64xf32>
    %cst_348 = arith.constant 0.327591091 : f32
    %1088 = vector.broadcast %cst_348 : f32 to vector<2x64xf32>
    %1089 = arith.mulf %1088, %1087 : vector<2x64xf32>
    %cst_349 = arith.constant 1.000000e+00 : f32
    %1090 = vector.broadcast %cst_349 : f32 to vector<2x64xf32>
    %1091 = arith.addf %1090, %1089 : vector<2x64xf32>
    %cst_350 = arith.constant 1.000000e+00 : f32
    %1092 = vector.broadcast %cst_350 : f32 to vector<2x64xf32>
    %1093 = arith.divf %1092, %1091 : vector<2x64xf32>
    %cst_351 = arith.constant 1.06140542 : f32
    %1094 = vector.broadcast %cst_351 : f32 to vector<2x64xf32>
    %1095 = arith.mulf %1094, %1093 : vector<2x64xf32>
    %cst_352 = arith.constant -1.45315206 : f32
    %1096 = vector.broadcast %cst_352 : f32 to vector<2x64xf32>
    %1097 = arith.addf %1095, %1096 : vector<2x64xf32>
    %1098 = arith.mulf %1097, %1093 : vector<2x64xf32>
    %cst_353 = arith.constant 1.42141378 : f32
    %1099 = vector.broadcast %cst_353 : f32 to vector<2x64xf32>
    %1100 = arith.addf %1098, %1099 : vector<2x64xf32>
    %1101 = arith.mulf %1100, %1093 : vector<2x64xf32>
    %cst_354 = arith.constant -0.284496725 : f32
    %1102 = vector.broadcast %cst_354 : f32 to vector<2x64xf32>
    %1103 = arith.addf %1101, %1102 : vector<2x64xf32>
    %1104 = arith.mulf %1103, %1093 : vector<2x64xf32>
    %cst_355 = arith.constant 0.254829586 : f32
    %1105 = vector.broadcast %cst_355 : f32 to vector<2x64xf32>
    %1106 = arith.addf %1104, %1105 : vector<2x64xf32>
    %1107 = arith.mulf %1106, %1093 : vector<2x64xf32>
    %cst_356 = arith.constant 0.000000e+00 : f32
    %1108 = vector.broadcast %cst_356 : f32 to vector<2x64xf32>
    %1109 = arith.subf %1108, %1087 : vector<2x64xf32>
    %1110 = arith.mulf %1109, %1087 : vector<2x64xf32>
    %1111 = math.exp %1110 : vector<2x64xf32>
    %1112 = arith.mulf %1107, %1111 : vector<2x64xf32>
    %cst_357 = arith.constant 1.000000e+00 : f32
    %1113 = vector.broadcast %cst_357 : f32 to vector<2x64xf32>
    %1114 = arith.subf %1113, %1112 : vector<2x64xf32>
    %1115 = arith.mulf %1086, %1114 : vector<2x64xf32>
    %cst_358 = arith.constant 1.000000e+00 : f32
    %1116 = vector.broadcast %cst_358 : f32 to vector<2x64xf32>
    %1117 = arith.addf %1116, %1115 : vector<2x64xf32>
    %1118 = arith.mulf %1079, %1117 : vector<2x64xf32>
    %1119 = arith.truncf %1118 : vector<2x64xf32> to vector<2x64xbf16>
    %c0_359 = arith.constant 0 : index
    %c0_360 = arith.constant 0 : index
    %1120 = vector.load %arg13[%c0_359, %c0_360] : memref<64x4xf32, #tpu.memory_space<vmem>>, vector<64x4xf32>
    %1121 = arith.truncf %1120 : vector<64x4xf32> to vector<64x4xbf16>
    %cst_361 = arith.constant dense<0.000000e+00> : vector<2x4xf32>
    %1122 = tpu.matmul %1119, %1121, %cst_361 {dimension_numbers = #tpu.dot_dimension_numbers<[1], [0], [0], [1], [0, 0, 1, 1], [], []>} : vector<2x64xbf16>, vector<64x4xbf16>, vector<2x4xf32> -> vector<2x4xf32>
    %c0_362 = arith.constant 0 : index
    %c0_363 = arith.constant 0 : index
    %1123 = vector.load %arg14[%c0_362, %c0_363] : memref<1x4xf32, #tpu.memory_space<vmem>>, vector<1x4xf32>
    %1124 = vector.broadcast %1123 : vector<1x4xf32> to vector<2x4xf32>
    %1125 = arith.addf %1122, %1124 : vector<2x4xf32>
    %c0_364 = arith.constant 0 : index
    %c0_365 = arith.constant 0 : index
    %1126 = vector.load %arg15[%c0_364, %c0_365] : memref<2x4xf32, #tpu.memory_space<vmem>>, vector<2x4xf32>
    tpu.vector_store %arg15[%c0_364, %c0_365], %1125 {strides = array<i32>} : memref<2x4xf32, #tpu.memory_space<vmem>>, vector<2x4xf32>,
    return
  }
}

</mosaic_0001>

<bundles_post_ra>
// kernel: recognizer_gat_forward.1
= control target key start
LH: loop header
LB: loop body
LE: loop exit
PB: predicated region body
PF: predicated region fallthrough
CT: control target
= control target key end

     0   :  { %v10161_v7 = vmov 0   ;;  %s10133_s0 = inlined_call_operand.vmem [shape: f32[32,64], index: 0, kind: input, shape index: {}]   ;;  %s10134_s1 = inlined_call_operand.vmem [shape: f32[32,32], index: 1, kind: input, shape index: {}]   ;;  %s10135_s2 = inlined_call_operand.vmem [shape: f32[32,32], index: 2, kind: input, shape index: {}]   ;;  %s10136_s3 = inlined_call_operand.vmem [shape: f32[2,32], index: 3, kind: input, shape index: {}]   ;;  %s10137_s4 = inlined_call_operand.vmem [shape: f32[32,2], index: 4, kind: input, shape index: {}]   ;;  %s10138_s5 = inlined_call_operand.vmem [shape: f32[4,64,192], index: 5, kind: input, shape index: {}]   ;;  %s10139_s6 = inlined_call_operand.vmem [shape: f32[4,192,6], index: 6, kind: input, shape index: {}]   ;;  %s10140_s7 = inlined_call_operand.vmem [shape: f32[4,1,64], index: 7, kind: input, shape index: {}]   ;;  %s10141_s8 = inlined_call_operand.vmem [shape: f32[4,64,1], index: 8, kind: input, shape index: {}]   ;;  %s10142_s9 = inlined_call_operand.vmem [shape: f32[128,64], index: 9, kind: input, shape index: {}]   ;;  %s10143_s10 = inlined_call_operand.vmem [shape: f32[1,64], index: 10, kind: input, shape index: {}]   ;;  %s10144_s11 = inlined_call_operand.vmem [shape: f32[64,64], index: 11, kind: input, shape index: {}]   ;;  %s10145_s12 = inlined_call_operand.vmem [shape: f32[1,64], index: 12, kind: input, shape index: {}]   ;;  %s10146_s13 = inlined_call_operand.vmem [shape: f32[64,4], index: 13, kind: input, shape index: {}]   ;;  %s10147_s14 = inlined_call_operand.vmem [shape: f32[1,4], index: 14, kind: input, shape index: {}]   ;;  %s10148_s15 = inlined_call_operand.hbm [shape: f32[2,4], index: 15, kind: output, shape index: {}]  }
   0x1   :  { %v89_v0 = vld [vmem:[%s10138_s5 + $0x8] sm:$0xff]  ;;  %v91_v1 = vld [vmem:[%s10138_s5 + $0x18] sm:$0xff]  ;;  %v88_v2 = vld [vmem:[%s10138_s5] sm:$0xff]  ;;  %230 = vmatprep.mubr.bf16.mxu0 %v10161_v7  ;;  %273 = vmatprep.subr.bf16.mxu1 %v10161_v7 }
   0x2   :  { %v184_v3 = vpack.c.bf16 %v91_v1, %v89_v0  ;;  %v90_v4 = vld [vmem:[%s10138_s5 + $0x10] sm:$0xff]  ;;  %v93_v5 = vld [vmem:[%s10138_s5 + $0x28] sm:$0xff]  ;;  %v95_v6 = vld [vmem:[%s10138_s5 + $0x38] sm:$0xff] }
   0x3   :  { %v183_v8 = vpack.c.bf16 %v90_v4, %v88_v2  ;;  %v186_v9 = vpack.c.bf16 %v95_v6, %v93_v5  ;;  %v92_v10 = vld [vmem:[%s10138_s5 + $0x20] sm:$0xff]  ;;  %v94_v11 = vld [vmem:[%s10138_s5 + $0x30] sm:$0xff]  ;;  %v97_v12 = vld [vmem:[%s10138_s5 + $0x48] sm:$0xff] }
   0x4   :  { %198 = vmatprep.subr.bf16.mxu0 %v184_v3  ;;  %v99_v13 = vld [vmem:[%s10138_s5 + $0x58] sm:$0xff]  ;;  %v185_v14 = vpack.c.bf16 %v94_v11, %v92_v10  ;;  %v96_v16 = vld [vmem:[%s10138_s5 + $0x40] sm:$0xff]  ;;  %v98_v17 = vld [vmem:[%s10138_s5 + $0x50] sm:$0xff] }
   0x5   :  { %199 = vmatpush1.bf16.msra.mxu0 %v183_v8  ;;  %v188_v15 = vpack.c.bf16 %v99_v13, %v97_v12  ;;  %v101_v18 = vld [vmem:[%s10138_s5 + $0x68] sm:$0xff]  ;;  %v103_v19 = vld [vmem:[%s10138_s5 + $0x78] sm:$0xff]  ;;  %v104_v20 = vld [vmem:[%s10139_s6] sm:$0xff]  ;;  %v187_v24 = vpack.c.bf16 %v98_v17, %v96_v16 }
   0x6   :  { %200 = vmatprep.subr.bf16.mxu0 %v186_v9  ;;  %v105_v21 = vld [vmem:[%s10139_s6 + $0x8] sm:$0xff]  ;;  %v106_v22 = vld [vmem:[%s10139_s6 + $0x10] sm:$0xff]  ;;  %v107_v23 = vld [vmem:[%s10139_s6 + $0x18] sm:$0xff]  ;;  %v190_v26 = vpack.c.bf16 %v103_v19, %v101_v18 }
   0x7   :  { %v255_v25 = vpack.c.bf16 %v105_v21, %v104_v20  ;;  %v100_v27 = vld [vmem:[%s10138_s5 + $0x60] sm:$0xff]  ;;  %v102_v28 = vld [vmem:[%s10138_s5 + $0x70] sm:$0xff]  ;;  %v256_v29 = vpack.c.bf16 %v107_v23, %v106_v22  ;;  %v109_v31 = vld [vmem:[%s10139_s6 + $0x28] sm:$0xff] }
   0x8   :  { %v108_v30 = vld [vmem:[%s10139_s6 + $0x20] sm:$0xff]  ;;  %v189_v32 = vpack.c.bf16 %v102_v28, %v100_v27  ;;  %v53_v34 = vld [vmem:[%s10133_s0 + $0x8] sm:$0xff] }
   0x9   :  { %201 = vmatpush1.bf16.msra.mxu0 %v185_v14  ;;  %274 = vmatpush1.bf16.msra.mxu1 %v255_v25  ;;  %v52_v33 = vld [vmem:[%s10133_s0] sm:$0xff] }
   0xa   :  { %202 = vmatprep.subr.bf16.mxu0 %v188_v15  ;;  %275 = vmatprep.subr.bf16.mxu1 %v10161_v7 }
   0xd   :  { %203 = vmatpush1.bf16.msra.mxu0 %v187_v24 }
   0xe   :  { %204 = vmatprep.subr.bf16.mxu0 %v190_v26 }
   0xf   :  { %20 = vsyncpa [#allocation3], 0  ;;  %276 = vmatpush1.bf16.msra.mxu1 %v256_v29  ;;  %v257_v35 = vpack.c.bf16 %v109_v31, %v108_v30  ;;  %v181_v36 = vpack.c.bf16 %v53_v34, %v52_v33  ;;  %v110_v37 = vld [vmem:[%s10139_s6 + $0x30] sm:$0xff]  ;;  %v111_v38 = vld [vmem:[%s10139_s6 + $0x38] sm:$0xff]  ;;  %vm10159_vm0 = vcmask 523264   ;;  %v7189_v3 = vmov 1.0  }
  0x10   :  { %277 = vmatprep.subr.bf16.mxu1 %v10161_v7  ;;  %v258_v39 = vpack.c.bf16 %v111_v38, %v110_v37  ;;  %v112_v40 = vld [vmem:[%s10139_s6 + $0x40] sm:$0xff]  ;;  %v113_v41 = vld [vmem:[%s10139_s6 + $0x48] sm:$0xff]  ;;  %v54_v42 = vld [vmem:[%s10133_s0 + $0x10] sm:$0xff]  ;;  %137 = vxpose.xlu1.b32.start [1/4] (short) (narrow) %v7189_v3, 8  ;;  %v10153_v17 = vmov 1   ;;  %s7191_s29 = smov 124  }
  0x11   :  { %205 = vmatpush1.bf16.msra.mxu0 %v189_v32  ;;  %v55_v43 = vld [vmem:[%s10133_s0 + $0x18] sm:$0xff]  ;;  %v259_v44 = vpack.c.bf16 %v113_v41, %v112_v40  ;;  %v114_v46 = vld [vmem:[%s10139_s6 + $0x50] sm:$0xff]  ;;  %v116_v49 = vld [vmem:[%s10139_s6 + $0x60] sm:$0xff]  ;;  %6771 = vset.pattern.permute.xlu0 %v10153_v17  ;;  %s7192_s30 = smov 125   ;;  %s7193_s16 = smov 123   ;;  %v10149_v26 = vmov 2  }
  0x12   :  { %v182_v45 = vpack.c.bf16 %v55_v43, %v54_v42  ;;  %v115_v47 = vld [vmem:[%s10139_s6 + $0x58] sm:$0xff]  ;;  %v117_v50 = vld [vmem:[%s10139_s6 + $0x68] sm:$0xff]  ;;  %v118_v52 = vld [vmem:[%s10139_s6 + $0x70] sm:$0xff]  ;;  %vm414_vm5 = vcmask 261120   ;;  %s7196_s24 = smov 64   ;;  %s7200_s20 = smov [#allocation2]  }
  0x13   :  { %278 = vmatpush1.bf16.msra.mxu1 %v257_v35  ;;  %v260_v48 = vpack.c.bf16 %v115_v47, %v114_v46  ;;  %v261_v51 = vpack.c.bf16 %v117_v50, %v116_v49  ;;  %v119_v53 = vld [vmem:[%s10139_s6 + $0x78] sm:$0xff]  ;;  %v120_v55 = vld [vmem:[%s10139_s6 + $0x80] sm:$0xff]  ;;  %v121_v56 = vld [vmem:[%s10139_s6 + $0x88] sm:$0xff]  ;;  %v69_v49 = vlaneseq  ;;  %s5996_s21 = sshll.u32 %s7200_s20, 4  ;;  %s5997_s21 = int_to_ptr.vmem [resolvable:$true] %s5996_s21 }
  0x14   :  { %6008 = vmatmul.mubr.msk.bf16.vlgmr.msra.gmra.mrb[0].mxu0 %vm10159_vm0, %v181_v36  ;;  %279 = vmatprep.subr.bf16.mxu1 %v10161_v7  ;;  %v262_v54 = vpack.c.bf16 %v119_v53, %v118_v52  ;;  %v263_v57 = vpack.c.bf16 %v121_v56, %v120_v55  ;;  %v122_v58 = vld [vmem:[%s10139_s6 + $0x90] sm:$0xff]  ;;  %v123_v59 = vld [vmem:[%s10139_s6 + $0x98] sm:$0xff]  ;;  %v124_v61 = vld [vmem:[%s10139_s6 + $0xa0] sm:$0xff]  ;;  %s7164_s0 = scalar_lea.vmem %s5997_s21, 32  ;;  %p7169_p1 = scmp.lt.s32.totalorder %s5997_s21, %s5997_s21 }
  0x15   :  { %240 = vmatprep.mubr.bf16.mxu0 %v10161_v7  ;;  %v264_v60 = vpack.c.bf16 %v123_v59, %v122_v58  ;;  %v125_v62 = vld [vmem:[%s10139_s6 + $0xa8] sm:$0xff]  ;;  %v126_v0 = vld [vmem:[%s10139_s6 + $0xb0] sm:$0xff]  ;;  %v127_v1 = vld [vmem:[%s10139_s6 + $0xb8] sm:$0xff]  ;;  %138 = vxpose.xlu1.b32.cont [2/4] (short) (narrow) %v7189_v3, 8  ;;  %v7480_v50 = vshrl.u32 %v69_v49, 7  ;;  %v7485_v53 = vand.u32 127, %v69_v49  ;;  %p7165_p0 = scmp.ne.s32.totalorder %s5997_s21, %s7164_s0  ;;  %p7170_p2 = scmp.lt.s32.totalorder %s7164_s0, %s7164_s0 }
  0x16   :  { %v265_v63 = vpack.c.bf16 %v125_v62, %v124_v61  ;;  %v266_v2 = vpack.c.bf16 %v127_v1, %v126_v0  ;;  %v56_v58 = vld [vmem:[%s10134_s1] sm:$0xff]  ;;  %v57_v59 = vld [vmem:[%s10134_s1 + $0x8] sm:$0xff]  ;;  %v58_v61 = vld [vmem:[%s10134_s1 + $0x10] sm:$0xff]  ;;  %v10155_v1 = vmov 0.0  }
  0x17   :  { %280 = vmatpush1.bf16.msra.mxu1 %v258_v39  ;;  %v7494_v56 = vadd.s32 16, %v7480_v50  ;;  %vm76_vm1 = vcmp.eq.s32.totalorder %v7480_v50, %v7485_v53  ;;  %v59_v62 = vld [vmem:[%s10134_s1 + $0x18] sm:$0xff]  ;;  %p7171_p3 = por %p7170_p2, %p7169_p1 }
  0x18   :  { %281 = vmatprep.subr.bf16.mxu1 %v10161_v7 }
  0x19   :  { %139 = vxpose.xlu1.b32.cont [3/4] (short) (narrow) %v7189_v3, 8  ;;  %vm78_vm3 = vcmp.eq.s32.totalorder %v7494_v56, %v7485_v53  ;;  %p7172_p4 = pnand %p7171_p3, %p7165_p0 }
  0x1b   :  { %282 = vmatpush1.bf16.msra.mxu1 %v259_v44 }
  0x1c   :  { %6009 = vmatmul.mubr.msk.bf16.gmra.mrb[4].mxu0 %vm10159_vm0, %v182_v45  ;;  %283 = vmatprep.subr.bf16.mxu1 %v10161_v7 }
  0x1d   :  { %140 = vxpose.xlu1.b32.end [4/4] (short) (narrow) %v7189_v3, 8 }
  0x1f   :  { %284 = vmatpush1.bf16.msra.mxu1 %v260_v48 }
  0x20   :  { %285 = vmatprep.subr.bf16.mxu1 %v10161_v7 }
  0x23   :  { %286 = vmatpush1.bf16.msra.mxu1 %v261_v51  ;;  %v7483_v51 = vsub.s32 0, %v7480_v50 }
  0x24   :  { %287 = vmatprep.subr.bf16.mxu1 %v10161_v7 }
  0x27   :  { %288 = vmatpush1.bf16.msra.mxu1 %v262_v54  ;;  %v7488_v54 = vadd.s32 8, %v7480_v50 }
  0x28   :  { %289 = vmatprep.subr.bf16.mxu1 %v10161_v7 }
  0x29   :  { %vm77_vm2 = vcmp.eq.s32.totalorder %v7488_v54, %v7485_v53 }
  0x2a   :  { %v7527_v3 = vsel %vm77_vm2, 1.0, %v10155_v1 }
  0x2b   :  { %290 = vmatpush1.bf16.msra.mxu1 %v263_v57  ;;  %v7497_v57 = vadd.s32 24, %v7480_v50 }
  0x2c   :  { %291 = vmatprep.subr.bf16.mxu1 %v10161_v7 }
  0x2d   :  { %vm79_vm4 = vcmp.eq.s32.totalorder %v7497_v57, %v7485_v53 }
  0x2f   :  { %292 = vmatpush1.bf16.msra.mxu1 %v264_v60 }
  0x30   :  { %293 = vmatprep.subr.bf16.mxu1 %v10161_v7 }
  0x33   :  { %294 = vmatpush1.bf16.msra.mxu1 %v265_v63 }
  0x34   :  { %295 = vmatprep.subr.bf16.mxu1 %v10161_v7 }
  0x37   :  { %296 = vmatpush1.bf16.msra.mxu1 %v266_v2  ;;  %v7524_v2 = vsel %vm76_vm1, 1.0, %v10155_v1 }
  0x3b   :  { %6772 = vset.pattern.permute.xlu1 %v10161_v7 }
  0x91   :  { %v153_v29 = vpop.trf.xlu1 }
  0x92   :  { %v7491_v55 = vrot.slane %v153_v29, %v7483_v51 }
  0x94   :  { %v173_v63 = vmul.f32 %v7491_v55, %v56_v58  ;;  %v174_v0 = vmul.f32 %v7491_v55, %v57_v59 }
  0xe7   :  { %v232_v4 = vpop.f32.mrb[0].mxu0 }
  0xe8   :  { %v234_v5 = vpop.f32.mrb[1].mxu0 }
  0xe9   :  { %v236_v6 = vpop.f32.mrb[2].mxu0 }
  0xea   :  { %v7430_v8 = vpack.c.bf16 %v236_v6, %v232_v4  ;;  %v238_v9 = vpop.f32.mrb[3].mxu0  ;;  %v176_v6 = vmul.f32 %v7491_v55, %v59_v62 }
  0xeb   :  { %v7432_v10 = vpack.c.bf16 %v238_v9, %v234_v5  ;;  %v175_v5 = vmul.f32 %v7491_v55, %v58_v61 }
  0xed   :  { %6010 = vmatprep.mubr.msk.bf16.mxu1 %vm10159_vm0, %v7432_v10 }
  0xee   :  { %306 = vmatmul.mubr.bf16.vlgmr.msra.gmra.mrb[0].mxu1 %v7430_v8 }
  0xef   :  { %v242_v11 = vpop.f32.mrb[4].mxu0 }
  0xf0   :  { %v244_v12 = vpop.f32.mrb[5].mxu0 }
  0xf1   :  { %v246_v13 = vpop.f32.mrb[6].mxu0 }
  0xf2   :  { %v7437_v14 = vpack.c.bf16 %v246_v13, %v242_v11  ;;  %v248_v15 = vpop.f32.mrb[7].mxu0  ;;  %v7533_v11 = vsel %vm78_vm3, 1.0, %v10155_v1  ;;  %v7539_v13 = vadd.f32 %v7524_v2, %v173_v63 }
  0xf3   :  { %v7439_v16 = vpack.c.bf16 %v248_v15, %v244_v12  ;;  %v7536_v12 = vsel %vm79_vm4, 1.0, %v10155_v1  ;;  %v7542_v15 = vadd.f32 %v7527_v3, %v174_v0 }
  0xf4   :  { %vm406_vm10 = vcmp.gt.f32.partialorder %v7539_v13, 0.0 }
  0xf5   :  { %6011 = vmatprep.mubr.msk.bf16.mxu1 %vm10159_vm0, %v7439_v16  ;;  %vm407_vm11 = vcmp.gt.f32.partialorder %v7542_v15, 0.0 }
  0xf6   :  { %314 = vmatmul.mubr.bf16.gmra.mrb[4].mxu1 %v7437_v14 }
 0x1c1   :  { %v307_v18 = vpop.f32.mrb[0].mxu1 }
 0x1c2   :  { %371 = vperm.xlu1 %6772, %v307_v18   ;;  %469 = vrot.lane.b32.xlu0 %v307_v18, %s7191_s29  ;;  %v309_v19 = vpop.f32.mrb[1].mxu1 }
 0x1c3   :  { %v310_v20 = vpop.f32.mrb[2].mxu1 }
 0x1c4   :  { %v312_v21 = vpop.f32.mrb[3].mxu1 }
 0x1c6   :  { %326 = vrot.lane.b32.xlu0 %v307_v18, %s7192_s30  ;;  %328 = vrot.lane.b32.xlu1 %v310_v20, %s7192_s30 }
 0x1c7   :  { %6774 = vset.pattern.permute.xlu1 %v10153_v17 }
 0x1c9   :  { %v315_v22 = vpop.f32.mrb[4].mxu1 }
 0x1ca   :  { %725 = vrot.lane.b32.xlu0 %v307_v18, %s7193_s16  ;;  %727 = vrot.lane.b32.xlu1 %v310_v20, %s7193_s16  ;;  %v317_v23 = vpop.f32.mrb[5].mxu1 }
 0x1cb   :  { %v318_v24 = vpop.f32.mrb[6].mxu1  ;;  %v7548_v23 = vadd.f32 %v7536_v12, %v176_v6 }
 0x1cc   :  { %v320_v25 = vpop.f32.mrb[7].mxu1 }
 0x1cd   :  { %vm409_vm13 = vcmp.gt.f32.partialorder %v7548_v23, 0.0 }
 0x1ce   :  { %514 = vperm.xlu0 %6771, %v307_v18   ;;  %518 = vperm.xlu1 %6774, %v310_v20  }
 0x1d2   :  { %6773 = vset.pattern.permute.xlu0 %v10149_v26  ;;  %6776 = vset.pattern.permute.xlu1 %v10149_v26 }
 0x1d3   :  { %770 = vperm.xlu0 %6773, %v307_v18   ;;  %774 = vperm.xlu1 %6776, %v310_v20  }
 0x1d7   :  { %471 = vrot.lane.b32.xlu0 %v310_v20, %s7191_s29  ;;  %473 = vrot.lane.b32.xlu1 %v315_v22, %s7191_s29 }
 0x1d8   :  { %6775 = vset.pattern.permute.xlu0 %v10161_v7  ;;  %6777 = vset.pattern.permute.xlu1 %v10153_v17 }
 0x1db   :  { %375 = vperm.xlu0 %6775, %v310_v20   ;;  %522 = vperm.xlu1 %6777, %v315_v22  }
 0x1df   :  { %330 = vrot.lane.b32.xlu0 %v315_v22, %s7192_s30  ;;  %6778 = vset.pattern.permute.xlu1 %v10161_v7 }
 0x1e0   :  { %379 = vperm.xlu1 %6778, %v315_v22   ;;  %6780 = vset.pattern.permute.xlu0 %v10153_v17 }
 0x1e3   :  { %729 = vrot.lane.b32.xlu0 %v315_v22, %s7193_s16 }
 0x1e4   :  { %6779 = vset.pattern.permute.xlu1 %v10149_v26 }
 0x1e5   :  { %778 = vperm.xlu1 %6779, %v315_v22   ;;  %v7545_v22 = vadd.f32 %v7533_v11, %v175_v5 }
 0x1e7   :  { %526 = vperm.xlu0 %6780, %v318_v24   ;;  %vm408_vm12 = vcmp.gt.f32.partialorder %v7545_v22, 0.0 }
 0x1e9   :  { %475 = vrot.lane.b32.xlu1 %v318_v24, %s7191_s29 }
 0x1ea   :  { %6781 = vset.pattern.permute.xlu1 %v10161_v7 }
 0x1eb   :  { %6782 = vset.pattern.permute.xlu0 %v10149_v26 }
 0x1ec   :  { %782 = vperm.xlu0 %6782, %v318_v24  }
 0x1ed   :  { %332 = vrot.lane.b32.xlu1 %v318_v24, %s7192_s30 }
 0x1f1   :  { %731 = vrot.lane.b32.xlu1 %v318_v24, %s7193_s16 }
 0x1f5   :  { %383 = vperm.xlu1 %6781, %v318_v24  }
 0x234   :  { %v470_v27 = vpop.permute.xlu0 %469 }
 0x235   :  { %481 = vxpose.xlu0.b32.start [1/4] (short) (narrow) %v470_v27, 8 }
 0x238   :  { %v327_v28 = vpop.permute.xlu0 %326 }
 0x23c   :  { %v726_v30 = vpop.permute.xlu0 %725 }
 0x23d   :  { %737 = vxpose.xlu1.b32.start [1/4] (short) (narrow) %v726_v30, 8 }
 0x241   :  { %v7467_v31 = vpop.permute.xlu1 %371 }
 0x245   :  { %v329_v32 = vpop.permute.xlu1 %328 }
 0x249   :  { %v728_v33 = vpop.permute.xlu1 %727 }
 0x24a   :  { %738 = vxpose.xlu1.b32.cont [2/4] (short) (narrow) %v728_v33, 8 }
 0x24d   :  { %v515_v34 = vpop.permute.xlu0 %514  ;;  %v519_v35 = vpop.permute.xlu1 %518 }
 0x252   :  { %v7469_v36 = vpop.permute.xlu0 %770  ;;  %v7471_v37 = vpop.permute.xlu1 %774 }
 0x256   :  { %v472_v38 = vpop.permute.xlu0 %471  ;;  %v474_v39 = vpop.permute.xlu1 %473 }
 0x257   :  { %482 = vxpose.xlu0.b32.cont [2/4] (short) (narrow) %v472_v38, 8 }
 0x25a   :  { %v7473_v40 = vpop.permute.xlu0 %375  ;;  %v523_v41 = vpop.permute.xlu1 %522 }
 0x25b   :  { %483 = vxpose.xlu0.b32.cont [3/4] (short) (narrow) %v474_v39, 8 }
 0x25e   :  { %v331_v42 = vpop.permute.xlu0 %330 }
 0x25f   :  { %v7475_v43 = vpop.permute.xlu1 %379 }
 0x262   :  { %v730_v44 = vpop.permute.xlu0 %729 }
 0x263   :  { %739 = vxpose.xlu1.b32.cont [3/4] (short) (narrow) %v730_v44, 8 }
 0x264   :  { %v7477_v45 = vpop.permute.xlu1 %778 }
 0x266   :  { %v527_v52 = vpop.permute.xlu0 %526 }
 0x268   :  { %v476_v46 = vpop.permute.xlu1 %475 }
 0x269   :  { %484 = vxpose.xlu0.b32.end [4/4] (short) (narrow) %v476_v46, 8 }
 0x26b   :  { %v7505_v60 = vpop.permute.xlu0 %782 }
 0x26c   :  { %v333_v47 = vpop.permute.xlu1 %332 }
 0x26d   :  { %338 = vxpose.xlu0.b32.start [1/4] (short) (narrow) %v327_v28, 8 }
 0x270   :  { %v732_v48 = vpop.permute.xlu1 %731 }
 0x271   :  { %339 = vxpose.xlu0.b32.cont [2/4] (short) (narrow) %v329_v32, 8  ;;  %740 = vxpose.xlu1.b32.end [4/4] (short) (narrow) %v732_v48, 8 }
 0x274   :  { %v384_v24 = vpop.permute.xlu1 %383 }
 0x275   :  { %340 = vxpose.xlu0.b32.cont [3/4] (short) (narrow) %v331_v42, 8 }
 0x279   :  { %341 = vxpose.xlu0.b32.end [4/4] (short) (narrow) %v333_v47, 8 }
 0x2a2   :  { %6783 = vset.pattern.permute.xlu0 %v10161_v7 }
 0x2dd   :  { %v497_v4 = vpop.trf.xlu0 }
 0x2de   :  { %v532_v9 = vrot.slane %v497_v4, %v7483_v51 }
 0x2e0   :  { %v533_v18 = vadd.f32 %v532_v9, %v515_v34  ;;  %v534_v19 = vadd.f32 %v532_v9, %v519_v35  ;;  %v535_v20 = vadd.f32 %v532_v9, %v523_v41  ;;  %v536_v21 = vadd.f32 %v532_v9, %v527_v52 }
 0x2e2   :  { %vm537_vm6 = vcmp.ge.f32.partialorder %v533_v18, 0.0  ;;  %v541_v25 = vmul.f32 0.2, %v533_v18  ;;  %vm538_vm7 = vcmp.ge.f32.partialorder %v534_v19, 0.0  ;;  %v542_v27 = vmul.f32 0.2, %v534_v19 }
 0x2e3   :  { %vm539_vm8 = vcmp.ge.f32.partialorder %v535_v20, 0.0  ;;  %v543_v28 = vmul.f32 0.2, %v535_v20  ;;  %vm540_vm9 = vcmp.ge.f32.partialorder %v536_v21, 0.0  ;;  %v544_v29 = vmul.f32 0.2, %v536_v21 }
 0x2e4   :  { %v545_v30 = vsel %vm537_vm6, %v533_v18, %v541_v25  ;;  %v546_v32 = vsel %vm538_vm7, %v534_v19, %v542_v27 }
 0x2e5   :  { %v7554_v33 = vsel %vm406_vm10, %v545_v30, -1e+30  ;;  %v7558_v34 = vsel %vm407_vm11, %v546_v32, -1e+30  ;;  %v547_v35 = vsel %vm539_vm8, %v535_v20, %v543_v28  ;;  %v548_v38 = vsel %vm540_vm9, %v536_v21, %v544_v29  ;;  %v753_v39 = vpop.trf.xlu1 }
 0x2e6   :  { %v553_v41 = vsel %vm414_vm5, %v7554_v33, -inf  ;;  %v556_v42 = vsel %vm414_vm5, %v7558_v34, -inf  ;;  %v7568_v44 = vsel %vm408_vm12, %v547_v35, -1e+30  ;;  %v7572_v46 = vsel %vm409_vm13, %v548_v38, -1e+30 }
 0x2e7   :  { %554 = vmax.xlane.f32.xlu0 %v553_v41  ;;  %557 = vmax.xlane.f32.xlu1 %v556_v42  ;;  %v788_v47 = vrot.slane %v753_v39, %v7483_v51  ;;  %v559_v48 = vsel %vm414_vm5, %v7568_v44, -inf  ;;  %v562_v49 = vsel %vm414_vm5, %v7572_v46, -inf }
 0x2e9   :  { %v790_v58 = vadd.f32 %v788_v47, %v7471_v37  ;;  %v789_v61 = vadd.f32 %v788_v47, %v7469_v36  ;;  %v792_v6 = vadd.f32 %v788_v47, %v7505_v60  ;;  %v791_v9 = vadd.f32 %v788_v47, %v7477_v45 }
 0x2eb   :  { %560 = vmax.xlane.f32.xlu0 %v559_v48  ;;  %563 = vmax.xlane.f32.xlu1 %v562_v49  ;;  %vm794_vm14 = vcmp.ge.f32.partialorder %v790_v58, 0.0  ;;  %v798_v5 = vmul.f32 0.2, %v790_v58  ;;  %vm793_vm4 = vcmp.ge.f32.partialorder %v789_v61, 0.0  ;;  %v800_v32 = vmul.f32 0.2, %v792_v6 }
 0x2ec   :  { %v799_v35 = vmul.f32 0.2, %v791_v9  ;;  %vm796_vm6 = vcmp.ge.f32.partialorder %v792_v6, 0.0  ;;  %vm795_vm7 = vcmp.ge.f32.partialorder %v791_v9, 0.0 }
 0x2ed   :  { %v354_v52 = vpop.trf.xlu0  ;;  %v802_v29 = vsel %vm794_vm14, %v790_v58, %v798_v5  ;;  %v804_v47 = vsel %vm796_vm6, %v792_v6, %v800_v32 }
 0x2ee   :  { %v389_v59 = vrot.slane %v354_v52, %v7483_v51  ;;  %v7608_v41 = vsel %vm407_vm11, %v802_v29, -1e+30  ;;  %v803_v48 = vsel %vm795_vm7, %v791_v9, %v799_v35  ;;  %v7620_v58 = vsel %vm409_vm13, %v804_v47, -1e+30 }
 0x2ef   :  { %v812_v49 = vsel %vm414_vm5, %v7608_v41, -inf  ;;  %vm10160_vm7 = vcmp.lt.s32.totalorder %v7485_v53, %v7494_v56 }
 0x2f0   :  { %v390_v62 = vadd.f32 %v389_v59, %v7467_v31  ;;  %v391_v63 = vadd.f32 %v389_v59, %v7473_v40  ;;  %v392_v0 = vadd.f32 %v389_v59, %v7475_v43  ;;  %v393_v4 = vadd.f32 %v389_v59, %v384_v24 }
 0x2f1   :  { %v797_v40 = vmul.f32 0.2, %v789_v61  ;;  %v7624_v59 = vsel %vm408_vm12, %v803_v48, -1e+30 }
 0x2f2   :  { %vm394_vm15 = vcmp.ge.f32.partialorder %v390_v62, 0.0  ;;  %v398_v18 = vmul.f32 0.2, %v390_v62  ;;  %vm395_vm1 = vcmp.ge.f32.partialorder %v391_v63, 0.0  ;;  %v399_v37 = vmul.f32 0.2, %v391_v63 }
 0x2f3   :  { %vm396_vm2 = vcmp.ge.f32.partialorder %v392_v0, 0.0  ;;  %v400_v19 = vmul.f32 0.2, %v392_v0  ;;  %vm397_vm3 = vcmp.ge.f32.partialorder %v393_v4, 0.0  ;;  %v401_v36 = vmul.f32 0.2, %v393_v4 }
 0x2f4   :  { %v402_v31 = vsel %vm394_vm15, %v390_v62, %v398_v18  ;;  %v403_v20 = vsel %vm395_vm1, %v391_v63, %v399_v37  ;;  %v801_v30 = vsel %vm793_vm4, %v789_v61, %v797_v40  ;;  %v818_v61 = vsel %vm414_vm5, %v7620_v58, -inf }
 0x2f5   :  { %v410_v43 = vsel %vm406_vm10, %v402_v31, -1e+30  ;;  %v411_v60 = vsel %vm407_vm11, %v403_v20, -1e+30  ;;  %v404_v21 = vsel %vm396_vm2, %v392_v0, %v400_v19  ;;  %v405_v45 = vsel %vm397_vm3, %v393_v4, %v401_v36 }
 0x2f6   :  { %v415_v24 = vsel %vm414_vm5, %v410_v43, -inf  ;;  %v418_v25 = vsel %vm414_vm5, %v411_v60, -inf  ;;  %v7595_v27 = vsel %vm408_vm12, %v404_v21, -1e+30  ;;  %v7599_v28 = vsel %vm409_vm13, %v405_v45, -1e+30 }
 0x2f7   :  { %416 = vmax.xlane.f32.xlu0 %v415_v24  ;;  %419 = vmax.xlane.f32.xlu1 %v418_v25  ;;  %v421_v38 = vsel %vm414_vm5, %v7595_v27, -inf  ;;  %v424_v39 = vsel %vm414_vm5, %v7599_v28, -inf  ;;  %v7612_v42 = vsel %vm406_vm10, %v801_v30, -1e+30  ;;  %v815_v62 = vsel %vm414_vm5, %v7624_v59, -inf }
 0x2f8   :  { %v809_v52 = vsel %vm414_vm5, %v7612_v42, -inf  ;;  %vm10182_vm12 = vcmp.lt.s32.totalorder %v7485_v53, %v7488_v54  ;;  %vm1205_vm1 = vcmp.lt.s32.totalorder %v7485_v53, %v7480_v50  ;;  %v7162_v50 = vld [vmem:[%s10135_s2 + $0x18] sm:$0xff] }
 0x2fb   :  { %422 = vmax.xlane.f32.xlu0 %v421_v38  ;;  %425 = vmax.xlane.f32.xlu1 %v424_v39 }
 0x2ff   :  { %813 = vmax.xlane.f32.xlu1 %v812_v49  ;;  %810 = vmax.xlane.f32.xlu0 %v809_v52 }
 0x303   :  { %819 = vmax.xlane.f32.xlu1 %v818_v61  ;;  %816 = vmax.xlane.f32.xlu0 %v815_v62 }
 0x374   :  { %v555_v63 = vpop.xlane.xlu0 %554  ;;  %v558_v0 = vpop.xlane.xlu1 %557 }
 0x375   :  { %v565_v4 = vsub.f32 %v7554_v33, %v555_v63  ;;  %v566_v5 = vsub.f32 %v7558_v34, %v558_v0 }
 0x377   :  { %v569_v6 = vmul.f32 1.442695, %v565_v4  ;;  %v571_v9 = vmul.f32 1.442695, %v566_v5 }
 0x378   :  { %v561_v18 = vpop.xlane.xlu0 %560  ;;  %v564_v37 = vpop.xlane.xlu1 %563 }
 0x379   :  { %6833 = vpow2.f32 %v569_v6  ;;  %v567_v19 = vsub.f32 %v7568_v44, %v561_v18  ;;  %v568_v36 = vsub.f32 %v7572_v46, %v564_v37 }
 0x37a   :  { %6835 = vpow2.f32 %v571_v9 }
 0x37b   :  { %v573_v31 = vmul.f32 1.442695, %v567_v19  ;;  %v575_v20 = vmul.f32 1.442695, %v568_v36 }
 0x37d   :  { %6837 = vpow2.f32 %v573_v31 }
 0x37e   :  { %6839 = vpow2.f32 %v575_v20 }
 0x383   :  { %v6834_v40 = vpop.eup %6833 }
 0x384   :  { %v6836_v21 = vpop.eup %6835  ;;  %v417_v45 = vpop.xlane.xlu0 %416  ;;  %v7635_v34 = vmul.f32 %v6834_v40, %v7539_v13 }
 0x385   :  { %v420_v33 = vpop.xlane.xlu1 %419  ;;  %v427_v24 = vsub.f32 %v410_v43, %v417_v45  ;;  %v7638_v29 = vmul.f32 %v6836_v21, %v7542_v15 }
 0x386   :  { %v428_v25 = vsub.f32 %v411_v60, %v420_v33  ;;  %v581_v44 = vsel %vm414_vm5, %v7635_v34, 0.0 }
 0x387   :  { %v6838_v46 = vpop.eup %6837  ;;  %v431_v30 = vmul.f32 1.442695, %v427_v24  ;;  %582 = vadd.xlane.f32.xlu0 %v581_v44  ;;  %v584_v35 = vsel %vm414_vm5, %v7638_v29, 0.0 }
 0x388   :  { %v433_v32 = vmul.f32 1.442695, %v428_v25  ;;  %v6840_v38 = vpop.eup %6839  ;;  %585 = vadd.xlane.f32.xlu1 %v584_v35  ;;  %v423_v39 = vpop.xlane.xlu0 %422  ;;  %v7645_v43 = vmul.f32 %v6838_v46, %v7545_v22 }
 0x389   :  { %v426_v47 = vpop.xlane.xlu1 %425  ;;  %6841 = vpow2.f32 %v431_v30  ;;  %v429_v60 = vsub.f32 %v7595_v27, %v423_v39  ;;  %v7650_v49 = vmul.f32 %v6840_v38, %v7548_v23 }
 0x38a   :  { %v430_v48 = vsub.f32 %v7599_v28, %v426_v47  ;;  %6843 = vpow2.f32 %v433_v32  ;;  %v587_v52 = vsel %vm414_vm5, %v7645_v43, 0.0 }
 0x38b   :  { %v435_v61 = vmul.f32 1.442695, %v429_v60  ;;  %588 = vadd.xlane.f32.xlu0 %v587_v52  ;;  %v590_v63 = vsel %vm414_vm5, %v7650_v49, 0.0 }
 0x38c   :  { %v437_v62 = vmul.f32 1.442695, %v430_v48  ;;  %591 = vadd.xlane.f32.xlu1 %v590_v63  ;;  %v811_v0 = vpop.xlane.xlu0 %810 }
 0x38d   :  { %v814_v4 = vpop.xlane.xlu1 %813  ;;  %6845 = vpow2.f32 %v435_v61  ;;  %v821_v27 = vsub.f32 %v7612_v42, %v811_v0  ;;  %v7714_v61 = vld [vmem:[%s10135_s2 + $0x8] sm:$0xff]  ;;  %v7722_v0 = vld [vmem:[%s10135_s2 + $0x10] sm:$0xff] }
 0x38e   :  { %v822_v28 = vsub.f32 %v7608_v41, %v814_v4  ;;  %6847 = vpow2.f32 %v437_v62  ;;  %v1242_v63 = vmul.f32 %v7491_v55, %v7714_v61 }
 0x38f   :  { %v825_v5 = vmul.f32 1.442695, %v821_v27  ;;  %v1243_v27 = vmul.f32 %v7491_v55, %v7722_v0 }
 0x390   :  { %v827_v6 = vmul.f32 1.442695, %v822_v28  ;;  %v817_v9 = vpop.xlane.xlu0 %816  ;;  %v1248_v4 = vsel %vm414_vm5, %v1242_v63, 0.0 }
 0x391   :  { %v820_v18 = vpop.xlane.xlu1 %819  ;;  %6849 = vpow2.f32 %v825_v5  ;;  %v823_v37 = vsub.f32 %v7624_v59, %v817_v9  ;;  %v1251_v28 = vsel %vm414_vm5, %v1243_v27, 0.0 }
 0x392   :  { %6851 = vpow2.f32 %v827_v6  ;;  %v824_v19 = vsub.f32 %v7620_v58, %v820_v18 }
 0x393   :  { %v6842_v36 = vpop.eup %6841  ;;  %v829_v31 = vmul.f32 1.442695, %v823_v37 }
 0x394   :  { %v6844_v20 = vpop.eup %6843  ;;  %v7661_v40 = vmul.f32 %v6842_v36, %v7539_v13  ;;  %v831_v41 = vmul.f32 1.442695, %v824_v19 }
 0x395   :  { %v7664_v42 = vmul.f32 %v6844_v20, %v7542_v15  ;;  %6853 = vpow2.f32 %v829_v31 }
 0x396   :  { %v443_v21 = vsel %vm414_vm5, %v7661_v40, 0.0  ;;  %6855 = vpow2.f32 %v831_v41 }
 0x397   :  { %v6846_v45 = vpop.eup %6845  ;;  %444 = vadd.xlane.f32.xlu0 %v443_v21  ;;  %v446_v59 = vsel %vm414_vm5, %v7664_v42, 0.0 }
 0x398   :  { %v6848_v58 = vpop.eup %6847  ;;  %447 = vadd.xlane.f32.xlu1 %v446_v59  ;;  %v7671_v33 = vmul.f32 %v6846_v45, %v7545_v22 }
 0x399   :  { %v7674_v24 = vmul.f32 %v6848_v58, %v7548_v23 }
 0x39a   :  { %v449_v25 = vsel %vm414_vm5, %v7671_v33, 0.0 }
 0x39b   :  { %v6850_v44 = vpop.eup %6849  ;;  %450 = vadd.xlane.f32.xlu0 %v449_v25  ;;  %v452_v46 = vsel %vm414_vm5, %v7674_v24, 0.0 }
 0x39c   :  { %v6852_v30 = vpop.eup %6851  ;;  %453 = vadd.xlane.f32.xlu1 %v452_v46  ;;  %v7681_v32 = vmul.f32 %v6850_v44, %v7539_v13 }
 0x39d   :  { %v7686_v38 = vmul.f32 %v6852_v30, %v7542_v15 }
 0x39e   :  { %v837_v35 = vsel %vm414_vm5, %v7681_v32, 0.0 }
 0x39f   :  { %v6854_v39 = vpop.eup %6853  ;;  %v840_v47 = vsel %vm414_vm5, %v7686_v38, 0.0 }
 0x3a0   :  { %838 = vadd.xlane.f32.xlu1 %v837_v35  ;;  %v7691_v60 = vmul.f32 %v6854_v39, %v7545_v22  ;;  %v6856_v48 = vpop.eup %6855  ;;  %v7707_v22 = vld [vmem:[%s10135_s2] sm:$0xff] }
 0x3a1   :  { %v7696_v52 = vmul.f32 %v6856_v48, %v7548_v23  ;;  %v1241_v23 = vmul.f32 %v7491_v55, %v7707_v22 }
 0x3a2   :  { %v843_v13 = vsel %vm414_vm5, %v7691_v60, 0.0 }
 0x3a3   :  { %v846_v15 = vsel %vm414_vm5, %v7696_v52, 0.0  ;;  %v1245_v62 = vsel %vm414_vm5, %v1241_v23, 0.0 }
 0x3a4   :  { %841 = vadd.xlane.f32.xlu1 %v840_v47 }
 0x3a8   :  { %844 = vadd.xlane.f32.xlu1 %v843_v13 }
 0x3ac   :  { %847 = vadd.xlane.f32.xlu1 %v846_v15 }
 0x3b1   :  { %609 = vrot.lane.b32.xlu0 %v7430_v8, %s7196_s24 }
 0x3bd   :  { %611 = vrot.lane.b32.xlu1 %v7437_v14, %s7196_s24 }
 0x3e1   :  { %1246 = vadd.xlane.f32.xlu1 %v1245_v62 }
 0x3e5   :  { %1249 = vadd.xlane.f32.xlu1 %v1248_v4 }
 0x3e9   :  { %1252 = vadd.xlane.f32.xlu1 %v1251_v28 }
 0x414   :  { %v583_v5 = vpop.xlane.xlu0 %582 }
 0x415   :  { %v593_v6 = vmax.f32 %v583_v5, 1e-16  ;;  %v586_v9 = vpop.xlane.xlu1 %585 }
 0x416   :  { %v594_v18 = vmax.f32 %v586_v9, 1e-16 }
 0x417   :  { %6857 = vrcp.f32 %v593_v6 }
 0x418   :  { %6859 = vrcp.f32 %v594_v18  ;;  %v589_v37 = vpop.xlane.xlu0 %588 }
 0x419   :  { %v592_v36 = vpop.xlane.xlu1 %591  ;;  %v595_v25 = vmax.f32 %v589_v37, 1e-16 }
 0x41a   :  { %v596_v46 = vmax.f32 %v592_v36, 1e-16 }
 0x41b   :  { %6861 = vrcp.f32 %v595_v25 }
 0x41c   :  { %6863 = vrcp.f32 %v596_v46  ;;  %v133_v46 = vld [vmem:[%s10141_s8 + $0x20] sm:$0xff] }
 0x421   :  { %v6858_v19 = vpop.eup %6857 }
 0x422   :  { %v6860_v31 = vpop.eup %6859  ;;  %v601_v20 = vmul.f32 %v6858_v19, %v7635_v34 }
 0x423   :  { %v602_v41 = vmul.f32 %v6860_v31, %v7638_v29 }
 0x424   :  { %v445_v21 = vpop.xlane.xlu0 %444 }
 0x425   :  { %v448_v45 = vpop.xlane.xlu1 %447  ;;  %v605_v59 = vpack.c.bf16 %v602_v41, %v601_v20  ;;  %v455_v30 = vmax.f32 %v445_v21, 1e-16  ;;  %v6862_v13 = vpop.eup %6861 }
 0x426   :  { %v456_v35 = vmax.f32 %v448_v45, 1e-16  ;;  %v6864_v23 = vpop.eup %6863  ;;  %v603_v5 = vmul.f32 %v6862_v13, %v7645_v43 }
 0x427   :  { %6366 = vmatprep.mubr.msk.bf16.mxu0 %vm414_vm5, %v605_v59  ;;  %6865 = vrcp.f32 %v455_v30  ;;  %v604_v6 = vmul.f32 %v6864_v23, %v7650_v49  ;;  %v134_v30 = vld [vmem:[%s10141_s8 + $0x28] sm:$0xff] }
 0x428   :  { %v451_v58 = vpop.xlane.xlu0 %450  ;;  %6867 = vrcp.f32 %v456_v35  ;;  %v6646_v35 = vpack.c.bf16 %v134_v30, %v133_v46 }
 0x429   :  { %v454_v44 = vpop.xlane.xlu1 %453  ;;  %v457_v48 = vmax.f32 %v451_v58, 1e-16  ;;  %v606_v19 = vpack.c.bf16 %v604_v6, %v603_v5 }
 0x42a   :  { %v458_v15 = vmax.f32 %v454_v44, 1e-16 }
 0x42b   :  { %6869 = vrcp.f32 %v457_v48 }
 0x42c   :  { %v610_v39 = vpop.permute.xlu0 %609  ;;  %6871 = vrcp.f32 %v458_v15 }
 0x42d   :  { %v839_v47 = vpop.xlane.xlu1 %838  ;;  %6362 = vmatprep.subr.bf16.mxu0 %v610_v39 }
 0x42e   :  { %6363 = vmatpush3.bf16.msra.mxu0 %v610_v39  ;;  %v849_v28 = vmax.f32 %v839_v47, 1e-16  ;;  %v135_v39 = vld [vmem:[%s10141_s8 + $0x30] sm:$0xff]  ;;  %v136_v47 = vld [vmem:[%s10141_s8 + $0x38] sm:$0xff] }
 0x431   :  { %v842_v34 = vpop.xlane.xlu1 %841  ;;  %v6866_v63 = vpop.eup %6865 }
 0x432   :  { %v850_v62 = vmax.f32 %v842_v34, 1e-16  ;;  %v6868_v27 = vpop.eup %6867  ;;  %v463_v18 = vmul.f32 %v6866_v63, %v7661_v40  ;;  %v6650_v34 = vpack.c.bf16 %v136_v47, %v135_v39 }
 0x433   :  { %v464_v37 = vmul.f32 %v6868_v27, %v7664_v42 }
 0x434   :  { %6873 = vrcp.f32 %v850_v62 }
 0x435   :  { %v845_v29 = vpop.xlane.xlu1 %844  ;;  %6875 = vrcp.f32 %v849_v28  ;;  %v467_v36 = vpack.c.bf16 %v464_v37, %v463_v18  ;;  %v6870_v43 = vpop.eup %6869 }
 0x436   :  { %v6872_v49 = vpop.eup %6871  ;;  %v851_v40 = vmax.f32 %v845_v29, 1e-16  ;;  %v465_v41 = vmul.f32 %v6870_v43, %v7671_v33  ;;  %v6018_v29 = vld [vmem:[%s10140_s7] ss:$0 sm:$0xff] }
 0x437   :  { %v466_v21 = vmul.f32 %v6872_v49, %v7674_v24 }
 0x439   :  { %v848_v4 = vpop.xlane.xlu1 %847  ;;  %v468_v59 = vpack.c.bf16 %v466_v21, %v465_v41 }
 0x43a   :  { %v852_v31 = vmax.f32 %v848_v4, 1e-16 }
 0x43c   :  { %6877 = vrcp.f32 %v852_v31 }
 0x43d   :  { %v612_v9 = vpop.permute.xlu1 %611  ;;  %6879 = vrcp.f32 %v851_v40 }
 0x43e   :  { %6364 = vmatprep.subr.bf16.mxu0 %v612_v9  ;;  %v6874_v42 = vpop.eup %6873 }
 0x43f   :  { %6365 = vmatpush3.bf16.msra.mxu0 %v612_v9  ;;  %v6876_v20 = vpop.eup %6875 }
 0x440   :  { %6370 = vmatprep.subr.bf16.mxu0 %v7430_v8  ;;  %v857_v45 = vmul.f32 %v6876_v20, %v7681_v32  ;;  %v129_v32 = vld [vmem:[%s10141_s8] sm:$0xff] }
 0x442   :  { %6367 = vmatmul.mubr.msk.bf16.vlgmr.msra.gmra.mrb[8].mxu0 %vm414_vm5, %v606_v19 }
 0x443   :  { %6371 = vmatpush3.bf16.msra.mxu0 %v7430_v8  ;;  %6374 = vmatprep.mubr.msk.bf16.mxu0 %vm414_vm5, %v467_v36  ;;  %v858_v8 = vmul.f32 %v6874_v42, %v7686_v38 }
 0x444   :  { %6372 = vmatprep.subr.bf16.mxu0 %v7437_v14 }
 0x445   :  { %v861_v58 = vpack.c.bf16 %v858_v8, %v857_v45 }
 0x447   :  { %6373 = vmatpush3.bf16.msra.mxu0 %v7437_v14  ;;  %v6878_v14 = vpop.eup %6877 }
 0x448   :  { %6378 = vmatprep.subr.bf16.mxu0 %v7432_v10  ;;  %v6880_v33 = vpop.eup %6879  ;;  %v860_v24 = vmul.f32 %v6878_v14, %v7696_v52 }
 0x449   :  { %v859_v38 = vmul.f32 %v6880_v33, %v7691_v60  ;;  %v132_v60 = vld [vmem:[%s10141_s8 + $0x18] sm:$0xff] }
 0x44b   :  { %v862_v25 = vpack.c.bf16 %v860_v24, %v859_v38 }
 0x44e   :  { %6375 = vmatmul.mubr.msk.bf16.vlgmr.msra.gmra.mrb[8].mxu0 %vm414_vm5, %v468_v59 }
 0x44f   :  { %6379 = vmatpush3.bf16.msra.mxu0 %v7432_v10  ;;  %6382 = vmatprep.mubr.msk.bf16.mxu0 %vm414_vm5, %v861_v58  ;;  %v130_v10 = vld [vmem:[%s10141_s8 + $0x8] sm:$0xff] }
 0x450   :  { %6380 = vmatprep.subr.bf16.mxu0 %v7439_v16  ;;  %v6638_v44 = vpack.c.bf16 %v130_v10, %v129_v32 }
 0x453   :  { %6381 = vmatpush3.bf16.msra.mxu0 %v7439_v16  ;;  %v131_v16 = vld [vmem:[%s10141_s8 + $0x10] sm:$0xff] }
 0x454   :  { %6639 = vmatprep.subr.bf16.mxu0 %v6638_v44  ;;  %v6642_v52 = vpack.c.bf16 %v132_v60, %v131_v16 }
 0x45a   :  { %6383 = vmatmul.mubr.msk.bf16.vlgmr.msra.gmra.mrb[8].mxu0 %vm414_vm5, %v862_v25 }
 0x45b   :  { %6641 = vmatpush3.bf16.msra.mxu0 %v6638_v44 }
 0x45c   :  { %6643 = vmatprep.subr.bf16.mxu0 %v6642_v52 }
 0x45f   :  { %6645 = vmatpush3.bf16.msra.mxu0 %v6642_v52 }
 0x460   :  { %6647 = vmatprep.subr.bf16.mxu0 %v6646_v35 }
 0x463   :  { %6649 = vmatpush3.bf16.msra.mxu0 %v6646_v35 }
 0x464   :  { %6651 = vmatprep.subr.bf16.mxu0 %v6650_v34 }
 0x467   :  { %6653 = vmatpush3.bf16.msra.mxu0 %v6650_v34 }
 0x52d   :  { %v6384_v48 = vpop.f32.mrb[8].mxu0 }
 0x52e   :  { %v924_v13 = vmul.f32 0.33333334, %v6384_v48  ;;  %v903_v15 = vpop.f32.mrb[9].mxu0 }
 0x52f   :  { %v922_v23 = vmul.f32 0.33333334, %v903_v15  ;;  %v6385_v62 = vpop.f32.mrb[10].mxu0 }
 0x530   :  { %v7781_v63 = vadd.f32 %v6018_v29, %v924_v13  ;;  %v925_v4 = vmul.f32 0.33333334, %v6385_v62  ;;  %v906_v27 = vpop.f32.mrb[11].mxu0 }
 0x531   :  { %v7783_v28 = vadd.f32 %v6018_v29, %v922_v23  ;;  %v923_v5 = vmul.f32 0.33333334, %v906_v27 }
 0x532   :  { %v7786_v6 = vmul.f32 0.70710677, %v7781_v63  ;;  %v7788_v9 = vadd.f32 %v6018_v29, %v925_v4 }
 0x533   :  { %v7791_v18 = vmul.f32 0.70710677, %v7783_v28  ;;  %v7797_v36 = vadd.f32 %v6018_v29, %v923_v5 }
 0x534   :  { %v954_v37 = vand.u32 2147483647, %v7786_v6  ;;  %v7795_v19 = vmul.f32 0.70710677, %v7788_v9  ;;  %vm946_vm9 = vcmp.ge.f32.partialorder %v7786_v6, 0.0 }
 0x535   :  { %v952_v31 = vand.u32 2147483647, %v7791_v18  ;;  %v7802_v20 = vmul.f32 0.70710677, %v7797_v36  ;;  %vm944_vm8 = vcmp.ge.f32.partialorder %v7791_v18, 0.0 }
 0x536   :  { %v958_v43 = vmul.f32 0.3275911, %v954_v37  ;;  %v955_v40 = vand.u32 2147483647, %v7795_v19  ;;  %v1010_v14 = vsub.f32 0.0, %v954_v37  ;;  %vm947_vm10 = vcmp.ge.f32.partialorder %v7795_v19, 0.0 }
 0x537   :  { %v956_v49 = vmul.f32 0.3275911, %v952_v31  ;;  %v953_v8 = vand.u32 2147483647, %v7802_v20  ;;  %v1008_v33 = vsub.f32 0.0, %v952_v31  ;;  %vm945_vm11 = vcmp.ge.f32.partialorder %v7802_v20, 0.0 }
 0x538   :  { %v962_v42 = vadd.f32 1.0, %v958_v43  ;;  %v959_v21 = vmul.f32 0.3275911, %v955_v40  ;;  %v1014_v38 = vmul.f32 %v1010_v14, %v954_v37  ;;  %v1011_v25 = vsub.f32 0.0, %v955_v40 }
 0x539   :  { %v960_v41 = vadd.f32 1.0, %v956_v49  ;;  %v957_v59 = vmul.f32 0.3275911, %v953_v8  ;;  %v1012_v44 = vmul.f32 %v1008_v33, %v952_v31  ;;  %v1009_v60 = vsub.f32 0.0, %v953_v8 }
 0x53a   :  { %6881 = vrcp.f32 %v962_v42  ;;  %v963_v45 = vadd.f32 1.0, %v959_v21  ;;  %v1020_v30 = vmul.f32 1.442695, %v1014_v38  ;;  %v1015_v39 = vmul.f32 %v1011_v25, %v955_v40 }
 0x53b   :  { %6883 = vrcp.f32 %v960_v41  ;;  %v961_v58 = vadd.f32 1.0, %v957_v59  ;;  %v1016_v34 = vmul.f32 1.442695, %v1012_v44  ;;  %v1013_v15 = vmul.f32 %v1009_v60, %v953_v8 }
 0x53c   :  { %6885 = vrcp.f32 %v963_v45  ;;  %v1022_v5 = vmul.f32 1.442695, %v1015_v39  ;;  %v937_v19 = vmul.f32 0.5, %v7797_v36 }
 0x53d   :  { %6887 = vrcp.f32 %v961_v58  ;;  %v1018_v42 = vmul.f32 1.442695, %v1013_v15 }
 0x53e   :  { %6889 = vpow2.f32 %v1020_v30 }
 0x53f   :  { %6891 = vpow2.f32 %v1016_v34 }
 0x540   :  { %6893 = vpow2.f32 %v1022_v5 }
 0x541   :  { %6895 = vpow2.f32 %v1018_v42 }
 0x544   :  { %v6882_v24 = vpop.eup %6881 }
 0x545   :  { %v6884_v32 = vpop.eup %6883  ;;  %v974_v10 = vmul.f32 1.0614054, %v6882_v24 }
 0x546   :  { %v972_v16 = vmul.f32 1.0614054, %v6884_v32  ;;  %v6886_v46 = vpop.eup %6885 }
 0x547   :  { %v978_v52 = vadd.f32 -1.4531521, %v974_v10  ;;  %v975_v29 = vmul.f32 1.0614054, %v6886_v46  ;;  %v6888_v48 = vpop.eup %6887 }
 0x548   :  { %v976_v35 = vadd.f32 -1.4531521, %v972_v16  ;;  %v973_v4 = vmul.f32 1.0614054, %v6888_v48 }
 0x549   :  { %v982_v47 = vmul.f32 %v6882_v24, %v978_v52  ;;  %v979_v62 = vadd.f32 -1.4531521, %v975_v29  ;;  %v6890_v52 = vpop.eup %6889 }
 0x54a   :  { %v980_v13 = vmul.f32 %v6884_v32, %v976_v35  ;;  %v977_v43 = vadd.f32 -1.4531521, %v973_v4  ;;  %v6892_v35 = vpop.eup %6891 }
 0x54b   :  { %v986_v23 = vadd.f32 1.4214138, %v982_v47  ;;  %v983_v31 = vmul.f32 %v6886_v46, %v979_v62 }
 0x54c   :  { %v984_v27 = vadd.f32 1.4214138, %v980_v13  ;;  %v981_v21 = vmul.f32 %v6888_v48, %v977_v43 }
 0x54d   :  { %v990_v37 = vmul.f32 %v6882_v24, %v986_v23  ;;  %v987_v40 = vadd.f32 1.4214138, %v983_v31  ;;  %v6894_v23 = vpop.eup %6893 }
 0x54e   :  { %v988_v49 = vmul.f32 %v6884_v32, %v984_v27  ;;  %v985_v8 = vadd.f32 1.4214138, %v981_v21  ;;  %v10163_v27 = vmov -1.0  }
 0x54f   :  { %v994_v41 = vadd.f32 -0.28449672, %v990_v37  ;;  %v991_v58 = vmul.f32 %v6886_v46, %v987_v40  ;;  %v950_v31 = vsel %vm946_vm9, 1.0, %v10163_v27  ;;  %v951_v21 = vsel %vm947_vm10, 1.0, %v10163_v27 }
 0x550   :  { %v992_v45 = vadd.f32 -0.28449672, %v988_v49  ;;  %v989_v25 = vmul.f32 %v6888_v48, %v985_v8  ;;  %v936_v49 = vmul.f32 0.5, %v7783_v28  ;;  %v938_v8 = vmul.f32 0.5, %v7781_v63 }
 0x551   :  { %v998_v59 = vmul.f32 %v6882_v24, %v994_v41  ;;  %v995_v38 = vadd.f32 -0.28449672, %v991_v58 }
 0x552   :  { %v996_v14 = vmul.f32 %v6884_v32, %v992_v45  ;;  %v993_v60 = vadd.f32 -0.28449672, %v989_v25 }
 0x553   :  { %v1002_v33 = vadd.f32 0.2548296, %v998_v59  ;;  %v999_v16 = vmul.f32 %v6886_v46, %v995_v38  ;;  %v939_v38 = vmul.f32 0.5, %v7788_v9 }
 0x554   :  { %v1000_v10 = vadd.f32 0.2548296, %v996_v14  ;;  %v997_v34 = vmul.f32 %v6888_v48, %v993_v60 }
 0x555   :  { %v1006_v44 = vmul.f32 %v6882_v24, %v1002_v33  ;;  %v1003_v47 = vadd.f32 0.2548296, %v999_v16  ;;  %v948_v24 = vsel %vm944_vm8, 1.0, %v10163_v27 }
 0x556   :  { %v1004_v30 = vmul.f32 %v6884_v32, %v1000_v10  ;;  %v1001_v15 = vadd.f32 0.2548296, %v997_v34  ;;  %v6896_v32 = vpop.eup %6895 }
 0x557   :  { %v1026_v39 = vmul.f32 %v6890_v52, %v1006_v44  ;;  %v1007_v13 = vmul.f32 %v6886_v46, %v1003_v47  ;;  %v7843_v44 = vld [vmem:[%s10135_s2 + $0x18] sm:$0xff]  ;;  %v6024_v47 = vld [vmem:[%s10138_s5 + $0x80] sm:$0xff] }
 0x558   :  { %v1024_v29 = vmul.f32 %v6892_v35, %v1004_v30  ;;  %v1005_v37 = vmul.f32 %v6888_v48, %v1001_v15  ;;  %v949_v48 = vsel %vm945_vm11, 1.0, %v10163_v27  ;;  %v1244_v16 = vmul.f32 %v7491_v55, %v7843_v44  ;;  %v6025_v35 = vld [vmem:[%s10138_s5 + $0x88] sm:$0xff]  ;;  %v6031_v15 = vld [vmem:[%s10138_s5 + $0xb8] sm:$0xff] }
 0x559   :  { %v1030_v62 = vsub.f32 1.0, %v1026_v39  ;;  %v1027_v5 = vmul.f32 %v6894_v23, %v1007_v13  ;;  %v6027_v39 = vld [vmem:[%s10138_s5 + $0x98] sm:$0xff]  ;;  %v6029_v13 = vld [vmem:[%s10138_s5 + $0xa8] sm:$0xff] }
 0x55a   :  { %v1028_v4 = vsub.f32 1.0, %v1024_v29  ;;  %v1025_v6 = vmul.f32 %v6896_v32, %v1005_v37  ;;  %v1254_v60 = vsel %vm414_vm5, %v1244_v16, 0.0  ;;  %v1581_v34 = vpack.c.bf16 %v6027_v39, %v6025_v35  ;;  %v6026_v29 = vld [vmem:[%s10138_s5 + $0x90] sm:$0xff]  ;;  %v6035_v37 = vld [vmem:[%s10138_s5 + $0xd8] sm:$0xff] }
 0x55b   :  { %v1031_v18 = vsub.f32 1.0, %v1027_v5  ;;  %v1034_v46 = vmul.f32 %v1030_v62, %v950_v31  ;;  %v1580_v23 = vpack.c.bf16 %v6026_v29, %v6024_v47  ;;  %v1583_v62 = vpack.c.bf16 %v6031_v15, %v6029_v13  ;;  %v6033_v5 = vld [vmem:[%s10138_s5 + $0xc8] sm:$0xff]  ;;  %v6038_v29 = vld [vmem:[%s10138_s5 + $0xf0] sm:$0xff] }
 0x55c   :  { %v1032_v43 = vmul.f32 %v1028_v4, %v948_v24  ;;  %v1029_v41 = vsub.f32 1.0, %v1025_v6  ;;  %v6028_v4 = vld [vmem:[%s10138_s5 + $0xa0] sm:$0xff]  ;;  %v6030_v24 = vld [vmem:[%s10138_s5 + $0xb0] sm:$0xff]  ;;  %1594 = vmatprep.subr.bf16.mxu0 %v1581_v34  ;;  %v1585_v31 = vpack.c.bf16 %v6035_v37, %v6033_v5  ;;  %v10151_v13 = vmov 0.0|0.0  }
 0x55d   :  { %v1035_v45 = vmul.f32 %v1031_v18, %v951_v21  ;;  %v1038_v58 = vadd.f32 1.0, %v1034_v46  ;;  %v1582_v32 = vpack.c.bf16 %v6030_v24, %v6028_v4  ;;  %v6034_v18 = vld [vmem:[%s10138_s5 + $0xd0] sm:$0xff]  ;;  %6654 = vmatprep.subr.bf16.mxu1 %v10151_v13 }
 0x55e   :  { %v1036_v42 = vadd.f32 1.0, %v1032_v43  ;;  %v1033_v59 = vmul.f32 %v1029_v41, %v949_v48  ;;  %v6032_v43 = vld [vmem:[%s10138_s5 + $0xc0] sm:$0xff] }
 0x55f   :  { %v1039_v28 = vadd.f32 1.0, %v1035_v45  ;;  %v7822_v33 = vmul.f32 %v1038_v58, %v938_v8  ;;  %v1584_v6 = vpack.c.bf16 %v6034_v18, %v6032_v43 }
 0x560   :  { %v7812_v40 = vmul.f32 %v1036_v42, %v936_v49  ;;  %v1037_v20 = vadd.f32 1.0, %v1033_v59  ;;  %v7886_v49 = vpop.xlane.xlu1 %1246 }
 0x561   :  { %v7829_v25 = vmul.f32 %v1039_v28, %v939_v38  ;;  %v1257_v24 = vmul.f32 0.8, %v7886_v49 }
 0x562   :  { %6402 = vmatprep.mubr.msk.f32.mxu0 %vm10159_vm0, %v7812_v40  ;;  %v7820_v14 = vmul.f32 %v1037_v20, %v937_v19 }
 0x564   :  { %6403 = vmatmul.mubr.msk.f32.vlgmr.msra.gmra.mrb[12].mxu0 %vm10159_vm0, %v7820_v14  ;;  %v7888_v41 = vpop.xlane.xlu1 %1249 }
 0x565   :  { %6405 = vmatprep.mubr.msk.f32.mxu0 %vm10159_vm0, %v7822_v33  ;;  %1595 = vmatpush1.bf16.msra.mxu0 %v1580_v23  ;;  %v1258_v4 = vmul.f32 0.8, %v7888_v41 }
 0x566   :  { %1596 = vmatprep.subr.bf16.mxu0 %v1583_v62 }
 0x567   :  { %v1262_v37 = vceil.f32 %v1258_v4  ;;  %v6050_v4 = vld [vmem:[%s10139_s6 + $0x110] sm:$0xff] }
 0x568   :  { %6406 = vmatmul.mubr.msk.f32.gmra.mrb[14].mxu0 %vm10159_vm0, %v7829_v25  ;;  %v7893_v59 = vpop.xlane.xlu1 %1252 }
 0x569   :  { %1626 = vmatprep.mubr.bf16.mxu0 %v10161_v7  ;;  %1597 = vmatpush1.bf16.msra.mxu0 %v1582_v32 }
 0x56a   :  { %1598 = vmatprep.subr.bf16.mxu0 %v1585_v31  ;;  %v1261_v31 = vceil.f32 %v1257_v24  ;;  %v6051_v24 = vld [vmem:[%s10139_s6 + $0x118] sm:$0xff] }
 0x56d   :  { %1599 = vmatpush1.bf16.msra.mxu0 %v1584_v6 }
 0x637   :  { %v6404_v63 = vpop.f32.mrb[12].mxu0 }
 0x638   :  { %1184 = vperm.xlu0 %6783, %v6404_v63   ;;  %v1122_v36 = vpop.f32.mrb[13].mxu0  ;;  %6897 = vtanh.f32 %v6404_v63 }
 0x639   :  { %6899 = vtanh.f32 %v1122_v36 }
 0x63b   :  { %v7834_v10 = vpop.f32.mrb[14].mxu0 }
 0x63c   :  { %1179 = vperm.xlu0 %6783, %v1122_v36   ;;  %1194 = vperm.xlu1 %6781, %v7834_v10   ;;  %v7837_v9 = vpop.f32.mrb[15].mxu0  ;;  %6901 = vtanh.f32 %v7834_v10 }
 0x63d   :  { %6903 = vtanh.f32 %v7837_v9 }
 0x640   :  { %1189 = vperm.xlu0 %6783, %v7837_v9  }
 0x642   :  { %v6898_v52 = vpop.eup %6897 }
 0x643   :  { %v6900_v30 = vpop.eup %6899 }
 0x65e   :  { %1141 = vxpose.xlu0.b32.start [1/4] (short) (narrow) %v1122_v36, 8 }
 0x660   :  { %1255 = vadd.xlane.f32.xlu1 %v1254_v60 }
 0x662   :  { %1142 = vxpose.xlu0.b32.cont [2/4] (short) (narrow) %v6404_v63, 8 }
 0x666   :  { %1143 = vxpose.xlu0.b32.cont [3/4] (short) (narrow) %v7837_v9, 8  ;;  %v6902_v9 = vpop.eup %6901 }
 0x667   :  { %v6904_v15 = vpop.eup %6903 }
 0x66a   :  { %1144 = vxpose.xlu0.b32.end [4/4] (short) (narrow) %v7834_v10, 8 }
 0x671   :  { %1284 = vperm.xlu1 %6781, %v6898_v52  }
 0x675   :  { %1279 = vperm.xlu1 %6781, %v6900_v30  }
 0x6b7   :  { %v1185_v46 = vpop.permute.xlu0 %1184 }
 0x6bb   :  { %v1180_v42 = vpop.permute.xlu0 %1179  ;;  %v1195_v58 = vpop.permute.xlu1 %1194 }
 0x6bf   :  { %v1190_v21 = vpop.permute.xlu0 %1189 }
 0x6de   :  { %v1157_v48 = vpop.trf.xlu0 }
 0x6df   :  { %v1176_v45 = vrot.slane %v1157_v48, %v7483_v51 }
 0x6e1   :  { %vm1198_vm13 = vcmp.gt.f32.partialorder %v1176_v45, %v1185_v46  ;;  %vm1202_vm14 = vcmp.eq.f32.partialorder %v1176_v45, %v1185_v46  ;;  %vm1201_vm15 = vcmp.eq.f32.partialorder %v1176_v45, %v1180_v42  ;;  %vm1197_vm3 = vcmp.gt.f32.partialorder %v1176_v45, %v1180_v42 }
 0x6e2   :  { %vm1210_vm2 = vmand %vm1202_vm14, %vm10182_vm12  ;;  %vm1203_vm6 = vcmp.eq.f32.partialorder %v1176_v45, %v1190_v21  ;;  %vm1199_vm9 = vcmp.gt.f32.partialorder %v1176_v45, %v1190_v21  ;;  %vm1204_vm11 = vcmp.eq.f32.partialorder %v1176_v45, %v1195_v58  ;;  %vm1208_vm14 = vcmp.lt.s32.totalorder %v7485_v53, %v7497_v57 }
 0x6e3   :  { %vm1214_vm4 = vmor %vm1198_vm13, %vm1210_vm2  ;;  %vm1200_vm2 = vcmp.gt.f32.partialorder %v1176_v45, %v1195_v58  ;;  %v1259_v46 = vmul.f32 0.8, %v7893_v59 }
 0x6e4   :  { %v1218_v19 = vsel %vm1214_vm4, 1.0, %v10155_v1  ;;  %vm1209_vm8 = vmand %vm1201_vm15, %vm1205_vm1 }
 0x6e5   :  { %v1222_v20 = vmul.f32 %v1218_v19, %v7714_v61  ;;  %vm1213_vm10 = vmor %vm1197_vm3, %vm1209_vm8  ;;  %v1263_v48 = vceil.f32 %v1259_v46 }
 0x6e6   :  { %v1217_v8 = vsel %vm1213_vm10, 1.0, %v10155_v1  ;;  %vm1211_vm13 = vmand %vm1203_vm6, %vm10160_vm7 }
 0x6e7   :  { %v1226_v28 = vmul.f32 %v1222_v20, %v7491_v55  ;;  %v1221_v38 = vmul.f32 %v1217_v8, %v7707_v22  ;;  %vm1215_vm15 = vmor %vm1199_vm9, %vm1211_vm13  ;;  %vm10157_vm9 = vmmov 0  }
 0x6e8   :  { %v1219_v63 = vsel %vm1215_vm15, 1.0, %v10155_v1  ;;  %vm1212_vm3 = vmand %vm1204_vm11, %vm1208_vm14  ;;  %6416 = vmatprep.mubr.msk.f32.mxu1 %vm10157_vm9, %v10155_v1 }
 0x6e9   :  { %v1232_v61 = vsel %vm414_vm5, %v1226_v28, 0.0  ;;  %v1225_v36 = vmul.f32 %v1221_v38, %v7491_v55  ;;  %v1223_v16 = vmul.f32 %v1219_v63, %v7722_v0  ;;  %vm1216_vm4 = vmor %vm1200_vm2, %vm1212_vm3  ;;  %v6037_v0 = vld [vmem:[%s10138_s5 + $0xe8] sm:$0xff] }
 0x6ea   :  { %1233 = vadd.xlane.f32.xlu0 %v1232_v61  ;;  %v1220_v60 = vsel %vm1216_vm4, 1.0, %v10155_v1 }
 0x6eb   :  { %v1229_v52 = vsel %vm414_vm5, %v1225_v36, 0.0  ;;  %v1227_v22 = vmul.f32 %v1223_v16, %v7491_v55  ;;  %v1224_v30 = vmul.f32 %v1220_v60, %v7843_v44  ;;  %v6039_v44 = vld [vmem:[%s10138_s5 + $0xf8] sm:$0xff] }
 0x6ec   :  { %1230 = vadd.xlane.f32.xlu1 %v1229_v52  ;;  %v1587_v34 = vpack.c.bf16 %v6039_v44, %v6037_v0  ;;  %v64_v52 = vld [vmem:[%s10136_s3] sm:$0x3] }
 0x6ed   :  { %v1228_v35 = vmul.f32 %v1224_v30, %v7491_v55  ;;  %v1235_v39 = vsel %vm414_vm5, %v1227_v22, 0.0  ;;  %v6036_v55 = vld [vmem:[%s10138_s5 + $0xe0] sm:$0xff]  ;;  %v1256_v23 = vpop.xlane.xlu1 %1255 }
 0x6ee   :  { %v1586_v10 = vpack.c.bf16 %v6038_v29, %v6036_v55  ;;  %1600 = vmatprep.subr.bf16.mxu0 %v1587_v34  ;;  %v1260_v45 = vmul.f32 0.8, %v1256_v23  ;;  %v6044_v44 = vld [vmem:[%s10139_s6 + $0xe0] sm:$0xff]  ;;  %v6045_v55 = vld [vmem:[%s10139_s6 + $0xe8] sm:$0xff]  ;;  %v6046_v29 = vld [vmem:[%s10139_s6 + $0xf0] sm:$0xff] }
 0x6ef   :  { %v1238_v47 = vsel %vm414_vm5, %v1228_v35, 0.0  ;;  %v1653_v34 = vpack.c.bf16 %v6045_v55, %v6044_v44  ;;  %v6049_v23 = vld [vmem:[%s10139_s6 + $0x108] sm:$0xff] }
 0x6f0   :  { %1236 = vadd.xlane.f32.xlu1 %v1235_v39  ;;  %1239 = vadd.xlane.f32.xlu0 %v1238_v47  ;;  %v1264_v19 = vceil.f32 %v1260_v45  ;;  %v6042_v39 = vld [vmem:[%s10139_s6 + $0xd0] sm:$0xff]  ;;  %v6043_v47 = vld [vmem:[%s10139_s6 + $0xd8] sm:$0xff] }
 0x6f1   :  { %1601 = vmatpush1.bf16.msra.mxu0 %v1586_v10  ;;  %v1285_v62 = vpop.permute.xlu1 %1284  ;;  %v1652_v0 = vpack.c.bf16 %v6043_v47, %v6042_v39  ;;  %v6047_v10 = vld [vmem:[%s10139_s6 + $0xf8] sm:$0xff]  ;;  %v6058_v45 = vld [vmem:[%s10139_s6 + $0x150] sm:$0xff] }
 0x6f2   :  { %v1298_v43 = vmul.f32 %v1285_v62, %v7820_v14 }
 0x6f5   :  { %v1280_v5 = vpop.permute.xlu1 %1279 }
 0x6f6   :  { %v1297_v42 = vmul.f32 %v1280_v5, %v7812_v40  ;;  %v1656_v5 = vpack.c.bf16 %v6051_v24, %v6050_v4 }
 0x701   :  { %1294 = vperm.xlu1 %6781, %v6902_v9   ;;  %v1654_v9 = vpack.c.bf16 %v6047_v10, %v6046_v29 }
 0x705   :  { %6784 = vset.pattern.permute.xlu1 %v10153_v17 }
 0x706   :  { %1289 = vperm.xlu0 %6783, %v6904_v15   ;;  %v6048_v15 = vld [vmem:[%s10139_s6 + $0x100] sm:$0xff] }
 0x707   :  { %v1655_v62 = vpack.c.bf16 %v6049_v23, %v6048_v15 }
 0x777   :  { %v1234_v32 = vpop.xlane.xlu0 %1233 }
 0x778   :  { %vm1266_vm6 = vcmp.lt.f32.partialorder %v1234_v32, %v1262_v37  ;;  %v6052_v37 = vld [vmem:[%s10139_s6 + $0x120] sm:$0xff]  ;;  %v6053_v32 = vld [vmem:[%s10139_s6 + $0x128] sm:$0xff] }
 0x779   :  { %v7949_v18 = vsel %vm1266_vm6, 1.0, %v10155_v1  ;;  %v1231_v6 = vpop.xlane.xlu1 %1230 }
 0x77a   :  { %v7954_v21 = vmul.f32 %v1298_v43, %v7949_v18  ;;  %vm1265_vm8 = vcmp.lt.f32.partialorder %v1231_v6, %v1261_v31  ;;  %v1657_v31 = vpack.c.bf16 %v6053_v32, %v6052_v37  ;;  %v6054_v43 = vld [vmem:[%s10139_s6 + $0x130] sm:$0xff]  ;;  %v6055_v6 = vld [vmem:[%s10139_s6 + $0x138] sm:$0xff] }
 0x77b   :  { %v7957_v49 = vsel %vm1265_vm8, 1.0, %v10155_v1  ;;  %v1658_v46 = vpack.c.bf16 %v6055_v6, %v6054_v43 }
 0x77c   :  { %10192 = vst [vmem:[#allocation5_spill] sm:$0xff] %v7954_v21  ;;  %10193 = vst [vmem:[#allocation6_spill] sm:$0xff] %v7957_v49  ;;  %v7960_v41 = vmul.f32 %v1297_v42, %v7957_v49  ;;  %1305 = vxpose.xlu0.b32.start [1/4] (short) (narrow) %v7957_v49, 8  ;;  %v6056_v42 = vld [vmem:[%s10139_s6 + $0x140] sm:$0xff] }
 0x77d   :  { %v1237_v14 = vpop.xlane.xlu1 %1236  ;;  %v1240_v40 = vpop.xlane.xlu0 %1239 }
 0x77e   :  { %10194 = vst [vmem:[#allocation7_spill] sm:$0xff] %v7960_v41  ;;  %v6655_v59 = vpack.c.bf16 %v7954_v21, %v7960_v41  ;;  %vm1267_vm10 = vcmp.lt.f32.partialorder %v1237_v14, %v1263_v48  ;;  %vm1268_vm11 = vcmp.lt.f32.partialorder %v1240_v40, %v1264_v19  ;;  %v6057_v14 = vld [vmem:[%s10139_s6 + $0x148] sm:$0xff] }
 0x77f   :  { %v7972_v20 = vsel %vm1267_vm10, 1.0, %v10155_v1  ;;  %v7978_v63 = vsel %vm1268_vm11, 1.0, %v10155_v1  ;;  %v1659_v48 = vpack.c.bf16 %v6057_v14, %v6056_v42  ;;  %v6061_v19 = vld [vmem:[%s10139_s6 + $0x168] sm:$0xff] }
 0x780   :  { %1306 = vxpose.xlu0.b32.cont [2/4] (short) (narrow) %v7949_v18, 8  ;;  %6656 = vmatpush3.bf16.msra.mxu1 %v6655_v59 }
 0x781   :  { %6073 = vmatmul.mubr.msk.bf16.vlgmr.msra.gmra.mrb[16].mxu0 %vm10159_vm0, %v6655_v59  ;;  %v1295_v58 = vpop.permute.xlu1 %1294  ;;  %6657 = vmatprep.subr.bf16.mxu1 %v10151_v13  ;;  %v6059_v59 = vld [vmem:[%s10139_s6 + $0x158] sm:$0xff] }
 0x782   :  { %1636 = vmatprep.mubr.bf16.mxu0 %v10161_v7  ;;  %v1300_v8 = vmul.f32 %v1295_v58, %v7829_v25  ;;  %v6041_v25 = vld [vmem:[%s10139_s6 + $0xc8] sm:$0xff]  ;;  %v1660_v40 = vpack.c.bf16 %v6059_v59, %v6058_v45  ;;  %v6060_v58 = vld [vmem:[%s10139_s6 + $0x160] sm:$0xff] }
 0x784   :  { %1307 = vxpose.xlu0.b32.cont [3/4] (short) (narrow) %v7972_v20, 8  ;;  %v7981_v61 = vmul.f32 %v1300_v8, %v7978_v63  ;;  %v1661_v8 = vpack.c.bf16 %v6061_v19, %v6060_v58 }
 0x785   :  { %v1290_v28 = vpop.permute.xlu0 %1289 }
 0x786   :  { %v1299_v38 = vmul.f32 %v1290_v28, %v7822_v33  ;;  %10195 = vst [vmem:[#allocation8_spill] sm:$0xff] %v7981_v61  ;;  %v6040_v33 = vld [vmem:[%s10139_s6 + $0xc0] sm:$0xff]  ;;  %v6062_v28 = vld [vmem:[%s10139_s6 + $0x170] sm:$0xff] }
 0x787   :  { %v1651_v30 = vpack.c.bf16 %v6041_v25, %v6040_v33 }
 0x788   :  { %v7984_v36 = vmul.f32 %v1299_v38, %v7972_v20  ;;  %1308 = vxpose.xlu0.b32.end [4/4] (short) (narrow) %v7978_v63, 8  ;;  %v6063_v38 = vld [vmem:[%s10139_s6 + $0x178] sm:$0xff] }
 0x78a   :  { %10196 = vst [vmem:[#allocation9_spill] sm:$0xff] %v7984_v36  ;;  %v6658_v16 = vpack.c.bf16 %v7981_v61, %v7984_v36 }
 0x78c   :  { %6659 = vmatpush3.bf16.msra.mxu1 %v6658_v16  ;;  %6074 = vmatmul.mubr.msk.bf16.gmra.mrb[20].mxu0 %vm10159_vm0, %v6658_v16  ;;  %v1662_v16 = vpack.c.bf16 %v6063_v38, %v6062_v28 }
 0x78d   :  { %1669 = vmatprep.subr.bf16.mxu1 %v10161_v7 }
 0x7b1   :  { %6789 = vset.pattern.permute.xlu0 %v10149_v26 }
 0x7fc   :  { %v1321_v60 = vpop.trf.xlu0 }
 0x7fd   :  { %v8002_v22 = vrot.slane %v1321_v60, %v7483_v51 }
 0x7ff   :  { %v8005_v35 = vmul.f32 %v8002_v22, %v64_v52 }
 0x801   :  { %6417 = vmatmul.mubr.msk.f32.vlgmr.msra.gmra.mrb[8].mxu1 %vm414_vm5, %v8005_v35 }
 0x802   :  { %1670 = vmatpush1.bf16.msra.mxu1 %v1651_v30 }
 0x803   :  { %1671 = vmatprep.subr.bf16.mxu1 %v10161_v7 }
 0x806   :  { %1672 = vmatpush1.bf16.msra.mxu1 %v1652_v0 }
 0x807   :  { %1673 = vmatprep.subr.bf16.mxu1 %v10161_v7 }
 0x80a   :  { %1674 = vmatpush1.bf16.msra.mxu1 %v1653_v34 }
 0x80b   :  { %1675 = vmatprep.subr.bf16.mxu1 %v10161_v7 }
 0x80e   :  { %1676 = vmatpush1.bf16.msra.mxu1 %v1654_v9 }
 0x80f   :  { %1677 = vmatprep.subr.bf16.mxu1 %v10161_v7 }
 0x812   :  { %1678 = vmatpush1.bf16.msra.mxu1 %v1655_v62 }
 0x813   :  { %1679 = vmatprep.subr.bf16.mxu1 %v10161_v7 }
 0x816   :  { %1680 = vmatpush1.bf16.msra.mxu1 %v1656_v5 }
 0x817   :  { %1681 = vmatprep.subr.bf16.mxu1 %v10161_v7 }
 0x81a   :  { %1682 = vmatpush1.bf16.msra.mxu1 %v1657_v31 }
 0x81b   :  { %1683 = vmatprep.subr.bf16.mxu1 %v10161_v7 }
 0x81e   :  { %1684 = vmatpush1.bf16.msra.mxu1 %v1658_v46 }
 0x81f   :  { %1685 = vmatprep.subr.bf16.mxu1 %v10161_v7 }
 0x822   :  { %1686 = vmatpush1.bf16.msra.mxu1 %v1659_v48 }
 0x823   :  { %1687 = vmatprep.subr.bf16.mxu1 %v10161_v7 }
 0x826   :  { %1688 = vmatpush1.bf16.msra.mxu1 %v1660_v40 }
 0x827   :  { %1689 = vmatprep.subr.bf16.mxu1 %v10161_v7 }
 0x82a   :  { %1690 = vmatpush1.bf16.msra.mxu1 %v1661_v8 }
 0x82b   :  { %1691 = vmatprep.subr.bf16.mxu1 %v10161_v7 }
 0x82e   :  { %1692 = vmatpush1.bf16.msra.mxu1 %v1662_v16 }
 0x82f   :  { %6676 = vmatprep.subr.bf16.mxu1 %v10151_v13 }
 0x854   :  { %v1628_v33 = vpop.f32.mrb[16].mxu0 }
 0x855   :  { %v1630_v25 = vpop.f32.mrb[17].mxu0 }
 0x856   :  { %v1632_v60 = vpop.f32.mrb[18].mxu0 }
 0x857   :  { %v8087_v52 = vpack.c.bf16 %v1632_v60, %v1628_v33  ;;  %v1634_v30 = vpop.f32.mrb[19].mxu0 }
 0x858   :  { %v8089_v39 = vpack.c.bf16 %v1634_v30, %v1630_v25 }
 0x85a   :  { %6075 = vmatprep.mubr.msk.bf16.mxu1 %vm10159_vm0, %v8089_v39 }
 0x85b   :  { %1702 = vmatmul.mubr.bf16.vlgmr.msra.gmra.mrb[12].mxu1 %v8087_v52 }
 0x85f   :  { %v1638_v47 = vpop.f32.mrb[20].mxu0 }
 0x860   :  { %v1640_v0 = vpop.f32.mrb[21].mxu0 }
 0x861   :  { %v1642_v44 = vpop.f32.mrb[22].mxu0 }
 0x862   :  { %v8094_v55 = vpack.c.bf16 %v1642_v44, %v1638_v47  ;;  %v1644_v34 = vpop.f32.mrb[23].mxu0  ;;  %v1563_v44 = vmul.f32 %v8002_v22, %v7949_v18 }
 0x863   :  { %v8096_v29 = vpack.c.bf16 %v1644_v34, %v1640_v0  ;;  %v1562_v0 = vmul.f32 %v8002_v22, %v7957_v49 }
 0x865   :  { %6076 = vmatprep.mubr.msk.bf16.mxu1 %vm10159_vm0, %v8096_v29 }
 0x866   :  { %1710 = vmatmul.mubr.bf16.gmra.mrb[16].mxu1 %v8094_v55 }
 0x867   :  { %6473 = vmatprep.mubr.msk.f32.mxu1 %vm10157_vm9, %v10155_v1 }
 0x8d4   :  { %v8103_v10 = vpop.f32.mrb[8].mxu1 }
 0x8d5   :  { %v6418_v9 = vpop.f32.mrb[9].mxu1 }
 0x92e   :  { %v1703_v15 = vpop.f32.mrb[12].mxu1 }
 0x92f   :  { %2120 = vrot.lane.b32.xlu0 %v1703_v15, %s7193_s16  ;;  %1864 = vrot.lane.b32.xlu1 %v1703_v15, %s7191_s29  ;;  %v1705_v23 = vpop.f32.mrb[13].mxu1 }
 0x930   :  { %v1706_v62 = vpop.f32.mrb[14].mxu1 }
 0x931   :  { %v1708_v4 = vpop.f32.mrb[15].mxu1 }
 0x933   :  { %1722 = vrot.lane.b32.xlu1 %v1703_v15, %s7192_s30  ;;  %2169 = vperm.xlu0 %6789, %v1706_v62  }
 0x937   :  { %1909 = vperm.xlu1 %6784, %v1703_v15   ;;  %6794 = vset.pattern.permute.xlu0 %v10161_v7 }
 0x939   :  { %v1711_v24 = vpop.f32.mrb[16].mxu1 }
 0x93a   :  { %v1713_v5 = vpop.f32.mrb[17].mxu1 }
 0x93b   :  { %6785 = vset.pattern.permute.xlu1 %v10161_v7  ;;  %v1714_v37 = vpop.f32.mrb[18].mxu1  ;;  %v1565_v5 = vmul.f32 %v8002_v22, %v7978_v63 }
 0x93c   :  { %1767 = vperm.xlu1 %6785, %v1703_v15   ;;  %1779 = vperm.xlu0 %6794, %v1714_v37   ;;  %v1716_v32 = vpop.f32.mrb[19].mxu1 }
 0x93d   :  { %v1570_v32 = vmul.f32 %v7524_v2, %v7957_v49 }
 0x940   :  { %6786 = vset.pattern.permute.xlu1 %v10149_v26 }
 0x941   :  { %2165 = vperm.xlu1 %6786, %v1703_v15   ;;  %v7137_v15 = vld [vmem:[%s10134_s1] sm:$0xff] }
 0x942   :  { %v1566_v23 = vmul.f32 %v7137_v15, %v1562_v0 }
 0x945   :  { %1866 = vrot.lane.b32.xlu1 %v1706_v62, %s7191_s29 }
 0x946   :  { %6787 = vset.pattern.permute.xlu1 %v10153_v17 }
 0x949   :  { %1724 = vrot.lane.b32.xlu1 %v1706_v62, %s7192_s30 }
 0x94d   :  { %2122 = vrot.lane.b32.xlu1 %v1706_v62, %s7193_s16 }
 0x951   :  { %1913 = vperm.xlu1 %6787, %v1706_v62  }
 0x955   :  { %6788 = vset.pattern.permute.xlu1 %v10161_v7 }
 0x956   :  { %1771 = vperm.xlu1 %6788, %v1706_v62   ;;  %v7138_v62 = vld [vmem:[%s10134_s1 + $0x8] sm:$0xff] }
 0x957   :  { %v1567_v4 = vmul.f32 %v7138_v62, %v1563_v44 }
 0x95a   :  { %1868 = vrot.lane.b32.xlu1 %v1711_v24, %s7191_s29 }
 0x95b   :  { %6790 = vset.pattern.permute.xlu1 %v10153_v17 }
 0x95e   :  { %1726 = vrot.lane.b32.xlu1 %v1711_v24, %s7192_s30 }
 0x962   :  { %2124 = vrot.lane.b32.xlu1 %v1711_v24, %s7193_s16 }
 0x966   :  { %1917 = vperm.xlu1 %6790, %v1711_v24  }
 0x96a   :  { %6791 = vset.pattern.permute.xlu1 %v10161_v7 }
 0x96b   :  { %1775 = vperm.xlu1 %6791, %v1711_v24  }
 0x96f   :  { %6792 = vset.pattern.permute.xlu1 %v10149_v26 }
 0x970   :  { %2173 = vperm.xlu1 %6792, %v1711_v24   ;;  %v1564_v24 = vmul.f32 %v8002_v22, %v7972_v20 }
 0x974   :  { %1870 = vrot.lane.b32.xlu1 %v1714_v37, %s7191_s29 }
 0x975   :  { %6793 = vset.pattern.permute.xlu1 %v10153_v17 }
 0x978   :  { %1728 = vrot.lane.b32.xlu1 %v1714_v37, %s7192_s30 }
 0x97c   :  { %2126 = vrot.lane.b32.xlu1 %v1714_v37, %s7193_s16 }
 0x980   :  { %1921 = vperm.xlu1 %6793, %v1714_v37  }
 0x984   :  { %6795 = vset.pattern.permute.xlu1 %v10149_v26 }
 0x985   :  { %2177 = vperm.xlu1 %6795, %v1714_v37   ;;  %v1571_v37 = vmul.f32 %v7527_v3, %v7949_v18 }
 0x9a1   :  { %v1865_v31 = vpop.permute.xlu1 %1864  ;;  %v2121_v25 = vpop.permute.xlu0 %2120 }
 0x9a2   :  { %1876 = vxpose.xlu0.b32.start [1/4] (short) (narrow) %v1865_v31, 8 }
 0x9a5   :  { %v1723_v43 = vpop.permute.xlu1 %1722 }
 0x9ae   :  { %1734 = vxpose.xlu1.b32.start [1/4] (short) (narrow) %v1723_v43, 8 }
 0x9b2   :  { %v8138_v47 = vpop.permute.xlu0 %2169 }
 0x9b6   :  { %v1910_v6 = vpop.permute.xlu1 %1909 }
 0x9bb   :  { %v8127_v46 = vpop.permute.xlu1 %1767  ;;  %v1780_v9 = vpop.permute.xlu0 %1779 }
 0x9c0   :  { %v8129_v42 = vpop.permute.xlu1 %2165 }
 0x9c4   :  { %v1867_v14 = vpop.permute.xlu1 %1866 }
 0x9c5   :  { %1877 = vxpose.xlu0.b32.cont [2/4] (short) (narrow) %v1867_v14, 8  ;;  %v8160_v14 = vadd.f32 %v1570_v32, %v1566_v23 }
 0x9c7   :  { %vm1802_vm13 = vcmp.gt.f32.partialorder %v8160_v14, 0.0 }
 0x9c8   :  { %v1725_v48 = vpop.permute.xlu1 %1724 }
 0x9c9   :  { %1735 = vxpose.xlu1.b32.cont [2/4] (short) (narrow) %v1725_v48, 8  ;;  %v8162_v48 = vadd.f32 %v1571_v37, %v1567_v4 }
 0x9cb   :  { %vm1803_vm2 = vcmp.gt.f32.partialorder %v8162_v48, 0.0 }
 0x9cc   :  { %v2123_v45 = vpop.permute.xlu1 %2122 }
 0x9d0   :  { %v1914_v59 = vpop.permute.xlu1 %1913 }
 0x9d5   :  { %v8131_v40 = vpop.permute.xlu1 %1771 }
 0x9d9   :  { %v1869_v58 = vpop.permute.xlu1 %1868 }
 0x9da   :  { %1878 = vxpose.xlu0.b32.cont [3/4] (short) (narrow) %v1869_v58, 8 }
 0x9dd   :  { %v1727_v19 = vpop.permute.xlu1 %1726 }
 0x9de   :  { %1736 = vxpose.xlu1.b32.cont [3/4] (short) (narrow) %v1727_v19, 8  ;;  %v7140_v19 = vld [vmem:[%s10134_s1 + $0x18] sm:$0xff] }
 0x9e1   :  { %v2125_v8 = vpop.permute.xlu1 %2124 }
 0x9e5   :  { %v1918_v28 = vpop.permute.xlu1 %1917 }
 0x9ea   :  { %v8133_v38 = vpop.permute.xlu1 %1775 }
 0x9ef   :  { %v8135_v16 = vpop.permute.xlu1 %2173 }
 0x9f3   :  { %v1871_v33 = vpop.permute.xlu1 %1870 }
 0x9f4   :  { %1879 = vxpose.xlu0.b32.end [4/4] (short) (narrow) %v1871_v33, 8 }
 0x9f7   :  { %v1729_v60 = vpop.permute.xlu1 %1728 }
 0x9f8   :  { %2132 = vxpose.xlu0.b32.start [1/4] (short) (narrow) %v2121_v25, 8  ;;  %1737 = vxpose.xlu1.b32.end [4/4] (short) (narrow) %v1729_v60, 8  ;;  %v1573_v25 = vmul.f32 %v7536_v12, %v7978_v63  ;;  %v1572_v60 = vmul.f32 %v7533_v11, %v7972_v20 }
 0x9fb   :  { %v2127_v30 = vpop.permute.xlu1 %2126 }
 0x9fc   :  { %2133 = vxpose.xlu0.b32.cont [2/4] (short) (narrow) %v2123_v45, 8  ;;  %v7139_v45 = vld [vmem:[%s10134_s1 + $0x10] sm:$0xff] }
 0x9fd   :  { %v1568_v58 = vmul.f32 %v7139_v45, %v1564_v24 }
 0x9ff   :  { %v1922_v34 = vpop.permute.xlu1 %1921  ;;  %v8177_v62 = vadd.f32 %v1572_v60, %v1568_v58 }
 0xa00   :  { %2134 = vxpose.xlu0.b32.cont [3/4] (short) (narrow) %v2125_v8, 8  ;;  %v1569_v8 = vmul.f32 %v7140_v19, %v1565_v5 }
 0xa01   :  { %vm1804_vm8 = vcmp.gt.f32.partialorder %v8177_v62, 0.0 }
 0xa02   :  { %v8179_v4 = vadd.f32 %v1573_v25, %v1569_v8 }
 0xa04   :  { %2135 = vxpose.xlu0.b32.end [4/4] (short) (narrow) %v2127_v30, 8  ;;  %v8158_v31 = vpop.permute.xlu1 %2177 }
 0xa16   :  { %6796 = vset.pattern.permute.xlu1 %v10161_v7 }
 0xa68   :  { %v1892_v43 = vpop.trf.xlu0 }
 0xa69   :  { %v1927_v33 = vrot.slane %v1892_v43, %v7483_v51 }
 0xa6b   :  { %v1928_v30 = vadd.f32 %v1927_v33, %v1910_v6  ;;  %v1929_v0 = vadd.f32 %v1927_v33, %v1914_v59  ;;  %v1930_v44 = vadd.f32 %v1927_v33, %v1918_v28  ;;  %v1931_v15 = vadd.f32 %v1927_v33, %v1922_v34 }
 0xa6c   :  { %v1750_v23 = vpop.trf.xlu1 }
 0xa6d   :  { %v1785_v24 = vrot.slane %v1750_v23, %v7483_v51  ;;  %vm1932_vm15 = vcmp.ge.f32.partialorder %v1928_v30, 0.0  ;;  %v1936_v5 = vmul.f32 0.2, %v1928_v30  ;;  %vm1933_vm3 = vcmp.ge.f32.partialorder %v1929_v0, 0.0 }
 0xa6e   :  { %v1937_v37 = vmul.f32 0.2, %v1929_v0  ;;  %vm1934_vm4 = vcmp.ge.f32.partialorder %v1930_v44, 0.0  ;;  %v1938_v6 = vmul.f32 0.2, %v1930_v44  ;;  %vm1935_vm6 = vcmp.ge.f32.partialorder %v1931_v15, 0.0 }
 0xa6f   :  { %v1940_v59 = vsel %vm1932_vm15, %v1928_v30, %v1936_v5  ;;  %v1787_v28 = vadd.f32 %v1785_v24, %v8131_v40  ;;  %v1939_v34 = vmul.f32 0.2, %v1931_v15  ;;  %v1789_v32 = vadd.f32 %v1785_v24, %v1780_v9 }
 0xa70   :  { %v8185_v43 = vsel %vm1802_vm13, %v1940_v59, -1e+30  ;;  %v1941_v45 = vsel %vm1933_vm3, %v1929_v0, %v1937_v37  ;;  %v1942_v58 = vsel %vm1934_vm4, %v1930_v44, %v1938_v6  ;;  %v1786_v19 = vadd.f32 %v1785_v24, %v8127_v46 }
 0xa71   :  { %v1948_v8 = vsel %vm414_vm5, %v8185_v43, -inf  ;;  %v8192_v33 = vsel %vm1803_vm2, %v1941_v45, -1e+30  ;;  %vm1791_vm10 = vcmp.ge.f32.partialorder %v1787_v28, 0.0  ;;  %v8199_v9 = vsel %vm1804_vm8, %v1942_v58, -1e+30 }
 0xa72   :  { %1949 = vmax.xlane.f32.xlu1 %v1948_v8  ;;  %v1951_v40 = vsel %vm414_vm5, %v8192_v33, -inf  ;;  %v1795_v25 = vmul.f32 0.2, %v1787_v28  ;;  %v1943_v46 = vsel %vm1935_vm6, %v1931_v15, %v1939_v34  ;;  %vm1793_vm11 = vcmp.ge.f32.partialorder %v1789_v32, 0.0 }
 0xa73   :  { %1952 = vmax.xlane.f32.xlu0 %v1951_v40  ;;  %v1797_v60 = vmul.f32 0.2, %v1789_v32  ;;  %vm1790_vm15 = vcmp.ge.f32.partialorder %v1786_v19, 0.0  ;;  %v1794_v0 = vmul.f32 0.2, %v1786_v19  ;;  %v1788_v44 = vadd.f32 %v1785_v24, %v8133_v38 }
 0xa74   :  { %v1799_v30 = vsel %vm1791_vm10, %v1787_v28, %v1795_v25  ;;  %v1954_v23 = vsel %vm414_vm5, %v8199_v9, -inf  ;;  %vm1805_vm3 = vcmp.gt.f32.partialorder %v8179_v4, 0.0 }
 0xa75   :  { %v8207_v5 = vsel %vm1803_vm2, %v1799_v30, -1e+30  ;;  %v1801_v37 = vsel %vm1793_vm11, %v1789_v32, %v1797_v60  ;;  %v8214_v6 = vsel %vm1805_vm3, %v1943_v46, -1e+30  ;;  %v1798_v59 = vsel %vm1790_vm15, %v1786_v19, %v1794_v0 }
 0xa76   :  { %1955 = vmax.xlane.f32.xlu1 %v1954_v23  ;;  %v1813_v15 = vsel %vm414_vm5, %v8207_v5, -inf  ;;  %v8218_v38 = vsel %vm1805_vm3, %v1801_v37, -1e+30  ;;  %v1796_v24 = vmul.f32 0.2, %v1788_v44  ;;  %vm1792_vm4 = vcmp.ge.f32.partialorder %v1788_v44, 0.0 }
 0xa77   :  { %1814 = vmax.xlane.f32.xlu0 %v1813_v15  ;;  %v1957_v32 = vsel %vm414_vm5, %v8214_v6, -inf  ;;  %v8225_v45 = vsel %vm1802_vm13, %v1798_v59, -1e+30  ;;  %v1819_v58 = vsel %vm414_vm5, %v8218_v38, -inf }
 0xa78   :  { %v2148_v28 = vpop.trf.xlu0  ;;  %v1800_v8 = vsel %vm1792_vm4, %v1788_v44, %v1796_v24  ;;  %v1810_v46 = vsel %vm414_vm5, %v8225_v45, -inf }
 0xa79   :  { %v2183_v34 = vrot.slane %v2148_v28, %v7483_v51  ;;  %v1808_v23 = vsel %vm1804_vm8, %v1800_v8, -1e+30 }
 0xa7a   :  { %1958 = vmax.xlane.f32.xlu1 %v1957_v32  ;;  %v1816_v59 = vsel %vm414_vm5, %v1808_v23, -inf }
 0xa7b   :  { %1820 = vmax.xlane.f32.xlu0 %v1819_v58  ;;  %v2185_v19 = vadd.f32 %v2183_v34, %v8138_v47  ;;  %v2187_v40 = vadd.f32 %v2183_v34, %v8158_v31  ;;  %v2184_v25 = vadd.f32 %v2183_v34, %v8129_v42  ;;  %v2186_v60 = vadd.f32 %v2183_v34, %v8135_v16 }
 0xa7d   :  { %vm2189_vm6 = vcmp.ge.f32.partialorder %v2185_v19, 0.0  ;;  %v2193_v30 = vmul.f32 0.2, %v2185_v19  ;;  %vm2191_vm10 = vcmp.ge.f32.partialorder %v2187_v40, 0.0  ;;  %v2195_v0 = vmul.f32 0.2, %v2187_v40 }
 0xa7e   :  { %1811 = vmax.xlane.f32.xlu1 %v1810_v46  ;;  %vm2188_vm11 = vcmp.ge.f32.partialorder %v2184_v25, 0.0  ;;  %v2192_v47 = vmul.f32 0.2, %v2184_v25  ;;  %v2194_v31 = vmul.f32 0.2, %v2186_v60  ;;  %vm2190_vm15 = vcmp.ge.f32.partialorder %v2186_v60, 0.0 }
 0xa7f   :  { %v2197_v44 = vsel %vm2189_vm6, %v2185_v19, %v2193_v30  ;;  %v2199_v37 = vsel %vm2191_vm10, %v2187_v40, %v2195_v0 }
 0xa80   :  { %v2201_v42 = vsel %vm1803_vm2, %v2197_v44, -1e+30  ;;  %v2196_v15 = vsel %vm2188_vm11, %v2184_v25, %v2192_v47  ;;  %v8243_v24 = vsel %vm1805_vm3, %v2199_v37, -1e+30  ;;  %v2198_v34 = vsel %vm2190_vm15, %v2186_v60, %v2194_v31 }
 0xa81   :  { %v2207_v16 = vsel %vm414_vm5, %v2201_v42, -inf  ;;  %v2200_v28 = vsel %vm1802_vm13, %v2196_v15, -1e+30  ;;  %v2213_v32 = vsel %vm414_vm5, %v8243_v24, -inf  ;;  %v8252_v19 = vsel %vm1804_vm8, %v2198_v34, -1e+30 }
 0xa82   :  { %2208 = vmax.xlane.f32.xlu0 %v2207_v16  ;;  %1817 = vmax.xlane.f32.xlu1 %v1816_v59  ;;  %v2204_v58 = vsel %vm414_vm5, %v2200_v28, -inf  ;;  %v2210_v8 = vsel %vm414_vm5, %v8252_v19, -inf }
 0xa86   :  { %2214 = vmax.xlane.f32.xlu0 %v2213_v32  ;;  %2205 = vmax.xlane.f32.xlu1 %v2204_v58 }
 0xa8a   :  { %2211 = vmax.xlane.f32.xlu1 %v2210_v8 }
 0xaff   :  { %v1950_v40 = vpop.xlane.xlu1 %1949 }
 0xb00   :  { %v1953_v25 = vpop.xlane.xlu0 %1952  ;;  %v1960_v46 = vsub.f32 %v8185_v43, %v1950_v40 }
 0xb01   :  { %v1961_v60 = vsub.f32 %v8192_v33, %v1953_v25 }
 0xb02   :  { %v1964_v30 = vmul.f32 1.442695, %v1960_v46 }
 0xb03   :  { %v1966_v0 = vmul.f32 1.442695, %v1961_v60  ;;  %v1956_v47 = vpop.xlane.xlu1 %1955 }
 0xb04   :  { %6905 = vpow2.f32 %v1964_v30  ;;  %v1815_v44 = vpop.xlane.xlu0 %1814  ;;  %v1962_v37 = vsub.f32 %v8199_v9, %v1956_v47 }
 0xb05   :  { %6907 = vpow2.f32 %v1966_v0  ;;  %v1823_v31 = vsub.f32 %v8207_v5, %v1815_v44 }
 0xb06   :  { %v1968_v15 = vmul.f32 1.442695, %v1962_v37 }
 0xb07   :  { %v1828_v16 = vmul.f32 1.442695, %v1823_v31  ;;  %v1959_v59 = vpop.xlane.xlu1 %1958 }
 0xb08   :  { %6909 = vpow2.f32 %v1968_v15  ;;  %v1821_v34 = vpop.xlane.xlu0 %1820  ;;  %v1963_v32 = vsub.f32 %v8214_v6, %v1959_v59 }
 0xb09   :  { %v1825_v43 = vsub.f32 %v8218_v38, %v1821_v34  ;;  %6911 = vpow2.f32 %v1828_v16 }
 0xb0a   :  { %v1970_v33 = vmul.f32 1.442695, %v1963_v32 }
 0xb0b   :  { %v1832_v58 = vmul.f32 1.442695, %v1825_v43  ;;  %v1812_v8 = vpop.xlane.xlu1 %1811 }
 0xb0c   :  { %6913 = vpow2.f32 %v1970_v33  ;;  %v1822_v40 = vsub.f32 %v8225_v45, %v1812_v8 }
 0xb0d   :  { %6915 = vpow2.f32 %v1832_v58 }
 0xb0e   :  { %v6906_v9 = vpop.eup %6905  ;;  %v1826_v25 = vmul.f32 1.442695, %v1822_v40 }
 0xb0f   :  { %v6908_v46 = vpop.eup %6907  ;;  %v2209_v5 = vpop.xlane.xlu0 %2208  ;;  %v8264_v30 = vmul.f32 %v6906_v9, %v8160_v14 }
 0xb10   :  { %v1818_v60 = vpop.xlane.xlu1 %1817  ;;  %6917 = vpow2.f32 %v1826_v25  ;;  %v2217_v6 = vsub.f32 %v2201_v42, %v2209_v5  ;;  %v8267_v38 = vmul.f32 %v6908_v46, %v8162_v48 }
 0xb11   :  { %v1824_v0 = vsub.f32 %v1808_v23, %v1818_v60  ;;  %v1976_v47 = vsel %vm414_vm5, %v8264_v30, 0.0 }
 0xb12   :  { %v6910_v44 = vpop.eup %6909  ;;  %v1979_v37 = vsel %vm414_vm5, %v8267_v38, 0.0  ;;  %1977 = vadd.xlane.f32.xlu1 %v1976_v47  ;;  %v2222_v16 = vmul.f32 1.442695, %v2217_v6 }
 0xb13   :  { %v1830_v45 = vmul.f32 1.442695, %v1824_v0  ;;  %1980 = vadd.xlane.f32.xlu0 %v1979_v37  ;;  %v8274_v15 = vmul.f32 %v6910_v44, %v8177_v62  ;;  %v6912_v23 = vpop.eup %6911  ;;  %v2215_v59 = vpop.xlane.xlu0 %2214 }
 0xb14   :  { %v2206_v31 = vpop.xlane.xlu1 %2205  ;;  %v2219_v8 = vsub.f32 %v8243_v24, %v2215_v59  ;;  %v8286_v25 = vmul.f32 %v6912_v23, %v8162_v48 }
 0xb15   :  { %v2216_v42 = vsub.f32 %v2200_v28, %v2206_v31  ;;  %6919 = vpow2.f32 %v1830_v45  ;;  %v1982_v34 = vsel %vm414_vm5, %v8274_v15, 0.0 }
 0xb16   :  { %v6914_v32 = vpop.eup %6913  ;;  %1983 = vadd.xlane.f32.xlu1 %v1982_v34  ;;  %6921 = vpow2.f32 %v2222_v16  ;;  %v2226_v6 = vmul.f32 1.442695, %v2219_v8  ;;  %v1841_v24 = vsel %vm414_vm5, %v8286_v25, 0.0 }
 0xb17   :  { %v2220_v43 = vmul.f32 1.442695, %v2216_v42  ;;  %v8279_v58 = vmul.f32 %v6914_v32, %v8179_v4  ;;  %v6916_v9 = vpop.eup %6915 }
 0xb18   :  { %v2212_v33 = vpop.xlane.xlu1 %2211  ;;  %v8296_v0 = vmul.f32 %v6916_v9, %v8179_v4  ;;  %v8340_v9 = vld [vmem:[%s10135_s2 + $0x8] sm:$0xff] }
 0xb19   :  { %v2218_v40 = vsub.f32 %v8252_v19, %v2212_v33  ;;  %6923 = vpow2.f32 %v2220_v43  ;;  %v1985_v28 = vsel %vm414_vm5, %v8279_v58, 0.0 }
 0xb1a   :  { %v6918_v46 = vpop.eup %6917  ;;  %1986 = vadd.xlane.f32.xlu0 %v1985_v28  ;;  %v1847_v45 = vsel %vm414_vm5, %v8296_v0, 0.0  ;;  %v2633_v28 = vmul.f32 %v8340_v9, %v8002_v22 }
 0xb1b   :  { %v2224_v5 = vmul.f32 1.442695, %v2218_v40  ;;  %v8289_v60 = vmul.f32 %v6918_v46, %v8160_v14 }
 0xb1c   :  { %v2639_v46 = vsel %vm414_vm5, %v2633_v28, 0.0 }
 0xb1d   :  { %6925 = vpow2.f32 %v2224_v5  ;;  %v1838_v19 = vsel %vm414_vm5, %v8289_v60, 0.0  ;;  %v8348_v5 = vld [vmem:[%s10135_s2 + $0x10] sm:$0xff] }
 0xb1e   :  { %1842 = vadd.xlane.f32.xlu0 %v1841_v24  ;;  %1839 = vadd.xlane.f32.xlu1 %v1838_v19  ;;  %6927 = vpow2.f32 %v2226_v6  ;;  %v2634_v6 = vmul.f32 %v8348_v5, %v8002_v22  ;;  %v8356_v19 = vld [vmem:[%s10135_s2 + $0x18] sm:$0xff] }
 0xb1f   :  { %v6920_v47 = vpop.eup %6919 }
 0xb20   :  { %v8299_v44 = vmul.f32 %v6920_v47, %v8177_v62  ;;  %v6922_v37 = vpop.eup %6921  ;;  %v2642_v24 = vsel %vm414_vm5, %v2634_v6, 0.0  ;;  %v2635_v47 = vmul.f32 %v8356_v19, %v8002_v22 }
 0xb21   :  { %v8311_v59 = vmul.f32 %v6922_v37, %v8162_v48 }
 0xb22   :  { %1848 = vadd.xlane.f32.xlu0 %v1847_v45  ;;  %v1844_v31 = vsel %vm414_vm5, %v8299_v44, 0.0  ;;  %v2645_v45 = vsel %vm414_vm5, %v2635_v47, 0.0 }
 0xb23   :  { %v6924_v16 = vpop.eup %6923  ;;  %1845 = vadd.xlane.f32.xlu1 %v1844_v31  ;;  %v2235_v32 = vsel %vm414_vm5, %v8311_v59, 0.0 }
 0xb24   :  { %v8306_v42 = vmul.f32 %v6924_v16, %v8160_v14 }
 0xb26   :  { %v2232_v23 = vsel %vm414_vm5, %v8306_v42, 0.0 }
 0xb27   :  { %v6926_v34 = vpop.eup %6925  ;;  %2233 = vadd.xlane.f32.xlu0 %v2232_v23 }
 0xb28   :  { %v8316_v43 = vmul.f32 %v6926_v34, %v8177_v62  ;;  %v6928_v33 = vpop.eup %6927  ;;  %v8332_v62 = vld [vmem:[%s10135_s2] sm:$0xff] }
 0xb29   :  { %v8321_v8 = vmul.f32 %v6928_v33, %v8179_v4  ;;  %v2632_v4 = vmul.f32 %v8332_v62, %v8002_v22 }
 0xb2a   :  { %v2238_v14 = vsel %vm414_vm5, %v8316_v43, 0.0 }
 0xb2b   :  { %2236 = vadd.xlane.f32.xlu0 %v2235_v32  ;;  %v2241_v48 = vsel %vm414_vm5, %v8321_v8, 0.0  ;;  %v2636_v40 = vsel %vm414_vm5, %v2632_v4, 0.0 }
 0xb2f   :  { %2239 = vadd.xlane.f32.xlu0 %v2238_v14 }
 0xb33   :  { %2242 = vadd.xlane.f32.xlu0 %v2241_v48 }
 0xb34   :  { %2004 = vrot.lane.b32.xlu1 %v8087_v52, %s7196_s24 }
 0xb49   :  { %2006 = vrot.lane.b32.xlu0 %v8094_v55, %s7196_s24 }
 0xb68   :  { %2637 = vadd.xlane.f32.xlu0 %v2636_v40 }
 0xb6c   :  { %2640 = vadd.xlane.f32.xlu0 %v2639_v46 }
 0xb70   :  { %2643 = vadd.xlane.f32.xlu0 %v2642_v24 }
 0xb74   :  { %2646 = vadd.xlane.f32.xlu0 %v2645_v45 }
 0xb9f   :  { %v1978_v37 = vpop.xlane.xlu1 %1977 }
 0xba0   :  { %v1981_v31 = vpop.xlane.xlu0 %1980  ;;  %v1988_v16 = vmax.f32 %v1978_v37, 1e-16 }
 0xba1   :  { %v1989_v23 = vmax.f32 %v1981_v31, 1e-16 }
 0xba2   :  { %6929 = vrcp.f32 %v1988_v16 }
 0xba3   :  { %6931 = vrcp.f32 %v1989_v23  ;;  %v1984_v34 = vpop.xlane.xlu1 %1983 }
 0xba4   :  { %v1990_v31 = vmax.f32 %v1984_v34, 1e-16 }
 0xba7   :  { %v1987_v32 = vpop.xlane.xlu0 %1986 }
 0xba8   :  { %v1991_v47 = vmax.f32 %v1987_v32, 1e-16 }
 0xbaa   :  { %6933 = vrcp.f32 %v1991_v47 }
 0xbab   :  { %v1843_v33 = vpop.xlane.xlu0 %1842  ;;  %v1840_v14 = vpop.xlane.xlu1 %1839 }
 0xbac   :  { %v6930_v48 = vpop.eup %6929  ;;  %v1851_v45 = vmax.f32 %v1843_v33, 1e-16  ;;  %v1850_v37 = vmax.f32 %v1840_v14, 1e-16 }
 0xbad   :  { %v6932_v4 = vpop.eup %6931  ;;  %v1996_v40 = vmul.f32 %v6930_v48, %v8264_v30 }
 0xbae   :  { %v1997_v28 = vmul.f32 %v6932_v4, %v8267_v38  ;;  %6935 = vrcp.f32 %v1851_v45 }
 0xbaf   :  { %v1849_v46 = vpop.xlane.xlu0 %1848  ;;  %6937 = vrcp.f32 %v1850_v37 }
 0xbb0   :  { %v1846_v6 = vpop.xlane.xlu1 %1845  ;;  %v2000_v24 = vpack.c.bf16 %v1997_v28, %v1996_v40  ;;  %6939 = vrcp.f32 %v1990_v31  ;;  %v1853_v38 = vmax.f32 %v1849_v46, 1e-16 }
 0xbb1   :  { %v1852_v4 = vmax.f32 %v1846_v6, 1e-16 }
 0xbb2   :  { %6423 = vmatprep.mubr.msk.bf16.mxu0 %vm414_vm5, %v2000_v24  ;;  %6941 = vrcp.f32 %v1853_v38 }
 0xbb3   :  { %6943 = vrcp.f32 %v1852_v4 }
 0xbb4   :  { %v2234_v16 = vpop.xlane.xlu0 %2233  ;;  %v2005_v23 = vpop.permute.xlu1 %2004 }
 0xbb5   :  { %6419 = vmatprep.subr.bf16.mxu0 %v2005_v23  ;;  %v6934_v26 = vpop.eup %6933  ;;  %v2244_v14 = vmax.f32 %v2234_v16, 1e-16 }
 0xbb6   :  { %6420 = vmatpush3.bf16.msra.mxu0 %v2005_v23  ;;  %v1999_v24 = vmul.f32 %v6934_v26, %v8279_v58 }
 0xbb8   :  { %v2237_v30 = vpop.xlane.xlu0 %2236  ;;  %v6936_v32 = vpop.eup %6935 }
 0xbb9   :  { %v2245_v40 = vmax.f32 %v2237_v30, 1e-16  ;;  %v6938_v28 = vpop.eup %6937  ;;  %v1859_v37 = vmul.f32 %v6936_v32, %v8286_v25 }
 0xbba   :  { %v6940_v34 = vpop.eup %6939  ;;  %v1858_v45 = vmul.f32 %v6938_v28, %v8289_v60  ;;  %v6070_v28 = vld [vmem:[%s10141_s8 + $0x68] sm:$0xff] }
 0xbbb   :  { %6945 = vrcp.f32 %v2245_v40  ;;  %v1998_v46 = vmul.f32 %v6940_v34, %v8274_v15  ;;  %v6071_v34 = vld [vmem:[%s10141_s8 + $0x70] sm:$0xff] }
 0xbbc   :  { %v2240_v48 = vpop.xlane.xlu0 %2239  ;;  %6947 = vrcp.f32 %v2244_v14  ;;  %v1862_v31 = vpack.c.bf16 %v1859_v37, %v1858_v45  ;;  %v6942_v26 = vpop.eup %6941  ;;  %v6083_v45 = vld [vmem:[%s10140_s7 + $0x1] ss:$0 sm:$0xff] }
 0xbbd   :  { %v2001_v6 = vpack.c.bf16 %v1999_v24, %v1998_v46  ;;  %v6944_v58 = vpop.eup %6943  ;;  %v2246_v25 = vmax.f32 %v2240_v48, 1e-16  ;;  %v1861_v23 = vmul.f32 %v6942_v26, %v8296_v0  ;;  %v6072_v24 = vld [vmem:[%s10141_s8 + $0x78] sm:$0xff] }
 0xbbe   :  { %v1860_v30 = vmul.f32 %v6944_v58, %v8299_v44 }
 0xbc0   :  { %v2243_v33 = vpop.xlane.xlu0 %2242  ;;  %v1863_v4 = vpack.c.bf16 %v1861_v23, %v1860_v30 }
 0xbc1   :  { %v2247_v16 = vmax.f32 %v2243_v33, 1e-16  ;;  %v6069_v33 = vld [vmem:[%s10141_s8 + $0x60] sm:$0xff] }
 0xbc2   :  { %v6668_v14 = vpack.c.bf16 %v6070_v28, %v6069_v33 }
 0xbc3   :  { %6949 = vrcp.f32 %v2247_v16 }
 0xbc4   :  { %v2007_v47 = vpop.permute.xlu0 %2006  ;;  %6951 = vrcp.f32 %v2246_v25 }
 0xbc5   :  { %6421 = vmatprep.subr.bf16.mxu0 %v2007_v47  ;;  %v6946_v15 = vpop.eup %6945 }
 0xbc6   :  { %6422 = vmatpush3.bf16.msra.mxu0 %v2007_v47  ;;  %v6948_v60 = vpop.eup %6947  ;;  %v6672_v47 = vpack.c.bf16 %v6072_v24, %v6071_v34 }
 0xbc7   :  { %6427 = vmatprep.subr.bf16.mxu0 %v8087_v52  ;;  %v2252_v38 = vmul.f32 %v6948_v60, %v8306_v42  ;;  %v6065_v42 = vld [vmem:[%s10141_s8 + $0x40] sm:$0xff] }
 0xbc9   :  { %6424 = vmatmul.mubr.msk.bf16.vlgmr.msra.gmra.mrb[24].mxu0 %vm414_vm5, %v2001_v6 }
 0xbca   :  { %6428 = vmatpush3.bf16.msra.mxu0 %v8087_v52  ;;  %6431 = vmatprep.mubr.msk.bf16.mxu0 %vm414_vm5, %v1862_v31  ;;  %v2253_v52 = vmul.f32 %v6946_v15, %v8311_v59 }
 0xbcb   :  { %6429 = vmatprep.subr.bf16.mxu0 %v8094_v55 }
 0xbcc   :  { %v2256_v40 = vpack.c.bf16 %v2253_v52, %v2252_v38 }
 0xbce   :  { %6430 = vmatpush3.bf16.msra.mxu0 %v8094_v55  ;;  %v6950_v55 = vpop.eup %6949 }
 0xbcf   :  { %6435 = vmatprep.subr.bf16.mxu0 %v8089_v39  ;;  %v6952_v0 = vpop.eup %6951  ;;  %v2255_v44 = vmul.f32 %v6950_v55, %v8321_v8 }
 0xbd0   :  { %v2254_v59 = vmul.f32 %v6952_v0, %v8316_v43  ;;  %v6068_v43 = vld [vmem:[%s10141_s8 + $0x58] sm:$0xff] }
 0xbd2   :  { %v2257_v48 = vpack.c.bf16 %v2255_v44, %v2254_v59 }
 0xbd5   :  { %6432 = vmatmul.mubr.msk.bf16.vlgmr.msra.gmra.mrb[24].mxu0 %vm414_vm5, %v1863_v4 }
 0xbd6   :  { %6436 = vmatpush3.bf16.msra.mxu0 %v8089_v39  ;;  %6439 = vmatprep.mubr.msk.bf16.mxu0 %vm414_vm5, %v2256_v40  ;;  %v6066_v39 = vld [vmem:[%s10141_s8 + $0x48] sm:$0xff] }
 0xbd7   :  { %6437 = vmatprep.subr.bf16.mxu0 %v8096_v29  ;;  %v6660_v32 = vpack.c.bf16 %v6066_v39, %v6065_v42 }
 0xbda   :  { %6438 = vmatpush3.bf16.msra.mxu0 %v8096_v29  ;;  %v6067_v29 = vld [vmem:[%s10141_s8 + $0x50] sm:$0xff] }
 0xbdb   :  { %6661 = vmatprep.subr.bf16.mxu0 %v6660_v32  ;;  %v6664_v8 = vpack.c.bf16 %v6068_v43, %v6067_v29 }
 0xbe1   :  { %6440 = vmatmul.mubr.msk.bf16.vlgmr.msra.gmra.mrb[24].mxu0 %vm414_vm5, %v2257_v48 }
 0xbe2   :  { %6663 = vmatpush3.bf16.msra.mxu0 %v6660_v32 }
 0xbe3   :  { %6665 = vmatprep.subr.bf16.mxu0 %v6664_v8 }
 0xbe6   :  { %6667 = vmatpush3.bf16.msra.mxu0 %v6664_v8 }
 0xbe7   :  { %6669 = vmatprep.subr.bf16.mxu0 %v6668_v14 }
 0xbea   :  { %6671 = vmatpush3.bf16.msra.mxu0 %v6668_v14 }
 0xbeb   :  { %6673 = vmatprep.subr.bf16.mxu0 %v6672_v47 }
 0xbee   :  { %6675 = vmatpush3.bf16.msra.mxu0 %v6672_v47 }
 0xcb4   :  { %v6441_v37 = vpop.f32.mrb[24].mxu0 }
 0xcb5   :  { %v2319_v46 = vmul.f32 0.33333334, %v6441_v37  ;;  %v2298_v6 = vpop.f32.mrb[25].mxu0 }
 0xcb6   :  { %v2317_v31 = vmul.f32 0.33333334, %v2298_v6  ;;  %v6442_v16 = vpop.f32.mrb[26].mxu0 }
 0xcb7   :  { %v8414_v26 = vadd.f32 %v6083_v45, %v2319_v46  ;;  %v2320_v58 = vmul.f32 0.33333334, %v6442_v16  ;;  %v2301_v25 = vpop.f32.mrb[27].mxu0 }
 0xcb8   :  { %v8416_v15 = vadd.f32 %v6083_v45, %v2317_v31  ;;  %v2318_v60 = vmul.f32 0.33333334, %v2301_v25 }
 0xcb9   :  { %v8419_v23 = vmul.f32 0.70710677, %v8414_v26  ;;  %v8421_v30 = vadd.f32 %v6083_v45, %v2320_v58 }
 0xcba   :  { %v8424_v52 = vmul.f32 0.70710677, %v8416_v15  ;;  %v8430_v40 = vadd.f32 %v6083_v45, %v2318_v60 }
 0xcbb   :  { %v2349_v38 = vand.u32 2147483647, %v8419_v23  ;;  %v8428_v4 = vmul.f32 0.70710677, %v8421_v30  ;;  %vm2341_vm2 = vcmp.ge.f32.partialorder %v8419_v23, 0.0 }
 0xcbc   :  { %v2347_v55 = vand.u32 2147483647, %v8424_v52  ;;  %v8435_v42 = vmul.f32 0.70710677, %v8430_v40  ;;  %vm2339_vm13 = vcmp.ge.f32.partialorder %v8424_v52, 0.0 }
 0xcbd   :  { %v2353_v0 = vmul.f32 0.3275911, %v2349_v38  ;;  %v2350_v59 = vand.u32 2147483647, %v8428_v4  ;;  %v2405_v28 = vsub.f32 0.0, %v2349_v38  ;;  %vm2342_vm8 = vcmp.ge.f32.partialorder %v8428_v4, 0.0 }
 0xcbe   :  { %v2351_v44 = vmul.f32 0.3275911, %v2347_v55  ;;  %v2348_v29 = vand.u32 2147483647, %v8435_v42  ;;  %v2403_v14 = vsub.f32 0.0, %v2347_v55  ;;  %vm2340_vm3 = vcmp.ge.f32.partialorder %v8435_v42, 0.0 }
 0xcbf   :  { %v2357_v48 = vadd.f32 1.0, %v2353_v0  ;;  %v2354_v32 = vmul.f32 0.3275911, %v2350_v59  ;;  %v2409_v24 = vmul.f32 %v2405_v28, %v2349_v38  ;;  %v2406_v47 = vsub.f32 0.0, %v2350_v59 }
 0xcc0   :  { %v2355_v39 = vadd.f32 1.0, %v2351_v44  ;;  %v2352_v8 = vmul.f32 0.3275911, %v2348_v29  ;;  %v2407_v46 = vmul.f32 %v2403_v14, %v2347_v55  ;;  %v2404_v31 = vsub.f32 0.0, %v2348_v29 }
 0xcc1   :  { %6953 = vrcp.f32 %v2357_v48  ;;  %v2358_v43 = vadd.f32 1.0, %v2354_v32  ;;  %v2415_v25 = vmul.f32 1.442695, %v2409_v24  ;;  %v2410_v0 = vmul.f32 %v2406_v47, %v2350_v59 }
 0xcc2   :  { %6955 = vrcp.f32 %v2355_v39  ;;  %v2356_v33 = vadd.f32 1.0, %v2352_v8  ;;  %v2411_v48 = vmul.f32 1.442695, %v2407_v46  ;;  %v2408_v8 = vmul.f32 %v2404_v31, %v2348_v29 }
 0xcc3   :  { %6957 = vrcp.f32 %v2358_v43  ;;  %v2417_v17 = vmul.f32 1.442695, %v2410_v0  ;;  %v2332_v4 = vmul.f32 0.5, %v8430_v40 }
 0xcc4   :  { %6959 = vrcp.f32 %v2356_v33  ;;  %v2413_v24 = vmul.f32 1.442695, %v2408_v8 }
 0xcc5   :  { %6961 = vpow2.f32 %v2415_v25 }
 0xcc6   :  { %6963 = vpow2.f32 %v2411_v48 }
 0xcc7   :  { %6965 = vpow2.f32 %v2417_v17 }
 0xcc8   :  { %6967 = vpow2.f32 %v2413_v24 }
 0xccb   :  { %v6954_v34 = vpop.eup %6953 }
 0xccc   :  { %v6956_v45 = vpop.eup %6955  ;;  %v2369_v37 = vmul.f32 1.0614054, %v6954_v34 }
 0xccd   :  { %v2367_v6 = vmul.f32 1.0614054, %v6956_v45  ;;  %v6958_v58 = vpop.eup %6957 }
 0xcce   :  { %v2373_v16 = vadd.f32 -1.4531521, %v2369_v37  ;;  %v2370_v39 = vmul.f32 1.0614054, %v6958_v58  ;;  %v6960_v32 = vpop.eup %6959 }
 0xccf   :  { %v2371_v60 = vadd.f32 -1.4531521, %v2367_v6  ;;  %v2368_v38 = vmul.f32 1.0614054, %v6960_v32 }
 0xcd0   :  { %v2377_v44 = vmul.f32 %v6954_v34, %v2373_v16  ;;  %v2374_v13 = vadd.f32 -1.4531521, %v2370_v39 }
 0xcd1   :  { %v2375_v43 = vmul.f32 %v6956_v45, %v2371_v60  ;;  %v2372_v37 = vadd.f32 -1.4531521, %v2368_v38 }
 0xcd2   :  { %v2381_v33 = vadd.f32 1.4214138, %v2377_v44  ;;  %v2378_v14 = vmul.f32 %v6958_v58, %v2374_v13 }
 0xcd3   :  { %v2379_v28 = vadd.f32 1.4214138, %v2375_v43  ;;  %v2376_v47 = vmul.f32 %v6960_v32, %v2372_v37 }
 0xcd4   :  { %v2385_v55 = vmul.f32 %v6954_v34, %v2381_v33  ;;  %v2382_v59 = vadd.f32 1.4214138, %v2378_v14  ;;  %v6962_v33 = vpop.eup %6961 }
 0xcd5   :  { %v2383_v1 = vmul.f32 %v6956_v45, %v2379_v28  ;;  %v2380_v29 = vadd.f32 1.4214138, %v2376_v47  ;;  %v6964_v8 = vpop.eup %6963 }
 0xcd6   :  { %v2389_v6 = vadd.f32 -0.28449672, %v2385_v55  ;;  %v2386_v60 = vmul.f32 %v6958_v58, %v2382_v59  ;;  %v6966_v24 = vpop.eup %6965 }
 0xcd7   :  { %v2387_v46 = vadd.f32 -0.28449672, %v2383_v1  ;;  %v2384_v39 = vmul.f32 %v6960_v32, %v2380_v29 }
 0xcd8   :  { %v2393_v16 = vmul.f32 %v6954_v34, %v2389_v6  ;;  %v2390_v25 = vadd.f32 -0.28449672, %v2386_v60 }
 0xcd9   :  { %v2391_v31 = vmul.f32 %v6956_v45, %v2387_v46  ;;  %v2388_v13 = vadd.f32 -0.28449672, %v2384_v39  ;;  %v2346_v39 = vsel %vm2342_vm8, 1.0, %v10163_v27 }
 0xcda   :  { %v2397_v44 = vadd.f32 0.2548296, %v2393_v16  ;;  %v2394_v48 = vmul.f32 %v6958_v58, %v2390_v25  ;;  %v6968_v16 = vpop.eup %6967 }
 0xcdb   :  { %v2395_v0 = vadd.f32 0.2548296, %v2391_v31  ;;  %v2392_v14 = vmul.f32 %v6960_v32, %v2388_v13  ;;  %v2333_v13 = vmul.f32 0.5, %v8414_v26 }
 0xcdc   :  { %v2401_v43 = vmul.f32 %v6954_v34, %v2397_v44  ;;  %v2398_v55 = vadd.f32 0.2548296, %v2394_v48  ;;  %v2343_v34 = vsel %vm2339_vm13, 1.0, %v10163_v27 }
 0xcdd   :  { %v2399_v38 = vmul.f32 %v6956_v45, %v2395_v0  ;;  %v2396_v37 = vadd.f32 0.2548296, %v2392_v14  ;;  %v2345_v45 = vsel %vm2341_vm2, 1.0, %v10163_v27 }
 0xcde   :  { %v2421_v28 = vmul.f32 %v6962_v33, %v2401_v43  ;;  %v2402_v1 = vmul.f32 %v6958_v58, %v2398_v55  ;;  %v2331_v58 = vmul.f32 0.5, %v8416_v15 }
 0xcdf   :  { %v2419_v17 = vmul.f32 %v6964_v8, %v2399_v38  ;;  %v2400_v46 = vmul.f32 %v6960_v32, %v2396_v37  ;;  %v2344_v32 = vsel %vm2340_vm3, 1.0, %v10163_v27  ;;  %v2334_v8 = vmul.f32 0.5, %v8421_v30  ;;  %v6089_v37 = vld [vmem:[%s10138_s5 + $0x100] sm:$0xff] }
 0xce0   :  { %v2425_v6 = vsub.f32 1.0, %v2421_v28  ;;  %v2422_v47 = vmul.f32 %v6966_v24, %v2402_v1  ;;  %v6092_v1 = vld [vmem:[%s10138_s5 + $0x118] sm:$0xff] }
 0xce1   :  { %v2423_v59 = vsub.f32 1.0, %v2419_v17  ;;  %v2420_v52 = vmul.f32 %v6968_v16, %v2400_v46  ;;  %v6090_v17 = vld [vmem:[%s10138_s5 + $0x108] sm:$0xff] }
 0xce2   :  { %v2426_v29 = vsub.f32 1.0, %v2422_v47  ;;  %v2429_v23 = vmul.f32 %v2425_v6, %v2345_v45  ;;  %v2974_v24 = vpack.c.bf16 %v6092_v1, %v6090_v17  ;;  %v6091_v6 = vld [vmem:[%s10138_s5 + $0x110] sm:$0xff]  ;;  %v6098_v17 = vld [vmem:[%s10138_s5 + $0x148] sm:$0xff]  ;;  %v6100_v1 = vld [vmem:[%s10138_s5 + $0x158] sm:$0xff] }
 0xce3   :  { %v2427_v60 = vmul.f32 %v2423_v59, %v2343_v34  ;;  %v2424_v44 = vsub.f32 1.0, %v2420_v52  ;;  %v2973_v59 = vpack.c.bf16 %v6091_v6, %v6089_v37  ;;  %v2978_v37 = vpack.c.bf16 %v6100_v1, %v6098_v17  ;;  %v6099_v6 = vld [vmem:[%s10138_s5 + $0x150] sm:$0xff] }
 0xce4   :  { %v2430_v0 = vmul.f32 %v2426_v29, %v2346_v39  ;;  %v2433_v48 = vadd.f32 1.0, %v2429_v23  ;;  %2987 = vmatprep.subr.bf16.mxu0 %v2974_v24  ;;  %v10197_v29 = vmov 0.0   ;;  %v6097_v24 = vld [vmem:[%s10138_s5 + $0x140] sm:$0xff] }
 0xce5   :  { %v2431_v31 = vadd.f32 1.0, %v2427_v60  ;;  %v2428_v43 = vmul.f32 %v2424_v44, %v2344_v32 }
 0xce6   :  { %v2434_v15 = vadd.f32 1.0, %v2430_v0  ;;  %v8455_v38 = vmul.f32 %v2433_v48, %v2333_v13 }
 0xce7   :  { %v8445_v25 = vmul.f32 %v2431_v31, %v2331_v58  ;;  %v2432_v42 = vadd.f32 1.0, %v2428_v43 }
 0xce8   :  { %v8462_v28 = vmul.f32 %v2434_v15, %v2334_v8  ;;  %v6094_v8 = vld [vmem:[%s10138_s5 + $0x128] sm:$0xff] }
 0xce9   :  { %6459 = vmatprep.mubr.msk.f32.mxu0 %vm10159_vm0, %v8445_v25  ;;  %v8453_v33 = vmul.f32 %v2432_v42, %v2332_v4 }
 0xceb   :  { %6460 = vmatmul.mubr.msk.f32.vlgmr.msra.gmra.mrb[28].mxu0 %vm10159_vm0, %v8453_v33 }
 0xcec   :  { %6462 = vmatprep.mubr.msk.f32.mxu0 %vm10159_vm0, %v8455_v38  ;;  %2988 = vmatpush1.bf16.msra.mxu0 %v2973_v59  ;;  %v2977_v59 = vpack.c.bf16 %v6099_v6, %v6097_v24  ;;  %v10202_v6 = vmov 0.0|0.0  }
 0xcef   :  { %6463 = vmatmul.mubr.msk.f32.gmra.mrb[30].mxu0 %vm10159_vm0, %v8462_v28 }
 0xcf0   :  { %3019 = vmatprep.mubr.bf16.mxu0 %v10161_v7 }
 0xdbe   :  { %v6461_v26 = vpop.f32.mrb[28].mxu0 }
 0xdbf   :  { %2579 = vperm.xlu1 %6796, %v6461_v26   ;;  %v2517_v40 = vpop.f32.mrb[29].mxu0 }
 0xdc0   :  { %6969 = vtanh.f32 %v2517_v40 }
 0xdc1   :  { %6971 = vtanh.f32 %v6461_v26 }
 0xdc2   :  { %v8467_v55 = vpop.f32.mrb[30].mxu0 }
 0xdc3   :  { %2574 = vperm.xlu1 %6796, %v2517_v40   ;;  %v8469_v30 = vpop.f32.mrb[31].mxu0 }
 0xdc4   :  { %6973 = vtanh.f32 %v8469_v30 }
 0xdc5   :  { %6975 = vtanh.f32 %v8467_v55 }
 0xdc7   :  { %2589 = vperm.xlu1 %6796, %v8467_v55  }
 0xdca   :  { %v6970_v14 = vpop.eup %6969 }
 0xdcb   :  { %2674 = vperm.xlu0 %6794, %v6970_v14   ;;  %2584 = vperm.xlu1 %6796, %v8469_v30  }
 0xdf4   :  { %2536 = vxpose.xlu1.b32.start [1/4] (short) (narrow) %v2517_v40, 8 }
 0xdf8   :  { %2537 = vxpose.xlu1.b32.cont [2/4] (short) (narrow) %v6461_v26, 8  ;;  %v6095_v26 = vld [vmem:[%s10138_s5 + $0x130] sm:$0xff] }
 0xdfc   :  { %2538 = vxpose.xlu1.b32.cont [3/4] (short) (narrow) %v8469_v30, 8  ;;  %v6102_v30 = vld [vmem:[%s10138_s5 + $0x168] sm:$0xff] }
 0xe00   :  { %2539 = vxpose.xlu1.b32.end [4/4] (short) (narrow) %v8467_v55, 8 }
 0xe3e   :  { %v2580_v34 = vpop.permute.xlu1 %2579 }
 0xe42   :  { %v2575_v47 = vpop.permute.xlu1 %2574 }
 0xe46   :  { %v2590_v46 = vpop.permute.xlu1 %2589 }
 0xe4a   :  { %v2585_v16 = vpop.permute.xlu1 %2584 }
 0xe74   :  { %v2552_v45 = vpop.trf.xlu1 }
 0xe75   :  { %v2571_v60 = vrot.slane %v2552_v45, %v7483_v51 }
 0xe77   :  { %vm2594_vm4 = vcmp.gt.f32.partialorder %v2571_v60, %v2585_v16  ;;  %vm2598_vm6 = vcmp.eq.f32.partialorder %v2571_v60, %v2585_v16  ;;  %vm2597_vm10 = vcmp.eq.f32.partialorder %v2571_v60, %v2580_v34  ;;  %vm2593_vm15 = vcmp.gt.f32.partialorder %v2571_v60, %v2580_v34  ;;  %v6104_v34 = vld [vmem:[%s10138_s5 + $0x178] sm:$0xff]  ;;  %v6103_v16 = vld [vmem:[%s10138_s5 + $0x170] sm:$0xff] }
 0xe78   :  { %vm2602_vm11 = vmand %vm2598_vm6, %vm10160_vm7  ;;  %vm2596_vm2 = vcmp.eq.f32.partialorder %v2571_v60, %v2575_v47  ;;  %vm2592_vm3 = vcmp.gt.f32.partialorder %v2571_v60, %v2575_v47  ;;  %vm2599_vm0 = vcmp.eq.f32.partialorder %v2571_v60, %v2590_v46  ;;  %vm2595_vm7 = vcmp.gt.f32.partialorder %v2571_v60, %v2590_v46  ;;  %v6101_v46 = vld [vmem:[%s10138_s5 + $0x160] sm:$0xff] }
 0xe79   :  { %vm2606_vm13 = vmor %vm2594_vm4, %vm2602_vm11  ;;  %v2980_v47 = vpack.c.bf16 %v6104_v34, %v6102_v30  ;;  %v2979_v45 = vpack.c.bf16 %v6103_v16, %v6101_v46 }
 0xe7a   :  { %v2610_v52 = vsel %vm2606_vm13, 1.0, %v10197_v29  ;;  %vm2601_vm8 = vmand %vm2597_vm10, %vm10182_vm12  ;;  %vm10201_vm13 = vcmask 523264  }
 0xe7b   :  { %v2614_v23 = vmul.f32 %v8348_v5, %v2610_v52  ;;  %vm2605_vm9 = vmor %vm2593_vm15, %vm2601_vm8  ;;  %v10198_v52 = vmov 1  }
 0xe7c   :  { %v2609_v58 = vsel %vm2605_vm9, 1.0, %v10197_v29  ;;  %vm2600_vm6 = vmand %vm2596_vm2, %vm1205_vm1 }
 0xe7d   :  { %v2618_v31 = vmul.f32 %v2614_v23, %v8002_v22  ;;  %v2613_v44 = vmul.f32 %v8340_v9, %v2609_v58  ;;  %vm2604_vm4 = vmor %vm2592_vm3, %vm2600_vm6  ;;  %v2638_v23 = vpop.xlane.xlu0 %2637  ;;  %vm10209_vm6 = vmmov 0  }
 0xe7e   :  { %v2608_v39 = vsel %vm2604_vm4, 1.0, %v10197_v29  ;;  %vm2603_vm10 = vmand %vm2599_vm0, %vm1208_vm14 }
 0xe7f   :  { %v2626_v5 = vsel %vm414_vm5, %v2618_v31, 0.0  ;;  %v2617_v32 = vmul.f32 %v2613_v44, %v8002_v22  ;;  %v2612_v0 = vmul.f32 %v8332_v62, %v2608_v39  ;;  %vm2607_vm9 = vmor %vm2595_vm7, %vm2603_vm10  ;;  %v6972_v62 = vpop.eup %6971 }
 0xe80   :  { %2627 = vadd.xlane.f32.xlu1 %v2626_v5  ;;  %v2611_v43 = vsel %vm2607_vm9, 1.0, %v10197_v29  ;;  %v6974_v55 = vpop.eup %6973  ;;  %vm10206_vm2 = vmmov %vm10201_vm13 }
 0xe81   :  { %v2623_v48 = vsel %vm414_vm5, %v2617_v32, 0.0  ;;  %v2616_v9 = vmul.f32 %v2612_v0, %v8002_v22  ;;  %v2615_v4 = vmul.f32 %v8356_v19, %v2611_v43  ;;  %v6096_v19 = vld [vmem:[%s10138_s5 + $0x138] sm:$0xff]  ;;  %v6976_v60 = vpop.eup %6975  ;;  %v2641_v58 = vpop.xlane.xlu0 %2640  ;;  %v2648_v0 = vmul.f32 0.8, %v2638_v23  ;;  %vm10207_vm8 = vmmov %vm10206_vm2 }
 0xe82   :  { %2624 = vadd.xlane.f32.xlu0 %v2623_v48  ;;  %v2976_v40 = vpack.c.bf16 %v6096_v19, %v6094_v8  ;;  %v2649_v39 = vmul.f32 0.8, %v2641_v58  ;;  %vm10208_vm3 = vmmov %vm10206_vm2 }
 0xe83   :  { %v2620_v42 = vsel %vm414_vm5, %v2616_v9, 0.0  ;;  %v2619_v13 = vmul.f32 %v2615_v4, %v8002_v22  ;;  %v6093_v22 = vld [vmem:[%s10138_s5 + $0x120] sm:$0xff] }
 0xe84   :  { %v2975_v14 = vpack.c.bf16 %v6095_v26, %v6093_v22  ;;  %2989 = vmatprep.subr.bf16.mxu0 %v2976_v40  ;;  %v2653_v43 = vceil.f32 %v2649_v39  ;;  %v7145_v39 = vld [vmem:[%s10136_s3] sm:$0x3] }
 0xe85   :  { %v2629_v15 = vsel %vm414_vm5, %v2619_v13, 0.0  ;;  %v2644_v31 = vpop.xlane.xlu0 %2643 }
 0xe86   :  { %2621 = vadd.xlane.f32.xlu0 %v2620_v42  ;;  %2990 = vmatpush1.bf16.msra.mxu0 %v2975_v14  ;;  %v2650_v9 = vmul.f32 0.8, %v2644_v31  ;;  %v2652_v42 = vceil.f32 %v2648_v0  ;;  %v6108_v0 = vld [vmem:[%s10139_s6 + $0x198] sm:$0xff] }
 0xe87   :  { %2991 = vmatprep.subr.bf16.mxu0 %v2978_v37 }
 0xe88   :  { %v2654_v8 = vceil.f32 %v2650_v9  ;;  %v6110_v9 = vld [vmem:[%s10139_s6 + $0x1a8] sm:$0xff] }
 0xe89   :  { %v2647_v44 = vpop.xlane.xlu0 %2646 }
 0xe8a   :  { %2630 = vadd.xlane.f32.xlu0 %v2629_v15  ;;  %2992 = vmatpush1.bf16.msra.mxu0 %v2977_v59  ;;  %v2651_v40 = vmul.f32 0.8, %v2647_v44 }
 0xe8b   :  { %2993 = vmatprep.subr.bf16.mxu0 %v2980_v47 }
 0xe8c   :  { %v2655_v37 = vceil.f32 %v2651_v40  ;;  %v6115_v40 = vld [vmem:[%s10139_s6 + $0x1d0] sm:$0xff] }
 0xe8d   :  { %v2675_v5 = vpop.permute.xlu0 %2674 }
 0xe8e   :  { %2994 = vmatpush1.bf16.msra.mxu0 %v2979_v45  ;;  %v2692_v22 = vmul.f32 %v2675_v5, %v8445_v25 }
 0xe91   :  { %2679 = vperm.xlu1 %6796, %v6972_v62  }
 0xea0   :  { %2684 = vperm.xlu0 %6794, %v6974_v55  }
 0xea4   :  { %2689 = vperm.xlu0 %6794, %v6976_v60  }
 0xea8   :  { %6797 = vset.pattern.permute.xlu0 %v10198_v52 }
 0xf0d   :  { %v2628_v32 = vpop.xlane.xlu1 %2627 }
 0xf0e   :  { %vm2658_vm11 = vcmp.lt.f32.partialorder %v2628_v32, %v2654_v8  ;;  %v6107_v32 = vld [vmem:[%s10139_s6 + $0x190] sm:$0xff]  ;;  %v6114_v8 = vld [vmem:[%s10139_s6 + $0x1c8] sm:$0xff] }
 0xf0f   :  { %v2625_v48 = vpop.xlane.xlu0 %2624  ;;  %v2662_v24 = vsel %vm2658_vm11, 1.0, %v10197_v29 }
 0xf10   :  { %vm2657_vm0 = vcmp.lt.f32.partialorder %v2625_v48, %v2653_v43  ;;  %v8579_v59 = vmul.f32 %v2662_v24, %v7972_v20  ;;  %v3045_v43 = vpack.c.bf16 %v6108_v0, %v6107_v32  ;;  %v6109_v48 = vld [vmem:[%s10139_s6 + $0x1a0] sm:$0xff]  ;;  %v6127_v0 = vld [vmem:[%s10139_s6 + $0x230] sm:$0xff] }
 0xf11   :  { %v2680_v4 = vpop.permute.xlu1 %2679  ;;  %v2661_v13 = vsel %vm2657_vm0, 1.0, %v10197_v29 }
 0xf12   :  { %v2693_v62 = vmul.f32 %v2680_v4, %v8453_v33  ;;  %v8560_v26 = vmul.f32 %v2661_v13, %v7949_v18  ;;  %10203 = vst [vmem:[#allocation12_spill] sm:$0xff] %v8579_v59  ;;  %v3046_v4 = vpack.c.bf16 %v6110_v9, %v6109_v48  ;;  %v6112_v13 = vld [vmem:[%s10139_s6 + $0x1b8] sm:$0xff] }
 0xf13   :  { %v2622_v15 = vpop.xlane.xlu0 %2621 }
 0xf14   :  { %vm2656_vm7 = vcmp.lt.f32.partialorder %v2622_v15, %v2652_v42  ;;  %v8566_v17 = vmul.f32 %v2693_v62, %v8560_v26  ;;  %v6111_v42 = vld [vmem:[%s10139_s6 + $0x1b0] sm:$0xff]  ;;  %v6113_v62 = vld [vmem:[%s10139_s6 + $0x1c0] sm:$0xff] }
 0xf15   :  { %v2660_v19 = vsel %vm2656_vm7, 1.0, %v10197_v29  ;;  %v3047_v15 = vpack.c.bf16 %v6112_v13, %v6111_v42 }
 0xf16   :  { %v8563_v14 = vmul.f32 %v2660_v19, %v7957_v49  ;;  %10199 = vst [vmem:[#allocation10_spill] sm:$0xff] %v8566_v17  ;;  %v3048_v19 = vpack.c.bf16 %v6114_v8, %v6113_v62 }
 0xf17   :  { %v2631_v1 = vpop.xlane.xlu0 %2630 }
 0xf18   :  { %2700 = vxpose.xlu1.b32.start [1/4] (short) (narrow) %v8563_v14, 8  ;;  %v8570_v33 = vmul.f32 %v2692_v22, %v8563_v14  ;;  %vm2659_vm15 = vcmp.lt.f32.partialorder %v2631_v1, %v2655_v37  ;;  %v6116_v22 = vld [vmem:[%s10139_s6 + $0x1d8] sm:$0xff]  ;;  %v6117_v37 = vld [vmem:[%s10139_s6 + $0x1e0] sm:$0xff] }
 0xf19   :  { %v2663_v30 = vsel %vm2659_vm15, 1.0, %v10197_v29  ;;  %v3049_v1 = vpack.c.bf16 %v6116_v22, %v6115_v40 }
 0xf1a   :  { %10200 = vst [vmem:[#allocation11_spill] sm:$0xff] %v8570_v33  ;;  %v6677_v25 = vpack.c.bf16 %v8566_v17, %v8570_v33  ;;  %v8585_v47 = vmul.f32 %v2663_v30, %v7978_v63  ;;  %v6119_v30 = vld [vmem:[%s10139_s6 + $0x1f0] sm:$0xff] }
 0xf1c   :  { %2701 = vxpose.xlu1.b32.cont [2/4] (short) (narrow) %v8560_v26, 8  ;;  %6678 = vmatpush3.bf16.msra.mxu1 %v6677_v25 }
 0xf1d   :  { %6138 = vmatmul.mubr.msk.bf16.vlgmr.msra.gmra.mrb[32].mxu0 %vm10201_vm13, %v6677_v25  ;;  %6679 = vmatprep.subr.bf16.mxu1 %v10202_v6  ;;  %v6118_v25 = vld [vmem:[%s10139_s6 + $0x1e8] sm:$0xff] }
 0xf1e   :  { %3029 = vmatprep.mubr.bf16.mxu0 %v10161_v7  ;;  %v3050_v24 = vpack.c.bf16 %v6118_v25, %v6117_v37 }
 0xf1f   :  { %v2685_v34 = vpop.permute.xlu0 %2684 }
 0xf20   :  { %2702 = vxpose.xlu1.b32.cont [3/4] (short) (narrow) %v8579_v59, 8  ;;  %v2694_v46 = vmul.f32 %v2685_v34, %v8455_v38  ;;  %v6105_v38 = vld [vmem:[%s10139_s6 + $0x180] sm:$0xff]  ;;  %v6120_v34 = vld [vmem:[%s10139_s6 + $0x1f8] sm:$0xff] }
 0xf22   :  { %v8591_v55 = vmul.f32 %v2694_v46, %v8579_v59  ;;  %v3051_v46 = vpack.c.bf16 %v6120_v34, %v6119_v30 }
 0xf23   :  { %v2690_v16 = vpop.permute.xlu0 %2689 }
 0xf24   :  { %v2695_v45 = vmul.f32 %v2690_v16, %v8462_v28  ;;  %2703 = vxpose.xlu1.b32.end [4/4] (short) (narrow) %v8585_v47, 8  ;;  %10204 = vst [vmem:[#allocation13_spill] sm:$0xff] %v8591_v55  ;;  %v6106_v28 = vld [vmem:[%s10139_s6 + $0x188] sm:$0xff]  ;;  %v6121_v16 = vld [vmem:[%s10139_s6 + $0x200] sm:$0xff] }
 0xf25   :  { %v3044_v44 = vpack.c.bf16 %v6106_v28, %v6105_v38  ;;  %v6123_v38 = vld [vmem:[%s10139_s6 + $0x210] sm:$0xff]  ;;  %v6124_v28 = vld [vmem:[%s10139_s6 + $0x218] sm:$0xff] }
 0xf26   :  { %v8594_v60 = vmul.f32 %v2695_v45, %v8585_v47  ;;  %v6122_v45 = vld [vmem:[%s10139_s6 + $0x208] sm:$0xff] }
 0xf28   :  { %10205 = vst [vmem:[#allocation14_spill] sm:$0xff] %v8594_v60  ;;  %v6680_v23 = vpack.c.bf16 %v8594_v60, %v8591_v55  ;;  %v2965_v60 = vmul.f32 %v7533_v11, %v8579_v59 }
 0xf2a   :  { %6681 = vmatpush3.bf16.msra.mxu1 %v6680_v23  ;;  %6139 = vmatmul.mubr.msk.bf16.gmra.mrb[36].mxu0 %vm10206_vm2, %v6680_v23  ;;  %v3052_v23 = vpack.c.bf16 %v6122_v45, %v6121_v16  ;;  %v10210_v45 = vmov 2  }
 0xf2b   :  { %3062 = vmatprep.subr.bf16.mxu1 %v10161_v7 }
 0xf42   :  { %6800 = vset.pattern.permute.xlu1 %v10198_v52 }
 0xf98   :  { %v2716_v58 = vpop.trf.xlu1 }
 0xf99   :  { %v8608_v31 = vrot.slane %v2716_v58, %v7483_v51  ;;  %v3053_v58 = vpack.c.bf16 %v6124_v28, %v6123_v38 }
 0xf9b   :  { %v8614_v5 = vmul.f32 %v7145_v39, %v8608_v31  ;;  %v6126_v39 = vld [vmem:[%s10139_s6 + $0x228] sm:$0xff] }
 0xf9d   :  { %6474 = vmatmul.mubr.msk.f32.vlgmr.msra.gmra.mrb[10].mxu1 %vm414_vm5, %v8614_v5 }
 0xf9e   :  { %3063 = vmatpush1.bf16.msra.mxu1 %v3044_v44  ;;  %v6125_v44 = vld [vmem:[%s10139_s6 + $0x220] sm:$0xff] }
 0xf9f   :  { %3064 = vmatprep.subr.bf16.mxu1 %v10161_v7  ;;  %v3054_v32 = vpack.c.bf16 %v6126_v39, %v6125_v44 }
 0xfa2   :  { %3065 = vmatpush1.bf16.msra.mxu1 %v3045_v43  ;;  %v6128_v43 = vld [vmem:[%s10139_s6 + $0x238] sm:$0xff] }
 0xfa3   :  { %3066 = vmatprep.subr.bf16.mxu1 %v10161_v7  ;;  %v3055_v48 = vpack.c.bf16 %v6128_v43, %v6127_v0 }
 0xfa6   :  { %3067 = vmatpush1.bf16.msra.mxu1 %v3046_v4 }
 0xfa7   :  { %3068 = vmatprep.subr.bf16.mxu1 %v10161_v7 }
 0xfaa   :  { %3069 = vmatpush1.bf16.msra.mxu1 %v3047_v15 }
 0xfab   :  { %3070 = vmatprep.subr.bf16.mxu1 %v10161_v7 }
 0xfae   :  { %3071 = vmatpush1.bf16.msra.mxu1 %v3048_v19 }
 0xfaf   :  { %3072 = vmatprep.subr.bf16.mxu1 %v10161_v7 }
 0xfb2   :  { %3073 = vmatpush1.bf16.msra.mxu1 %v3049_v1 }
 0xfb3   :  { %3074 = vmatprep.subr.bf16.mxu1 %v10161_v7 }
 0xfb6   :  { %3075 = vmatpush1.bf16.msra.mxu1 %v3050_v24 }
 0xfb7   :  { %3076 = vmatprep.subr.bf16.mxu1 %v10161_v7 }
 0xfba   :  { %3077 = vmatpush1.bf16.msra.mxu1 %v3051_v46 }
 0xfbb   :  { %3078 = vmatprep.subr.bf16.mxu1 %v10161_v7 }
 0xfbe   :  { %3079 = vmatpush1.bf16.msra.mxu1 %v3052_v23 }
 0xfbf   :  { %3080 = vmatprep.subr.bf16.mxu1 %v10161_v7 }
 0xfc2   :  { %3081 = vmatpush1.bf16.msra.mxu1 %v3053_v58 }
 0xfc3   :  { %3082 = vmatprep.subr.bf16.mxu1 %v10161_v7 }
 0xfc6   :  { %3083 = vmatpush1.bf16.msra.mxu1 %v3054_v32 }
 0xfc7   :  { %3084 = vmatprep.subr.bf16.mxu1 %v10161_v7 }
 0xfca   :  { %3085 = vmatpush1.bf16.msra.mxu1 %v3055_v48 }
 0xfcb   :  { %6698 = vmatprep.subr.bf16.mxu1 %v10202_v6 }
 0xff0   :  { %v3021_v9 = vpop.f32.mrb[32].mxu0 }
 0xff1   :  { %v3023_v4 = vpop.f32.mrb[33].mxu0 }
 0xff2   :  { %v3025_v42 = vpop.f32.mrb[34].mxu0 }
 0xff3   :  { %v8696_v13 = vpack.c.bf16 %v3025_v42, %v3021_v9  ;;  %v3027_v15 = vpop.f32.mrb[35].mxu0 }
 0xff4   :  { %v8698_v62 = vpack.c.bf16 %v3027_v15, %v3023_v4 }
 0xff6   :  { %6140 = vmatprep.mubr.msk.bf16.mxu1 %vm10207_vm8, %v8698_v62 }
 0xff7   :  { %3095 = vmatmul.mubr.bf16.vlgmr.msra.gmra.mrb[20].mxu1 %v8696_v13 }
 0xffd   :  { %v3031_v8 = vpop.f32.mrb[36].mxu0 }
 0xffe   :  { %v3033_v19 = vpop.f32.mrb[37].mxu0 }
 0xfff   :  { %v3035_v40 = vpop.f32.mrb[38].mxu0 }
0x1000   :  { %v8703_v22 = vpack.c.bf16 %v3035_v40, %v3031_v8  ;;  %v3037_v1 = vpop.f32.mrb[39].mxu0 }
0x1001   :  { %v8705_v37 = vpack.c.bf16 %v3037_v1, %v3033_v19 }
0x1003   :  { %6141 = vmatprep.mubr.msk.bf16.mxu1 %vm10208_vm3, %v8705_v37 }
0x1004   :  { %3103 = vmatmul.mubr.bf16.gmra.mrb[24].mxu1 %v8703_v22 }
0x1005   :  { %6530 = vmatprep.mubr.msk.f32.mxu1 %vm10209_vm6, %v10197_v29 }
0x1070   :  { %v8712_v25 = vpop.f32.mrb[10].mxu1 }
0x1071   :  { %v6475_v24 = vpop.f32.mrb[11].mxu1 }
0x10ca   :  { %v3096_v30 = vpop.f32.mrb[20].mxu1 }
0x10cb   :  { %3257 = vrot.lane.b32.xlu0 %v3096_v30, %s7191_s29  ;;  %v3098_v34 = vpop.f32.mrb[21].mxu1 }
0x10cc   :  { %v3099_v46 = vpop.f32.mrb[22].mxu1 }
0x10cd   :  { %3306 = vperm.xlu1 %6800, %v3099_v46   ;;  %v3101_v16 = vpop.f32.mrb[23].mxu1 }
0x10cf   :  { %3115 = vrot.lane.b32.xlu0 %v3096_v30, %s7192_s30 }
0x10d1   :  { %6802 = vset.pattern.permute.xlu1 %v10210_v45 }
0x10d2   :  { %3562 = vperm.xlu1 %6802, %v3099_v46  }
0x10d3   :  { %3513 = vrot.lane.b32.xlu0 %v3096_v30, %s7193_s16 }
0x10d7   :  { %3302 = vperm.xlu0 %6797, %v3096_v30   ;;  %v3104_v23 = vpop.f32.mrb[24].mxu1 }
0x10d8   :  { %3566 = vperm.xlu1 %6802, %v3104_v23   ;;  %v3106_v38 = vpop.f32.mrb[25].mxu1 }
0x10d9   :  { %v3107_v28 = vpop.f32.mrb[26].mxu1 }
0x10da   :  { %v3109_v58 = vpop.f32.mrb[27].mxu1 }
0x10db   :  { %6798 = vset.pattern.permute.xlu0 %v10161_v7  ;;  %v2956_v58 = vmul.f32 %v8608_v31, %v8560_v26 }
0x10dc   :  { %3160 = vperm.xlu0 %6798, %v3096_v30   ;;  %6806 = vset.pattern.permute.xlu1 %v10161_v7 }
0x10dd   :  { %3172 = vperm.xlu1 %6806, %v3107_v28  }
0x10e0   :  { %6799 = vset.pattern.permute.xlu0 %v10210_v45 }
0x10e1   :  { %3558 = vperm.xlu0 %6799, %v3096_v30  }
0x10e5   :  { %3259 = vrot.lane.b32.xlu0 %v3099_v46, %s7191_s29 }
0x10e6   :  { %6801 = vset.pattern.permute.xlu0 %v10161_v7 }
0x10e9   :  { %3117 = vrot.lane.b32.xlu0 %v3099_v46, %s7192_s30 }
0x10ed   :  { %3515 = vrot.lane.b32.xlu0 %v3099_v46, %s7193_s16 }
0x10f1   :  { %3164 = vperm.xlu0 %6801, %v3099_v46  }
0x10f5   :  { %3261 = vrot.lane.b32.xlu0 %v3104_v23, %s7191_s29 }
0x10f6   :  { %6803 = vset.pattern.permute.xlu0 %v10198_v52 }
0x10f9   :  { %3119 = vrot.lane.b32.xlu0 %v3104_v23, %s7192_s30 }
0x10fd   :  { %3517 = vrot.lane.b32.xlu0 %v3104_v23, %s7193_s16 }
0x1101   :  { %3310 = vperm.xlu0 %6803, %v3104_v23  }
0x1105   :  { %6804 = vset.pattern.permute.xlu0 %v10161_v7 }
0x1106   :  { %3168 = vperm.xlu0 %6804, %v3104_v23  }
0x110a   :  { %3263 = vrot.lane.b32.xlu0 %v3107_v28, %s7191_s29 }
0x110b   :  { %6805 = vset.pattern.permute.xlu0 %v10198_v52 }
0x110e   :  { %3121 = vrot.lane.b32.xlu0 %v3107_v28, %s7192_s30 }
0x1112   :  { %3519 = vrot.lane.b32.xlu0 %v3107_v28, %s7193_s16 }
0x1116   :  { %3314 = vperm.xlu0 %6805, %v3107_v28  }
0x111a   :  { %6807 = vset.pattern.permute.xlu0 %v10210_v45 }
0x111b   :  { %3570 = vperm.xlu0 %6807, %v3107_v28   ;;  %v2955_v28 = vmul.f32 %v8608_v31, %v8563_v14 }
0x113d   :  { %v3258_v44 = vpop.permute.xlu0 %3257 }
0x113e   :  { %3269 = vxpose.xlu1.b32.start [1/4] (short) (narrow) %v3258_v44, 8 }
0x1141   :  { %v3116_v39 = vpop.permute.xlu0 %3115 }
0x1142   :  { %3127 = vxpose.xlu0.b32.start [1/4] (short) (narrow) %v3116_v39, 8 }
0x1145   :  { %v3514_v32 = vpop.permute.xlu0 %3513 }
0x114c   :  { %v3307_v16 = vpop.permute.xlu1 %3306 }
0x1151   :  { %v8744_v23 = vpop.permute.xlu1 %3562 }
0x1156   :  { %v3303_v0 = vpop.permute.xlu0 %3302 }
0x1157   :  { %v8746_v38 = vpop.permute.xlu1 %3566 }
0x115b   :  { %v8735_v43 = vpop.permute.xlu0 %3160 }
0x115c   :  { %v3173_v39 = vpop.permute.xlu1 %3172 }
0x1160   :  { %v8737_v48 = vpop.permute.xlu0 %3558 }
0x1164   :  { %v3260_v9 = vpop.permute.xlu0 %3259 }
0x1165   :  { %3270 = vxpose.xlu1.b32.cont [2/4] (short) (narrow) %v3260_v9, 8 }
0x1168   :  { %v3118_v4 = vpop.permute.xlu0 %3117 }
0x1169   :  { %3128 = vxpose.xlu0.b32.cont [2/4] (short) (narrow) %v3118_v4, 8  ;;  %v7147_v4 = vld [vmem:[%s10134_s1 + $0x8] sm:$0xff] }
0x116c   :  { %v3516_v42 = vpop.permute.xlu0 %3515 }
0x1170   :  { %v8739_v15 = vpop.permute.xlu0 %3164 }
0x1174   :  { %v3262_v8 = vpop.permute.xlu0 %3261 }
0x1175   :  { %3271 = vxpose.xlu1.b32.cont [3/4] (short) (narrow) %v3262_v8, 8  ;;  %v2957_v8 = vmul.f32 %v8608_v31, %v8579_v59 }
0x1178   :  { %v3120_v19 = vpop.permute.xlu0 %3119 }
0x1179   :  { %3129 = vxpose.xlu0.b32.cont [3/4] (short) (narrow) %v3120_v19, 8  ;;  %v2958_v19 = vmul.f32 %v8608_v31, %v8585_v47 }
0x117c   :  { %v3518_v40 = vpop.permute.xlu0 %3517 }
0x1180   :  { %v3311_v1 = vpop.permute.xlu0 %3310 }
0x1185   :  { %v8741_v24 = vpop.permute.xlu0 %3168 }
0x1189   :  { %v3264_v30 = vpop.permute.xlu0 %3263 }
0x118a   :  { %3272 = vxpose.xlu1.b32.end [4/4] (short) (narrow) %v3264_v30, 8  ;;  %v2964_v30 = vmul.f32 %v7527_v3, %v8560_v26 }
0x118d   :  { %v3122_v34 = vpop.permute.xlu0 %3121 }
0x118e   :  { %3130 = vxpose.xlu0.b32.end [4/4] (short) (narrow) %v3122_v34, 8 }
0x1191   :  { %v3520_v46 = vpop.permute.xlu0 %3519 }
0x1192   :  { %3525 = vxpose.xlu0.b32.start [1/4] (short) (narrow) %v3514_v32, 8  ;;  %v7146_v32 = vld [vmem:[%s10134_s1] sm:$0xff] }
0x1193   :  { %v2959_v9 = vmul.f32 %v7146_v32, %v2955_v28 }
0x1195   :  { %v3315_v44 = vpop.permute.xlu0 %3314 }
0x1196   :  { %3526 = vxpose.xlu0.b32.cont [2/4] (short) (narrow) %v3516_v42, 8  ;;  %v2960_v42 = vmul.f32 %v7147_v4, %v2956_v58  ;;  %v7148_v58 = vld [vmem:[%s10134_s1 + $0x10] sm:$0xff] }
0x1197   :  { %v2961_v4 = vmul.f32 %v7148_v58, %v2957_v8 }
0x1198   :  { %v8770_v32 = vadd.f32 %v2964_v30, %v2960_v42 }
0x1199   :  { %v8785_v8 = vadd.f32 %v2965_v60, %v2961_v4 }
0x119a   :  { %3527 = vxpose.xlu0.b32.cont [3/4] (short) (narrow) %v3518_v40, 8  ;;  %v2963_v40 = vmul.f32 %v7524_v2, %v8563_v14  ;;  %v8766_v34 = vpop.permute.xlu0 %3570  ;;  %vm3196_vm10 = vcmp.gt.f32.partialorder %v8770_v32, 0.0 }
0x119b   :  { %vm3197_vm15 = vcmp.gt.f32.partialorder %v8785_v8, 0.0 }
0x119c   :  { %v8768_v28 = vadd.f32 %v2963_v40, %v2959_v9  ;;  %v2966_v9 = vmul.f32 %v7536_v12, %v8585_v47 }
0x119e   :  { %3528 = vxpose.xlu0.b32.end [4/4] (short) (narrow) %v3520_v46, 8  ;;  %vm3195_vm4 = vcmp.gt.f32.partialorder %v8768_v28, 0.0 }
0x11c7   :  { %6808 = vset.pattern.permute.xlu0 %v10161_v7  ;;  %v7149_v7 = vld [vmem:[%s10134_s1 + $0x18] sm:$0xff] }
0x11c8   :  { %v2962_v27 = vmul.f32 %v7149_v7, %v2958_v19 }
0x11ca   :  { %v8787_v7 = vadd.f32 %v2966_v9, %v2962_v27 }
0x11cc   :  { %vm3198_vm3 = vcmp.gt.f32.partialorder %v8787_v7, 0.0 }
0x11fe   :  { %v3285_v46 = vpop.trf.xlu1 }
0x11ff   :  { %v3320_v55 = vrot.slane %v3285_v46, %v7483_v51 }
0x1201   :  { %v3321_v42 = vadd.f32 %v3320_v55, %v3303_v0  ;;  %v3322_v40 = vadd.f32 %v3320_v55, %v3307_v16  ;;  %v3323_v30 = vadd.f32 %v3320_v55, %v3311_v1  ;;  %v3324_v33 = vadd.f32 %v3320_v55, %v3315_v44 }
0x1202   :  { %v3143_v17 = vpop.trf.xlu0 }
0x1203   :  { %v3178_v19 = vrot.slane %v3143_v17, %v7483_v51  ;;  %vm3325_vm9 = vcmp.ge.f32.partialorder %v3321_v42, 0.0  ;;  %v3329_v46 = vmul.f32 0.2, %v3321_v42  ;;  %vm3326_vm0 = vcmp.ge.f32.partialorder %v3322_v40, 0.0 }
0x1204   :  { %v3330_v58 = vmul.f32 0.2, %v3322_v40  ;;  %vm3327_vm7 = vcmp.ge.f32.partialorder %v3323_v30, 0.0  ;;  %v3331_v0 = vmul.f32 0.2, %v3323_v30  ;;  %vm3328_vm11 = vcmp.ge.f32.partialorder %v3324_v33, 0.0 }
0x1205   :  { %v3333_v1 = vsel %vm3325_vm9, %v3321_v42, %v3329_v46  ;;  %v3180_v55 = vadd.f32 %v3178_v19, %v8739_v15  ;;  %v3332_v16 = vmul.f32 0.2, %v3324_v33  ;;  %v3182_v44 = vadd.f32 %v3178_v19, %v3173_v39 }
0x1206   :  { %v8793_v60 = vsel %vm3195_vm4, %v3333_v1, -1e+30  ;;  %v3334_v27 = vsel %vm3326_vm0, %v3322_v40, %v3330_v58  ;;  %v3335_v4 = vsel %vm3327_vm7, %v3323_v30, %v3331_v0  ;;  %v3179_v17 = vadd.f32 %v3178_v19, %v8735_v43 }
0x1207   :  { %v3341_v9 = vsel %vm414_vm5, %v8793_v60, -inf  ;;  %v8800_v41 = vsel %vm3196_vm10, %v3334_v27, -1e+30  ;;  %vm3184_vm13 = vcmp.ge.f32.partialorder %v3180_v55, 0.0  ;;  %v8807_v39 = vsel %vm3197_vm15, %v3335_v4, -1e+30 }
0x1208   :  { %3342 = vmax.xlane.f32.xlu1 %v3341_v9  ;;  %v3344_v15 = vsel %vm414_vm5, %v8800_v41, -inf  ;;  %v3188_v42 = vmul.f32 0.2, %v3180_v55  ;;  %v3336_v43 = vsel %vm3328_vm11, %v3324_v33, %v3332_v16  ;;  %vm3186_vm2 = vcmp.ge.f32.partialorder %v3182_v44, 0.0 }
0x1209   :  { %3345 = vmax.xlane.f32.xlu0 %v3344_v15  ;;  %v3190_v40 = vmul.f32 0.2, %v3182_v44  ;;  %vm3183_vm8 = vcmp.ge.f32.partialorder %v3179_v17, 0.0  ;;  %v3187_v46 = vmul.f32 0.2, %v3179_v17  ;;  %v3181_v58 = vadd.f32 %v3178_v19, %v8741_v24 }
0x120a   :  { %v3192_v30 = vsel %vm3184_vm13, %v3180_v55, %v3188_v42  ;;  %v3347_v0 = vsel %vm414_vm5, %v8807_v39, -inf  ;;  %v8822_v55 = vsel %vm3198_vm3, %v3336_v43, -1e+30 }
0x120b   :  { %v8815_v1 = vsel %vm3196_vm10, %v3192_v30, -1e+30  ;;  %v3194_v27 = vsel %vm3186_vm2, %v3182_v44, %v3190_v40  ;;  %v3191_v19 = vsel %vm3183_vm8, %v3179_v17, %v3187_v46  ;;  %vm3185_vm9 = vcmp.ge.f32.partialorder %v3181_v58, 0.0 }
0x120c   :  { %3348 = vmax.xlane.f32.xlu1 %v3347_v0  ;;  %v3206_v33 = vsel %vm414_vm5, %v8815_v1, -inf  ;;  %v8826_v24 = vsel %vm3198_vm3, %v3194_v27, -1e+30  ;;  %v3189_v16 = vmul.f32 0.2, %v3181_v58  ;;  %v3350_v4 = vsel %vm414_vm5, %v8822_v55, -inf }
0x120d   :  { %3207 = vmax.xlane.f32.xlu0 %v3206_v33  ;;  %v3212_v44 = vsel %vm414_vm5, %v8826_v24, -inf  ;;  %v8834_v9 = vsel %vm3195_vm4, %v3191_v19, -1e+30  ;;  %vm10212_vm8 = vcmask 523264  }
0x120e   :  { %v3193_v15 = vsel %vm3185_vm9, %v3181_v58, %v3189_v16  ;;  %v3203_v17 = vsel %vm414_vm5, %v8834_v9, -inf }
0x120f   :  { %v8841_v40 = vsel %vm3197_vm15, %v3193_v15, -1e+30 }
0x1210   :  { %3351 = vmax.xlane.f32.xlu1 %v3350_v4  ;;  %v3209_v27 = vsel %vm414_vm5, %v8841_v40, -inf }
0x1211   :  { %3213 = vmax.xlane.f32.xlu0 %v3212_v44 }
0x1212   :  { %v3541_v42 = vpop.trf.xlu0 }
0x1213   :  { %v3576_v43 = vrot.slane %v3541_v42, %v7483_v51 }
0x1214   :  { %3204 = vmax.xlane.f32.xlu1 %v3203_v17 }
0x1215   :  { %v3578_v30 = vadd.f32 %v3576_v43, %v8744_v23  ;;  %v3577_v46 = vadd.f32 %v3576_v43, %v8737_v48  ;;  %v3580_v0 = vadd.f32 %v3576_v43, %v8766_v34  ;;  %v3579_v58 = vadd.f32 %v3576_v43, %v8746_v38 }
0x1217   :  { %vm3582_vm0 = vcmp.ge.f32.partialorder %v3578_v30, 0.0  ;;  %v3586_v33 = vmul.f32 0.2, %v3578_v30  ;;  %vm3581_vm7 = vcmp.ge.f32.partialorder %v3577_v46, 0.0  ;;  %v3585_v19 = vmul.f32 0.2, %v3577_v46 }
0x1218   :  { %3210 = vmax.xlane.f32.xlu1 %v3209_v27  ;;  %vm3584_vm11 = vcmp.ge.f32.partialorder %v3580_v0, 0.0  ;;  %v3588_v16 = vmul.f32 0.2, %v3580_v0  ;;  %vm3583_vm13 = vcmp.ge.f32.partialorder %v3579_v58, 0.0  ;;  %v3587_v4 = vmul.f32 0.2, %v3579_v58 }
0x1219   :  { %v3590_v44 = vsel %vm3582_vm0, %v3578_v30, %v3586_v33  ;;  %v3589_v23 = vsel %vm3581_vm7, %v3577_v46, %v3585_v19 }
0x121a   :  { %v8851_v48 = vsel %vm3196_vm10, %v3590_v44, -1e+30  ;;  %v8855_v38 = vsel %vm3195_vm4, %v3589_v23, -1e+30  ;;  %v3592_v34 = vsel %vm3584_vm11, %v3580_v0, %v3588_v16  ;;  %v3591_v15 = vsel %vm3583_vm13, %v3579_v58, %v3587_v4 }
0x121b   :  { %v3600_v42 = vsel %vm414_vm5, %v8851_v48, -inf  ;;  %v3597_v43 = vsel %vm414_vm5, %v8855_v38, -inf  ;;  %v8863_v17 = vsel %vm3198_vm3, %v3592_v34, -1e+30  ;;  %v8867_v30 = vsel %vm3197_vm15, %v3591_v15, -1e+30  ;;  %vm10213_vm3 = vmmov %vm10212_vm8 }
0x121c   :  { %3601 = vmax.xlane.f32.xlu0 %v3600_v42  ;;  %3598 = vmax.xlane.f32.xlu1 %v3597_v43  ;;  %v3606_v46 = vsel %vm414_vm5, %v8863_v17, -inf  ;;  %v3603_v0 = vsel %vm414_vm5, %v8867_v30, -inf  ;;  %vm10214_vm9 = vmmov %vm10213_vm3 }
0x121d   :  { %vm10215_vm0 = vmmov %vm10213_vm3 }
0x1220   :  { %3607 = vmax.xlane.f32.xlu0 %v3606_v46  ;;  %3604 = vmax.xlane.f32.xlu1 %v3603_v0 }
0x1231   :  { %3397 = vrot.lane.b32.xlu1 %v8696_v13, %s7196_s24 }
0x1295   :  { %v3343_v58 = vpop.xlane.xlu1 %3342 }
0x1296   :  { %v3353_v27 = vsub.f32 %v8793_v60, %v3343_v58  ;;  %v3346_v33 = vpop.xlane.xlu0 %3345 }
0x1297   :  { %v3354_v19 = vsub.f32 %v8800_v41, %v3346_v33 }
0x1298   :  { %v3357_v16 = vmul.f32 1.442695, %v3353_v27 }
0x1299   :  { %v3359_v4 = vmul.f32 1.442695, %v3354_v19  ;;  %v3349_v44 = vpop.xlane.xlu1 %3348 }
0x129a   :  { %6977 = vpow2.f32 %v3357_v16  ;;  %v3355_v23 = vsub.f32 %v8807_v39, %v3349_v44  ;;  %v3208_v34 = vpop.xlane.xlu0 %3207 }
0x129b   :  { %6979 = vpow2.f32 %v3359_v4  ;;  %v3216_v15 = vsub.f32 %v8815_v1, %v3208_v34 }
0x129c   :  { %v3361_v42 = vmul.f32 1.442695, %v3355_v23 }
0x129d   :  { %v3221_v43 = vmul.f32 1.442695, %v3216_v15  ;;  %v3352_v46 = vpop.xlane.xlu1 %3351 }
0x129e   :  { %6981 = vpow2.f32 %v3361_v42  ;;  %v3356_v0 = vsub.f32 %v8822_v55, %v3352_v46  ;;  %v3214_v60 = vpop.xlane.xlu0 %3213 }
0x129f   :  { %v3218_v58 = vsub.f32 %v8826_v24, %v3214_v60  ;;  %6983 = vpow2.f32 %v3221_v43 }
0x12a0   :  { %v3363_v41 = vmul.f32 1.442695, %v3356_v0 }
0x12a1   :  { %v3225_v27 = vmul.f32 1.442695, %v3218_v58  ;;  %v3205_v33 = vpop.xlane.xlu1 %3204 }
0x12a2   :  { %6985 = vpow2.f32 %v3363_v41  ;;  %v3215_v39 = vsub.f32 %v8834_v9, %v3205_v33 }
0x12a3   :  { %6987 = vpow2.f32 %v3225_v27 }
0x12a4   :  { %v6978_v19 = vpop.eup %6977  ;;  %v3219_v16 = vmul.f32 1.442695, %v3215_v39 }
0x12a5   :  { %v6980_v4 = vpop.eup %6979  ;;  %v3211_v1 = vpop.xlane.xlu1 %3210  ;;  %v8883_v44 = vmul.f32 %v6978_v19, %v8768_v28 }
0x12a6   :  { %6989 = vpow2.f32 %v3219_v16  ;;  %v3217_v55 = vsub.f32 %v8841_v40, %v3211_v1  ;;  %v8887_v24 = vmul.f32 %v6980_v4, %v8770_v32 }
0x12a7   :  { %v3369_v23 = vsel %vm414_vm5, %v8883_v44, 0.0 }
0x12a8   :  { %v6982_v34 = vpop.eup %6981  ;;  %v3223_v15 = vmul.f32 1.442695, %v3217_v55  ;;  %3370 = vadd.xlane.f32.xlu1 %v3369_v23  ;;  %v3372_v9 = vsel %vm414_vm5, %v8887_v24, 0.0 }
0x12a9   :  { %3373 = vadd.xlane.f32.xlu0 %v3372_v9  ;;  %v3599_v42 = vpop.xlane.xlu1 %3598  ;;  %v3602_v43 = vpop.xlane.xlu0 %3601  ;;  %v8894_v46 = vmul.f32 %v6982_v34, %v8785_v8 }
0x12aa   :  { %6991 = vpow2.f32 %v3223_v15  ;;  %v3609_v40 = vsub.f32 %v8855_v38, %v3599_v42  ;;  %v3610_v0 = vsub.f32 %v8851_v48, %v3602_v43  ;;  %v6984_v60 = vpop.eup %6983 }
0x12ab   :  { %v3375_v58 = vsel %vm414_vm5, %v8894_v46, 0.0  ;;  %v8908_v55 = vmul.f32 %v6984_v60, %v8770_v32 }
0x12ac   :  { %v6986_v41 = vpop.eup %6985  ;;  %v3613_v27 = vmul.f32 1.442695, %v3609_v40  ;;  %v3615_v33 = vmul.f32 1.442695, %v3610_v0  ;;  %3376 = vadd.xlane.f32.xlu1 %v3375_v58 }
0x12ad   :  { %v3605_v39 = vpop.xlane.xlu1 %3604  ;;  %v3608_v19 = vpop.xlane.xlu0 %3607  ;;  %v8901_v16 = vmul.f32 %v6986_v41, %v8787_v7 }
0x12ae   :  { %6993 = vpow2.f32 %v3613_v27  ;;  %v3611_v4 = vsub.f32 %v8867_v30, %v3605_v39  ;;  %v3612_v38 = vsub.f32 %v8863_v17, %v3608_v19  ;;  %v6988_v1 = vpop.eup %6987  ;;  %v3234_v30 = vsel %vm414_vm5, %v8908_v55, 0.0 }
0x12af   :  { %6995 = vpow2.f32 %v3615_v33  ;;  %v3378_v48 = vsel %vm414_vm5, %v8901_v16, 0.0  ;;  %v8918_v43 = vmul.f32 %v6988_v1, %v8787_v7 }
0x12b0   :  { %v6990_v23 = vpop.eup %6989  ;;  %v3617_v34 = vmul.f32 1.442695, %v3611_v4  ;;  %3379 = vadd.xlane.f32.xlu0 %v3378_v48  ;;  %v3619_v42 = vmul.f32 1.442695, %v3612_v38 }
0x12b1   :  { %v3398_v15 = vpop.permute.xlu1 %3397  ;;  %v8911_v9 = vmul.f32 %v6990_v23, %v8768_v28  ;;  %v3240_v58 = vsel %vm414_vm5, %v8918_v43, 0.0 }
0x12b2   :  { %6997 = vpow2.f32 %v3617_v34  ;;  %6476 = vmatprep.subr.bf16.mxu0 %v3398_v15  ;;  %v8950_v34 = vld [vmem:[%s10135_s2] sm:$0xff] }
0x12b3   :  { %6477 = vmatpush3.bf16.msra.mxu0 %v3398_v15  ;;  %v3231_v17 = vsel %vm414_vm5, %v8911_v9, 0.0  ;;  %6999 = vpow2.f32 %v3619_v42 }
0x12b4   :  { %v6992_v40 = vpop.eup %6991  ;;  %3232 = vadd.xlane.f32.xlu1 %v3231_v17  ;;  %3235 = vadd.xlane.f32.xlu0 %v3234_v30 }
0x12b5   :  { %v8921_v0 = vmul.f32 %v6992_v40, %v8785_v8 }
0x12b7   :  { %v3237_v60 = vsel %vm414_vm5, %v8921_v0, 0.0 }
0x12b8   :  { %v6994_v41 = vpop.eup %6993  ;;  %3238 = vadd.xlane.f32.xlu1 %v3237_v60  ;;  %3241 = vadd.xlane.f32.xlu0 %v3240_v58 }
0x12b9   :  { %v6996_v27 = vpop.eup %6995  ;;  %v8928_v33 = vmul.f32 %v6994_v41, %v8768_v28 }
0x12ba   :  { %v8933_v19 = vmul.f32 %v6996_v27, %v8770_v32 }
0x12bb   :  { %v3625_v39 = vsel %vm414_vm5, %v8928_v33, 0.0 }
0x12bc   :  { %v6998_v4 = vpop.eup %6997  ;;  %3626 = vadd.xlane.f32.xlu0 %v3625_v39  ;;  %v3628_v38 = vsel %vm414_vm5, %v8933_v19, 0.0 }
0x12bd   :  { %v8938_v1 = vmul.f32 %v6998_v4, %v8785_v8  ;;  %v7000_v48 = vpop.eup %6999  ;;  %v4025_v8 = vmul.f32 %v8950_v34, %v8608_v31 }
0x12be   :  { %v8943_v23 = vmul.f32 %v7000_v48, %v8787_v7 }
0x12bf   :  { %v3631_v28 = vsel %vm414_vm5, %v8938_v1, 0.0  ;;  %v4029_v15 = vsel %vm414_vm5, %v4025_v8, 0.0 }
0x12c0   :  { %3629 = vadd.xlane.f32.xlu0 %v3628_v38  ;;  %v3634_v32 = vsel %vm414_vm5, %v8943_v23, 0.0 }
0x12c4   :  { %3632 = vadd.xlane.f32.xlu0 %v3631_v28 }
0x12c8   :  { %3635 = vadd.xlane.f32.xlu0 %v3634_v32 }
0x12c9   :  { %3399 = vrot.lane.b32.xlu1 %v8703_v22, %s7196_s24 }
0x12cc   :  { %4030 = vadd.xlane.f32.xlu0 %v4029_v15 }
0x1335   :  { %v3371_v7 = vpop.xlane.xlu1 %3370 }
0x1336   :  { %v3381_v42 = vmax.f32 %v3371_v7, 1e-16  ;;  %v3374_v17 = vpop.xlane.xlu0 %3373 }
0x1337   :  { %v3382_v30 = vmax.f32 %v3374_v17, 1e-16 }
0x1338   :  { %7001 = vrcp.f32 %v3381_v42 }
0x1339   :  { %7003 = vrcp.f32 %v3382_v30  ;;  %v3377_v40 = vpop.xlane.xlu1 %3376 }
0x133a   :  { %v3383_v60 = vmax.f32 %v3377_v40, 1e-16 }
0x133c   :  { %7005 = vrcp.f32 %v3383_v60 }
0x133d   :  { %v3380_v58 = vpop.xlane.xlu0 %3379 }
0x133e   :  { %v3384_v41 = vmax.f32 %v3380_v58, 1e-16 }
0x1340   :  { %7007 = vrcp.f32 %v3384_v41 }
0x1341   :  { %v3233_v27 = vpop.xlane.xlu1 %3232  ;;  %v3236_v39 = vpop.xlane.xlu0 %3235 }
0x1342   :  { %v7002_v4 = vpop.eup %7001  ;;  %v3243_v38 = vmax.f32 %v3233_v27, 1e-16  ;;  %v3244_v48 = vmax.f32 %v3236_v39, 1e-16 }
0x1343   :  { %v7004_v28 = vpop.eup %7003  ;;  %v3389_v32 = vmul.f32 %v7002_v4, %v8883_v44 }
0x1344   :  { %7009 = vrcp.f32 %v3243_v38  ;;  %v3390_v8 = vmul.f32 %v7004_v28, %v8887_v24 }
0x1345   :  { %7011 = vrcp.f32 %v3244_v48  ;;  %v3239_v15 = vpop.xlane.xlu1 %3238  ;;  %v3242_v7 = vpop.xlane.xlu0 %3241 }
0x1346   :  { %v3245_v42 = vmax.f32 %v3239_v15, 1e-16  ;;  %v3246_v17 = vmax.f32 %v3242_v7, 1e-16  ;;  %v3393_v30 = vpack.c.bf16 %v3390_v8, %v3389_v32  ;;  %v7006_v40 = vpop.eup %7005 }
0x1347   :  { %v3391_v44 = vmul.f32 %v7006_v40, %v8894_v46 }
0x1348   :  { %7013 = vrcp.f32 %v3245_v42  ;;  %6480 = vmatprep.mubr.msk.bf16.mxu0 %vm414_vm5, %v3393_v30 }
0x1349   :  { %7015 = vrcp.f32 %v3246_v17  ;;  %v3400_v60 = vpop.permute.xlu1 %3399  ;;  %v3627_v58 = vpop.xlane.xlu0 %3626 }
0x134a   :  { %v7008_v41 = vpop.eup %7007  ;;  %v3637_v27 = vmax.f32 %v3627_v58, 1e-16  ;;  %6478 = vmatprep.subr.bf16.mxu0 %v3400_v60 }
0x134b   :  { %v3392_v24 = vmul.f32 %v7008_v41, %v8901_v16  ;;  %6479 = vmatpush3.bf16.msra.mxu0 %v3400_v60 }
0x134c   :  { %6484 = vmatprep.subr.bf16.mxu0 %v8696_v13  ;;  %7017 = vrcp.f32 %v3637_v27 }
0x134d   :  { %v3394_v39 = vpack.c.bf16 %v3392_v24, %v3391_v44  ;;  %v3630_v4 = vpop.xlane.xlu0 %3629 }
0x134e   :  { %v7010_v38 = vpop.eup %7009  ;;  %v3638_v48 = vmax.f32 %v3630_v4, 1e-16  ;;  %v6135_v4 = vld [vmem:[%s10141_s8 + $0xa8] sm:$0xff] }
0x134f   :  { %v7012_v28 = vpop.eup %7011  ;;  %6481 = vmatmul.mubr.msk.bf16.vlgmr.msra.gmra.mrb[40].mxu0 %vm414_vm5, %v3394_v39  ;;  %v3251_v32 = vmul.f32 %v7010_v38, %v8911_v9  ;;  %v6134_v39 = vld [vmem:[%s10141_s8 + $0xa0] sm:$0xff] }
0x1350   :  { %7019 = vrcp.f32 %v3638_v48  ;;  %6485 = vmatpush3.bf16.msra.mxu0 %v8696_v13  ;;  %v3252_v46 = vmul.f32 %v7012_v28, %v8908_v55  ;;  %v6690_v38 = vpack.c.bf16 %v6135_v4, %v6134_v39  ;;  %v6136_v48 = vld [vmem:[%s10141_s8 + $0xb0] sm:$0xff]  ;;  %v6137_v28 = vld [vmem:[%s10141_s8 + $0xb8] sm:$0xff] }
0x1351   :  { %6486 = vmatprep.subr.bf16.mxu0 %v8703_v22  ;;  %v3633_v16 = vpop.xlane.xlu0 %3632 }
0x1352   :  { %v7014_v8 = vpop.eup %7013  ;;  %v3639_v15 = vmax.f32 %v3633_v16, 1e-16  ;;  %v3255_v7 = vpack.c.bf16 %v3252_v46, %v3251_v32  ;;  %v6694_v32 = vpack.c.bf16 %v6137_v28, %v6136_v48  ;;  %v6148_v46 = vld [vmem:[%s10140_s7 + $0x2] ss:$0 sm:$0xff] }
0x1353   :  { %v7016_v42 = vpop.eup %7015  ;;  %v3253_v17 = vmul.f32 %v7014_v8, %v8921_v0 }
0x1354   :  { %6487 = vmatpush3.bf16.msra.mxu0 %v8703_v22  ;;  %6488 = vmatprep.mubr.msk.bf16.mxu0 %vm414_vm5, %v3255_v7  ;;  %v3254_v9 = vmul.f32 %v7016_v42, %v8918_v43  ;;  %7021 = vrcp.f32 %v3639_v15 }
0x1355   :  { %6492 = vmatprep.subr.bf16.mxu0 %v8698_v62  ;;  %v3636_v13 = vpop.xlane.xlu0 %3635 }
0x1356   :  { %v3640_v55 = vmax.f32 %v3636_v13, 1e-16  ;;  %v7018_v30 = vpop.eup %7017  ;;  %v3256_v40 = vpack.c.bf16 %v3254_v9, %v3253_v17 }
0x1357   :  { %v3645_v58 = vmul.f32 %v7018_v30, %v8928_v33  ;;  %v6131_v33 = vld [vmem:[%s10141_s8 + $0x88] sm:$0xff] }
0x1358   :  { %7023 = vrcp.f32 %v3640_v55 }
0x135a   :  { %v7020_v60 = vpop.eup %7019 }
0x135b   :  { %6489 = vmatmul.mubr.msk.bf16.vlgmr.msra.gmra.mrb[40].mxu0 %vm414_vm5, %v3256_v40  ;;  %v3646_v22 = vmul.f32 %v7020_v60, %v8933_v19 }
0x135c   :  { %6493 = vmatpush3.bf16.msra.mxu0 %v8698_v62  ;;  %v6130_v62 = vld [vmem:[%s10141_s8 + $0x80] sm:$0xff] }
0x135d   :  { %6494 = vmatprep.subr.bf16.mxu0 %v8705_v37  ;;  %v3649_v43 = vpack.c.bf16 %v3646_v22, %v3645_v58  ;;  %v6682_v19 = vpack.c.bf16 %v6131_v33, %v6130_v62 }
0x135e   :  { %v7022_v0 = vpop.eup %7021 }
0x135f   :  { %6496 = vmatprep.mubr.msk.bf16.mxu0 %vm414_vm5, %v3649_v43  ;;  %v3647_v27 = vmul.f32 %v7022_v0, %v8938_v1  ;;  %v6133_v1 = vld [vmem:[%s10141_s8 + $0x98] sm:$0xff] }
0x1360   :  { %6495 = vmatpush3.bf16.msra.mxu0 %v8705_v37  ;;  %v6132_v37 = vld [vmem:[%s10141_s8 + $0x90] sm:$0xff] }
0x1361   :  { %6683 = vmatprep.subr.bf16.mxu0 %v6682_v19 }
0x1362   :  { %v7024_v41 = vpop.eup %7023 }
0x1363   :  { %v3648_v44 = vmul.f32 %v7024_v41, %v8943_v23  ;;  %v6686_v23 = vpack.c.bf16 %v6133_v1, %v6132_v37 }
0x1365   :  { %v3650_v24 = vpack.c.bf16 %v3648_v44, %v3647_v27 }
0x1367   :  { %6497 = vmatmul.mubr.msk.bf16.vlgmr.msra.gmra.mrb[40].mxu0 %vm414_vm5, %v3650_v24 }
0x1368   :  { %6685 = vmatpush3.bf16.msra.mxu0 %v6682_v19 }
0x1369   :  { %6687 = vmatprep.subr.bf16.mxu0 %v6686_v23 }
0x136c   :  { %6689 = vmatpush3.bf16.msra.mxu0 %v6686_v23 }
0x136d   :  { %6691 = vmatprep.subr.bf16.mxu0 %v6690_v38 }
0x1370   :  { %6693 = vmatpush3.bf16.msra.mxu0 %v6690_v38 }
0x1371   :  { %6695 = vmatprep.subr.bf16.mxu0 %v6694_v32 }
0x1374   :  { %6697 = vmatpush3.bf16.msra.mxu0 %v6694_v32 }
0x143a   :  { %v6498_v16 = vpop.f32.mrb[40].mxu0 }
0x143b   :  { %v3712_v8 = vmul.f32 0.33333334, %v6498_v16  ;;  %v3691_v15 = vpop.f32.mrb[41].mxu0 }
0x143c   :  { %v3710_v7 = vmul.f32 0.33333334, %v3691_v15  ;;  %v6499_v42 = vpop.f32.mrb[42].mxu0 }
0x143d   :  { %v9010_v17 = vadd.f32 %v6148_v46, %v3712_v8  ;;  %v3713_v9 = vmul.f32 0.33333334, %v6499_v42  ;;  %v3694_v13 = vpop.f32.mrb[43].mxu0 }
0x143e   :  { %v9012_v55 = vadd.f32 %v6148_v46, %v3710_v7  ;;  %v3711_v30 = vmul.f32 0.33333334, %v3694_v13 }
0x143f   :  { %v9015_v40 = vmul.f32 0.70710677, %v9010_v17  ;;  %v9017_v60 = vadd.f32 %v6148_v46, %v3713_v9 }
0x1440   :  { %v9020_v58 = vmul.f32 0.70710677, %v9012_v55  ;;  %v9026_v0 = vadd.f32 %v6148_v46, %v3711_v30 }
0x1441   :  { %v3742_v22 = vand.u32 2147483647, %v9015_v40  ;;  %v9024_v43 = vmul.f32 0.70710677, %v9017_v60  ;;  %vm3734_vm10 = vcmp.ge.f32.partialorder %v9015_v40, 0.0 }
0x1442   :  { %v3740_v41 = vand.u32 2147483647, %v9020_v58  ;;  %v9031_v33 = vmul.f32 0.70710677, %v9026_v0  ;;  %vm3732_vm4 = vcmp.ge.f32.partialorder %v9020_v58, 0.0 }
0x1443   :  { %v3746_v27 = vmul.f32 0.3275911, %v3742_v22  ;;  %v3743_v24 = vand.u32 2147483647, %v9024_v43  ;;  %v3798_v38 = vsub.f32 0.0, %v3742_v22  ;;  %vm3735_vm15 = vcmp.ge.f32.partialorder %v9024_v43, 0.0 }
0x1444   :  { %v3744_v44 = vmul.f32 0.3275911, %v3740_v41  ;;  %v3741_v1 = vand.u32 2147483647, %v9031_v33  ;;  %v3796_v48 = vsub.f32 0.0, %v3740_v41  ;;  %vm3733_vm2 = vcmp.ge.f32.partialorder %v9031_v33, 0.0 }
0x1445   :  { %v3750_v62 = vadd.f32 1.0, %v3746_v27  ;;  %v3747_v37 = vmul.f32 0.3275911, %v3743_v24  ;;  %v3802_v32 = vmul.f32 %v3798_v38, %v3742_v22  ;;  %v3799_v46 = vsub.f32 0.0, %v3743_v24 }
0x1446   :  { %v3748_v19 = vadd.f32 1.0, %v3744_v44  ;;  %v3745_v39 = vmul.f32 0.3275911, %v3741_v1  ;;  %v3800_v15 = vmul.f32 %v3796_v48, %v3740_v41  ;;  %v3797_v42 = vsub.f32 0.0, %v3741_v1 }
0x1447   :  { %7025 = vrcp.f32 %v3750_v62  ;;  %v3751_v23 = vadd.f32 1.0, %v3747_v37  ;;  %v3808_v30 = vmul.f32 1.442695, %v3802_v32  ;;  %v3803_v44 = vmul.f32 %v3799_v46, %v3743_v24 }
0x1448   :  { %7027 = vrcp.f32 %v3748_v19  ;;  %v3749_v4 = vadd.f32 1.0, %v3745_v39  ;;  %v3804_v19 = vmul.f32 1.442695, %v3800_v15  ;;  %v3725_v43 = vmul.f32 0.5, %v9026_v0 }
0x1449   :  { %7029 = vrcp.f32 %v3751_v23  ;;  %v3810_v61 = vmul.f32 1.442695, %v3803_v44  ;;  %v10216_v0 = vmov 0  }
0x144a   :  { %7031 = vrcp.f32 %v3749_v4  ;;  %v3801_v4 = vmul.f32 %v3797_v42, %v3741_v1 }
0x144b   :  { %7033 = vpow2.f32 %v3808_v30 }
0x144c   :  { %7035 = vpow2.f32 %v3804_v19  ;;  %v3806_v32 = vmul.f32 1.442695, %v3801_v4 }
0x144d   :  { %7037 = vpow2.f32 %v3810_v61 }
0x144e   :  { %7039 = vpow2.f32 %v3806_v32 }
0x1451   :  { %v7026_v28 = vpop.eup %7025 }
0x1452   :  { %v7028_v16 = vpop.eup %7027  ;;  %v3762_v8 = vmul.f32 1.0614054, %v7026_v28 }
0x1453   :  { %v3760_v7 = vmul.f32 1.0614054, %v7028_v16  ;;  %v7030_v13 = vpop.eup %7029 }
0x1454   :  { %v3766_v9 = vadd.f32 -1.4531521, %v3762_v8  ;;  %v3763_v37 = vmul.f32 1.0614054, %v7030_v13  ;;  %v7032_v23 = vpop.eup %7031 }
0x1455   :  { %v3764_v27 = vadd.f32 -1.4531521, %v3760_v7  ;;  %v3761_v22 = vmul.f32 1.0614054, %v7032_v23 }
0x1456   :  { %v3770_v62 = vmul.f32 %v7026_v28, %v3766_v9  ;;  %v3767_v21 = vadd.f32 -1.4531521, %v3763_v37 }
0x1457   :  { %v3768_v39 = vmul.f32 %v7028_v16, %v3764_v27  ;;  %v3765_v8 = vadd.f32 -1.4531521, %v3761_v22 }
0x1458   :  { %v3774_v36 = vadd.f32 1.4214138, %v3770_v62  ;;  %v3771_v48 = vmul.f32 %v7030_v13, %v3767_v21 }
0x1459   :  { %v3772_v38 = vadd.f32 1.4214138, %v3768_v39  ;;  %v3769_v46 = vmul.f32 %v7032_v23, %v3765_v8  ;;  %v7034_v39 = vpop.eup %7033 }
0x145a   :  { %v3778_v41 = vmul.f32 %v7026_v28, %v3774_v36  ;;  %v3775_v24 = vadd.f32 1.4214138, %v3771_v48  ;;  %v7036_v4 = vpop.eup %7035 }
0x145b   :  { %v3776_v49 = vmul.f32 %v7028_v16, %v3772_v38  ;;  %v3773_v1 = vadd.f32 1.4214138, %v3769_v46  ;;  %v7038_v32 = vpop.eup %7037  ;;  %v10211_v46 = vmov -1.0  }
0x145c   :  { %v3782_v7 = vadd.f32 -0.28449672, %v3778_v41  ;;  %v3779_v27 = vmul.f32 %v7030_v13, %v3775_v24 }
0x145d   :  { %v3780_v15 = vadd.f32 -0.28449672, %v3776_v49  ;;  %v3777_v37 = vmul.f32 %v7032_v23, %v3773_v1 }
0x145e   :  { %v3786_v9 = vmul.f32 %v7026_v28, %v3782_v7  ;;  %v3783_v30 = vadd.f32 -0.28449672, %v3779_v27  ;;  %v7040_v27 = vpop.eup %7039 }
0x145f   :  { %v3784_v42 = vmul.f32 %v7028_v16, %v3780_v15  ;;  %v3781_v21 = vadd.f32 -0.28449672, %v3777_v37 }
0x1460   :  { %v3790_v62 = vadd.f32 0.2548296, %v3786_v9  ;;  %v3787_v19 = vmul.f32 %v7030_v13, %v3783_v30 }
0x1461   :  { %v3788_v44 = vadd.f32 0.2548296, %v3784_v42  ;;  %v3785_v48 = vmul.f32 %v7032_v23, %v3781_v21 }
0x1462   :  { %v3794_v36 = vmul.f32 %v7026_v28, %v3790_v62  ;;  %v3791_v41 = vadd.f32 0.2548296, %v3787_v19  ;;  %v3736_v28 = vsel %vm3732_vm4, 1.0, %v10211_v46 }
0x1463   :  { %v3792_v22 = vmul.f32 %v7028_v16, %v3788_v44  ;;  %v3789_v8 = vadd.f32 0.2548296, %v3785_v48  ;;  %v3738_v16 = vsel %vm3734_vm10, 1.0, %v10211_v46  ;;  %v3739_v44 = vsel %vm3735_vm15, 1.0, %v10211_v46 }
0x1464   :  { %v3814_v38 = vmul.f32 %v7034_v39, %v3794_v36  ;;  %v3795_v61 = vmul.f32 %v7030_v13, %v3791_v41  ;;  %v3724_v13 = vmul.f32 0.5, %v9012_v55  ;;  %v3726_v39 = vmul.f32 0.5, %v9010_v17 }
0x1465   :  { %v3812_v49 = vmul.f32 %v7036_v4, %v3792_v22  ;;  %v3793_v9 = vmul.f32 %v7032_v23, %v3789_v8  ;;  %v3737_v23 = vsel %vm3733_vm2, 1.0, %v10211_v46 }
0x1466   :  { %v3818_v7 = vsub.f32 1.0, %v3814_v38  ;;  %v3815_v15 = vmul.f32 %v7038_v32, %v3795_v61  ;;  %v3727_v38 = vmul.f32 0.5, %v9017_v60  ;;  %v9069_v61 = vld [vmem:[%s10135_s2 + $0x10] sm:$0xff] }
0x1467   :  { %v3816_v24 = vsub.f32 1.0, %v3812_v49  ;;  %v3813_v58 = vmul.f32 %v7040_v27, %v3793_v9  ;;  %v4027_v8 = vmul.f32 %v9069_v61, %v8608_v31  ;;  %v7153_v9 = vld [vmem:[%s10135_s2 + $0x8] sm:$0xff] }
0x1468   :  { %v3819_v42 = vsub.f32 1.0, %v3815_v15  ;;  %v3822_v40 = vmul.f32 %v3818_v7, %v3738_v16  ;;  %v7152_v7 = vld [vmem:[%s10135_s2 + $0x18] sm:$0xff]  ;;  %v4026_v27 = vmul.f32 %v7153_v9, %v8608_v31 }
0x1469   :  { %v3820_v1 = vmul.f32 %v3816_v24, %v3736_v28  ;;  %v3817_v30 = vsub.f32 1.0, %v3813_v58  ;;  %v4035_v32 = vsel %vm414_vm5, %v4027_v8, 0.0  ;;  %v4028_v24 = vmul.f32 %v7152_v7, %v8608_v31  ;;  %v6155_v58 = vld [vmem:[%s10138_s5 + $0x188] sm:$0xff] }
0x146a   :  { %v3823_v36 = vmul.f32 %v3819_v42, %v3739_v44  ;;  %v3826_v21 = vadd.f32 1.0, %v3822_v40  ;;  %v4032_v16 = vsel %vm414_vm5, %v4026_v27, 0.0  ;;  %v6157_v40 = vld [vmem:[%s10138_s5 + $0x198] sm:$0xff] }
0x146b   :  { %v3824_v62 = vadd.f32 1.0, %v3820_v1  ;;  %v3821_v19 = vmul.f32 %v3817_v30, %v3737_v23  ;;  %v4038_v28 = vsel %vm414_vm5, %v4028_v24, 0.0  ;;  %v6156_v30 = vld [vmem:[%s10138_s5 + $0x190] sm:$0xff] }
0x146c   :  { %v3827_v55 = vadd.f32 1.0, %v3823_v36  ;;  %v9051_v4 = vmul.f32 %v3826_v21, %v3726_v39  ;;  %v9098_v21 = vpop.xlane.xlu0 %4030 }
0x146d   :  { %v9041_v37 = vmul.f32 %v3824_v62, %v3724_v13  ;;  %v3825_v33 = vadd.f32 1.0, %v3821_v19  ;;  %v6154_v13 = vld [vmem:[%s10138_s5 + $0x180] sm:$0xff]  ;;  %v4367_v62 = vpack.c.bf16 %v6157_v40, %v6155_v58  ;;  %v6161_v58 = vld [vmem:[%s10138_s5 + $0x1b8] sm:$0xff] }
0x146e   :  { %v9058_v41 = vmul.f32 %v3827_v55, %v3727_v38  ;;  %v4366_v44 = vpack.c.bf16 %v6156_v30, %v6154_v13  ;;  %v6165_v30 = vld [vmem:[%s10138_s5 + $0x1d8] sm:$0xff] }
0x146f   :  { %6516 = vmatprep.mubr.msk.f32.mxu0 %vm10212_vm8, %v9041_v37  ;;  %v9049_v22 = vmul.f32 %v3825_v33, %v3725_v43  ;;  %4380 = vmatprep.subr.bf16.mxu0 %v4367_v62  ;;  %v6163_v62 = vld [vmem:[%s10138_s5 + $0x1c8] sm:$0xff] }
0x1471   :  { %6517 = vmatmul.mubr.msk.f32.vlgmr.msra.gmra.mrb[44].mxu0 %vm10213_vm3, %v9049_v22 }
0x1472   :  { %6519 = vmatprep.mubr.msk.f32.mxu0 %vm10214_vm9, %v9051_v4  ;;  %4381 = vmatpush1.bf16.msra.mxu0 %v4366_v44  ;;  %v6162_v44 = vld [vmem:[%s10138_s5 + $0x1c0] sm:$0xff] }
0x1475   :  { %6520 = vmatmul.mubr.msk.f32.gmra.mrb[46].mxu0 %vm10215_vm0, %v9058_v41 }
0x1476   :  { %4412 = vmatprep.mubr.bf16.mxu0 %v10216_v0 }
0x1544   :  { %v6518_v17 = vpop.f32.mrb[44].mxu0 }
0x1545   :  { %3972 = vperm.xlu1 %6806, %v6518_v17   ;;  %v3910_v48 = vpop.f32.mrb[45].mxu0 }
0x1546   :  { %3967 = vperm.xlu0 %6808, %v3910_v48   ;;  %7041 = vtanh.f32 %v3910_v48 }
0x1547   :  { %7043 = vtanh.f32 %v6518_v17 }
0x1548   :  { %v6521_v49 = vpop.f32.mrb[46].mxu0 }
0x1549   :  { %3982 = vperm.xlu1 %6806, %v6521_v49   ;;  %v9063_v60 = vpop.f32.mrb[47].mxu0  ;;  %7045 = vtanh.f32 %v6521_v49 }
0x154a   :  { %7047 = vtanh.f32 %v9063_v60 }
0x154d   :  { %3977 = vperm.xlu1 %6806, %v9063_v60  }
0x1550   :  { %v7042_v15 = vpop.eup %7041 }
0x1551   :  { %v7044_v1 = vpop.eup %7043 }
0x1553   :  { %v7046_v42 = vpop.eup %7045 }
0x1565   :  { %4036 = vadd.xlane.f32.xlu0 %v4035_v32 }
0x1569   :  { %4039 = vadd.xlane.f32.xlu0 %v4038_v28 }
0x1576   :  { %3929 = vxpose.xlu1.b32.start [1/4] (short) (narrow) %v3910_v48, 8 }
0x157a   :  { %3930 = vxpose.xlu1.b32.cont [2/4] (short) (narrow) %v6518_v17, 8 }
0x157e   :  { %3931 = vxpose.xlu1.b32.cont [3/4] (short) (narrow) %v9063_v60, 8 }
0x157f   :  { %4067 = vperm.xlu0 %6808, %v7042_v15  }
0x1582   :  { %3932 = vxpose.xlu1.b32.end [4/4] (short) (narrow) %v6521_v49, 8 }
0x15a9   :  { %4033 = vadd.xlane.f32.xlu1 %v4032_v16 }
0x15ba   :  { %4072 = vperm.xlu1 %6806, %v7044_v1  }
0x15be   :  { %4082 = vperm.xlu1 %6806, %v7046_v42  }
0x15c2   :  { %6809 = vset.pattern.permute.xlu1 %v10198_v52 }
0x15c4   :  { %v3973_v23 = vpop.permute.xlu1 %3972 }
0x15c5   :  { %v3968_v39 = vpop.permute.xlu0 %3967 }
0x15c8   :  { %v3983_v36 = vpop.permute.xlu1 %3982 }
0x15cc   :  { %v3978_v19 = vpop.permute.xlu1 %3977 }
0x15f6   :  { %v3945_v43 = vpop.trf.xlu1 }
0x15f7   :  { %v3964_v33 = vrot.slane %v3945_v43, %v7483_v51  ;;  %v6167_v43 = vld [vmem:[%s10138_s5 + $0x1e8] sm:$0xff] }
0x15f9   :  { %vm3986_vm7 = vcmp.gt.f32.partialorder %v3964_v33, %v3973_v23  ;;  %vm3990_vm11 = vcmp.eq.f32.partialorder %v3964_v33, %v3973_v23  ;;  %vm3985_vm4 = vcmp.gt.f32.partialorder %v3964_v33, %v3968_v39  ;;  %vm3989_vm10 = vcmp.eq.f32.partialorder %v3964_v33, %v3968_v39  ;;  %v6166_v39 = vld [vmem:[%s10138_s5 + $0x1e0] sm:$0xff] }
0x15fa   :  { %vm3994_vm13 = vmand %vm3990_vm11, %vm10182_vm12  ;;  %vm3992_vm2 = vcmp.eq.f32.partialorder %v3964_v33, %v3983_v36  ;;  %vm3988_vm3 = vcmp.gt.f32.partialorder %v3964_v33, %v3983_v36  ;;  %vm3991_vm0 = vcmp.eq.f32.partialorder %v3964_v33, %v3978_v19  ;;  %vm3987_vm12 = vcmp.gt.f32.partialorder %v3964_v33, %v3978_v19  ;;  %v6164_v36 = vld [vmem:[%s10138_s5 + $0x1d0] sm:$0xff]  ;;  %v6169_v33 = vld [vmem:[%s10138_s5 + $0x1f8] sm:$0xff] }
0x15fb   :  { %vm3998_vm15 = vmor %vm3986_vm7, %vm3994_vm13  ;;  %vm10217_vm13 = vcmp.lt.s32.totalorder %v7485_v53, %v7494_v56  ;;  %v4371_v23 = vpack.c.bf16 %v6165_v30, %v6163_v62  ;;  %v4370_v19 = vpack.c.bf16 %v6164_v36, %v6162_v44 }
0x15fc   :  { %v4002_v55 = vsel %vm3998_vm15, 1.0, %v10197_v29  ;;  %vm3993_vm8 = vmand %vm3989_vm10, %vm1205_vm1 }
0x15fd   :  { %v4006_v38 = vmul.f32 %v7153_v9, %v4002_v55  ;;  %vm3997_vm9 = vmor %vm3985_vm4, %vm3993_vm8  ;;  %v4373_v55 = vpack.c.bf16 %v6169_v33, %v6167_v43 }
0x15fe   :  { %v4001_v17 = vsel %vm3997_vm9, 1.0, %v10197_v29  ;;  %vm3996_vm11 = vmand %vm3992_vm2, %vm1208_vm14 }
0x15ff   :  { %v4010_v48 = vmul.f32 %v4006_v38, %v8608_v31  ;;  %v4005_v49 = vmul.f32 %v8950_v34, %v4001_v17  ;;  %vm4000_vm7 = vmor %vm3988_vm3, %vm3996_vm11  ;;  %v6168_v38 = vld [vmem:[%s10138_s5 + $0x1f0] sm:$0xff]  ;;  %v7048_v17 = vpop.eup %7047  ;;  %vm10220_vm3 = vcmask 523264  }
0x1600   :  { %v4004_v8 = vsel %vm4000_vm7, 1.0, %v10197_v29  ;;  %vm3995_vm10 = vmand %vm3991_vm0, %vm10217_vm13  ;;  %v4372_v60 = vpack.c.bf16 %v6168_v38, %v6166_v39 }
0x1601   :  { %v4016_v32 = vsel %vm414_vm5, %v4010_v48, 0.0  ;;  %v4009_v24 = vmul.f32 %v4005_v49, %v8608_v31  ;;  %v4008_v28 = vmul.f32 %v7152_v7, %v4004_v8  ;;  %vm3999_vm4 = vmor %vm3987_vm12, %vm3995_vm10  ;;  %v6159_v7 = vld [vmem:[%s10138_s5 + $0x1a8] sm:$0xff]  ;;  %v4037_v48 = vpop.xlane.xlu0 %4036 }
0x1602   :  { %4017 = vadd.xlane.f32.xlu0 %v4016_v32  ;;  %v4003_v15 = vsel %vm3999_vm4, 1.0, %v10197_v29  ;;  %v4369_v40 = vpack.c.bf16 %v6161_v58, %v6159_v7  ;;  %v4043_v7 = vmul.f32 0.8, %v4037_v48  ;;  %vm10223_vm9 = vmmov %vm10220_vm3 }
0x1603   :  { %v4013_v9 = vsel %vm414_vm5, %v4009_v24, 0.0  ;;  %v4012_v34 = vmul.f32 %v4008_v28, %v8608_v31  ;;  %v4007_v27 = vmul.f32 %v9069_v61, %v4003_v15  ;;  %v6158_v61 = vld [vmem:[%s10138_s5 + $0x1a0] sm:$0xff]  ;;  %v4041_v28 = vmul.f32 0.8, %v9098_v21  ;;  %vm10224_vm0 = vmmov %vm10220_vm3 }
0x1604   :  { %4382 = vmatprep.subr.bf16.mxu0 %v4369_v40  ;;  %v4047_v44 = vceil.f32 %v4043_v7  ;;  %vm10225_vm11 = vmmov %vm10224_vm0 }
0x1605   :  { %v4022_v16 = vsel %vm414_vm5, %v4012_v34, 0.0  ;;  %v4011_v1 = vmul.f32 %v4007_v27, %v8608_v31  ;;  %v6160_v31 = vld [vmem:[%s10138_s5 + $0x1b0] sm:$0xff]  ;;  %v4040_v49 = vpop.xlane.xlu0 %4039  ;;  %v4045_v27 = vceil.f32 %v4041_v28  ;;  %v7154_v28 = vld [vmem:[%s10136_s3] sm:$0x3] }
0x1606   :  { %4014 = vadd.xlane.f32.xlu0 %v4013_v9  ;;  %v4368_v13 = vpack.c.bf16 %v6160_v31, %v6158_v61  ;;  %v4044_v61 = vmul.f32 0.8, %v4040_v49 }
0x1607   :  { %v4019_v42 = vsel %vm414_vm5, %v4011_v1, 0.0 }
0x1608   :  { %4383 = vmatpush1.bf16.msra.mxu0 %v4368_v13 }
0x1609   :  { %4384 = vmatprep.subr.bf16.mxu0 %v4371_v23  ;;  %v4068_v24 = vpop.permute.xlu0 %4067  ;;  %v4048_v23 = vceil.f32 %v4044_v61  ;;  %v6177_v61 = vld [vmem:[%s10139_s6 + $0x278] sm:$0xff] }
0x160a   :  { %4023 = vadd.xlane.f32.xlu0 %v4022_v16  ;;  %v4085_v40 = vmul.f32 %v4068_v24, %v9041_v37 }
0x160c   :  { %4385 = vmatpush1.bf16.msra.mxu0 %v4370_v19 }
0x160d   :  { %4386 = vmatprep.subr.bf16.mxu0 %v4373_v55 }
0x160e   :  { %4020 = vadd.xlane.f32.xlu0 %v4019_v42 }
0x1610   :  { %4387 = vmatpush1.bf16.msra.mxu0 %v4372_v60 }
0x1624   :  { %4077 = vperm.xlu0 %6808, %v7048_v17  }
0x1636   :  { %v4034_v8 = vpop.xlane.xlu1 %4033 }
0x1637   :  { %v4042_v32 = vmul.f32 0.8, %v4034_v8 }
0x1639   :  { %v4046_v15 = vceil.f32 %v4042_v32 }
0x163a   :  { %v4073_v16 = vpop.permute.xlu1 %4072 }
0x163b   :  { %v4086_v21 = vmul.f32 %v4073_v16, %v9049_v22  ;;  %v6174_v16 = vld [vmem:[%s10139_s6 + $0x260] sm:$0xff] }
0x163e   :  { %v4083_v33 = vpop.permute.xlu1 %4082 }
0x163f   :  { %v4088_v38 = vmul.f32 %v4083_v33, %v9058_v41  ;;  %v6171_v41 = vld [vmem:[%s10139_s6 + $0x248] sm:$0xff] }
0x168f   :  { %v4018_v9 = vpop.xlane.xlu0 %4017 }
0x1690   :  { %vm4050_vm12 = vcmp.lt.f32.partialorder %v4018_v9, %v4046_v15  ;;  %v6172_v9 = vld [vmem:[%s10139_s6 + $0x250] sm:$0xff] }
0x1691   :  { %v4054_v34 = vsel %vm4050_vm12, 1.0, %v10197_v29 }
0x1692   :  { %v9167_v42 = vmul.f32 %v4054_v34, %v8560_v26  ;;  %v6173_v34 = vld [vmem:[%s10139_s6 + $0x258] sm:$0xff] }
0x1693   :  { %v4015_v1 = vpop.xlane.xlu0 %4014 }
0x1694   :  { %vm4049_vm15 = vcmp.lt.f32.partialorder %v4015_v1, %v4045_v27  ;;  %v9180_v30 = vmul.f32 %v4086_v21, %v9167_v42  ;;  %v4438_v27 = vpack.c.bf16 %v6173_v34, %v6172_v9  ;;  %v6175_v1 = vld [vmem:[%s10139_s6 + $0x268] sm:$0xff]  ;;  %v6178_v21 = vld [vmem:[%s10139_s6 + $0x280] sm:$0xff] }
0x1695   :  { %v4053_v58 = vsel %vm4049_vm15, 1.0, %v10197_v29  ;;  %v4439_v7 = vpack.c.bf16 %v6175_v1, %v6174_v16  ;;  %v6190_v9 = vld [vmem:[%s10139_s6 + $0x2e0] sm:$0xff]  ;;  %v6191_v34 = vld [vmem:[%s10139_s6 + $0x2e8] sm:$0xff]  ;;  %v6192_v16 = vld [vmem:[%s10139_s6 + $0x2f0] sm:$0xff] }
0x1696   :  { %v9173_v31 = vmul.f32 %v4053_v58, %v8563_v14  ;;  %10219 = vst [vmem:[#allocation16_spill] sm:$0xff] %v9180_v30  ;;  %v6176_v58 = vld [vmem:[%s10139_s6 + $0x270] sm:$0xff]  ;;  %v6193_v1 = vld [vmem:[%s10139_s6 + $0x2f8] sm:$0xff] }
0x1697   :  { %v4024_v13 = vpop.xlane.xlu0 %4023 }
0x1698   :  { %4093 = vxpose.xlu0.b32.start [1/4] (short) (narrow) %v9173_v31, 8  ;;  %v9177_v62 = vmul.f32 %v4085_v40, %v9173_v31  ;;  %vm4052_vm2 = vcmp.lt.f32.partialorder %v4024_v13, %v4048_v23  ;;  %v4440_v40 = vpack.c.bf16 %v6177_v61, %v6176_v58  ;;  %v6179_v13 = vld [vmem:[%s10139_s6 + $0x288] sm:$0xff]  ;;  %v6180_v23 = vld [vmem:[%s10139_s6 + $0x290] sm:$0xff] }
0x1699   :  { %v4056_v43 = vsel %vm4052_vm2, 1.0, %v10197_v29 }
0x169a   :  { %10218 = vst [vmem:[#allocation15_spill] sm:$0xff] %v9177_v62  ;;  %v6699_v36 = vpack.c.bf16 %v9180_v30, %v9177_v62  ;;  %v9195_v39 = vmul.f32 %v4056_v43, %v8585_v47  ;;  %v6183_v43 = vld [vmem:[%s10139_s6 + $0x2a8] sm:$0xff] }
0x169b   :  { %v4021_v37 = vpop.xlane.xlu0 %4020 }
0x169c   :  { %vm4051_vm8 = vcmp.lt.f32.partialorder %v4021_v37, %v4047_v44  ;;  %4094 = vxpose.xlu0.b32.cont [2/4] (short) (narrow) %v9167_v42, 8  ;;  %6700 = vmatpush3.bf16.msra.mxu1 %v6699_v36  ;;  %v9201_v17 = vmul.f32 %v4088_v38, %v9195_v39  ;;  %v4441_v44 = vpack.c.bf16 %v6179_v13, %v6178_v21  ;;  %v6185_v38 = vld [vmem:[%s10139_s6 + $0x2b8] sm:$0xff] }
0x169d   :  { %v4055_v22 = vsel %vm4051_vm8, 1.0, %v10197_v29  ;;  %6203 = vmatmul.mubr.msk.bf16.vlgmr.msra.gmra.mrb[48].mxu0 %vm10220_vm3, %v6699_v36  ;;  %6701 = vmatprep.subr.bf16.mxu1 %v10202_v6  ;;  %v6181_v36 = vld [vmem:[%s10139_s6 + $0x298] sm:$0xff] }
0x169e   :  { %v9189_v19 = vmul.f32 %v4055_v22, %v8579_v59  ;;  %4422 = vmatprep.mubr.bf16.mxu0 %v10216_v0  ;;  %10221 = vst [vmem:[#allocation17_spill] sm:$0xff] %v9201_v17  ;;  %v4442_v37 = vpack.c.bf16 %v6181_v36, %v6180_v23  ;;  %v6182_v22 = vld [vmem:[%s10139_s6 + $0x2a0] sm:$0xff] }
0x169f   :  { %v4443_v33 = vpack.c.bf16 %v6183_v43, %v6182_v22 }
0x16a0   :  { %4095 = vxpose.xlu0.b32.cont [3/4] (short) (narrow) %v9189_v19, 8 }
0x16a3   :  { %v4078_v55 = vpop.permute.xlu0 %4077 }
0x16a4   :  { %v4087_v60 = vmul.f32 %v4078_v55, %v9051_v4  ;;  %4096 = vxpose.xlu0.b32.end [4/4] (short) (narrow) %v9195_v39, 8  ;;  %v6170_v4 = vld [vmem:[%s10139_s6 + $0x240] sm:$0xff]  ;;  %v6184_v55 = vld [vmem:[%s10139_s6 + $0x2b0] sm:$0xff] }
0x16a5   :  { %v4437_v24 = vpack.c.bf16 %v6171_v41, %v6170_v4  ;;  %v6187_v4 = vld [vmem:[%s10139_s6 + $0x2c8] sm:$0xff] }
0x16a6   :  { %v9204_v48 = vmul.f32 %v4087_v60, %v9189_v19  ;;  %v4444_v60 = vpack.c.bf16 %v6185_v38, %v6184_v55 }
0x16a8   :  { %10222 = vst [vmem:[#allocation18_spill] sm:$0xff] %v9204_v48  ;;  %v6702_v49 = vpack.c.bf16 %v9201_v17, %v9204_v48 }
0x16aa   :  { %6703 = vmatpush3.bf16.msra.mxu1 %v6702_v49  ;;  %6204 = vmatmul.mubr.msk.bf16.gmra.mrb[52].mxu0 %vm10223_vm9, %v6702_v49  ;;  %v6186_v49 = vld [vmem:[%s10139_s6 + $0x2c0] sm:$0xff] }
0x16ab   :  { %4455 = vmatprep.subr.bf16.mxu1 %v10216_v0  ;;  %v4445_v41 = vpack.c.bf16 %v6187_v4, %v6186_v49 }
0x16cd   :  { %6817 = vset.pattern.permute.xlu0 %v10210_v45 }
0x1718   :  { %v4109_v8 = vpop.trf.xlu0 }
0x1719   :  { %v9218_v32 = vrot.slane %v4109_v8, %v7483_v51  ;;  %v6188_v8 = vld [vmem:[%s10139_s6 + $0x2d0] sm:$0xff] }
0x171b   :  { %v9224_v15 = vmul.f32 %v7154_v28, %v9218_v32  ;;  %v4351_v62 = vmul.f32 %v9218_v32, %v9195_v39 }
0x171d   :  { %6531 = vmatmul.mubr.msk.f32.vlgmr.msra.gmra.mrb[28].mxu1 %vm414_vm5, %v9224_v15 }
0x171e   :  { %4456 = vmatpush1.bf16.msra.mxu1 %v4437_v24  ;;  %v6189_v24 = vld [vmem:[%s10139_s6 + $0x2d8] sm:$0xff] }
0x171f   :  { %4457 = vmatprep.subr.bf16.mxu1 %v10216_v0  ;;  %v4446_v28 = vpack.c.bf16 %v6189_v24, %v6188_v8 }
0x1722   :  { %4458 = vmatpush1.bf16.msra.mxu1 %v4438_v27  ;;  %v4447_v27 = vpack.c.bf16 %v6191_v34, %v6190_v9 }
0x1723   :  { %4459 = vmatprep.subr.bf16.mxu1 %v10216_v0 }
0x1726   :  { %4460 = vmatpush1.bf16.msra.mxu1 %v4439_v7  ;;  %v4448_v7 = vpack.c.bf16 %v6193_v1, %v6192_v16 }
0x1727   :  { %4461 = vmatprep.subr.bf16.mxu1 %v10216_v0 }
0x172a   :  { %4462 = vmatpush1.bf16.msra.mxu1 %v4440_v40 }
0x172b   :  { %4463 = vmatprep.subr.bf16.mxu1 %v10216_v0 }
0x172e   :  { %4464 = vmatpush1.bf16.msra.mxu1 %v4441_v44 }
0x172f   :  { %4465 = vmatprep.subr.bf16.mxu1 %v10216_v0 }
0x1732   :  { %4466 = vmatpush1.bf16.msra.mxu1 %v4442_v37 }
0x1733   :  { %4467 = vmatprep.subr.bf16.mxu1 %v10216_v0 }
0x1736   :  { %4468 = vmatpush1.bf16.msra.mxu1 %v4443_v33 }
0x1737   :  { %4469 = vmatprep.subr.bf16.mxu1 %v10216_v0 }
0x173a   :  { %4470 = vmatpush1.bf16.msra.mxu1 %v4444_v60 }
0x173b   :  { %4471 = vmatprep.subr.bf16.mxu1 %v10216_v0 }
0x173e   :  { %4472 = vmatpush1.bf16.msra.mxu1 %v4445_v41 }
0x173f   :  { %4473 = vmatprep.subr.bf16.mxu1 %v10216_v0 }
0x1742   :  { %4474 = vmatpush1.bf16.msra.mxu1 %v4446_v28 }
0x1743   :  { %4475 = vmatprep.subr.bf16.mxu1 %v10216_v0 }
0x1746   :  { %4476 = vmatpush1.bf16.msra.mxu1 %v4447_v27 }
0x1747   :  { %4477 = vmatprep.subr.bf16.mxu1 %v10216_v0 }
0x174a   :  { %4478 = vmatpush1.bf16.msra.mxu1 %v4448_v7 }
0x174b   :  { %6720 = vmatprep.subr.bf16.mxu1 %v10202_v6 }
0x1770   :  { %v4414_v58 = vpop.f32.mrb[48].mxu0 }
0x1771   :  { %v4416_v61 = vpop.f32.mrb[49].mxu0 }
0x1772   :  { %v4418_v40 = vpop.f32.mrb[50].mxu0 }
0x1773   :  { %v9306_v21 = vpack.c.bf16 %v4418_v40, %v4414_v58  ;;  %v4420_v13 = vpop.f32.mrb[51].mxu0 }
0x1774   :  { %v9308_v44 = vpack.c.bf16 %v4420_v13, %v4416_v61 }
0x1776   :  { %6205 = vmatprep.mubr.msk.bf16.mxu1 %vm10224_vm0, %v9308_v44 }
0x1777   :  { %4488 = vmatmul.mubr.bf16.vlgmr.msra.gmra.mrb[32].mxu1 %v9306_v21 }
0x177d   :  { %v4424_v23 = vpop.f32.mrb[52].mxu0 }
0x177e   :  { %v4426_v36 = vpop.f32.mrb[53].mxu0 }
0x177f   :  { %v4428_v37 = vpop.f32.mrb[54].mxu0 }
0x1780   :  { %v9313_v22 = vpack.c.bf16 %v4428_v37, %v4424_v23  ;;  %v4430_v43 = vpop.f32.mrb[55].mxu0 }
0x1781   :  { %v9315_v33 = vpack.c.bf16 %v4430_v43, %v4426_v36 }
0x1783   :  { %6206 = vmatprep.mubr.msk.bf16.mxu1 %vm10225_vm11, %v9315_v33 }
0x1784   :  { %4496 = vmatmul.mubr.bf16.gmra.mrb[36].mxu1 %v9313_v22 }
0x1785   :  { %6587 = vmatprep.mubr.msk.f32.mxu1 %vm10209_vm6, %v10197_v29 }
0x17f0   :  { %v9322_v55 = vpop.f32.mrb[28].mxu1 }
0x17f1   :  { %10226 = vst [vmem:[#allocation19_spill] sm:$0xff] %v9322_v55  ;;  %v6532_v38 = vpop.f32.mrb[29].mxu1 }
0x184a   :  { %v4489_v60 = vpop.f32.mrb[32].mxu1 }
0x184b   :  { %4650 = vrot.lane.b32.xlu1 %v4489_v60, %s7191_s29  ;;  %v4491_v49 = vpop.f32.mrb[33].mxu1 }
0x184c   :  { %v4492_v4 = vpop.f32.mrb[34].mxu1 }
0x184d   :  { %v4494_v41 = vpop.f32.mrb[35].mxu1 }
0x184f   :  { %4508 = vrot.lane.b32.xlu1 %v4489_v60, %s7192_s30 }
0x1853   :  { %4906 = vrot.lane.b32.xlu1 %v4489_v60, %s7193_s16 }
0x1857   :  { %4695 = vperm.xlu1 %6809, %v4489_v60   ;;  %v4497_v8 = vpop.f32.mrb[36].mxu1 }
0x1858   :  { %4959 = vperm.xlu0 %6817, %v4497_v8   ;;  %v4499_v24 = vpop.f32.mrb[37].mxu1 }
0x1859   :  { %v4500_v28 = vpop.f32.mrb[38].mxu1 }
0x185a   :  { %v4502_v9 = vpop.f32.mrb[39].mxu1 }
0x185b   :  { %6810 = vset.pattern.permute.xlu1 %v10216_v0 }
0x185c   :  { %4553 = vperm.xlu1 %6810, %v4489_v60   ;;  %4912 = vrot.lane.b32.xlu0 %v4500_v28, %s7193_s16 }
0x1860   :  { %6811 = vset.pattern.permute.xlu1 %v10210_v45 }
0x1861   :  { %4951 = vperm.xlu1 %6811, %v4489_v60  }
0x1865   :  { %4652 = vrot.lane.b32.xlu1 %v4492_v4, %s7191_s29 }
0x1866   :  { %6812 = vset.pattern.permute.xlu1 %v10198_v52 }
0x1869   :  { %4510 = vrot.lane.b32.xlu1 %v4492_v4, %s7192_s30 }
0x186d   :  { %4908 = vrot.lane.b32.xlu1 %v4492_v4, %s7193_s16 }
0x1871   :  { %4699 = vperm.xlu1 %6812, %v4492_v4  }
0x1875   :  { %6813 = vset.pattern.permute.xlu1 %v10216_v0 }
0x1876   :  { %4557 = vperm.xlu1 %6813, %v4492_v4  }
0x187a   :  { %6814 = vset.pattern.permute.xlu1 %v10210_v45 }
0x187b   :  { %4955 = vperm.xlu1 %6814, %v4492_v4  }
0x187f   :  { %4654 = vrot.lane.b32.xlu1 %v4497_v8, %s7191_s29 }
0x1880   :  { %6815 = vset.pattern.permute.xlu1 %v10198_v52 }
0x1883   :  { %4512 = vrot.lane.b32.xlu1 %v4497_v8, %s7192_s30 }
0x1887   :  { %4910 = vrot.lane.b32.xlu1 %v4497_v8, %s7193_s16 }
0x188b   :  { %4703 = vperm.xlu1 %6815, %v4497_v8  }
0x188f   :  { %6816 = vset.pattern.permute.xlu1 %v10216_v0 }
0x1890   :  { %4561 = vperm.xlu1 %6816, %v4497_v8  }
0x1894   :  { %4656 = vrot.lane.b32.xlu1 %v4500_v28, %s7191_s29 }
0x1895   :  { %6818 = vset.pattern.permute.xlu1 %v10198_v52 }
0x1898   :  { %4514 = vrot.lane.b32.xlu1 %v4500_v28, %s7192_s30 }
0x189c   :  { %4707 = vperm.xlu1 %6818, %v4500_v28  }
0x18a0   :  { %6819 = vset.pattern.permute.xlu1 %v10216_v0 }
0x18a1   :  { %4565 = vperm.xlu1 %6819, %v4500_v28  }
0x18a5   :  { %6820 = vset.pattern.permute.xlu1 %v10210_v45 }
0x18a6   :  { %4963 = vperm.xlu1 %6820, %v4500_v28  }
0x18bd   :  { %v4651_v34 = vpop.permute.xlu1 %4650 }
0x18c1   :  { %v4509_v27 = vpop.permute.xlu1 %4508 }
0x18c2   :  { %4520 = vxpose.xlu0.b32.start [1/4] (short) (narrow) %v4509_v27, 8  ;;  %v4348_v27 = vmul.f32 %v9218_v32, %v9173_v31 }
0x18c5   :  { %v4907_v16 = vpop.permute.xlu1 %4906 }
0x18cf   :  { %4662 = vxpose.xlu1.b32.start [1/4] (short) (narrow) %v4651_v34, 8  ;;  %v4349_v34 = vmul.f32 %v9218_v32, %v9167_v42 }
0x18d6   :  { %v4696_v1 = vpop.permute.xlu1 %4695 }
0x18d7   :  { %v9354_v8 = vpop.permute.xlu0 %4959 }
0x18db   :  { %v9346_v7 = vpop.permute.xlu1 %4553  ;;  %v4913_v24 = vpop.permute.xlu0 %4912 }
0x18e0   :  { %v9348_v58 = vpop.permute.xlu1 %4951 }
0x18e4   :  { %v4653_v61 = vpop.permute.xlu1 %4652 }
0x18e5   :  { %4663 = vxpose.xlu1.b32.cont [2/4] (short) (narrow) %v4653_v61, 8  ;;  %v7155_v61 = vld [vmem:[%s10134_s1 + $0x8] sm:$0xff] }
0x18e8   :  { %v4511_v40 = vpop.permute.xlu1 %4510 }
0x18e9   :  { %4521 = vxpose.xlu0.b32.cont [2/4] (short) (narrow) %v4511_v40, 8  ;;  %v4353_v40 = vmul.f32 %v7155_v61, %v4349_v34  ;;  %v7157_v34 = vld [vmem:[%s10134_s1 + $0x10] sm:$0xff] }
0x18ec   :  { %v4909_v13 = vpop.permute.xlu1 %4908 }
0x18f0   :  { %v4700_v23 = vpop.permute.xlu1 %4699 }
0x18f5   :  { %v9350_v36 = vpop.permute.xlu1 %4557 }
0x18fa   :  { %v9352_v45 = vpop.permute.xlu1 %4955 }
0x18fe   :  { %v4655_v37 = vpop.permute.xlu1 %4654 }
0x18ff   :  { %4664 = vxpose.xlu1.b32.cont [3/4] (short) (narrow) %v4655_v37, 8  ;;  %v4357_v37 = vmul.f32 %v7527_v3, %v9167_v42 }
0x1902   :  { %v4513_v43 = vpop.permute.xlu1 %4512 }
0x1903   :  { %4522 = vxpose.xlu0.b32.cont [3/4] (short) (narrow) %v4513_v43, 8  ;;  %v7156_v43 = vld [vmem:[%s10134_s1] sm:$0xff] }
0x1906   :  { %v4911_v38 = vpop.permute.xlu1 %4910 }
0x190a   :  { %v4704_v60 = vpop.permute.xlu1 %4703 }
0x190f   :  { %v4562_v49 = vpop.permute.xlu1 %4561 }
0x1913   :  { %v4657_v4 = vpop.permute.xlu1 %4656 }
0x1914   :  { %4665 = vxpose.xlu1.b32.end [4/4] (short) (narrow) %v4657_v4, 8 }
0x1917   :  { %v4515_v41 = vpop.permute.xlu1 %4514 }
0x1918   :  { %4523 = vxpose.xlu0.b32.end [4/4] (short) (narrow) %v4515_v41, 8  ;;  %v9376_v41 = vadd.f32 %v4357_v37, %v4353_v40 }
0x191a   :  { %vm4589_vm7 = vcmp.gt.f32.partialorder %v9376_v41, 0.0 }
0x191b   :  { %v4708_v28 = vpop.permute.xlu1 %4707 }
0x191c   :  { %4918 = vxpose.xlu0.b32.start [1/4] (short) (narrow) %v4907_v16, 8 }
0x1920   :  { %4919 = vxpose.xlu0.b32.cont [2/4] (short) (narrow) %v4909_v13, 8  ;;  %v9358_v9 = vpop.permute.xlu1 %4565  ;;  %v4350_v13 = vmul.f32 %v9218_v32, %v9189_v19 }
0x1922   :  { %v4354_v61 = vmul.f32 %v7157_v34, %v4350_v13  ;;  %v7158_v13 = vld [vmem:[%s10134_s1 + $0x18] sm:$0xff] }
0x1923   :  { %v4355_v34 = vmul.f32 %v7158_v13, %v4351_v62 }
0x1924   :  { %4920 = vxpose.xlu0.b32.cont [3/4] (short) (narrow) %v4911_v38, 8  ;;  %v4352_v38 = vmul.f32 %v7156_v43, %v4348_v27  ;;  %v4358_v27 = vmul.f32 %v7533_v11, %v9189_v19 }
0x1925   :  { %v9364_v16 = vpop.permute.xlu1 %4963 }
0x1926   :  { %v9391_v17 = vadd.f32 %v4358_v27, %v4354_v61 }
0x1928   :  { %4921 = vxpose.xlu0.b32.end [4/4] (short) (narrow) %v4913_v24, 8  ;;  %v4356_v24 = vmul.f32 %v7524_v2, %v9173_v31  ;;  %vm4590_vm8 = vcmp.gt.f32.partialorder %v9391_v17, 0.0 }
0x192a   :  { %v9386_v48 = vadd.f32 %v4356_v24, %v4352_v38  ;;  %v4359_v38 = vmul.f32 %v7536_v12, %v9195_v39 }
0x192c   :  { %vm4588_vm4 = vcmp.gt.f32.partialorder %v9386_v48, 0.0  ;;  %v9414_v13 = vadd.f32 %v4359_v38, %v4355_v34 }
0x192e   :  { %vm4591_vm9 = vcmp.gt.f32.partialorder %v9414_v13, 0.0 }
0x1932   :  { %6822 = vset.pattern.permute.xlu1 %v10216_v0 }
0x1951   :  { %6821 = vset.pattern.permute.xlu0 %v10216_v0 }
0x1988   :  { %v4678_v4 = vpop.trf.xlu1 }
0x1989   :  { %v4713_v3 = vrot.slane %v4678_v4, %v7483_v51 }
0x198b   :  { %v4715_v40 = vadd.f32 %v4713_v3, %v4700_v23  ;;  %v4714_v37 = vadd.f32 %v4713_v3, %v4696_v1  ;;  %v4716_v43 = vadd.f32 %v4713_v3, %v4704_v60  ;;  %v4717_v30 = vadd.f32 %v4713_v3, %v4708_v28 }
0x198c   :  { %v4536_v2 = vpop.trf.xlu0 }
0x198d   :  { %v4571_v4 = vrot.slane %v4536_v2, %v7483_v51  ;;  %vm4719_vm13 = vcmp.ge.f32.partialorder %v4715_v40, 0.0  ;;  %v4723_v11 = vmul.f32 0.2, %v4715_v40  ;;  %vm4718_vm10 = vcmp.ge.f32.partialorder %v4714_v37, 0.0 }
0x198e   :  { %v4722_v1 = vmul.f32 0.2, %v4714_v37  ;;  %vm4720_vm12 = vcmp.ge.f32.partialorder %v4716_v43, 0.0  ;;  %v4724_v23 = vmul.f32 0.2, %v4716_v43  ;;  %vm4721_vm15 = vcmp.ge.f32.partialorder %v4717_v30, 0.0 }
0x198f   :  { %v4727_v60 = vsel %vm4719_vm13, %v4715_v40, %v4723_v11  ;;  %v4574_v28 = vadd.f32 %v4571_v4, %v4562_v49  ;;  %v4725_v24 = vmul.f32 0.2, %v4717_v30  ;;  %v4572_v3 = vadd.f32 %v4571_v4, %v9346_v7 }
0x1990   :  { %v9402_v62 = vsel %vm4589_vm7, %v4727_v60, -1e+30  ;;  %v4726_v61 = vsel %vm4718_vm10, %v4714_v37, %v4722_v1  ;;  %v4728_v12 = vsel %vm4720_vm12, %v4716_v43, %v4724_v23  ;;  %v4573_v23 = vadd.f32 %v4571_v4, %v9350_v36 }
0x1991   :  { %v4737_v27 = vsel %vm414_vm5, %v9402_v62, -inf  ;;  %v9409_v2 = vsel %vm4588_vm4, %v4726_v61, -1e+30  ;;  %vm4578_vm2 = vcmp.ge.f32.partialorder %v4574_v28, 0.0  ;;  %v4582_v40 = vmul.f32 0.2, %v4574_v28 }
0x1992   :  { %4738 = vmax.xlane.f32.xlu0 %v4737_v27  ;;  %v4734_v49 = vsel %vm414_vm5, %v9409_v2, -inf  ;;  %v9418_v7 = vsel %vm4590_vm8, %v4728_v12, -1e+30  ;;  %v4729_v11 = vsel %vm4721_vm15, %v4717_v30, %v4725_v24  ;;  %v4580_v1 = vmul.f32 0.2, %v4572_v3 }
0x1993   :  { %4735 = vmax.xlane.f32.xlu1 %v4734_v49  ;;  %v4586_v37 = vsel %vm4578_vm2, %v4574_v28, %v4582_v40  ;;  %vm4576_vm3 = vcmp.ge.f32.partialorder %v4572_v3, 0.0  ;;  %v4740_v34 = vsel %vm414_vm5, %v9418_v7, -inf  ;;  %v9433_v38 = vsel %vm4591_vm9, %v4729_v11, -1e+30 }
0x1994   :  { %v9422_v43 = vsel %vm4590_vm8, %v4586_v37, -1e+30  ;;  %v4584_v28 = vsel %vm4576_vm3, %v4572_v3, %v4580_v1  ;;  %v4581_v30 = vmul.f32 0.2, %v4573_v23  ;;  %v4575_v24 = vadd.f32 %v4571_v4, %v9358_v9 }
0x1995   :  { %v4602_v60 = vsel %vm414_vm5, %v9422_v43, -inf  ;;  %vm4577_vm0 = vcmp.ge.f32.partialorder %v4573_v23, 0.0  ;;  %v4743_v36 = vsel %vm414_vm5, %v9433_v38, -inf  ;;  %v9440_v61 = vsel %vm4588_vm4, %v4584_v28, -1e+30 }
0x1996   :  { %4603 = vmax.xlane.f32.xlu0 %v4602_v60  ;;  %v4585_v27 = vsel %vm4577_vm0, %v4573_v23, %v4581_v30  ;;  %v4583_v40 = vmul.f32 0.2, %v4575_v24  ;;  %vm4579_vm11 = vcmp.ge.f32.partialorder %v4575_v24, 0.0  ;;  %v4596_v3 = vsel %vm414_vm5, %v9440_v61, -inf }
0x1997   :  { %4741 = vmax.xlane.f32.xlu1 %v4740_v34  ;;  %v9447_v9 = vsel %vm4589_vm7, %v4585_v27, -1e+30  ;;  %vm10227_vm3 = vcmask 523264  }
0x1998   :  { %v4587_v1 = vsel %vm4579_vm11, %v4575_v24, %v4583_v40  ;;  %v4599_v28 = vsel %vm414_vm5, %v9447_v9, -inf  ;;  %vm10229_vm0 = vmmov %vm10227_vm3 }
0x1999   :  { %vm10230_vm11 = vmmov %vm10229_vm0 }
0x199b   :  { %4744 = vmax.xlane.f32.xlu1 %v4743_v36 }
0x199c   :  { %v4934_v12 = vpop.trf.xlu0 }
0x199d   :  { %v4969_v49 = vrot.slane %v4934_v12, %v7483_v51 }
0x199f   :  { %4597 = vmax.xlane.f32.xlu1 %v4596_v3  ;;  %v4970_v4 = vadd.f32 %v4969_v49, %v9348_v58  ;;  %v4972_v37 = vadd.f32 %v4969_v49, %v9354_v8  ;;  %v4971_v11 = vadd.f32 %v4969_v49, %v9352_v45  ;;  %v4973_v23 = vadd.f32 %v4969_v49, %v9364_v16 }
0x19a0   :  { %v9457_v58 = vsel %vm4591_vm9, %v4587_v1, -1e+30 }
0x19a1   :  { %vm4974_vm13 = vcmp.ge.f32.partialorder %v4970_v4, 0.0  ;;  %v4978_v60 = vmul.f32 0.2, %v4970_v4  ;;  %vm4976_vm10 = vcmp.ge.f32.partialorder %v4972_v37, 0.0  ;;  %v4980_v34 = vmul.f32 0.2, %v4972_v37 }
0x19a2   :  { %vm4975_vm12 = vcmp.ge.f32.partialorder %v4971_v11, 0.0  ;;  %v4979_v30 = vmul.f32 0.2, %v4971_v11  ;;  %v4981_v24 = vmul.f32 0.2, %v4973_v23  ;;  %vm4977_vm15 = vcmp.ge.f32.partialorder %v4973_v23, 0.0 }
0x19a3   :  { %4600 = vmax.xlane.f32.xlu1 %v4599_v28  ;;  %v4982_v36 = vsel %vm4974_vm13, %v4970_v4, %v4978_v60  ;;  %v4984_v8 = vsel %vm4976_vm10, %v4972_v37, %v4980_v34  ;;  %v4605_v27 = vsel %vm414_vm5, %v9457_v58, -inf }
0x19a4   :  { %v4986_v45 = vsel %vm4588_vm4, %v4982_v36, -1e+30  ;;  %v4983_v16 = vsel %vm4975_vm12, %v4971_v11, %v4979_v30  ;;  %v9466_v40 = vsel %vm4590_vm8, %v4984_v8, -1e+30  ;;  %v4985_v3 = vsel %vm4977_vm15, %v4973_v23, %v4981_v24 }
0x19a5   :  { %v4990_v12 = vsel %vm414_vm5, %v4986_v45, -inf  ;;  %v9470_v49 = vsel %vm4589_vm7, %v4983_v16, -1e+30  ;;  %v4996_v4 = vsel %vm414_vm5, %v9466_v40, -inf  ;;  %v9478_v11 = vsel %vm4591_vm9, %v4985_v3, -1e+30  ;;  %vm10228_vm9 = vmmov %vm10227_vm3 }
0x19a6   :  { %4991 = vmax.xlane.f32.xlu0 %v4990_v12  ;;  %v4993_v37 = vsel %vm414_vm5, %v9470_v49, -inf  ;;  %v4999_v1 = vsel %vm414_vm5, %v9478_v11, -inf  ;;  %vm10231_vm15 = vcmp.lt.s32.totalorder %v7485_v53, %v7488_v54 }
0x19a7   :  { %4606 = vmax.xlane.f32.xlu1 %v4605_v27 }
0x19aa   :  { %4997 = vmax.xlane.f32.xlu0 %v4996_v4 }
0x19ab   :  { %4994 = vmax.xlane.f32.xlu1 %v4993_v37 }
0x19af   :  { %5000 = vmax.xlane.f32.xlu1 %v4999_v1 }
0x1a1f   :  { %v4739_v60 = vpop.xlane.xlu0 %4738 }
0x1a20   :  { %v4747_v34 = vsub.f32 %v9402_v62, %v4739_v60  ;;  %v4736_v23 = vpop.xlane.xlu1 %4735 }
0x1a21   :  { %v4746_v28 = vsub.f32 %v9409_v2, %v4736_v23 }
0x1a22   :  { %v4752_v30 = vmul.f32 1.442695, %v4747_v34 }
0x1a23   :  { %v4750_v36 = vmul.f32 1.442695, %v4746_v28  ;;  %v4604_v16 = vpop.xlane.xlu0 %4603 }
0x1a24   :  { %7049 = vpow2.f32 %v4752_v30  ;;  %v4742_v8 = vpop.xlane.xlu1 %4741  ;;  %v4610_v27 = vsub.f32 %v9422_v43, %v4604_v16 }
0x1a25   :  { %7051 = vpow2.f32 %v4750_v36  ;;  %v4748_v24 = vsub.f32 %v9418_v7, %v4742_v8 }
0x1a26   :  { %v4616_v62 = vmul.f32 1.442695, %v4610_v27 }
0x1a27   :  { %v4754_v12 = vmul.f32 1.442695, %v4748_v24 }
0x1a28   :  { %v4745_v3 = vpop.xlane.xlu1 %4744 }
0x1a29   :  { %7053 = vpow2.f32 %v4754_v12  ;;  %v4749_v4 = vsub.f32 %v9433_v38, %v4745_v3 }
0x1a2b   :  { %v4756_v37 = vmul.f32 1.442695, %v4749_v4 }
0x1a2c   :  { %v4598_v1 = vpop.xlane.xlu1 %4597 }
0x1a2d   :  { %7055 = vpow2.f32 %v4756_v37  ;;  %v4608_v2 = vsub.f32 %v9440_v61, %v4598_v1 }
0x1a2e   :  { %v7050_v60 = vpop.eup %7049  ;;  %7057 = vpow2.f32 %v4616_v62 }
0x1a2f   :  { %v7052_v34 = vpop.eup %7051  ;;  %v4612_v23 = vmul.f32 1.442695, %v4608_v2  ;;  %v9489_v28 = vmul.f32 %v7050_v60, %v9376_v41 }
0x1a30   :  { %v4601_v7 = vpop.xlane.xlu1 %4600  ;;  %v9492_v43 = vmul.f32 %v7052_v34, %v9386_v48 }
0x1a31   :  { %7059 = vpow2.f32 %v4612_v23  ;;  %v4609_v38 = vsub.f32 %v9447_v9, %v4601_v7  ;;  %v4765_v30 = vsel %vm414_vm5, %v9489_v28, 0.0 }
0x1a32   :  { %4766 = vadd.xlane.f32.xlu1 %v4765_v30  ;;  %v4762_v61 = vsel %vm414_vm5, %v9492_v43, 0.0 }
0x1a33   :  { %v7054_v36 = vpop.eup %7053  ;;  %v4614_v8 = vmul.f32 1.442695, %v4609_v38  ;;  %4763 = vadd.xlane.f32.xlu0 %v4762_v61  ;;  %v4992_v16 = vpop.xlane.xlu0 %4991 }
0x1a34   :  { %v5002_v24 = vsub.f32 %v4986_v45, %v4992_v16  ;;  %v4607_v12 = vpop.xlane.xlu1 %4606  ;;  %v9500_v27 = vmul.f32 %v7054_v36, %v9391_v17 }
0x1a35   :  { %7061 = vpow2.f32 %v4614_v8  ;;  %v4611_v3 = vsub.f32 %v9457_v58, %v4607_v12 }
0x1a36   :  { %v5006_v9 = vmul.f32 1.442695, %v5002_v24  ;;  %v4768_v4 = vsel %vm414_vm5, %v9500_v27, 0.0 }
0x1a37   :  { %v7056_v37 = vpop.eup %7055  ;;  %v4618_v62 = vmul.f32 1.442695, %v4611_v3  ;;  %4769 = vadd.xlane.f32.xlu0 %v4768_v4  ;;  %v4998_v1 = vpop.xlane.xlu0 %4997 }
0x1a38   :  { %7063 = vpow2.f32 %v5006_v9  ;;  %v4995_v2 = vpop.xlane.xlu1 %4994  ;;  %v9506_v60 = vmul.f32 %v7056_v37, %v9414_v13  ;;  %v5004_v45 = vsub.f32 %v9466_v40, %v4998_v1  ;;  %v7058_v23 = vpop.eup %7057 }
0x1a39   :  { %7065 = vpow2.f32 %v4618_v62  ;;  %v5003_v34 = vsub.f32 %v9470_v49, %v4995_v2  ;;  %v9519_v49 = vmul.f32 %v7058_v23, %v9391_v17 }
0x1a3a   :  { %v4771_v58 = vsel %vm414_vm5, %v9506_v60, 0.0  ;;  %v5010_v36 = vmul.f32 1.442695, %v5004_v45 }
0x1a3b   :  { %v7060_v7 = vpop.eup %7059  ;;  %v5008_v38 = vmul.f32 1.442695, %v5003_v34  ;;  %4772 = vadd.xlane.f32.xlu1 %v4771_v58  ;;  %v4630_v9 = vsel %vm414_vm5, %v9519_v49, 0.0 }
0x1a3c   :  { %v5001_v30 = vpop.xlane.xlu1 %5000  ;;  %v9513_v61 = vmul.f32 %v7060_v7, %v9386_v48 }
0x1a3d   :  { %7067 = vpow2.f32 %v5008_v38  ;;  %v5005_v8 = vsub.f32 %v9478_v11, %v5001_v30 }
0x1a3e   :  { %v4624_v40 = vsel %vm414_vm5, %v9513_v61, 0.0  ;;  %7069 = vpow2.f32 %v5010_v36 }
0x1a3f   :  { %v7062_v16 = vpop.eup %7061  ;;  %4625 = vadd.xlane.f32.xlu0 %v4624_v40  ;;  %v5012_v12 = vmul.f32 1.442695, %v5005_v8 }
0x1a40   :  { %v9522_v24 = vmul.f32 %v7062_v16, %v9376_v41 }
0x1a41   :  { %7071 = vpow2.f32 %v5012_v12 }
0x1a42   :  { %v7064_v3 = vpop.eup %7063  ;;  %v4627_v11 = vsel %vm414_vm5, %v9522_v24, 0.0 }
0x1a43   :  { %v7066_v4 = vpop.eup %7065  ;;  %4631 = vadd.xlane.f32.xlu0 %v4630_v9  ;;  %4628 = vadd.xlane.f32.xlu1 %v4627_v11  ;;  %v9534_v1 = vmul.f32 %v7064_v3, %v9386_v48 }
0x1a44   :  { %v9529_v37 = vmul.f32 %v7066_v4, %v9414_v13 }
0x1a45   :  { %v5018_v45 = vsel %vm414_vm5, %v9534_v1, 0.0 }
0x1a46   :  { %v4633_v62 = vsel %vm414_vm5, %v9529_v37, 0.0 }
0x1a47   :  { %v7068_v2 = vpop.eup %7067  ;;  %4634 = vadd.xlane.f32.xlu1 %v4633_v62 }
0x1a48   :  { %v9539_v34 = vmul.f32 %v7068_v2, %v9376_v41  ;;  %v7070_v23 = vpop.eup %7069 }
0x1a49   :  { %v9544_v7 = vmul.f32 %v7070_v23, %v9391_v17 }
0x1a4a   :  { %v5021_v58 = vsel %vm414_vm5, %v9539_v34, 0.0 }
0x1a4b   :  { %5019 = vadd.xlane.f32.xlu1 %v5018_v45  ;;  %v7072_v38 = vpop.eup %7071  ;;  %v5024_v48 = vsel %vm414_vm5, %v9544_v7, 0.0 }
0x1a4c   :  { %v9549_v30 = vmul.f32 %v7072_v38, %v9414_v13 }
0x1a4e   :  { %v5027_v41 = vsel %vm414_vm5, %v9549_v30, 0.0 }
0x1a4f   :  { %5022 = vadd.xlane.f32.xlu1 %v5021_v58 }
0x1a53   :  { %5025 = vadd.xlane.f32.xlu1 %v5024_v48 }
0x1a57   :  { %5028 = vadd.xlane.f32.xlu1 %v5027_v41 }
0x1a59   :  { %4790 = vrot.lane.b32.xlu0 %v9306_v21, %s7196_s24 }
0x1a68   :  { %4792 = vrot.lane.b32.xlu1 %v9313_v22, %s7196_s24 }
0x1abf   :  { %v4767_v17 = vpop.xlane.xlu1 %4766 }
0x1ac0   :  { %v4764_v36 = vpop.xlane.xlu0 %4763  ;;  %v4775_v8 = vmax.f32 %v4767_v17, 1e-16 }
0x1ac1   :  { %v4774_v40 = vmax.f32 %v4764_v36, 1e-16 }
0x1ac2   :  { %7073 = vrcp.f32 %v4775_v8 }
0x1ac3   :  { %7075 = vrcp.f32 %v4774_v40 }
0x1ac4   :  { %v4770_v16 = vpop.xlane.xlu0 %4769 }
0x1ac5   :  { %v4776_v41 = vmax.f32 %v4770_v16, 1e-16 }
0x1ac8   :  { %v4773_v12 = vpop.xlane.xlu1 %4772 }
0x1ac9   :  { %v4777_v38 = vmax.f32 %v4773_v12, 1e-16 }
0x1acb   :  { %7077 = vrcp.f32 %v4777_v38 }
0x1acc   :  { %v7074_v13 = vpop.eup %7073  ;;  %v4626_v3 = vpop.xlane.xlu0 %4625 }
0x1acd   :  { %v7076_v9 = vpop.eup %7075  ;;  %v4783_v11 = vmul.f32 %v7074_v13, %v9489_v28  ;;  %v4636_v36 = vmax.f32 %v4626_v3, 1e-16 }
0x1ace   :  { %v4782_v4 = vmul.f32 %v7076_v9, %v9492_v43 }
0x1ad0   :  { %v4632_v62 = vpop.xlane.xlu0 %4631  ;;  %v4629_v2 = vpop.xlane.xlu1 %4628  ;;  %v4786_v45 = vpack.c.bf16 %v4783_v11, %v4782_v4 }
0x1ad1   :  { %v4637_v48 = vmax.f32 %v4629_v2, 1e-16  ;;  %v4638_v9 = vmax.f32 %v4632_v62, 1e-16 }
0x1ad2   :  { %6537 = vmatprep.mubr.msk.bf16.mxu0 %vm414_vm5, %v4786_v45 }
0x1ad3   :  { %7079 = vrcp.f32 %v4637_v48 }
0x1ad4   :  { %v4791_v23 = vpop.permute.xlu0 %4790  ;;  %v4635_v58 = vpop.xlane.xlu1 %4634  ;;  %7081 = vrcp.f32 %v4776_v41 }
0x1ad5   :  { %6533 = vmatprep.subr.bf16.mxu0 %v4791_v23  ;;  %7083 = vrcp.f32 %v4636_v36  ;;  %v4639_v8 = vmax.f32 %v4635_v58, 1e-16  ;;  %v7078_v13 = vpop.eup %7077 }
0x1ad6   :  { %6534 = vmatpush3.bf16.msra.mxu0 %v4791_v23  ;;  %v4785_v16 = vmul.f32 %v7078_v13, %v9506_v60  ;;  %v6199_v13 = vld [vmem:[%s10141_s8 + $0xe0] sm:$0xff] }
0x1ad7   :  { %7085 = vrcp.f32 %v4639_v8 }
0x1ad8   :  { %v5020_v17 = vpop.xlane.xlu1 %5019 }
0x1ad9   :  { %v5030_v45 = vmax.f32 %v5020_v17, 1e-16 }
0x1adc   :  { %v5023_v28 = vpop.xlane.xlu1 %5022 }
0x1add   :  { %v5031_v40 = vmax.f32 %v5023_v28, 1e-16  ;;  %v7080_v4 = vpop.eup %7079 }
0x1ade   :  { %v7082_v55 = vpop.eup %7081  ;;  %v4645_v2 = vmul.f32 %v7080_v4, %v9522_v24  ;;  %v6201_v4 = vld [vmem:[%s10141_s8 + $0xf0] sm:$0xff] }
0x1adf   :  { %v7084_v12 = vpop.eup %7083  ;;  %7087 = vrcp.f32 %v5031_v40  ;;  %v4784_v23 = vmul.f32 %v7082_v55, %v9500_v27 }
0x1ae0   :  { %v5026_v43 = vpop.xlane.xlu1 %5025  ;;  %7089 = vrcp.f32 %v4638_v9  ;;  %v4644_v62 = vmul.f32 %v7084_v12, %v9513_v61  ;;  %v6200_v9 = vld [vmem:[%s10141_s8 + $0xe8] sm:$0xff] }
0x1ae1   :  { %7091 = vrcp.f32 %v5030_v45  ;;  %v4787_v58 = vpack.c.bf16 %v4785_v16, %v4784_v23  ;;  %v7086_v60 = vpop.eup %7085  ;;  %v5032_v55 = vmax.f32 %v5026_v43, 1e-16  ;;  %v6202_v45 = vld [vmem:[%s10141_s8 + $0xf8] sm:$0xff]  ;;  %v6213_v16 = vld [vmem:[%s10140_s7 + $0x3] ss:$0 sm:$0xff] }
0x1ae2   :  { %v4648_v38 = vpack.c.bf16 %v4645_v2, %v4644_v62  ;;  %v4647_v41 = vmul.f32 %v7086_v60, %v9529_v37  ;;  %v6716_v12 = vpack.c.bf16 %v6202_v45, %v6201_v4 }
0x1ae4   :  { %v5029_v11 = vpop.xlane.xlu1 %5028 }
0x1ae5   :  { %v5033_v48 = vmax.f32 %v5029_v11, 1e-16  ;;  %v6712_v11 = vpack.c.bf16 %v6200_v9, %v6199_v13 }
0x1ae7   :  { %7093 = vrcp.f32 %v5033_v48 }
0x1ae8   :  { %v4793_v3 = vpop.permute.xlu1 %4792  ;;  %7095 = vrcp.f32 %v5032_v55 }
0x1ae9   :  { %6535 = vmatprep.subr.bf16.mxu0 %v4793_v3  ;;  %v7088_v27 = vpop.eup %7087 }
0x1aea   :  { %6536 = vmatpush3.bf16.msra.mxu0 %v4793_v3  ;;  %v7090_v24 = vpop.eup %7089  ;;  %v5039_v17 = vmul.f32 %v7088_v27, %v9539_v34 }
0x1aeb   :  { %6541 = vmatprep.subr.bf16.mxu0 %v9306_v21  ;;  %v7092_v61 = vpop.eup %7091 }
0x1aec   :  { %v5038_v36 = vmul.f32 %v7092_v61, %v9534_v1  ;;  %v6195_v1 = vld [vmem:[%s10141_s8 + $0xc0] sm:$0xff] }
0x1aed   :  { %6538 = vmatmul.mubr.msk.bf16.vlgmr.msra.gmra.mrb[56].mxu0 %vm414_vm5, %v4787_v58 }
0x1aee   :  { %6542 = vmatpush3.bf16.msra.mxu0 %v9306_v21  ;;  %6545 = vmatprep.mubr.msk.bf16.mxu0 %vm414_vm5, %v4648_v38  ;;  %v4646_v21 = vmul.f32 %v7090_v24, %v9519_v49  ;;  %v5042_v8 = vpack.c.bf16 %v5039_v17, %v5038_v36 }
0x1aef   :  { %6543 = vmatprep.subr.bf16.mxu0 %v9313_v22 }
0x1af0   :  { %v4649_v28 = vpack.c.bf16 %v4647_v41, %v4646_v21 }
0x1af2   :  { %6544 = vmatpush3.bf16.msra.mxu0 %v9313_v22  ;;  %v7094_v22 = vpop.eup %7093 }
0x1af3   :  { %6549 = vmatprep.subr.bf16.mxu0 %v9308_v44  ;;  %v7096_v37 = vpop.eup %7095  ;;  %v5041_v34 = vmul.f32 %v7094_v22, %v9549_v30 }
0x1af4   :  { %v5040_v49 = vmul.f32 %v7096_v37, %v9544_v7  ;;  %v6198_v7 = vld [vmem:[%s10141_s8 + $0xd8] sm:$0xff] }
0x1af6   :  { %v5043_v43 = vpack.c.bf16 %v5041_v34, %v5040_v49 }
0x1af9   :  { %6546 = vmatmul.mubr.msk.bf16.vlgmr.msra.gmra.mrb[56].mxu0 %vm414_vm5, %v4649_v28 }
0x1afa   :  { %6550 = vmatpush3.bf16.msra.mxu0 %v9308_v44  ;;  %6553 = vmatprep.mubr.msk.bf16.mxu0 %vm414_vm5, %v5042_v8  ;;  %v6196_v44 = vld [vmem:[%s10141_s8 + $0xc8] sm:$0xff] }
0x1afb   :  { %6551 = vmatprep.subr.bf16.mxu0 %v9315_v33  ;;  %v6704_v40 = vpack.c.bf16 %v6196_v44, %v6195_v1 }
0x1afe   :  { %6552 = vmatpush3.bf16.msra.mxu0 %v9315_v33  ;;  %v6197_v33 = vld [vmem:[%s10141_s8 + $0xd0] sm:$0xff] }
0x1aff   :  { %6705 = vmatprep.subr.bf16.mxu0 %v6704_v40  ;;  %v6708_v30 = vpack.c.bf16 %v6198_v7, %v6197_v33 }
0x1b05   :  { %6554 = vmatmul.mubr.msk.bf16.vlgmr.msra.gmra.mrb[56].mxu0 %vm414_vm5, %v5043_v43 }
0x1b06   :  { %6707 = vmatpush3.bf16.msra.mxu0 %v6704_v40 }
0x1b07   :  { %6709 = vmatprep.subr.bf16.mxu0 %v6708_v30 }
0x1b0a   :  { %6711 = vmatpush3.bf16.msra.mxu0 %v6708_v30 }
0x1b0b   :  { %6713 = vmatprep.subr.bf16.mxu0 %v6712_v11 }
0x1b0e   :  { %6715 = vmatpush3.bf16.msra.mxu0 %v6712_v11 }
0x1b0f   :  { %6717 = vmatprep.subr.bf16.mxu0 %v6716_v12 }
0x1b12   :  { %6719 = vmatpush3.bf16.msra.mxu0 %v6716_v12 }
0x1b13   :  { %6590 = vmatprep.subr.bf16.mxu0 %v10197_v29 }
0x1bd8   :  { %v6555_v3 = vpop.f32.mrb[56].mxu0 }
0x1bd9   :  { %v5105_v2 = vmul.f32 0.33333334, %v6555_v3  ;;  %v5084_v23 = vpop.f32.mrb[57].mxu0 }
0x1bda   :  { %v5103_v62 = vmul.f32 0.33333334, %v5084_v23  ;;  %v6556_v58 = vpop.f32.mrb[58].mxu0 }
0x1bdb   :  { %v9611_v38 = vadd.f32 %v6213_v16, %v5105_v2  ;;  %v5106_v48 = vmul.f32 0.33333334, %v6556_v58  ;;  %v5087_v60 = vpop.f32.mrb[59].mxu0 }
0x1bdc   :  { %v9613_v55 = vadd.f32 %v6213_v16, %v5103_v62  ;;  %v5104_v27 = vmul.f32 0.33333334, %v5087_v60 }
0x1bdd   :  { %v9616_v24 = vmul.f32 0.70710677, %v9611_v38  ;;  %v9618_v61 = vadd.f32 %v6213_v16, %v5106_v48 }
0x1bde   :  { %v9621_v41 = vmul.f32 0.70710677, %v9613_v55  ;;  %v9627_v36 = vadd.f32 %v6213_v16, %v5104_v27 }
0x1bdf   :  { %v5135_v17 = vand.u32 2147483647, %v9616_v24  ;;  %v9625_v21 = vmul.f32 0.70710677, %v9618_v61  ;;  %vm5127_vm4 = vcmp.ge.f32.partialorder %v9616_v24, 0.0 }
0x1be0   :  { %v5133_v28 = vand.u32 2147483647, %v9621_v41  ;;  %v9632_v49 = vmul.f32 0.70710677, %v9627_v36  ;;  %vm5125_vm7 = vcmp.ge.f32.partialorder %v9621_v41, 0.0 }
0x1be1   :  { %v5139_v8 = vmul.f32 0.3275911, %v5135_v17  ;;  %v5136_v37 = vand.u32 2147483647, %v9625_v21  ;;  %v5191_v30 = vsub.f32 0.0, %v5135_v17  ;;  %vm5128_vm2 = vcmp.ge.f32.partialorder %v9625_v21, 0.0 }
0x1be2   :  { %v5137_v22 = vmul.f32 0.3275911, %v5133_v28  ;;  %v5134_v44 = vand.u32 2147483647, %v9632_v49  ;;  %v5189_v13 = vsub.f32 0.0, %v5133_v28  ;;  %vm5126_vm8 = vcmp.ge.f32.partialorder %v9632_v49, 0.0 }
0x1be3   :  { %v5143_v34 = vadd.f32 1.0, %v5139_v8  ;;  %v5140_v1 = vmul.f32 0.3275911, %v5136_v37  ;;  %v5195_v11 = vmul.f32 %v5191_v30, %v5135_v17  ;;  %v5192_v4 = vsub.f32 0.0, %v5136_v37 }
0x1be4   :  { %v5141_v43 = vadd.f32 1.0, %v5137_v22  ;;  %v5138_v33 = vmul.f32 0.3275911, %v5134_v44  ;;  %v5193_v16 = vmul.f32 %v5189_v13, %v5133_v28  ;;  %v5190_v2 = vsub.f32 0.0, %v5134_v44 }
0x1be5   :  { %7097 = vrcp.f32 %v5143_v34  ;;  %v5144_v40 = vadd.f32 1.0, %v5140_v1  ;;  %v5201_v58 = vmul.f32 1.442695, %v5195_v11  ;;  %v5196_v60 = vmul.f32 %v5192_v4, %v5136_v37 }
0x1be6   :  { %7099 = vrcp.f32 %v5141_v43  ;;  %v5142_v7 = vadd.f32 1.0, %v5138_v33  ;;  %v5197_v8 = vmul.f32 1.442695, %v5193_v16  ;;  %v5194_v1 = vmul.f32 %v5190_v2, %v5134_v44 }
0x1be7   :  { %7101 = vrcp.f32 %v5144_v40  ;;  %v5203_v30 = vmul.f32 1.442695, %v5196_v60  ;;  %v5118_v21 = vmul.f32 0.5, %v9627_v36 }
0x1be8   :  { %7103 = vrcp.f32 %v5142_v7  ;;  %v5199_v11 = vmul.f32 1.442695, %v5194_v1 }
0x1be9   :  { %7105 = vpow2.f32 %v5201_v58 }
0x1bea   :  { %7107 = vpow2.f32 %v5197_v8 }
0x1beb   :  { %7109 = vpow2.f32 %v5203_v30 }
0x1bec   :  { %7111 = vpow2.f32 %v5199_v11 }
0x1bef   :  { %v7098_v9 = vpop.eup %7097 }
0x1bf0   :  { %v7100_v45 = vpop.eup %7099  ;;  %v5155_v12 = vmul.f32 1.0614054, %v7098_v9 }
0x1bf1   :  { %v5153_v3 = vmul.f32 1.0614054, %v7100_v45  ;;  %v7102_v62 = vpop.eup %7101 }
0x1bf2   :  { %v5159_v23 = vadd.f32 -1.4531521, %v5155_v12  ;;  %v5156_v22 = vmul.f32 1.0614054, %v7102_v62  ;;  %v7104_v34 = vpop.eup %7103 }
0x1bf3   :  { %v5157_v48 = vadd.f32 -1.4531521, %v5153_v3  ;;  %v5154_v17 = vmul.f32 1.0614054, %v7104_v34 }
0x1bf4   :  { %v5163_v27 = vmul.f32 %v7098_v9, %v5159_v23  ;;  %v5160_v33 = vadd.f32 -1.4531521, %v5156_v22 }
0x1bf5   :  { %v5161_v43 = vmul.f32 %v7100_v45, %v5157_v48  ;;  %v5158_v12 = vadd.f32 -1.4531521, %v5154_v17 }
0x1bf6   :  { %v5167_v40 = vadd.f32 1.4214138, %v5163_v27  ;;  %v5164_v13 = vmul.f32 %v7102_v62, %v5160_v33  ;;  %v7106_v33 = vpop.eup %7105 }
0x1bf7   :  { %v5165_v7 = vadd.f32 1.4214138, %v5161_v43  ;;  %v5162_v4 = vmul.f32 %v7104_v34, %v5158_v12  ;;  %v7108_v1 = vpop.eup %7107 }
0x1bf8   :  { %v5171_v28 = vmul.f32 %v7098_v9, %v5167_v40  ;;  %v5168_v37 = vadd.f32 1.4214138, %v5164_v13  ;;  %v7110_v11 = vpop.eup %7109 }
0x1bf9   :  { %v5169_v59 = vmul.f32 %v7100_v45, %v5165_v7  ;;  %v5166_v44 = vadd.f32 1.4214138, %v5162_v4 }
0x1bfa   :  { %v5175_v3 = vadd.f32 -0.28449672, %v5171_v28  ;;  %v5172_v48 = vmul.f32 %v7102_v62, %v5168_v37 }
0x1bfb   :  { %v5173_v16 = vadd.f32 -0.28449672, %v5169_v59  ;;  %v5170_v22 = vmul.f32 %v7104_v34, %v5166_v44 }
0x1bfc   :  { %v5179_v23 = vmul.f32 %v7098_v9, %v5175_v3  ;;  %v5176_v58 = vadd.f32 -0.28449672, %v5172_v48 }
0x1bfd   :  { %v5177_v2 = vmul.f32 %v7100_v45, %v5173_v16  ;;  %v5174_v40 = vadd.f32 -0.28449672, %v5170_v22  ;;  %v5132_v22 = vsel %vm5128_vm2, 1.0, %v10211_v46 }
0x1bfe   :  { %v5183_v27 = vadd.f32 0.2548296, %v5179_v23  ;;  %v5180_v8 = vmul.f32 %v7102_v62, %v5176_v58  ;;  %v7112_v23 = vpop.eup %7111 }
0x1bff   :  { %v5181_v60 = vadd.f32 0.2548296, %v5177_v2  ;;  %v5178_v13 = vmul.f32 %v7104_v34, %v5174_v40  ;;  %v5119_v40 = vmul.f32 0.5, %v9611_v38 }
0x1c00   :  { %v5187_v43 = vmul.f32 %v7098_v9, %v5183_v27  ;;  %v5184_v28 = vadd.f32 0.2548296, %v5180_v8  ;;  %v5129_v9 = vsel %vm5125_vm7, 1.0, %v10211_v46 }
0x1c01   :  { %v5185_v17 = vmul.f32 %v7100_v45, %v5181_v60  ;;  %v5182_v12 = vadd.f32 0.2548296, %v5178_v13  ;;  %v5131_v45 = vsel %vm5127_vm4, 1.0, %v10211_v46  ;;  %v7159_v13 = vld [vmem:[%s10135_s2] sm:$0xff] }
0x1c02   :  { %v5207_v7 = vmul.f32 %v7106_v33, %v5187_v43  ;;  %v5188_v30 = vmul.f32 %v7102_v62, %v5184_v28  ;;  %v5117_v62 = vmul.f32 0.5, %v9613_v55 }
0x1c03   :  { %v5205_v59 = vmul.f32 %v7108_v1, %v5185_v17  ;;  %v5186_v16 = vmul.f32 %v7104_v34, %v5182_v12  ;;  %v5130_v34 = vsel %vm5126_vm8, 1.0, %v10211_v46  ;;  %v5120_v1 = vmul.f32 0.5, %v9618_v61  ;;  %v7160_v12 = vld [vmem:[%s10135_s2 + $0x8] sm:$0xff] }
0x1c04   :  { %v5211_v3 = vsub.f32 1.0, %v5207_v7  ;;  %v5208_v4 = vmul.f32 %v7110_v11, %v5188_v30  ;;  %v5419_v11 = vmul.f32 %v7160_v12, %v9218_v32 }
0x1c05   :  { %v5209_v37 = vsub.f32 1.0, %v5205_v59  ;;  %v5206_v41 = vmul.f32 %v7112_v23, %v5186_v16  ;;  %v5418_v59 = vmul.f32 %v7159_v13, %v9218_v32 }
0x1c06   :  { %v5212_v44 = vsub.f32 1.0, %v5208_v4  ;;  %v5215_v24 = vmul.f32 %v5211_v3, %v5131_v45  ;;  %v5425_v3 = vsel %vm414_vm5, %v5419_v11, 0.0 }
0x1c07   :  { %v5213_v48 = vmul.f32 %v5209_v37, %v5129_v9  ;;  %v5210_v27 = vsub.f32 1.0, %v5206_v41  ;;  %v5422_v30 = vsel %vm414_vm5, %v5418_v59, 0.0  ;;  %v7161_v37 = vld [vmem:[%s10135_s2 + $0x10] sm:$0xff] }
0x1c08   :  { %v5216_v60 = vmul.f32 %v5212_v44, %v5132_v22  ;;  %v5219_v8 = vadd.f32 1.0, %v5215_v24  ;;  %v5420_v9 = vmul.f32 %v7161_v37, %v9218_v32 }
0x1c09   :  { %v5217_v2 = vadd.f32 1.0, %v5213_v48  ;;  %v5214_v43 = vmul.f32 %v5210_v27, %v5130_v34  ;;  %v5421_v34 = vmul.f32 %v7162_v50, %v9218_v32 }
0x1c0a   :  { %v5220_v55 = vadd.f32 1.0, %v5216_v60  ;;  %v9652_v17 = vmul.f32 %v5219_v8, %v5119_v40  ;;  %v5428_v4 = vsel %vm414_vm5, %v5420_v9, 0.0 }
0x1c0b   :  { %v9642_v58 = vmul.f32 %v5217_v2, %v5117_v62  ;;  %v5218_v49 = vadd.f32 1.0, %v5214_v43 }
0x1c0c   :  { %v9659_v7 = vmul.f32 %v5220_v55, %v5120_v1 }
0x1c0d   :  { %6573 = vmatprep.mubr.msk.f32.mxu0 %vm10227_vm3, %v9642_v58  ;;  %v9650_v33 = vmul.f32 %v5218_v49, %v5118_v21 }
0x1c0f   :  { %6574 = vmatmul.mubr.msk.f32.vlgmr.msra.gmra.mrb[60].mxu0 %vm10228_vm9, %v9650_v33 }
0x1c10   :  { %6576 = vmatprep.mubr.msk.f32.mxu0 %vm10229_vm0, %v9652_v17 }
0x1c13   :  { %6577 = vmatmul.mubr.msk.f32.gmra.mrb[62].mxu0 %vm10230_vm11, %v9659_v7  ;;  %vm10232_vm11 = vcmp.lt.s32.totalorder %v7485_v53, %v7494_v56  ;;  %v5431_v56 = vsel %vm414_vm5, %v5421_v34, 0.0 }
0x1c14   :  { %6598 = vmatprep.mubr.msk.bf16.mxu0 %vm10209_vm6, %v10197_v29 }
0x1ce2   :  { %v6575_v38 = vpop.f32.mrb[60].mxu0 }
0x1ce3   :  { %5365 = vperm.xlu0 %6821, %v6575_v38   ;;  %v5303_v36 = vpop.f32.mrb[61].mxu0 }
0x1ce4   :  { %7113 = vtanh.f32 %v5303_v36 }
0x1ce6   :  { %v6578_v28 = vpop.f32.mrb[62].mxu0 }
0x1ce7   :  { %5360 = vperm.xlu0 %6821, %v5303_v36   ;;  %5375 = vperm.xlu1 %6822, %v6578_v28   ;;  %v9665_v61 = vpop.f32.mrb[63].mxu0  ;;  %7115 = vtanh.f32 %v6578_v28 }
0x1ce8   :  { %7117 = vtanh.f32 %v6575_v38 }
0x1ce9   :  { %7119 = vtanh.f32 %v9665_v61 }
0x1ceb   :  { %5370 = vperm.xlu0 %6821, %v9665_v61  }
0x1cee   :  { %v7114_v8 = vpop.eup %7113 }
0x1cf1   :  { %v7116_v21 = vpop.eup %7115 }
0x1cf2   :  { %v7118_v49 = vpop.eup %7117 }
0x1cf3   :  { %v7120_v11 = vpop.eup %7119 }
0x1d09   :  { %5322 = vxpose.xlu0.b32.start [1/4] (short) (narrow) %v5303_v36, 8 }
0x1d0b   :  { %5423 = vadd.xlane.f32.xlu1 %v5422_v30 }
0x1d0d   :  { %5323 = vxpose.xlu0.b32.cont [2/4] (short) (narrow) %v6575_v38, 8 }
0x1d0f   :  { %5426 = vadd.xlane.f32.xlu1 %v5425_v3  ;;  %v9740_v3 = vld [vmem:[%s10137_s4 + $0x10] sm:$0xff] }
0x1d11   :  { %5324 = vxpose.xlu0.b32.cont [3/4] (short) (narrow) %v9665_v61, 8 }
0x1d13   :  { %5429 = vadd.xlane.f32.xlu1 %v5428_v4  ;;  %v9762_v4 = vld [vmem:[%s10137_s4] sm:$0xff] }
0x1d15   :  { %5325 = vxpose.xlu0.b32.end [4/4] (short) (narrow) %v6578_v28, 8 }
0x1d62   :  { %v5366_v16 = vpop.permute.xlu0 %5365 }
0x1d66   :  { %v5361_v23 = vpop.permute.xlu0 %5360  ;;  %v5376_v40 = vpop.permute.xlu1 %5375 }
0x1d6a   :  { %v5371_v45 = vpop.permute.xlu0 %5370 }
0x1d89   :  { %v5338_v48 = vpop.trf.xlu0 }
0x1d8a   :  { %v5357_v44 = vrot.slane %v5338_v48, %v7483_v51 }
0x1d8c   :  { %vm5379_vm13 = vcmp.gt.f32.partialorder %v5357_v44, %v5366_v16  ;;  %vm5383_vm10 = vcmp.eq.f32.partialorder %v5357_v44, %v5366_v16  ;;  %vm5382_vm12 = vcmp.eq.f32.partialorder %v5357_v44, %v5361_v23  ;;  %vm5378_vm4 = vcmp.gt.f32.partialorder %v5357_v44, %v5361_v23 }
0x1d8d   :  { %vm5387_vm7 = vmand %vm5383_vm10, %vm10231_vm15  ;;  %vm5380_vm2 = vcmp.gt.f32.partialorder %v5357_v44, %v5371_v45  ;;  %vm5384_vm8 = vcmp.eq.f32.partialorder %v5357_v44, %v5371_v45 }
0x1d8e   :  { %vm5391_vm3 = vmor %vm5379_vm13, %vm5387_vm7  ;;  %vm5385_vm13 = vcmp.eq.f32.partialorder %v5357_v44, %v5376_v40 }
0x1d8f   :  { %v5395_v41 = vsel %vm5391_vm3, 1.0, %v10197_v29  ;;  %vm5386_vm9 = vmand %vm5382_vm12, %vm1205_vm1  ;;  %vm5381_vm12 = vcmp.gt.f32.partialorder %v5357_v44, %v5376_v40 }
0x1d90   :  { %v5399_v24 = vmul.f32 %v7160_v12, %v5395_v41  ;;  %vm5390_vm0 = vmor %vm5378_vm4, %vm5386_vm9  ;;  %vm1342_vm4 = vcmask 254976  }
0x1d91   :  { %v5394_v62 = vsel %vm5390_vm0, 1.0, %v10197_v29  ;;  %vm5388_vm10 = vmand %vm5384_vm8, %vm10232_vm11  ;;  %v1343_v36 = vsel %vm1342_vm4, %v8005_v35, 0.0  ;;  %v2737_v53 = vsel %vm1342_vm4, %v8614_v5, 0.0  ;;  %v9729_v35 = vld [vmem:[%s10137_s4 + $0x8] sm:$0xff]  ;;  %v4130_v44 = vsel %vm1342_vm4, %v9224_v15, 0.0 }
0x1d92   :  { %v5403_v2 = vmul.f32 %v5399_v24, %v9218_v32  ;;  %v5398_v27 = vmul.f32 %v7159_v13, %v5394_v62  ;;  %vm9704_vm1 = vmor %vm5380_vm2, %vm5388_vm10  ;;  %v1423_v12 = vmul.f32 %v7949_v18, %v9729_v35  ;;  %v2817_v5 = vmul.f32 %v8560_v26, %v9729_v35  ;;  %v9751_v26 = vld [vmem:[%s10137_s4 + $0x18] sm:$0xff] }
0x1d93   :  { %vm5389_vm15 = vmand %vm5385_vm13, %vm1208_vm14  ;;  %v5396_v38 = vsel %vm9704_vm1, 1.0, %v10197_v29  ;;  %v1424_v18 = vmul.f32 %v7972_v20, %v9740_v3  ;;  %v2816_v20 = vmul.f32 %v8563_v14, %v9762_v4 }
0x1d94   :  { %v5409_v54 = vsel %vm414_vm5, %v5403_v2, 0.0  ;;  %v5402_v22 = vmul.f32 %v5398_v27, %v9218_v32  ;;  %vm5393_vm7 = vmor %vm5381_vm12, %vm5389_vm15  ;;  %v5400_v13 = vmul.f32 %v7161_v37, %v5396_v38  ;;  %vm1427_vm14 = vcmp.gt.f32.partialorder %v1423_v12, 0.0 }
0x1d95   :  { %5410 = vadd.xlane.f32.xlu1 %v5409_v54  ;;  %v5397_v55 = vsel %vm5393_vm7, 1.0, %v10197_v29  ;;  %vm2821_vm2 = vcmp.gt.f32.partialorder %v2817_v5, 0.0  ;;  %vm1428_vm8 = vcmp.gt.f32.partialorder %v1424_v18, 0.0  ;;  %v1425_v37 = vmul.f32 %v7978_v63, %v9751_v26 }
0x1d96   :  { %v5406_v43 = vsel %vm414_vm5, %v5402_v22, 0.0  ;;  %v5401_v1 = vmul.f32 %v7162_v50, %v5397_v55  ;;  %v5404_v59 = vmul.f32 %v5400_v13, %v9218_v32  ;;  %v9743_v61 = vsel %vm2821_vm2, 1, %v10216_v0 }
0x1d97   :  { %5407 = vadd.xlane.f32.xlu0 %v5406_v43  ;;  %v9757_v9 = vsel %vm1428_vm8, 1, %v10216_v0  ;;  %vm1429_vm3 = vcmp.gt.f32.partialorder %v1425_v37, 0.0  ;;  %vm2820_vm9 = vcmp.gt.f32.partialorder %v2816_v20, 0.0  ;;  %v2819_v63 = vmul.f32 %v8585_v47, %v9751_v26 }
0x1d98   :  { %v5405_v28 = vmul.f32 %v5401_v1, %v9218_v32  ;;  %v5412_v30 = vsel %vm414_vm5, %v5404_v59, 0.0  ;;  %v1431_v32 = vsel %vm1427_vm14, 1, %v10216_v0  ;;  %v9768_v16 = vsel %vm1429_vm3, 1, %v10216_v0  ;;  %v5424_v14 = vpop.xlane.xlu1 %5423 }
0x1d99   :  { %5432 = vadd.xlane.f32.xlu1 %v5431_v56  ;;  %v9774_v23 = vsel %vm2820_vm9, 1, %v10216_v0  ;;  %vm2823_vm0 = vcmp.gt.f32.partialorder %v2819_v63, 0.0  ;;  %v5434_v24 = vmul.f32 0.8, %v5424_v14 }
0x1d9a   :  { %v5415_v57 = vsel %vm414_vm5, %v5405_v28, 0.0  ;;  %v9778_v45 = vsel %vm2823_vm0, 1, %v10216_v0 }
0x1d9b   :  { %v5438_v2 = vceil.f32 %v5434_v24 }
0x1d9c   :  { %v5427_v48 = vpop.xlane.xlu1 %5426 }
0x1d9d   :  { %v5435_v47 = vmul.f32 0.8, %v5427_v48 }
0x1d9f   :  { %v5439_v27 = vceil.f32 %v5435_v47 }
0x1da0   :  { %v5430_v41 = vpop.xlane.xlu1 %5429 }
0x1da1   :  { %v5436_v28 = vmul.f32 0.8, %v5430_v41 }
0x1da3   :  { %v5440_v59 = vceil.f32 %v5436_v28 }
0x1daa   :  { %5460 = vperm.xlu1 %6822, %v7114_v8  }
0x1dad   :  { %5475 = vperm.xlu0 %6821, %v7116_v21  }
0x1dae   :  { %5465 = vperm.xlu1 %6822, %v7118_v49  }
0x1db1   :  { %6824 = vset.pattern.permute.xlu0 %v10198_v52 }
0x1dcc   :  { %1344 = vadd.xlane.f32.xlu0 %v1343_v36 }
0x1dd0   :  { %2738 = vadd.xlane.f32.xlu0 %v2737_v53 }
0x1dd2   :  { %5416 = vadd.xlane.f32.xlu1 %v5415_v57 }
0x1dd6   :  { %5413 = vadd.xlane.f32.xlu1 %v5412_v30 }
0x1de6   :  { %1475 = vperm.xlu0 %6824, %v1431_v32  }
0x1de7   :  { %5470 = vperm.xlu1 %6822, %v7120_v11  }
0x1dea   :  { %2869 = vperm.xlu0 %6824, %v9743_v61  }
0x1dee   :  { %6827 = vset.pattern.permute.xlu0 %v10216_v0 }
0x1def   :  { %1438 = vperm.xlu0 %6827, %v1431_v32  }
0x1df3   :  { %1441 = vperm.xlu0 %6827, %v9757_v9  }
0x1df7   :  { %1444 = vperm.xlu0 %6827, %v9768_v16  }
0x1dfb   :  { %2829 = vperm.xlu0 %6827, %v9774_v23  }
0x1dff   :  { %2838 = vperm.xlu0 %6827, %v9778_v45  }
0x1e1e   :  { %4131 = vadd.xlane.f32.xlu0 %v4130_v44 }
0x1e22   :  { %v5411_v62 = vpop.xlane.xlu1 %5410 }
0x1e23   :  { %vm5443_vm11 = vcmp.lt.f32.partialorder %v5411_v62, %v5439_v27 }
0x1e24   :  { %v5408_v54 = vpop.xlane.xlu0 %5407  ;;  %v5447_v60 = vsel %vm5443_vm11, 1.0, %v10197_v29 }
0x1e25   :  { %vm5442_vm10 = vcmp.lt.f32.partialorder %v5408_v54, %v5438_v2  ;;  %v9790_v43 = vmul.f32 %v5447_v60, %v9167_v42  ;;  %v10236_v54 = vld [vmem:[#allocation12_spill] sm:$0xff] }
0x1e26   :  { %v5446_v22 = vsel %vm5442_vm10, 1.0, %v10197_v29  ;;  %v5433_v50 = vpop.xlane.xlu1 %5432 }
0x1e27   :  { %v9785_v34 = vmul.f32 %v5446_v22, %v9173_v31  ;;  %v2818_v22 = vmul.f32 %v10236_v54, %v9740_v3 }
0x1e29   :  { %5486 = vxpose.xlu1.b32.start [1/4] (short) (narrow) %v9785_v34, 8  ;;  %vm2822_vm15 = vcmp.gt.f32.partialorder %v2818_v22, 0.0 }
0x1e2a   :  { %v5461_v15 = vpop.permute.xlu1 %5460  ;;  %v2826_v60 = vsel %vm2822_vm15, 1, %v10216_v0 }
0x1e2b   :  { %v5478_v56 = vmul.f32 %v5461_v15, %v9642_v58  ;;  %v5437_v58 = vmul.f32 0.8, %v5433_v50 }
0x1e2c   :  { %v5476_v1 = vpop.permute.xlu0 %5475 }
0x1e2d   :  { %5487 = vxpose.xlu1.b32.cont [2/4] (short) (narrow) %v9790_v43, 8  ;;  %v9796_v49 = vmul.f32 %v5478_v56, %v9785_v34  ;;  %v5441_v13 = vceil.f32 %v5437_v58  ;;  %v5481_v20 = vmul.f32 %v5476_v1, %v9659_v7 }
0x1e2e   :  { %v5466_v8 = vpop.permute.xlu1 %5465 }
0x1e2f   :  { %v5479_v21 = vmul.f32 %v5466_v8, %v9650_v33  ;;  %v4210_v8 = vmul.f32 %v9167_v42, %v9729_v35  ;;  %v10237_v42 = vld [vmem:[#allocation19_spill] sm:$0xff] }
0x1e31   :  { %v9799_v40 = vmul.f32 %v5479_v21, %v9790_v43  ;;  %vm4214_vm14 = vcmp.gt.f32.partialorder %v4210_v8, 0.0  ;;  %v5695_v8 = vld [vmem:[%s10142_s9 + $0x38] sm:$0xff] }
0x1e32   :  { %v4218_v21 = vsel %vm4214_vm14, 1, %v10216_v0 }
0x1e33   :  { %v6721_v55 = vpack.c.bf16 %v9799_v40, %v9796_v49 }
0x1e35   :  { %6722 = vmatpush3.bf16.msra.mxu1 %v6721_v55 }
0x1e36   :  { %6723 = vmatprep.subr.bf16.mxu1 %v10202_v6 }
0x1e59   :  { %v9804_v38 = vpop.xlane.xlu0 %1344 }
0x1e5a   :  { %v1419_v36 = vmax.f32 %v9804_v38, 1.0 }
0x1e5c   :  { %7121 = vrcp.f32 %v1419_v36 }
0x1e5d   :  { %v9807_v33 = vpop.xlane.xlu0 %2738 }
0x1e5e   :  { %v2813_v53 = vmax.f32 %v9807_v33, 1.0 }
0x1e5f   :  { %v5417_v57 = vpop.xlane.xlu1 %5416 }
0x1e60   :  { %7123 = vrcp.f32 %v2813_v53  ;;  %vm5445_vm1 = vcmp.lt.f32.partialorder %v5417_v57, %v5441_v13 }
0x1e61   :  { %v5449_v30 = vsel %vm5445_vm1, 1.0, %v10197_v29 }
0x1e62   :  { %v9813_v32 = vmul.f32 %v5449_v30, %v9195_v39 }
0x1e63   :  { %v5414_v6 = vpop.xlane.xlu1 %5413 }
0x1e64   :  { %vm5444_vm13 = vcmp.lt.f32.partialorder %v5414_v6, %v5440_v59  ;;  %v9823_v48 = vmul.f32 %v5481_v20, %v9813_v32  ;;  %v5605_v53 = vmul.f32 %v9813_v32, %v9751_v26 }
0x1e65   :  { %v5448_v12 = vsel %vm5444_vm13, 1.0, %v10197_v29  ;;  %v9835_v47 = vpop.permute.xlu0 %1475 }
0x1e66   :  { %v7122_v5 = vpop.eup %7121  ;;  %v9816_v11 = vmul.f32 %v5448_v12, %v9189_v19  ;;  %vm5609_vm0 = vcmp.gt.f32.partialorder %v5605_v53, 0.0 }
0x1e67   :  { %v5471_v18 = vpop.permute.xlu1 %5470  ;;  %v1421_v37 = vmul.f32 %v7122_v5, %v8103_v10  ;;  %v10240_v5 = vld [vmem:[#allocation9_spill] sm:$0xff] }
0x1e68   :  { %v5480_v63 = vmul.f32 %v5471_v18, %v9652_v17  ;;  %5488 = vxpose.xlu1.b32.cont [3/4] (short) (narrow) %v9816_v11, 8  ;;  %v10235_v17 = vld [vmem:[#allocation6_spill] sm:$0xff]  ;;  %v5688_v18 = vld [vmem:[%s10142_s9] sm:$0xff] }
0x1e69   :  { %v1422_v7 = vmul.f32 %v10235_v17, %v9762_v4  ;;  %v9837_v62 = vpop.permute.xlu0 %2869 }
0x1e6a   :  { %v7124_v14 = vpop.eup %7123  ;;  %v9826_v44 = vmul.f32 %v5480_v63, %v9816_v11  ;;  %v10242_v63 = vld [vmem:[#allocation7_spill] sm:$0xff] }
0x1e6b   :  { %v2815_v41 = vmul.f32 %v7124_v14, %v8712_v25  ;;  %vm1426_vm12 = vcmp.gt.f32.partialorder %v1422_v7, 0.0 }
0x1e6c   :  { %v6724_v24 = vpack.c.bf16 %v9823_v48, %v9826_v44  ;;  %5489 = vxpose.xlu1.b32.end [4/4] (short) (narrow) %v9813_v32, 8  ;;  %v1430_v2 = vsel %vm1426_vm12, 1, %v10216_v0 }
0x1e6d   :  { %v2901_v10 = vadd.f32 %v2815_v41, %v1421_v37 }
0x1e6e   :  { %6725 = vmatpush3.bf16.msra.mxu1 %v6724_v24  ;;  %v9841_v25 = vpop.permute.xlu0 %1438 }
0x1e6f   :  { %6602 = vmatprep.subr.bf16.mxu1 %v10197_v29  ;;  %vm1447_vm1 = vcmp.eq.s32.totalorder %v9841_v25, 1  ;;  %v5691_v25 = vld [vmem:[%s10142_s9 + $0x18] sm:$0xff] }
0x1e72   :  { %v9844_v27 = vpop.permute.xlu0 %1441 }
0x1e73   :  { %vm1448_vm13 = vcmp.eq.s32.totalorder %v9844_v27, 1 }
0x1e74   :  { %v1452_v32 = vsel %vm1448_vm13, %v10240_v5, -1e+30 }
0x1e76   :  { %v9849_v50 = vpop.permute.xlu0 %1444 }
0x1e77   :  { %vm1449_vm10 = vcmp.eq.s32.totalorder %v9849_v50, 1  ;;  %v5692_v50 = vld [vmem:[%s10142_s9 + $0x20] sm:$0xff] }
0x1e7a   :  { %v9854_v15 = vpop.permute.xlu0 %2829 }
0x1e8a   :  { %1435 = vperm.xlu1 %6822, %v1430_v2  }
0x1e8e   :  { %6823 = vset.pattern.permute.xlu1 %v10198_v52 }
0x1e8f   :  { %1472 = vperm.xlu1 %6823, %v1430_v2   ;;  %v5690_v2 = vld [vmem:[%s10142_s9 + $0x10] sm:$0xff] }
0x1e90   :  { %v5706_v54 = vpack.c.bf16 %v5691_v25, %v5690_v2 }
0x1e93   :  { %1478 = vperm.xlu1 %6823, %v9757_v9   ;;  %v9858_v9 = vpop.permute.xlu0 %2838 }
0x1e94   :  { %vm2843_vm13 = vcmp.eq.s32.totalorder %v9858_v9, 1 }
0x1e97   :  { %1481 = vperm.xlu1 %6823, %v9768_v16   ;;  %v4209_v16 = vmul.f32 %v9173_v31, %v9762_v4  ;;  %v4211_v31 = vmul.f32 %v9189_v19, %v9740_v3  ;;  %v5602_v19 = vmul.f32 %v9785_v34, %v9762_v4  ;;  %v5613_v4 = vsel %vm5609_vm0, 1, %v10216_v0 }
0x1e98   :  { %v5603_v34 = vmul.f32 %v9790_v43, %v9729_v35  ;;  %v10239_v35 = vld [vmem:[#allocation5_spill] sm:$0xff] }
0x1e99   :  { %vm4213_vm7 = vcmp.gt.f32.partialorder %v4209_v16, 0.0  ;;  %vm4215_vm2 = vcmp.gt.f32.partialorder %v4211_v31, 0.0  ;;  %vm5606_vm3 = vcmp.gt.f32.partialorder %v5602_v19, 0.0  ;;  %v1451_v43 = vsel %vm1447_vm1, %v10239_v35, -1e+30 }
0x1e9a   :  { %v4219_v1 = vsel %vm4215_vm2, 1, %v10216_v0  ;;  %v5610_v13 = vsel %vm5606_vm3, 1, %v10216_v0  ;;  %vm5607_vm11 = vcmp.gt.f32.partialorder %v5603_v34, 0.0  ;;  %vm1484_vm2 = vcmp.eq.s32.totalorder %v9835_v47, 1 }
0x1e9b   :  { %6825 = vset.pattern.permute.xlu1 %v10216_v0  ;;  %v5611_v6 = vsel %vm5607_vm11, 1, %v10216_v0  ;;  %v1488_v47 = vsel %vm1484_vm2, %v10239_v35, -1e+30  ;;  %vm2840_vm1 = vcmp.eq.s32.totalorder %v9854_v15, 1 }
0x1e9c   :  { %2832 = vperm.xlu1 %6825, %v9743_v61  }
0x1ea0   :  { %2835 = vperm.xlu1 %6825, %v2826_v60  }
0x1ea4   :  { %6826 = vset.pattern.permute.xlu1 %v10198_v52 }
0x1ea5   :  { %2866 = vperm.xlu1 %6826, %v9774_v23   ;;  %v4217_v23 = vsel %vm4213_vm7, 1, %v10216_v0 }
0x1ea9   :  { %2872 = vperm.xlu1 %6826, %v2826_v60   ;;  %v5693_v60 = vld [vmem:[%s10142_s9 + $0x28] sm:$0xff] }
0x1eaa   :  { %v5707_v16 = vpack.c.bf16 %v5693_v60, %v5692_v50 }
0x1eab   :  { %v9862_v56 = vpop.xlane.xlu0 %4131 }
0x1eac   :  { %v4206_v61 = vmax.f32 %v9862_v56, 1.0 }
0x1ead   :  { %2875 = vperm.xlu1 %6826, %v9778_v45   ;;  %v4212_v45 = vmul.f32 %v9195_v39, %v9751_v26  ;;  %v5604_v39 = vmul.f32 %v9816_v11, %v9740_v3  ;;  %v7163_v26 = vld [vmem:[%s10136_s3] sm:$0x3] }
0x1eae   :  { %7125 = vrcp.f32 %v4206_v61  ;;  %v5694_v61 = vld [vmem:[%s10142_s9 + $0x30] sm:$0xff] }
0x1eaf   :  { %vm4216_vm8 = vcmp.gt.f32.partialorder %v4212_v45, 0.0  ;;  %vm5608_vm9 = vcmp.gt.f32.partialorder %v5604_v39, 0.0  ;;  %v5708_v45 = vpack.c.bf16 %v5695_v8, %v5694_v61 }
0x1eb0   :  { %v4220_v28 = vsel %vm4216_vm8, 1, %v10216_v0  ;;  %v5612_v57 = vsel %vm5608_vm9, 1, %v10216_v0 }
0x1eb1   :  { %6828 = vset.pattern.permute.xlu1 %v10216_v0 }
0x1eb2   :  { %4222 = vperm.xlu1 %6828, %v4217_v23  }
0x1eb6   :  { %4225 = vperm.xlu1 %6828, %v4218_v21  }
0x1eb8   :  { %v7126_v55 = vpop.eup %7125 }
0x1eb9   :  { %v4208_v58 = vmul.f32 %v7126_v55, %v10237_v42  ;;  %v5696_v55 = vld [vmem:[%s10142_s9 + $0x40] sm:$0xff]  ;;  %v5698_v42 = vld [vmem:[%s10142_s9 + $0x50] sm:$0xff] }
0x1eba   :  { %4228 = vperm.xlu1 %6828, %v4219_v1  }
0x1ebb   :  { %v9877_v36 = vadd.f32 %v4208_v58, %v2901_v10 }
0x1ebe   :  { %4231 = vperm.xlu1 %6828, %v4220_v28  }
0x1ec2   :  { %6829 = vset.pattern.permute.xlu1 %v10198_v52 }
0x1ec3   :  { %4259 = vperm.xlu1 %6829, %v4217_v23  }
0x1ec7   :  { %4262 = vperm.xlu1 %6829, %v4218_v21  }
0x1ecb   :  { %4265 = vperm.xlu1 %6829, %v4219_v1   ;;  %v5697_v1 = vld [vmem:[%s10142_s9 + $0x48] sm:$0xff] }
0x1ecc   :  { %v5710_v39 = vpack.c.bf16 %v5697_v1, %v5696_v55 }
0x1ece   :  { %6591 = vmatpush3.bf16.msra.mxu0 %v5710_v39 }
0x1ecf   :  { %4268 = vperm.xlu1 %6829, %v4220_v28   ;;  %6592 = vmatprep.subr.bf16.mxu0 %v10197_v29 }
0x1ed3   :  { %6830 = vset.pattern.permute.xlu1 %v10216_v0 }
0x1ed4   :  { %5615 = vperm.xlu1 %6830, %v5610_v13  }
0x1ed8   :  { %5621 = vperm.xlu1 %6830, %v5612_v57  }
0x1edc   :  { %5624 = vperm.xlu1 %6830, %v5613_v4  }
0x1ee0   :  { %6831 = vset.pattern.permute.xlu1 %v10198_v52  ;;  %v5502_v3 = vpop.trf.xlu1 }
0x1ee1   :  { %v5521_v59 = vrot.slane %v5502_v3, %v7483_v51  ;;  %5652 = vperm.xlu1 %6831, %v5610_v13   ;;  %v10238_v51 = vld [vmem:[#allocation8_spill] sm:$0xff] }
0x1ee2   :  { %v1453_v0 = vsel %vm1449_vm10, %v10238_v51, -1e+30  ;;  %v5699_v13 = vld [vmem:[%s10142_s9 + $0x58] sm:$0xff] }
0x1ee3   :  { %v5522_v30 = vmul.f32 %v7163_v26, %v5521_v59 }
0x1ee5   :  { %5655 = vperm.xlu1 %6831, %v5611_v6   ;;  %6588 = vmatmul.mubr.msk.f32.vlgmr.msra.gmra.mrb[30].mxu1 %vm414_vm5, %v5522_v30  ;;  %v5523_v12 = vsel %vm1342_vm4, %v5522_v30, 0.0  ;;  %vm10241_vm5 = vcmask 523264  }
0x1ee6   :  { %5524 = vadd.xlane.f32.xlu0 %v5523_v12  ;;  %6610 = vmatprep.mubr.msk.bf16.mxu1 %vm10209_vm6, %v10197_v29  ;;  %v1457_v37 = vsel %vm10241_vm5, %v1453_v0, -inf  ;;  %vm10243_vm12 = vmmov %vm10241_vm5  ;;  %v10250_v0 = vld [vmem:[#allocation10_spill] sm:$0xff] }
0x1ee7   :  { %v1455_v41 = vsel %vm10243_vm12, %v1451_v43, -inf  ;;  %vm10244_vm15 = vmmov %vm10241_vm5  ;;  %v10251_v43 = vld [vmem:[#allocation11_spill] sm:$0xff] }
0x1ee8   :  { %v1456_v24 = vsel %vm10244_vm15, %v1452_v32, -inf  ;;  %vm10245_vm7 = vmmov %vm10241_vm5 }
0x1ee9   :  { %5658 = vperm.xlu1 %6831, %v5612_v57   ;;  %v1459_v17 = vmax.f32 %v1456_v24, %v1457_v37  ;;  %vm10246_vm3 = vmmov %vm10241_vm5 }
0x1eea   :  { %vm10247_vm0 = vmmov %vm10246_vm3 }
0x1eeb   :  { %v1492_v34 = vsel %vm10247_vm0, %v1488_v47, -inf  ;;  %vm10248_vm11 = vmmov %vm10247_vm0 }
0x1eec   :  { %vm10249_vm10 = vmmov %vm10247_vm0 }
0x1eed   :  { %5661 = vperm.xlu1 %6831, %v5613_v4   ;;  %v5711_v4 = vpack.c.bf16 %v5699_v13, %v5698_v42  ;;  %vm10254_vm15 = vmmov %vm10247_vm0 }
0x1eef   :  { %6593 = vmatpush3.bf16.msra.mxu0 %v5711_v4 }
0x1ef0   :  { %6594 = vmatprep.subr.bf16.mxu0 %v10197_v29 }
0x1efc   :  { %5618 = vperm.xlu0 %6827, %v5611_v6  }
0x1f00   :  { %6832 = vset.pattern.permute.xlu0 %v10198_v52  ;;  %v5689_v52 = vld [vmem:[%s10142_s9 + $0x8] sm:$0xff] }
0x1f01   :  { %v5705_v20 = vpack.c.bf16 %v5689_v52, %v5688_v18  ;;  %v10252_v18 = vld [vmem:[#allocation14_spill] sm:$0xff] }
0x1f02   :  { %v2847_v52 = vsel %vm2843_vm13, %v10252_v18, -1e+30 }
0x1f03   :  { %6603 = vmatpush3.bf16.msra.mxu1 %v5705_v20 }
0x1f04   :  { %6604 = vmatprep.subr.bf16.mxu1 %v10197_v29 }
0x1f07   :  { %6605 = vmatpush3.bf16.msra.mxu1 %v5706_v54 }
0x1f08   :  { %6606 = vmatprep.subr.bf16.mxu1 %v10197_v29 }
0x1f09   :  { %v1436_v11 = vpop.permute.xlu1 %1435 }
0x1f0a   :  { %vm1446_vm4 = vcmp.eq.s32.totalorder %v1436_v11, 1 }
0x1f0b   :  { %v1450_v14 = vsel %vm1446_vm4, %v10242_v63, -1e+30  ;;  %6607 = vmatpush3.bf16.msra.mxu1 %v5707_v16  ;;  %vm10253_vm4 = vmmov %vm10247_vm0 }
0x1f0c   :  { %v1454_v10 = vsel %vm10245_vm7, %v1450_v14, -inf  ;;  %6608 = vmatprep.subr.bf16.mxu1 %v10197_v29  ;;  %vm10256_vm7 = vmmov %vm10247_vm0 }
0x1f0d   :  { %v1458_v7 = vmax.f32 %v1454_v10, %v1455_v41  ;;  %v2851_v41 = vsel %vm10256_vm7, %v2847_v52, -inf }
0x1f0e   :  { %v1473_v27 = vpop.permute.xlu1 %1472 }
0x1f0f   :  { %v1460_v22 = vmax.f32 %v1458_v7, %v1459_v17  ;;  %vm1483_vm14 = vcmp.eq.s32.totalorder %v1473_v27, 1  ;;  %6609 = vmatpush3.bf16.msra.mxu1 %v5708_v45 }
0x1f10   :  { %v1487_v21 = vsel %vm1483_vm14, %v10242_v63, -1e+30  ;;  %6626 = vmatprep.subr.bf16.mxu1 %v10197_v29  ;;  %v10255_v63 = vld [vmem:[#allocation13_spill] sm:$0xff]  ;;  %vm10257_vm14 = vmmov %vm10247_vm0 }
0x1f11   :  { %v1461_v23 = vrot.slane %v1460_v22, 4  ;;  %v1491_v53 = vsel %vm10246_vm3, %v1487_v21, -inf  ;;  %vm1467_vm3 = vcmp.gt.f32.partialorder %v9804_v38, 0.0 }
0x1f12   :  { %v1479_v31 = vpop.permute.xlu1 %1478  ;;  %v1495_v30 = vmax.f32 %v1491_v53, %v1492_v34 }
0x1f13   :  { %vm1485_vm8 = vcmp.eq.s32.totalorder %v1479_v31, 1  ;;  %v1462_v58 = vmax.f32 %v1460_v22, %v1461_v23 }
0x1f14   :  { %v1489_v28 = vsel %vm1485_vm8, %v10240_v5, -1e+30  ;;  %v2844_v5 = vsel %vm2840_vm1, %v10251_v43, -1e+30  ;;  %vm1505_vm8 = vcmask 1040384   ;;  %vm10259_vm1 = vmmov %vm10253_vm4 }
0x1f15   :  { %v1493_v3 = vsel %vm10248_vm11, %v1489_v28, -inf  ;;  %v1463_v26 = vrot.slane %v1462_v58, 2  ;;  %v2848_v9 = vsel %vm10254_vm15, %v2844_v5, -inf  ;;  %vm10258_vm11 = vmmov %vm10253_vm4 }
0x1f16   :  { %v1482_v19 = vpop.permute.xlu1 %1481  ;;  %vm10260_vm13 = vmmov %vm10259_vm1 }
0x1f17   :  { %vm1486_vm9 = vcmp.eq.s32.totalorder %v1482_v19, 1  ;;  %v1464_v32 = vmax.f32 %v1462_v58, %v1463_v26 }
0x1f18   :  { %v1490_v57 = vsel %vm1486_vm9, %v10238_v51, -1e+30  ;;  %vm2878_vm9 = vcmp.eq.s32.totalorder %v9837_v62, 1 }
0x1f19   :  { %v1494_v59 = vsel %vm10249_vm10, %v1490_v57, -inf  ;;  %v1465_v24 = vrot.slane %v1464_v32, 1  ;;  %v2882_v45 = vsel %vm2878_vm9, %v10250_v0, -1e+30 }
0x1f1a   :  { %v1496_v6 = vmax.f32 %v1493_v3, %v1494_v59  ;;  %v2886_v62 = vsel %vm10259_vm1, %v2882_v45, -inf }
0x1f1b   :  { %v2833_v12 = vpop.permute.xlu1 %2832  ;;  %v1466_v22 = vmax.f32 %v1464_v32, %v1465_v24 }
0x1f1c   :  { %v1497_v51 = vmax.f32 %v1495_v30, %v1496_v6  ;;  %vm2841_vm5 = vcmp.eq.s32.totalorder %v2833_v12, 1 }
0x1f1d   :  { %v2845_v35 = vsel %vm2841_vm5, %v10250_v0, -1e+30  ;;  %v1470_v8 = vsel %vm1467_vm3, %v1466_v22, 0.0  ;;  %vm10261_vm5 = vmmov %vm10259_vm1  ;;  %v5701_v0 = vld [vmem:[%s10142_s9 + $0x68] sm:$0xff] }
0x1f1e   :  { %v1498_v11 = vrot.slane %v1497_v51, 4  ;;  %v2849_v15 = vsel %vm10253_vm4, %v2845_v35, -inf  ;;  %vm2861_vm4 = vcmp.gt.f32.partialorder %v9807_v33, 0.0 }
0x1f1f   :  { %v2836_v37 = vpop.permute.xlu1 %2835  ;;  %v2852_v7 = vmax.f32 %v2848_v9, %v2849_v15 }
0x1f20   :  { %v1499_v20 = vmax.f32 %v1497_v51, %v1498_v11  ;;  %vm2842_vm12 = vcmp.eq.s32.totalorder %v2836_v37, 1  ;;  %v5700_v51 = vld [vmem:[%s10142_s9 + $0x60] sm:$0xff]  ;;  %v5702_v11 = vld [vmem:[%s10142_s9 + $0x70] sm:$0xff] }
0x1f21   :  { %v2846_v14 = vsel %vm2842_vm12, %v10255_v63, -1e+30  ;;  %v5712_v5 = vpack.c.bf16 %v5701_v0, %v5700_v51 }
0x1f22   :  { %v1500_v10 = vrot.slane %v1499_v20, 2  ;;  %v2850_v17 = vsel %vm10257_vm14, %v2846_v14, -inf }
0x1f23   :  { %v2853_v2 = vmax.f32 %v2850_v17, %v2851_v41  ;;  %6595 = vmatpush3.bf16.msra.mxu0 %v5712_v5 }
0x1f24   :  { %v1501_v25 = vmax.f32 %v1499_v20, %v1500_v10  ;;  %v2867_v27 = vpop.permute.xlu1 %2866  ;;  %6596 = vmatprep.subr.bf16.mxu0 %v10197_v29 }
0x1f25   :  { %v2854_v54 = vmax.f32 %v2852_v7, %v2853_v2  ;;  %vm2877_vm2 = vcmp.eq.s32.totalorder %v2867_v27, 1 }
0x1f26   :  { %v1502_v50 = vrot.slane %v1501_v25, 1  ;;  %v2881_v31 = vsel %vm2877_vm2, %v10251_v43, -1e+30 }
0x1f27   :  { %v2855_v16 = vrot.slane %v2854_v54, 4  ;;  %v2885_v47 = vsel %vm10258_vm11, %v2881_v31, -inf  ;;  %vm10265_vm11 = vmmov %vm10259_vm1 }
0x1f28   :  { %v1503_v60 = vmax.f32 %v1501_v25, %v1502_v50  ;;  %v2873_v61 = vpop.permute.xlu1 %2872  ;;  %v2889_v39 = vmax.f32 %v2885_v47, %v2886_v62  ;;  %v10262_v25 = vld [vmem:[#allocation17_spill] sm:$0xff]  ;;  %v10263_v50 = vld [vmem:[#allocation16_spill] sm:$0xff] }
0x1f29   :  { %vm2879_vm0 = vcmp.eq.s32.totalorder %v2873_v61, 1  ;;  %v2856_v55 = vmax.f32 %v2854_v54, %v2855_v16  ;;  %v10264_v16 = vld [vmem:[#allocation18_spill] sm:$0xff] }
0x1f2a   :  { %v1504_v23 = vsel %vm1467_vm3, %v1503_v60, 0.0  ;;  %v2883_v1 = vsel %vm2879_vm0, %v10255_v63, -1e+30 }
0x1f2b   :  { %v1506_v21 = vsel %vm1505_vm8, %v1470_v8, %v1504_v23  ;;  %v2887_v58 = vsel %vm10260_vm13, %v2883_v1, -inf  ;;  %v2857_v19 = vrot.slane %v2856_v55, 2  ;;  %vm10268_vm13 = vmmov %vm10259_vm1 }
0x1f2c   :  { %v2876_v42 = vpop.permute.xlu1 %2875 }
0x1f2d   :  { %vm2880_vm10 = vcmp.eq.s32.totalorder %v2876_v42, 1  ;;  %v2858_v4 = vmax.f32 %v2856_v55, %v2857_v19 }
0x1f2e   :  { %v2884_v38 = vsel %vm2880_vm10, %v10252_v18, -1e+30  ;;  %v5703_v18 = vld [vmem:[%s10142_s9 + $0x78] sm:$0xff]  ;;  %vm10267_vm10 = vmmov %vm10259_vm1 }
0x1f2f   :  { %v2888_v28 = vsel %vm10261_vm5, %v2884_v38, -inf  ;;  %v2859_v26 = vrot.slane %v2858_v4, 1  ;;  %v5713_v37 = vpack.c.bf16 %v5703_v18, %v5702_v11 }
0x1f30   :  { %v2890_v13 = vmax.f32 %v2887_v58, %v2888_v28 }
0x1f31   :  { %v4223_v53 = vpop.permute.xlu1 %4222  ;;  %v2860_v35 = vmax.f32 %v2858_v4, %v2859_v26  ;;  %6597 = vmatpush3.bf16.msra.mxu0 %v5713_v37 }
0x1f32   :  { %v2891_v57 = vmax.f32 %v2889_v39, %v2890_v13  ;;  %6614 = vmatprep.subr.bf16.mxu0 %v10197_v29  ;;  %vm4233_vm0 = vcmp.eq.s32.totalorder %v4223_v53, 1 }
0x1f33   :  { %v2864_v20 = vsel %vm2861_vm4, %v2860_v35, 0.0 }
0x1f34   :  { %v2892_v34 = vrot.slane %v2891_v57, 4 }
0x1f35   :  { %v4226_v3 = vpop.permute.xlu1 %4225 }
0x1f36   :  { %v2893_v59 = vmax.f32 %v2891_v57, %v2892_v34  ;;  %vm4234_vm2 = vcmp.eq.s32.totalorder %v4226_v3, 1 }
0x1f37   :  { %v4238_v23 = vsel %vm4234_vm2, %v10263_v50, -1e+30  ;;  %vm10272_vm2 = vmmov %vm10259_vm1 }
0x1f38   :  { %v2894_v30 = vrot.slane %v2893_v59, 2 }
0x1f39   :  { %v4229_v6 = vpop.permute.xlu1 %4228 }
0x1f3a   :  { %v2895_v12 = vmax.f32 %v2893_v59, %v2894_v30  ;;  %vm4235_vm3 = vcmp.eq.s32.totalorder %v4229_v6, 1 }
0x1f3b   :  { %v4239_v31 = vsel %vm4235_vm3, %v10264_v16, -1e+30 }
0x1f3c   :  { %v2896_v43 = vrot.slane %v2895_v12, 1 }
0x1f3d   :  { %v4232_v32 = vpop.permute.xlu1 %4231 }
0x1f3e   :  { %v2897_v52 = vmax.f32 %v2895_v12, %v2896_v43  ;;  %vm4236_vm15 = vcmp.eq.s32.totalorder %v4232_v32, 1 }
0x1f3f   :  { %v4240_v22 = vsel %vm4236_vm15, %v10262_v25, -1e+30  ;;  %vm10270_vm15 = vmmov %vm10259_vm1 }
0x1f40   :  { %v2898_v15 = vsel %vm2861_vm4, %v2897_v52, 0.0  ;;  %v4244_v55 = vsel %vm10267_vm10, %v4240_v22, -inf  ;;  %v4243_v28 = vsel %vm10270_vm15, %v4239_v31, -inf }
0x1f41   :  { %v2899_v9 = vsel %vm1505_vm8, %v2864_v20, %v2898_v15  ;;  %v4246_v39 = vmax.f32 %v4243_v28, %v4244_v55 }
0x1f42   :  { %v4260_v63 = vpop.permute.xlu1 %4259  ;;  %v10002_v14 = vadd.f32 %v2899_v9, %v1506_v21  ;;  %v10266_v21 = vld [vmem:[#allocation15_spill] sm:$0xff] }
0x1f43   :  { %vm4270_vm9 = vcmp.eq.s32.totalorder %v4260_v63, 1  ;;  %v4237_v38 = vsel %vm4233_vm0, %v10266_v21, -1e+30  ;;  %vm10274_vm0 = vmmov %vm10259_vm1 }
0x1f44   :  { %v4274_v45 = vsel %vm4270_vm9, %v10266_v21, -1e+30  ;;  %v4241_v57 = vsel %vm10272_vm2, %v4237_v38, -inf  ;;  %vm10273_vm9 = vmmov %vm10259_vm1  ;;  %vm4254_vm2 = vcmp.gt.f32.partialorder %v9862_v56, 0.0 }
0x1f45   :  { %vm10276_vm10 = vmmov %vm10274_vm0 }
0x1f46   :  { %v4263_v41 = vpop.permute.xlu1 %4262  ;;  %vm10278_vm15 = vmmov %vm10274_vm0 }
0x1f47   :  { %vm4271_vm7 = vcmp.eq.s32.totalorder %v4263_v41, 1 }
0x1f48   :  { %v4275_v60 = vsel %vm4271_vm7, %v10263_v50, -1e+30  ;;  %vm10271_vm7 = vmmov %vm10259_vm1 }
0x1f49   :  { %v4279_v1 = vsel %vm10259_vm1, %v4275_v60, -inf  ;;  %v4278_v19 = vsel %vm10271_vm7, %v4274_v45, -inf  ;;  %vm10279_vm7 = vmmov %vm10274_vm0 }
0x1f4a   :  { %v4266_v24 = vpop.permute.xlu1 %4265  ;;  %v4282_v13 = vmax.f32 %v4278_v19, %v4279_v1 }
0x1f4b   :  { %vm4272_vm14 = vcmp.eq.s32.totalorder %v4266_v24, 1 }
0x1f4c   :  { %v4276_v61 = vsel %vm4272_vm14, %v10264_v16, -1e+30 }
0x1f4d   :  { %v4280_v42 = vsel %vm10268_vm13, %v4276_v61, -inf }
0x1f4e   :  { %v4269_v10 = vpop.permute.xlu1 %4268 }
0x1f4f   :  { %vm4273_vm12 = vcmp.eq.s32.totalorder %v4269_v10, 1 }
0x1f50   :  { %v4277_v27 = vsel %vm4273_vm12, %v10262_v25, -1e+30  ;;  %vm10269_vm12 = vmmov %vm10259_vm1 }
0x1f51   :  { %v4281_v8 = vsel %vm10265_vm11, %v4277_v27, -inf  ;;  %v4242_v58 = vsel %vm10269_vm12, %v4238_v23, -inf  ;;  %vm10275_vm11 = vmmov %vm10274_vm0 }
0x1f52   :  { %v4283_v62 = vmax.f32 %v4280_v42, %v4281_v8  ;;  %v4245_v3 = vmax.f32 %v4241_v57, %v4242_v58 }
0x1f53   :  { %v10005_v17 = vpop.permute.xlu1 %5615 }
0x1f54   :  { %v4284_v59 = vmax.f32 %v4282_v13, %v4283_v62  ;;  %v4247_v12 = vmax.f32 %v4245_v3, %v4246_v39  ;;  %vm5626_vm13 = vcmp.eq.s32.totalorder %v10005_v17, 1 }
0x1f55   :  { %v5630_v24 = vsel %vm5626_vm13, %v9796_v49, -1e+30 }
0x1f56   :  { %v4285_v5 = vrot.slane %v4284_v59, 4  ;;  %v4248_v11 = vrot.slane %v4247_v12, 4  ;;  %v5634_v17 = vsel %vm10278_vm15, %v5630_v24, -inf }
0x1f57   :  { %v10007_v7 = vpop.permute.xlu1 %5621 }
0x1f58   :  { %v4286_v52 = vmax.f32 %v4284_v59, %v4285_v5  ;;  %v4249_v37 = vmax.f32 %v4247_v12, %v4248_v11  ;;  %v5837_v12 = vld [vmem:[%s10144_s11 + $0x8] sm:$0xff]  ;;  %v5842_v11 = vld [vmem:[%s10144_s11 + $0x30] sm:$0xff] }
0x1f59   :  { %v5841_v5 = vld [vmem:[%s10144_s11 + $0x28] sm:$0xff] }
0x1f5a   :  { %v4287_v9 = vrot.slane %v4286_v52, 2  ;;  %v4250_v41 = vrot.slane %v4249_v37, 2 }
0x1f5b   :  { %v5625_v33 = vpop.permute.xlu1 %5624 }
0x1f5c   :  { %vm5629_vm1 = vcmp.eq.s32.totalorder %v5625_v33, 1  ;;  %v4288_v33 = vmax.f32 %v4286_v52, %v4287_v9 }
0x1f5d   :  { %v5633_v63 = vsel %vm5629_vm1, %v9823_v48, -1e+30  ;;  %vm5988_vm1 = vcmask 25600  }
0x1f5e   :  { %v4289_v16 = vrot.slane %v4288_v33, 1 }
0x1f60   :  { %v5653_v2 = vpop.permute.xlu1 %5652  ;;  %v4290_v31 = vmax.f32 %v4288_v33, %v4289_v16 }
0x1f61   :  { %vm5663_vm14 = vcmp.eq.s32.totalorder %v5653_v2, 1 }
0x1f62   :  { %v5667_v26 = vsel %vm5663_vm14, %v9796_v49, -1e+30  ;;  %vm10280_vm14 = vmmov %vm10274_vm0  ;;  %v4291_v1 = vsel %vm4254_vm2, %v4290_v31, 0.0 }
0x1f63   :  { %v5671_v35 = vsel %vm10276_vm10, %v5667_v26, -inf  ;;  %vm10283_vm10 = vmmov %vm10274_vm0 }
0x1f64   :  { %v5656_v54 = vpop.permute.xlu1 %5655 }
0x1f65   :  { %vm5664_vm5 = vcmp.eq.s32.totalorder %v5656_v54, 1 }
0x1f66   :  { %v5668_v53 = vsel %vm5664_vm5, %v9799_v40, -1e+30  ;;  %vm5628_vm5 = vcmp.eq.s32.totalorder %v10007_v7, 1 }
0x1f67   :  { %v5672_v30 = vsel %vm10273_vm9, %v5668_v53, -inf  ;;  %v5632_v10 = vsel %vm5628_vm5, %v9826_v44, -1e+30  ;;  %vm10281_vm9 = vmmov %vm10274_vm0 }
0x1f68   :  { %v5659_v47 = vpop.permute.xlu1 %5658  ;;  %v5675_v32 = vmax.f32 %v5671_v35, %v5672_v30  ;;  %v5636_v7 = vsel %vm10279_vm7, %v5632_v10, -inf }
0x1f69   :  { %vm5665_vm4 = vcmp.eq.s32.totalorder %v5659_v47, 1 }
0x1f6a   :  { %v5669_v4 = vsel %vm5665_vm4, %v9826_v44, -1e+30  ;;  %vm10277_vm4 = vmmov %vm10274_vm0 }
0x1f6b   :  { %v5673_v51 = vsel %vm10274_vm0, %v5669_v4, -inf  ;;  %v5637_v27 = vsel %vm10277_vm4, %v5633_v63, -inf }
0x1f6c   :  { %v5662_v34 = vpop.permute.xlu1 %5661  ;;  %v5639_v50 = vmax.f32 %v5636_v7, %v5637_v27 }
0x1f6d   :  { %vm5666_vm3 = vcmp.eq.s32.totalorder %v5662_v34, 1 }
0x1f6e   :  { %v5670_v6 = vsel %vm5666_vm3, %v9823_v48, -1e+30  ;;  %v4251_v48 = vmax.f32 %v4249_v37, %v4250_v41  ;;  %v6221_v41 = vld [vmem:[%s10143_s10] ss:$0 sm:$0xff] }
0x1f6f   :  { %v5674_v0 = vsel %vm10275_vm11, %v5670_v6, -inf }
0x1f70   :  { %v5676_v43 = vmax.f32 %v5673_v51, %v5674_v0  ;;  %v4252_v61 = vrot.slane %v4251_v48, 1  ;;  %v5839_v0 = vld [vmem:[%s10144_s11 + $0x18] sm:$0xff] }
0x1f72   :  { %v5677_v18 = vmax.f32 %v5675_v32, %v5676_v43  ;;  %v4253_v45 = vmax.f32 %v4251_v48, %v4252_v61  ;;  %v5840_v43 = vld [vmem:[%s10144_s11 + $0x20] sm:$0xff] }
0x1f73   :  { %v5525_v15 = vpop.xlane.xlu0 %5524  ;;  %v5846_v32 = vpack.c.bf16 %v5841_v5, %v5840_v43 }
0x1f74   :  { %v5678_v20 = vrot.slane %v5677_v18, 4  ;;  %v4257_v47 = vsel %vm4254_vm2, %v4253_v45, 0.0  ;;  %vm5647_vm3 = vcmp.gt.f32.partialorder %v5525_v15, 0.0  ;;  %v5599_v56 = vmax.f32 %v5525_v15, 1.0 }
0x1f75   :  { %v4292_v58 = vsel %vm1505_vm8, %v4257_v47, %v4291_v1 }
0x1f76   :  { %v5679_v2 = vmax.f32 %v5677_v18, %v5678_v20  ;;  %v4293_v13 = vadd.f32 %v4292_v58, %v10002_v14  ;;  %7127 = vrcp.f32 %v5599_v56  ;;  %v5836_v14 = vld [vmem:[%s10144_s11] sm:$0xff]  ;;  %v5843_v18 = vld [vmem:[%s10144_s11 + $0x38] sm:$0xff] }
0x1f77   :  { %v5844_v51 = vpack.c.bf16 %v5837_v12, %v5836_v14  ;;  %v5847_v52 = vpack.c.bf16 %v5843_v18, %v5842_v11  ;;  %v5930_v56 = vld [vmem:[%s10146_s13 + $0x20] sm:$0xff] }
0x1f78   :  { %v5680_v60 = vrot.slane %v5679_v2, 2 }
0x1f7a   :  { %v5681_v8 = vmax.f32 %v5679_v2, %v5680_v60 }
0x1f7b   :  { %v5619_v25 = vpop.permute.xlu0 %5618 }
0x1f7c   :  { %vm5627_vm12 = vcmp.eq.s32.totalorder %v5619_v25, 1  ;;  %v5682_v55 = vrot.slane %v5681_v8, 1 }
0x1f7d   :  { %v5631_v54 = vsel %vm5627_vm12, %v9799_v40, -1e+30 }
0x1f7e   :  { %v5635_v22 = vsel %vm10280_vm14, %v5631_v54, -inf  ;;  %v5683_v38 = vmax.f32 %v5681_v8, %v5682_v55 }
0x1f7f   :  { %v5638_v49 = vmax.f32 %v5634_v17, %v5635_v22 }
0x1f80   :  { %v5684_v19 = vsel %vm5647_vm3, %v5683_v38, 0.0  ;;  %v7128_v34 = vpop.eup %7127 }
0x1f81   :  { %v5640_v44 = vmax.f32 %v5638_v49, %v5639_v50 }
0x1f83   :  { %v5641_v23 = vrot.slane %v5640_v44, 4 }
0x1f85   :  { %v5642_v21 = vmax.f32 %v5640_v44, %v5641_v23 }
0x1f87   :  { %v5643_v40 = vrot.slane %v5642_v21, 2 }
0x1f89   :  { %v5644_v42 = vmax.f32 %v5642_v21, %v5643_v40 }
0x1f8b   :  { %v5645_v62 = vrot.slane %v5644_v42, 1 }
0x1f8d   :  { %v5646_v28 = vmax.f32 %v5644_v42, %v5645_v62 }
0x1f8f   :  { %v5650_v39 = vsel %vm5647_vm3, %v5646_v28, 0.0 }
0x1f90   :  { %v5685_v53 = vsel %vm1505_vm8, %v5650_v39, %v5684_v19  ;;  %vm10282_vm8 = vmmov %vm10274_vm0  ;;  %v5926_v19 = vld [vmem:[%s10146_s13] sm:$0xff]  ;;  %v5927_v39 = vld [vmem:[%s10146_s13 + $0x8] sm:$0xff] }
0x1f91   :  { %v5686_v57 = vadd.f32 %v5685_v53, %v4293_v13  ;;  %v5934_v13 = vpack.c.bf16 %v5927_v39, %v5926_v19  ;;  %v5928_v53 = vld [vmem:[%s10146_s13 + $0x10] sm:$0xff] }
0x1f93   :  { %v5704_v4 = vpack.c.bf16 %v5686_v57, %v5686_v57  ;;  %v5929_v57 = vld [vmem:[%s10146_s13 + $0x18] sm:$0xff] }
0x1f95   :  { %6611 = vmatmul.mubr.msk.bf16.vlgmr.msra.gmra.mrb[40].mxu1 %vm10281_vm9, %v5704_v4  ;;  %v5935_v4 = vpack.c.bf16 %v5929_v57, %v5928_v53 }
0x1f96   :  { %6634 = vmatprep.mubr.msk.bf16.mxu1 %vm10209_vm6, %v10197_v29  ;;  %6627 = vmatpush3.bf16.msra.mxu1 %v5934_v13 }
0x1f97   :  { %6628 = vmatprep.subr.bf16.mxu1 %v10197_v29 }
0x1f9a   :  { %6629 = vmatpush3.bf16.msra.mxu1 %v5935_v4 }
0x1f9b   :  { %6630 = vmatprep.subr.bf16.mxu1 %v10197_v29 }
0x1fb8   :  { %v5595_v3 = vpop.f32.mrb[30].mxu1 }
0x1fb9   :  { %v5601_v59 = vmul.f32 %v7128_v34, %v5595_v3  ;;  %v6589_v26 = vpop.f32.mrb[31].mxu1  ;;  %v5931_v34 = vld [vmem:[%s10146_s13 + $0x28] sm:$0xff] }
0x1fba   :  { %v5936_v3 = vpack.c.bf16 %v5931_v34, %v5930_v56  ;;  %v5933_v26 = vld [vmem:[%s10146_s13 + $0x38] sm:$0xff] }
0x1fbb   :  { %v5687_v30 = vadd.f32 %v5601_v59, %v9877_v36  ;;  %v5838_v36 = vld [vmem:[%s10144_s11 + $0x10] sm:$0xff] }
0x1fbc   :  { %v5845_v35 = vpack.c.bf16 %v5839_v0, %v5838_v36  ;;  %v5932_v59 = vld [vmem:[%s10146_s13 + $0x30] sm:$0xff]  ;;  %6631 = vmatpush3.bf16.msra.mxu1 %v5936_v3 }
0x1fbd   :  { %v5709_v6 = vpack.c.bf16 %v5687_v30, %v5687_v30  ;;  %v5937_v30 = vpack.c.bf16 %v5933_v26, %v5932_v59  ;;  %6632 = vmatprep.subr.bf16.mxu1 %v10197_v29 }
0x1fbf   :  { %6599 = vmatmul.mubr.msk.bf16.vlgmr.msra.gmra.mrb[64].mxu0 %vm10274_vm0, %v5709_v6  ;;  %v6222_v6 = vld [vmem:[%s10145_s12] ss:$0 sm:$0xff] }
0x1fc0   :  { %6622 = vmatprep.mubr.msk.bf16.mxu0 %vm10209_vm6, %v10197_v29  ;;  %6615 = vmatpush3.bf16.msra.mxu0 %v5844_v51 }
0x1fc1   :  { %6616 = vmatprep.subr.bf16.mxu0 %v10197_v29  ;;  %6633 = vmatpush3.bf16.msra.mxu1 %v5937_v30 }
0x1fc4   :  { %6617 = vmatpush3.bf16.msra.mxu0 %v5845_v35 }
0x1fc5   :  { %6618 = vmatprep.subr.bf16.mxu0 %v10197_v29 }
0x1fc8   :  { %6619 = vmatpush3.bf16.msra.mxu0 %v5846_v32 }
0x1fc9   :  { %6620 = vmatprep.subr.bf16.mxu0 %v10197_v29 }
0x1fcc   :  { %6621 = vmatpush3.bf16.msra.mxu0 %v5847_v52 }
0x2068   :  { %v5794_v37 = vpop.f32.mrb[40].mxu1 }
0x2069   :  { %v6612_v20 = vpop.f32.mrb[41].mxu1 }
0x206a   :  { %v5797_v15 = vpop.f32.mrb[42].mxu1 }
0x206b   :  { %v6613_v9 = vpop.f32.mrb[43].mxu1 }
0x2092   :  { %v5751_v63 = vpop.f32.mrb[64].mxu0 }
0x2093   :  { %v5795_v24 = vadd.f32 %v5794_v37, %v5751_v63  ;;  %v6600_v10 = vpop.f32.mrb[65].mxu0 }
0x2094   :  { %v5754_v2 = vpop.f32.mrb[66].mxu0 }
0x2095   :  { %v5807_v25 = vadd.f32 %v6221_v41, %v5795_v24  ;;  %v6601_v27 = vpop.f32.mrb[67].mxu0 }
0x2097   :  { %v5809_v33 = vmul.f32 0.70710677, %v5807_v25  ;;  %v5808_v38 = vmul.f32 0.5, %v5807_v25 }
0x2099   :  { %v5812_v54 = vand.u32 2147483647, %v5809_v33  ;;  %vm5810_vm6 = vcmp.ge.f32.partialorder %v5809_v33, 0.0 }
0x209a   :  { %v5811_v42 = vsel %vm5810_vm6, 1.0, %v10211_v46 }
0x209b   :  { %v5813_v17 = vmul.f32 0.3275911, %v5812_v54  ;;  %v5826_v22 = vsub.f32 0.0, %v5812_v54 }
0x209d   :  { %v5814_v7 = vadd.f32 1.0, %v5813_v17  ;;  %v5827_v50 = vmul.f32 %v5826_v22, %v5812_v54 }
0x209f   :  { %7129 = vrcp.f32 %v5814_v7  ;;  %v5828_v16 = vmul.f32 1.442695, %v5827_v50 }
0x20a1   :  { %7131 = vpow2.f32 %v5828_v16 }
0x20a9   :  { %v7130_v48 = vpop.eup %7129 }
0x20aa   :  { %v5817_v60 = vmul.f32 1.0614054, %v7130_v48 }
0x20ab   :  { %v7132_v55 = vpop.eup %7131 }
0x20ac   :  { %v5818_v49 = vadd.f32 -1.4531521, %v5817_v60  ;;  %v6224_v60 = vld [vmem:[%s10147_s14] ss:$0 sm:$0xff] }
0x20ae   :  { %v5819_v44 = vmul.f32 %v7130_v48, %v5818_v49 }
0x20b0   :  { %v5820_v61 = vadd.f32 1.4214138, %v5819_v44 }
0x20b2   :  { %v5821_v8 = vmul.f32 %v7130_v48, %v5820_v61 }
0x20b4   :  { %v5822_v23 = vadd.f32 -0.28449672, %v5821_v8 }
0x20b6   :  { %v5823_v31 = vmul.f32 %v7130_v48, %v5822_v23 }
0x20b8   :  { %v5824_v21 = vadd.f32 0.2548296, %v5823_v31 }
0x20ba   :  { %v5825_v45 = vmul.f32 %v7130_v48, %v5824_v21 }
0x20bc   :  { %v5830_v40 = vmul.f32 %v7132_v55, %v5825_v45 }
0x20be   :  { %v5831_v1 = vsub.f32 1.0, %v5830_v40 }
0x20c0   :  { %v5832_v47 = vmul.f32 %v5831_v1, %v5811_v42 }
0x20c2   :  { %v5833_v62 = vadd.f32 1.0, %v5832_v47 }
0x20c4   :  { %v5834_v58 = vmul.f32 %v5833_v62, %v5808_v38 }
0x20c6   :  { %v5835_v28 = vpack.c.bf16 %v5834_v58, %v5834_v58 }
0x20c8   :  { %6623 = vmatmul.mubr.msk.bf16.vlgmr.msra.gmra.mrb[68].mxu0 %vm10282_vm8, %v5835_v28 }
0x219b   :  { %v5892_v14 = vpop.f32.mrb[68].mxu0 }
0x219c   :  { %v5893_v12 = vadd.f32 %v6222_v6, %v5892_v14  ;;  %v6624_v51 = vpop.f32.mrb[69].mxu0 }
0x219d   :  { %v5895_v36 = vpop.f32.mrb[70].mxu0 }
0x219e   :  { %v5899_v0 = vmul.f32 0.70710677, %v5893_v12  ;;  %v6625_v35 = vpop.f32.mrb[71].mxu0  ;;  %v5898_v7 = vmul.f32 0.5, %v5893_v12 }
0x21a0   :  { %v5902_v43 = vand.u32 2147483647, %v5899_v0  ;;  %vm5900_vm11 = vcmp.ge.f32.partialorder %v5899_v0, 0.0 }
0x21a1   :  { %v5901_v54 = vsel %vm5900_vm11, 1.0, %v10211_v46 }
0x21a2   :  { %v5903_v5 = vmul.f32 0.3275911, %v5902_v43  ;;  %v5916_v11 = vsub.f32 0.0, %v5902_v43 }
0x21a4   :  { %v5904_v32 = vadd.f32 1.0, %v5903_v5  ;;  %v5917_v52 = vmul.f32 %v5916_v11, %v5902_v43 }
0x21a6   :  { %7133 = vrcp.f32 %v5904_v32  ;;  %v5918_v20 = vmul.f32 1.442695, %v5917_v52 }
0x21a8   :  { %7135 = vpow2.f32 %v5918_v20 }
0x21b0   :  { %v7134_v18 = vpop.eup %7133 }
0x21b1   :  { %v5907_v37 = vmul.f32 1.0614054, %v7134_v18 }
0x21b2   :  { %v7136_v25 = vpop.eup %7135 }
0x21b3   :  { %v5908_v29 = vadd.f32 -1.4531521, %v5907_v37 }
0x21b5   :  { %v5909_v15 = vmul.f32 %v7134_v18, %v5908_v29 }
0x21b7   :  { %v5910_v9 = vadd.f32 1.4214138, %v5909_v15 }
0x21b9   :  { %v5911_v63 = vmul.f32 %v7134_v18, %v5910_v9 }
0x21bb   :  { %v5912_v41 = vadd.f32 -0.28449672, %v5911_v63 }
0x21bd   :  { %v5913_v24 = vmul.f32 %v7134_v18, %v5912_v41 }
0x21bf   :  { %v5914_v10 = vadd.f32 0.2548296, %v5913_v24 }
0x21c1   :  { %v5915_v2 = vmul.f32 %v7134_v18, %v5914_v10 }
0x21c3   :  { %v5920_v27 = vmul.f32 %v7136_v25, %v5915_v2 }
0x21c5   :  { %v5921_v33 = vsub.f32 1.0, %v5920_v27 }
0x21c7   :  { %v5922_v17 = vmul.f32 %v5921_v33, %v5901_v54 }
0x21c9   :  { %v5923_v22 = vadd.f32 1.0, %v5922_v17 }
0x21cb   :  { %v5924_v48 = vmul.f32 %v5923_v22, %v5898_v7 }
0x21cd   :  { %v5925_v50 = vpack.c.bf16 %v5924_v48, %v5924_v48 }
0x21cf   :  { %6635 = vmatmul.mubr.msk.bf16.vlgmr.msra.gmra.mrb[44].mxu1 %vm10283_vm10, %v5925_v50 }
0x22a2   :  { %v5982_v49 = vpop.f32.mrb[44].mxu1 }
0x22a3   :  { %v5983_v16 = vadd.f32 %v6224_v60, %v5982_v49  ;;  %v6636_v44 = vpop.f32.mrb[45].mxu1 }
0x22a4   :  { %v5985_v61 = vpop.f32.mrb[46].mxu1 }
0x22a5   :  { %v6637_v46 = vpop.f32.mrb[47].mxu1  ;;  %5989 = vst.msk [vmem:[#allocation2] sm:$0x3] %vm5988_vm1, %v5983_v16 }
0x22a6   :  { %7175 = shalt.err (!%p7172_p4)
}
0x22a7   :  { %s7176_s14 = scalar_lea.hbm %s10148_s15, 32 }
0x22a8   :  { %p7177_p5 = scmp.ne.s32.totalorder %s10148_s15, %s7176_s14  ;;  %p7180_p6 = scmp.lt.u32.totalorder %s7176_s14, %s10148_s15 }
0x22aa   :  { %p7182_p7 = pnand %p7180_p6, %p7177_p5 }
0x22ac   :  { %7185 = shalt.err (!%p7182_p7)
}
0x22ad   :  { %5999 = dma.vmem_to_hbm [thread:$0]  %s5997_s21, 32, %s10148_s15, [#allocation3]  }
0x22ae   :  { %7186 = dma.done.wait [#allocation3], 32  }
0x22af   :  { %7187 = vsyncadd [#allocation3], 4294967264 }
0x22b0   :  { %6003 = vsyncpa [#allocation3], 1 }

</bundles_post_ra>
